<compile_context>
chip_gen: v6e
topology: v6e:2x2x1
jax: 0.10.0
libtpu: 0.0.40
codegen_flags: <defaults>
</compile_context>

<pallas_src>
import math

import jax
import jax.numpy as jnp
from jax.experimental import pallas as pl
from jax.experimental.pallas import tpu as pltpu

# ----------------------------- synthetic sizes ------------------------------
DIM = 2          # trajectory dimensionality (x, y)
N_AGENTS = 8     # num_agents (batch)
T_HIST = 8       # hist_len
RNN_DIM = 32     # rnn.hidden_size
Z_DIM = 16       # enc.out_size // 2
FX_OUT = 16      # feat_enc_x.out_size
FZ_OUT = 16      # feat_enc_z.out_size
NUM_LAYERS = 2   # rnn.num_layers (forward() requires exactly 2)
HID = 64         # MLP hidden width

LOG2PI = math.log(2.0 * math.pi)

# widths of the fused / composed weight blocks (tile-aligned slice offsets)
EP_W = 2 * HID           # 128: fused enc+prior first-layer width
G0_W = 3 * RNN_DIM       # 96 : GRU gate width
DEC_W = HID              # 64 : decoder first-layer width
FXCAT_W = EP_W + G0_W    # 224: [ep 0:128 | g0 128:224]
FZCAT_W = 128 + G0_W     # 224: [dec 0:64 | pad | g0 128:224]
H1CAT_W = 256 + DEC_W    # 320: [ep 0:128 | gh1 128:224 | pad | dec 256:320]

# ---------------------- packed (transformed) weight layout ------------------
PACK_LANES = 384         # >= widest block (320), multiple of 128
_PACKED_SHAPES = (
    ('fx_W1', (DIM, HID)), ('fx_b1', (1, HID)),
    ('fx_cat_W', (HID, FXCAT_W)), ('fx_cat_b', (1, FXCAT_W)),
    ('ep_W2', (2 * HID, 4 * Z_DIM)), ('ep_b2', (1, 4 * Z_DIM)),
    ('fz_W1', (Z_DIM, HID)), ('fz_b1', (1, HID)),
    ('fzh_cat_W', (HID, FZCAT_W)),
    ('dec_W2', (HID, 2 * DIM)), ('dec_b2', (1, 2 * DIM)),
    ('h1cat_W', (RNN_DIM, H1CAT_W)), ('h1cat_b', (1, H1CAT_W)),
    ('g0_Whh', (RNN_DIM, 3 * RNN_DIM)), ('g0_bhh', (1, 3 * RNN_DIM)),
    ('g1_Wih', (RNN_DIM, 3 * RNN_DIM)), ('g1_bih', (1, 3 * RNN_DIM)),
    ('lg_W_h', (RNN_DIM, RNN_DIM)), ('lg_W_g', (RNN_DIM, RNN_DIM)),
    ('lg_b', (1, RNN_DIM)),
)


def _build_layout():
    layout = {}
    row = 0
    for name, (r, c) in _PACKED_SHAPES:
        layout[name] = (row, r, c)
        row += ((r + 7) // 8) * 8          # keep every block 8-sublane aligned
    return layout, row


PACK_LAYOUT, PACK_ROWS = _build_layout()   # PACK_ROWS == 576


# ------------------------------- parameters ---------------------------------
def init_params(key):
    def mlp_params(k, din, dhid, dout):
        k1, k2, k3, k4 = jax.random.split(k, 4)
        return dict(
            W1=0.1 * jax.random.normal(k1, (din, dhid), jnp.float32),
            b1=0.1 * jax.random.normal(k2, (1, dhid), jnp.float32),
            W2=0.1 * jax.random.normal(k3, (dhid, dout), jnp.float32),
            b2=0.1 * jax.random.normal(k4, (1, dout), jnp.float32),
        )

    def gru_layer(k, din):
        k1, k2, k3, k4 = jax.random.split(k, 4)
        return dict(
            Wih=0.1 * jax.random.normal(k1, (din, 3 * RNN_DIM), jnp.float32),
            bih=0.1 * jax.random.normal(k2, (1, 3 * RNN_DIM), jnp.float32),
            Whh=0.1 * jax.random.normal(k3, (RNN_DIM, 3 * RNN_DIM), jnp.float32),
            bhh=0.1 * jax.random.normal(k4, (1, 3 * RNN_DIM), jnp.float32),
        )

    keys = jax.random.split(key, 10)
    return {
        'f_x':    mlp_params(keys[0], DIM, HID, FX_OUT),
        'enc':    mlp_params(keys[1], FX_OUT + RNN_DIM, HID, 2 * Z_DIM),
        'prior':  mlp_params(keys[2], RNN_DIM, HID, 2 * Z_DIM),
        'f_z':    mlp_params(keys[3], Z_DIM, HID, FZ_OUT),
        'dec':    mlp_params(keys[4], FZ_OUT + RNN_DIM, HID, 2 * DIM),
        'gru_l0': gru_layer(keys[5], FX_OUT + FZ_OUT),
        'gru_l1': gru_layer(keys[6], RNN_DIM),
        'lg': dict(
            W=0.1 * jax.random.normal(keys[7], (2 * RNN_DIM, RNN_DIM), jnp.float32),
            b=0.1 * jax.random.normal(keys[8], (1, RNN_DIM), jnp.float32),
        ),
    }


def transform_params(params):
    """Build the fused / linearly-composed weight set used by the kernel."""
    fx, enc, pr = params['f_x'], params['enc'], params['prior']
    fz, dec = params['f_z'], params['dec']
    g0, g1, lg = params['gru_l0'], params['gru_l1'], params['lg']
    f32 = jnp.float32
    Z2 = 2 * Z_DIM

    # fused encoder+prior second layer (block-diagonal)
    ep_W2 = jnp.zeros((2 * HID, 4 * Z_DIM), f32)
    ep_W2 = ep_W2.at[:HID, :Z2].set(enc['W2'])
    ep_W2 = ep_W2.at[HID:, Z2:].set(pr['W2'])
    ep_b2 = jnp.concatenate([enc['b2'], pr['b2']], axis=1)

    # first-layer splits of the concat-fed MLPs
    enc_W1_fx = enc['W1'][:FX_OUT]                                  # (16, 64)
    enc_W1_h = enc['W1'][FX_OUT:]                                   # (32, 64)
    ep_W1_h = jnp.concatenate([enc_W1_h, pr['W1']], axis=1)         # (32, 128)
    ep_W1_fx = jnp.concatenate(
        [enc_W1_fx, jnp.zeros((FX_OUT, HID), f32)], axis=1)         # (16, 128)
    ep_b1 = jnp.concatenate([enc['b1'], pr['b1']], axis=1)          # (1, 128)

    dec_W1_fz = dec['W1'][:FZ_OUT]                                  # (16, 64)
    dec_W1_h = dec['W1'][FZ_OUT:]                                   # (32, 64)
    g0_Wih_fx = g0['Wih'][:FX_OUT]                                  # (16, 96)
    g0_Wih_fz = g0['Wih'][FX_OUT:]                                  # (16, 96)

    # compose away f_x second layer (f_x is only ever consumed linearly)
    fx_cat_W = jnp.zeros((HID, FXCAT_W), f32)
    fx_cat_W = fx_cat_W.at[:, :EP_W].set(fx['W2'] @ ep_W1_fx)
    fx_cat_W = fx_cat_W.at[:, EP_W:EP_W + G0_W].set(fx['W2'] @ g0_Wih_fx)
    fx_cat_b = jnp.zeros((1, FXCAT_W), f32)
    fx_cat_b = fx_cat_b.at[:, :EP_W].set(ep_b1 + fx['b2'] @ ep_W1_fx)
    fx_cat_b = fx_cat_b.at[:, EP_W:EP_W + G0_W].set(
        g0['bih'] + fx['b2'] @ g0_Wih_fx + fz['b2'] @ g0_Wih_fz)

    # compose away f_z second layer (f_z is only ever consumed linearly)
    fzh_cat_W = jnp.zeros((HID, FZCAT_W), f32)
    fzh_cat_W = fzh_cat_W.at[:, :DEC_W].set(fz['W2'] @ dec_W1_fz)
    fzh_cat_W = fzh_cat_W.at[:, 128:128 + G0_W].set(fz['W2'] @ g0_Wih_fz)

    # every h1-consumer fused into one matmul (slices on 128-lane boundaries)
    h1cat_W = jnp.zeros((RNN_DIM, H1CAT_W), f32)
    h1cat_W = h1cat_W.at[:, :EP_W].set(ep_W1_h)
    h1cat_W = h1cat_W.at[:, 128:128 + G0_W].set(g1['Whh'])
    h1cat_W = h1cat_W.at[:, 256:256 + DEC_W].set(dec_W1_h)
    h1cat_b = jnp.zeros((1, H1CAT_W), f32)
    h1cat_b = h1cat_b.at[:, 128:128 + G0_W].set(g1['bhh'])
    h1cat_b = h1cat_b.at[:, 256:256 + DEC_W].set(
        dec['b1'] + fz['b2'] @ dec_W1_fz)

    return {
        'fx_W1': fx['W1'], 'fx_b1': fx['b1'],
        'fx_cat_W': fx_cat_W, 'fx_cat_b': fx_cat_b,
        'ep_W2': ep_W2, 'ep_b2': ep_b2,
        'fz_W1': fz['W1'], 'fz_b1': fz['b1'],
        'fzh_cat_W': fzh_cat_W,
        'dec_W2': dec['W2'], 'dec_b2': dec['b2'],
        'h1cat_W': h1cat_W, 'h1cat_b': h1cat_b,
        'g0_Whh': g0['Whh'], 'g0_bhh': g0['bhh'],
        'g1_Wih': g1['Wih'], 'g1_bih': g1['bih'],
        'lg_W_h': lg['W'][:RNN_DIM], 'lg_W_g': lg['W'][RNN_DIM:], 'lg_b': lg['b'],
    }


def pack_weights(params):
    tw = transform_params(params)
    slab = jnp.zeros((PACK_ROWS, PACK_LANES), jnp.float32)
    for name, (r0, r, c) in PACK_LAYOUT.items():
        slab = slab.at[r0:r0 + r, :c].set(tw[name])
    return slab


# --------------------------------- kernel -----------------------------------
def _vrnn_kernel(hist_ref, adj_ref, eps_ref, w_ref, kld_ref, nll_ref, h_ref):
    """Whole VRNN forward pass in one invocation (T unrolled at trace time)."""
    f32 = jnp.float32
    R = RNN_DIM

    def W(name):
        r0, nr, nc = PACK_LAYOUT[name]
        return w_ref[r0:r0 + nr, 0:nc]

    def dot(a, b):
        return jnp.dot(a, b, preferred_element_type=f32)

    def gru_gates(gi, gh, hprev):
        r = jax.nn.sigmoid(gi[:, :R] + gh[:, :R])
        z = jax.nn.sigmoid(gi[:, R:2 * R] + gh[:, R:2 * R])
        n = jnp.tanh(gi[:, 2 * R:] + r * gh[:, 2 * R:])
        return (1.0 - z) * n + z * hprev

    # ---- hoisted, h-independent prefix: two matmuls over all T*N rows ------
    x_all = hist_ref[...]                                           # (T*N, 2)
    fx_h_all = jnp.maximum(dot(x_all, W('fx_W1')) + W('fx_b1'), 0.0)
    fx_cat_all = dot(fx_h_all, W('fx_cat_W')) + W('fx_cat_b')       # (T*N, 224)

    adj_all = adj_ref[...]                                          # (T, N, N)
    inv_deg = 1.0 / jnp.sum(adj_all, axis=-1, keepdims=True)        # (T, N, 1)

    h0 = jnp.zeros((N_AGENTS, R), f32)
    h1 = jnp.zeros((N_AGENTS, R), f32)
    kld_acc = jnp.zeros((N_AGENTS, 1), f32)
    nll_acc = jnp.zeros((N_AGENTS, 1), f32)

    # fully unrolled recurrence (T_HIST is small and static)
    for t in range(T_HIST):
        row = t * N_AGENTS
        x_t = x_all[row:row + N_AGENTS, :]                          # (N, DIM)
        fx_ep_t = fx_cat_all[row:row + N_AGENTS, 0:EP_W]            # (N, 128)
        fx_g0_t = fx_cat_all[row:row + N_AGENTS, EP_W:EP_W + G0_W]  # (N, 96)

        # all h1-consumers in one matmul (enc+prior L1 | GRU-l1 hh | dec L1)
        h1cat = dot(h1, W('h1cat_W')) + W('h1cat_b')                # (N, 320)
        ep_h1 = h1cat[:, 0:EP_W]
        gh1 = h1cat[:, 128:128 + G0_W]
        dec_h1 = h1cat[:, 256:256 + DEC_W]

        # fused encoder + prior
        ep_h = jnp.maximum(fx_ep_t + ep_h1, 0.0)                    # (N, 128)
        ep_out = dot(ep_h, W('ep_W2')) + W('ep_b2')                 # (N, 4Z)
        enc_mean = ep_out[:, 0:Z_DIM]
        enc_logvar = ep_out[:, Z_DIM:2 * Z_DIM]
        prior_mean = ep_out[:, 2 * Z_DIM:3 * Z_DIM]
        prior_logvar = ep_out[:, 3 * Z_DIM:4 * Z_DIM]

        # reparameterize (uniform eps precomputed, matches torch.rand_like),
        # f_z first layer; its second layer is folded into fzh_cat_W.
        z_t = eps_ref[t] * jnp.exp(0.5 * enc_logvar) + enc_mean
        fz_h = jnp.maximum(dot(z_t, W('fz_W1')) + W('fz_b1'), 0.0)  # (N, 64)
        fzh_cat = dot(fz_h, W('fzh_cat_W'))                         # (N, 224)
        fzh_dec = fzh_cat[:, 0:DEC_W]
        fzh_g0 = fzh_cat[:, 128:128 + G0_W]

        # decoder
        dec_h = jnp.maximum(fzh_dec + dec_h1, 0.0)
        dec_out = dot(dec_h, W('dec_W2')) + W('dec_b2')             # (N, 2*DIM)
        dec_mean = dec_out[:, 0:DIM]
        dec_logvar = dec_out[:, DIM:2 * DIM]

        # 2-layer GRU, one step
        gi0 = fx_g0_t + fzh_g0                                      # biases folded
        gh0 = dot(h0, W('g0_Whh')) + W('g0_bhh')
        h0 = gru_gates(gi0, gh0, h0)
        gi1 = dot(h0, W('g1_Wih')) + W('g1_bih')
        h1_new = gru_gates(gi1, gh1, h1)

        # graph 'pool':  (adj @ h) * (1/rowsum(adj)), reciprocal hoisted
        h_g = dot(adj_all[t], h1_new) * inv_deg[t]

        # refinement linear (split input matmul, no lane concat)
        h1 = dot(h1_new, W('lg_W_h')) + dot(h_g, W('lg_W_g')) + W('lg_b')

        # per-agent losses, accumulated across time
        x1 = jnp.sum(prior_logvar - enc_logvar, axis=1, keepdims=True)
        x2 = jnp.sum(jnp.exp(enc_logvar - prior_logvar), axis=1, keepdims=True)
        x3 = jnp.sum((enc_mean - prior_mean) ** 2 / jnp.exp(prior_logvar),
                     axis=1, keepdims=True)
        kld_acc += 0.5 * (x1 - float(Z_DIM) + x2 + x3)

        n1 = jnp.sum((x_t - dec_mean) ** 2 / jnp.exp(dec_logvar),
                     axis=1, keepdims=True)
        n3 = jnp.sum(dec_logvar, axis=1, keepdims=True)
        nll_acc += 0.5 * (n1 + float(DIM) * LOG2PI + n3)

    # single final reduction (mean over agents) and single store
    kld_ref[...] = jnp.sum(kld_acc, keepdims=True) * (1.0 / N_AGENTS)
    nll_ref[...] = jnp.sum(nll_acc, keepdims=True) * (1.0 / N_AGENTS)
    h_ref[0] = h0
    h_ref[1] = h1


# --------------------------------- wrapper ----------------------------------
def traj_pred_ego_avrnn_forward(params, hist, hist_resnet, hist_abs,
                                hist_seq_start_end, hist_adj, eps):
    """Pallas implementation of TrajPredEgoAVRNN.forward().

    hist_resnet / hist_abs / hist_seq_start_end are unused by forward()
    (same as the PyTorch module); eps is the uniform noise for reparameterize.
    Returns (KLD[1], NLL[1], h[num_layers, N, rnn_dim]).
    """
    del hist_resnet, hist_abs, hist_seq_start_end
    T, N, D = hist.shape
    assert (T, N, D) == (T_HIST, N_AGENTS, DIM)

    slab = pack_weights(params)          # one packed weight input, one DMA
    hist2d = hist.reshape(T * N, D)      # flat rows -> no in-kernel reshape

    in_specs = [
        pl.BlockSpec((T * N, D), lambda i: (0, 0)),                   # hist
        pl.BlockSpec((T, N, N), lambda i: (0, 0, 0)),                 # hist_adj
        pl.BlockSpec((T, N, Z_DIM), lambda i: (0, 0, 0)),             # eps
        pl.BlockSpec((PACK_ROWS, PACK_LANES), lambda i: (0, 0)),      # weights
    ]
    out_specs = [
        pl.BlockSpec((1, 1), lambda i: (0, 0)),                       # KLD
        pl.BlockSpec((1, 1), lambda i: (0, 0)),                       # NLL
        pl.BlockSpec((NUM_LAYERS, N, RNN_DIM), lambda i: (0, 0, 0)),  # h
    ]
    out_shape = [
        jax.ShapeDtypeStruct((1, 1), jnp.float32),
        jax.ShapeDtypeStruct((1, 1), jnp.float32),
        jax.ShapeDtypeStruct((NUM_LAYERS, N, RNN_DIM), jnp.float32),
    ]

    kld, nll, h = pl.pallas_call(
        _vrnn_kernel,
        out_shape=out_shape,
        grid=(1,),                        # single invocation: loop lives in-kernel
        in_specs=in_specs,
        out_specs=out_specs,
        compiler_params=pltpu.CompilerParams(
            dimension_semantics=("arbitrary",)),
    )(hist2d, hist_adj, eps, slab)

    return kld.reshape(1), nll.reshape(1), h


# ------------------------- pure-JAX reference (check) ------------------------
def reference_forward(params, hist, hist_adj, eps):
    T, N, _ = hist.shape

    def mlp(x, p):
        return jnp.maximum(x @ p['W1'] + p['b1'], 0.0) @ p['W2'] + p['b2']

    def gru_cell(x, hprev, p):
        gi = x @ p['Wih'] + p['bih']
        gh = hprev @ p['Whh'] + p['bhh']
        r = jax.nn.sigmoid(gi[:, :RNN_DIM] + gh[:, :RNN_DIM])
        z = jax.nn.sigmoid(gi[:, RNN_DIM:2 * RNN_DIM] + gh[:, RNN_DIM:2 * RNN_DIM])
        n = jnp.tanh(gi[:, 2 * RNN_DIM:] + r * gh[:, 2 * RNN_DIM:])
        return (1.0 - z) * n + z * hprev

    h = jnp.zeros((NUM_LAYERS, N, RNN_DIM), jnp.float32)
    KLD = jnp.zeros((1,), jnp.float32)
    NLL = jnp.zeros((1,), jnp.float32)
    for t in range(T):
        x_t, adj_t, eps_t = hist[t], hist_adj[t], eps[t]
        f_x_t = mlp(x_t, params['f_x'])
        x_enc_t = mlp(jnp.concatenate([f_x_t, h[-1]], axis=1), params['enc'])
        enc_mean, enc_logvar = x_enc_t[:, :Z_DIM], x_enc_t[:, Z_DIM:]
        x_prior_t = mlp(h[-1], params['prior'])
        prior_mean, prior_logvar = x_prior_t[:, :Z_DIM], x_prior_t[:, Z_DIM:]
        z_t = eps_t * jnp.exp(0.5 * enc_logvar) + enc_mean
        f_z_t = mlp(z_t, params['f_z'])
        x_dec_t = mlp(jnp.concatenate([f_z_t, h[-1]], axis=1), params['dec'])
        dec_mean, dec_logvar = x_dec_t[:, :DIM], x_dec_t[:, DIM:]

        x_rnn = jnp.concatenate([f_x_t, f_z_t], axis=1)
        h0_new = gru_cell(x_rnn, h[0], params['gru_l0'])
        h1_new = gru_cell(h0_new, h[1], params['gru_l1'])

        h_g = (adj_t @ h1_new) / jnp.sum(adj_t, axis=-1, keepdims=True)
        h_refined = jnp.concatenate([h1_new, h_g], axis=1) @ params['lg']['W'] \
            + params['lg']['b']
        h = jnp.stack([h0_new, h_refined])

        x1 = jnp.sum(prior_logvar - enc_logvar, axis=1)
        x2 = jnp.sum(jnp.exp(enc_logvar - prior_logvar), axis=1)
        x3 = jnp.sum((enc_mean - prior_mean) ** 2 / jnp.exp(prior_logvar), axis=1)
        KLD += jnp.mean(0.5 * (x1 - Z_DIM + x2 + x3))

        n1 = jnp.sum((x_t - dec_mean) ** 2 / jnp.exp(dec_logvar), axis=1)
        n3 = jnp.sum(dec_logvar, axis=1)
        NLL += jnp.mean(0.5 * (n1 + DIM * LOG2PI + n3))
    return KLD, NLL, h


# ----------------------------------- main ------------------------------------
if __name__ == "__main__":
    key = jax.random.PRNGKey(0)
    kp, kh, ka, ke = jax.random.split(key, 4)

    params = init_params(kp)
    hist = jax.random.normal(kh, (T_HIST, N_AGENTS, DIM), jnp.float32)
    hist_adj = jax.random.uniform(ka, (T_HIST, N_AGENTS, N_AGENTS),
                                  jnp.float32, minval=0.5, maxval=1.0)
    # TODO(synk): torch.rand_like RNG inside the kernel replaced by host-side
    # uniform noise passed as an input (same distribution, deterministic).
    eps = jax.random.uniform(ke, (T_HIST, N_AGENTS, Z_DIM), jnp.float32)

    # unused by forward() (kept for signature fidelity)
    hist_resnet = jnp.zeros((T_HIST, N_AGENTS, 64), jnp.float32)
    hist_abs = hist
    hist_seq_start_end = jnp.array([[0, N_AGENTS]], jnp.int32)

    KLD, NLL, h = traj_pred_ego_avrnn_forward(
        params, hist, hist_resnet, hist_abs, hist_seq_start_end, hist_adj, eps)
    jax.block_until_ready((KLD, NLL, h))

    KLD_r, NLL_r, h_r = reference_forward(params, hist, hist_adj, eps)
    assert jnp.all(jnp.isfinite(KLD)) and jnp.all(jnp.isfinite(NLL))
    assert jnp.allclose(KLD, KLD_r, rtol=5e-2, atol=5e-2), (KLD, KLD_r)
    assert jnp.allclose(NLL, NLL_r, rtol=5e-2, atol=5e-2), (NLL, NLL_r)
    assert jnp.allclose(h, h_r, rtol=5e-2, atol=5e-2)

    print("KERNEL_OK")
</pallas_src>

<mosaic_0001>
module attributes {stable_mosaic.version = 11 : i64} {
  func.func @_vrnn_kernel(%arg0: i32, %arg1: memref<64x2xf32, #tpu.memory_space<vmem>>, %arg2: memref<8x8x8xf32, #tpu.memory_space<vmem>>, %arg3: memref<8x8x16xf32, #tpu.memory_space<vmem>>, %arg4: memref<576x384xf32, #tpu.memory_space<vmem>>, %arg5: memref<1x1xf32, #tpu.memory_space<vmem>>, %arg6: memref<1x1xf32, #tpu.memory_space<vmem>>, %arg7: memref<2x8x32xf32, #tpu.memory_space<vmem>>) attributes {dimension_semantics = [#tpu.dimension_semantics<arbitrary>], iteration_bounds = array<i64: 1>, scalar_prefetch = 0 : i64, scratch_operands = 0 : i64, tpu.core_type = #tpu.core_type<tc>, window_params = [{pipeline_mode = #tpu.pipeline_mode<synchronous>, transform_indices = @transform_0, window_bounds = array<i64: 64, 2>}, {pipeline_mode = #tpu.pipeline_mode<synchronous>, transform_indices = @transform_1, window_bounds = array<i64: 8, 8, 8>}, {pipeline_mode = #tpu.pipeline_mode<synchronous>, transform_indices = @transform_2, window_bounds = array<i64: 8, 8, 16>}, {pipeline_mode = #tpu.pipeline_mode<synchronous>, transform_indices = @transform_3, window_bounds = array<i64: 576, 384>}, {pipeline_mode = #tpu.pipeline_mode<synchronous>, transform_indices = @transform_4, window_bounds = array<i64: 1, 1>}, {pipeline_mode = #tpu.pipeline_mode<synchronous>, transform_indices = @transform_5, window_bounds = array<i64: 1, 1>}, {pipeline_mode = #tpu.pipeline_mode<synchronous>, transform_indices = @transform_6, window_bounds = array<i64: 2, 8, 32>}]} {
    %c0 = arith.constant 0 : index
    %c0_0 = arith.constant 0 : index
    %0 = vector.load %arg1[%c0, %c0_0] : memref<64x2xf32, #tpu.memory_space<vmem>>, vector<64x2xf32>
    %c0_1 = arith.constant 0 : index
    %c0_2 = arith.constant 0 : index
    %1 = vector.load %arg4[%c0_1, %c0_2] : memref<576x384xf32, #tpu.memory_space<vmem>>, vector<2x64xf32>
    %cst = arith.constant dense<0.000000e+00> : vector<64x64xf32>
    %2 = tpu.matmul %0, %1, %cst {dimension_numbers = #tpu.dot_dimension_numbers<[1], [0], [0], [1], [0, 0, 1, 1], [], []>} : vector<64x2xf32>, vector<2x64xf32>, vector<64x64xf32> -> vector<64x64xf32>
    %c8 = arith.constant 8 : index
    %c0_3 = arith.constant 0 : index
    %3 = vector.load %arg4[%c8, %c0_3] : memref<576x384xf32, #tpu.memory_space<vmem>>, vector<1x64xf32>
    %4 = vector.broadcast %3 : vector<1x64xf32> to vector<64x64xf32>
    %5 = arith.addf %2, %4 : vector<64x64xf32>
    %cst_4 = arith.constant 0.000000e+00 : f32
    %6 = vector.broadcast %cst_4 : f32 to vector<64x64xf32>
    %7 = arith.maximumf %5, %6 : vector<64x64xf32>
    %c16 = arith.constant 16 : index
    %c0_5 = arith.constant 0 : index
    %8 = vector.load %arg4[%c16, %c0_5] : memref<576x384xf32, #tpu.memory_space<vmem>>, vector<64x224xf32>
    %cst_6 = arith.constant dense<0.000000e+00> : vector<64x224xf32>
    %9 = tpu.matmul %7, %8, %cst_6 {dimension_numbers = #tpu.dot_dimension_numbers<[1], [0], [0], [1], [0, 0, 1, 1], [], []>} : vector<64x64xf32>, vector<64x224xf32>, vector<64x224xf32> -> vector<64x224xf32>
    %c80 = arith.constant 80 : index
    %c0_7 = arith.constant 0 : index
    %10 = vector.load %arg4[%c80, %c0_7] : memref<576x384xf32, #tpu.memory_space<vmem>>, vector<1x224xf32>
    %11 = vector.broadcast %10 : vector<1x224xf32> to vector<64x224xf32>
    %12 = arith.addf %9, %11 : vector<64x224xf32>
    %c0_8 = arith.constant 0 : index
    %c0_9 = arith.constant 0 : index
    %c0_10 = arith.constant 0 : index
    %13 = vector.load %arg2[%c0_8, %c0_9, %c0_10] : memref<8x8x8xf32, #tpu.memory_space<vmem>>, vector<8x8x8xf32>
    %cst_11 = arith.constant dense<0.000000e+00> : vector<8x8xf32>
    %14 = vector.multi_reduction <add>, %13, %cst_11 [2] : vector<8x8x8xf32> to vector<8x8xf32>
    %15 = vector.shape_cast %14 : vector<8x8xf32> to vector<8x8x1xf32>
    %cst_12 = arith.constant 1.000000e+00 : f32
    %16 = vector.broadcast %cst_12 : f32 to vector<8x8x1xf32>
    %17 = arith.divf %16, %15 : vector<8x8x1xf32>
    %cst_13 = arith.constant 0.000000e+00 : f32
    %18 = vector.broadcast %cst_13 : f32 to vector<8x32xf32>
    %cst_14 = arith.constant 0.000000e+00 : f32
    %19 = vector.broadcast %cst_14 : f32 to vector<8x32xf32>
    %cst_15 = arith.constant 0.000000e+00 : f32
    %20 = vector.broadcast %cst_15 : f32 to vector<8x1xf32>
    %cst_16 = arith.constant 0.000000e+00 : f32
    %21 = vector.broadcast %cst_16 : f32 to vector<8x1xf32>
    %22 = vector.extract_strided_slice %0 {offsets = [0, 0], sizes = [8, 2], strides = [1, 1]} : vector<64x2xf32> to vector<8x2xf32>
    %23 = vector.extract_strided_slice %12 {offsets = [0, 0], sizes = [8, 128], strides = [1, 1]} : vector<64x224xf32> to vector<8x128xf32>
    %24 = vector.extract_strided_slice %12 {offsets = [0, 128], sizes = [8, 96], strides = [1, 1]} : vector<64x224xf32> to vector<8x96xf32>
    %c384 = arith.constant 384 : index
    %c0_17 = arith.constant 0 : index
    %25 = vector.load %arg4[%c384, %c0_17] : memref<576x384xf32, #tpu.memory_space<vmem>>, vector<32x320xf32>
    %cst_18 = arith.constant dense<0.000000e+00> : vector<8x320xf32>
    %26 = tpu.matmul %19, %25, %cst_18 {dimension_numbers = #tpu.dot_dimension_numbers<[1], [0], [0], [1], [0, 0, 1, 1], [], []>} : vector<8x32xf32>, vector<32x320xf32>, vector<8x320xf32> -> vector<8x320xf32>
    %c416 = arith.constant 416 : index
    %c0_19 = arith.constant 0 : index
    %27 = vector.load %arg4[%c416, %c0_19] : memref<576x384xf32, #tpu.memory_space<vmem>>, vector<1x320xf32>
    %28 = vector.broadcast %27 : vector<1x320xf32> to vector<8x320xf32>
    %29 = arith.addf %26, %28 : vector<8x320xf32>
    %30 = vector.extract_strided_slice %29 {offsets = [0, 0], sizes = [8, 128], strides = [1, 1]} : vector<8x320xf32> to vector<8x128xf32>
    %31 = vector.extract_strided_slice %29 {offsets = [0, 128], sizes = [8, 96], strides = [1, 1]} : vector<8x320xf32> to vector<8x96xf32>
    %32 = vector.extract_strided_slice %29 {offsets = [0, 256], sizes = [8, 64], strides = [1, 1]} : vector<8x320xf32> to vector<8x64xf32>
    %33 = arith.addf %23, %30 : vector<8x128xf32>
    %cst_20 = arith.constant 0.000000e+00 : f32
    %34 = vector.broadcast %cst_20 : f32 to vector<8x128xf32>
    %35 = arith.maximumf %33, %34 : vector<8x128xf32>
    %c88 = arith.constant 88 : index
    %c0_21 = arith.constant 0 : index
    %36 = vector.load %arg4[%c88, %c0_21] : memref<576x384xf32, #tpu.memory_space<vmem>>, vector<128x64xf32>
    %cst_22 = arith.constant dense<0.000000e+00> : vector<8x64xf32>
    %37 = tpu.matmul %35, %36, %cst_22 {dimension_numbers = #tpu.dot_dimension_numbers<[1], [0], [0], [1], [0, 0, 1, 1], [], []>} : vector<8x128xf32>, vector<128x64xf32>, vector<8x64xf32> -> vector<8x64xf32>
    %c216 = arith.constant 216 : index
    %c0_23 = arith.constant 0 : index
    %38 = vector.load %arg4[%c216, %c0_23] : memref<576x384xf32, #tpu.memory_space<vmem>>, vector<1x64xf32>
    %39 = vector.broadcast %38 : vector<1x64xf32> to vector<8x64xf32>
    %40 = arith.addf %37, %39 : vector<8x64xf32>
    %41 = vector.extract_strided_slice %40 {offsets = [0, 0], sizes = [8, 16], strides = [1, 1]} : vector<8x64xf32> to vector<8x16xf32>
    %42 = vector.extract_strided_slice %40 {offsets = [0, 16], sizes = [8, 16], strides = [1, 1]} : vector<8x64xf32> to vector<8x16xf32>
    %43 = vector.extract_strided_slice %40 {offsets = [0, 32], sizes = [8, 16], strides = [1, 1]} : vector<8x64xf32> to vector<8x16xf32>
    %44 = vector.extract_strided_slice %40 {offsets = [0, 48], sizes = [8, 16], strides = [1, 1]} : vector<8x64xf32> to vector<8x16xf32>
    %c0_24 = arith.constant 0 : index
    %c0_25 = arith.constant 0 : index
    %c0_26 = arith.constant 0 : index
    %45 = vector.load %arg3[%c0_24, %c0_25, %c0_26] : memref<8x8x16xf32, #tpu.memory_space<vmem>>, vector<1x8x16xf32>
    %46 = vector.shape_cast %45 : vector<1x8x16xf32> to vector<8x16xf32>
    %cst_27 = arith.constant 5.000000e-01 : f32
    %47 = vector.broadcast %cst_27 : f32 to vector<8x16xf32>
    %48 = arith.mulf %47, %42 : vector<8x16xf32>
    %49 = math.exp %48 : vector<8x16xf32>
    %50 = arith.mulf %46, %49 : vector<8x16xf32>
    %51 = arith.addf %50, %41 : vector<8x16xf32>
    %c224 = arith.constant 224 : index
    %c0_28 = arith.constant 0 : index
    %52 = vector.load %arg4[%c224, %c0_28] : memref<576x384xf32, #tpu.memory_space<vmem>>, vector<16x64xf32>
    %cst_29 = arith.constant dense<0.000000e+00> : vector<8x64xf32>
    %53 = tpu.matmul %51, %52, %cst_29 {dimension_numbers = #tpu.dot_dimension_numbers<[1], [0], [0], [1], [0, 0, 1, 1], [], []>} : vector<8x16xf32>, vector<16x64xf32>, vector<8x64xf32> -> vector<8x64xf32>
    %c240 = arith.constant 240 : index
    %c0_30 = arith.constant 0 : index
    %54 = vector.load %arg4[%c240, %c0_30] : memref<576x384xf32, #tpu.memory_space<vmem>>, vector<1x64xf32>
    %55 = vector.broadcast %54 : vector<1x64xf32> to vector<8x64xf32>
    %56 = arith.addf %53, %55 : vector<8x64xf32>
    %cst_31 = arith.constant 0.000000e+00 : f32
    %57 = vector.broadcast %cst_31 : f32 to vector<8x64xf32>
    %58 = arith.maximumf %56, %57 : vector<8x64xf32>
    %c248 = arith.constant 248 : index
    %c0_32 = arith.constant 0 : index
    %59 = vector.load %arg4[%c248, %c0_32] : memref<576x384xf32, #tpu.memory_space<vmem>>, vector<64x224xf32>
    %cst_33 = arith.constant dense<0.000000e+00> : vector<8x224xf32>
    %60 = tpu.matmul %58, %59, %cst_33 {dimension_numbers = #tpu.dot_dimension_numbers<[1], [0], [0], [1], [0, 0, 1, 1], [], []>} : vector<8x64xf32>, vector<64x224xf32>, vector<8x224xf32> -> vector<8x224xf32>
    %61 = vector.extract_strided_slice %60 {offsets = [0, 0], sizes = [8, 64], strides = [1, 1]} : vector<8x224xf32> to vector<8x64xf32>
    %62 = vector.extract_strided_slice %60 {offsets = [0, 128], sizes = [8, 96], strides = [1, 1]} : vector<8x224xf32> to vector<8x96xf32>
    %63 = arith.addf %61, %32 : vector<8x64xf32>
    %cst_34 = arith.constant 0.000000e+00 : f32
    %64 = vector.broadcast %cst_34 : f32 to vector<8x64xf32>
    %65 = arith.maximumf %63, %64 : vector<8x64xf32>
    %c312 = arith.constant 312 : index
    %c0_35 = arith.constant 0 : index
    %66 = vector.load %arg4[%c312, %c0_35] : memref<576x384xf32, #tpu.memory_space<vmem>>, vector<64x4xf32>
    %cst_36 = arith.constant dense<0.000000e+00> : vector<8x4xf32>
    %67 = tpu.matmul %65, %66, %cst_36 {dimension_numbers = #tpu.dot_dimension_numbers<[1], [0], [0], [1], [0, 0, 1, 1], [], []>} : vector<8x64xf32>, vector<64x4xf32>, vector<8x4xf32> -> vector<8x4xf32>
    %c376 = arith.constant 376 : index
    %c0_37 = arith.constant 0 : index
    %68 = vector.load %arg4[%c376, %c0_37] : memref<576x384xf32, #tpu.memory_space<vmem>>, vector<1x4xf32>
    %69 = vector.broadcast %68 : vector<1x4xf32> to vector<8x4xf32>
    %70 = arith.addf %67, %69 : vector<8x4xf32>
    %71 = vector.extract_strided_slice %70 {offsets = [0, 0], sizes = [8, 2], strides = [1, 1]} : vector<8x4xf32> to vector<8x2xf32>
    %72 = vector.extract_strided_slice %70 {offsets = [0, 2], sizes = [8, 2], strides = [1, 1]} : vector<8x4xf32> to vector<8x2xf32>
    %73 = arith.addf %24, %62 : vector<8x96xf32>
    %c424 = arith.constant 424 : index
    %c0_38 = arith.constant 0 : index
    %74 = vector.load %arg4[%c424, %c0_38] : memref<576x384xf32, #tpu.memory_space<vmem>>, vector<32x96xf32>
    %cst_39 = arith.constant dense<0.000000e+00> : vector<8x96xf32>
    %75 = tpu.matmul %18, %74, %cst_39 {dimension_numbers = #tpu.dot_dimension_numbers<[1], [0], [0], [1], [0, 0, 1, 1], [], []>} : vector<8x32xf32>, vector<32x96xf32>, vector<8x96xf32> -> vector<8x96xf32>
    %c456 = arith.constant 456 : index
    %c0_40 = arith.constant 0 : index
    %76 = vector.load %arg4[%c456, %c0_40] : memref<576x384xf32, #tpu.memory_space<vmem>>, vector<1x96xf32>
    %77 = vector.broadcast %76 : vector<1x96xf32> to vector<8x96xf32>
    %78 = arith.addf %75, %77 : vector<8x96xf32>
    %79 = vector.extract_strided_slice %73 {offsets = [0, 0], sizes = [8, 32], strides = [1, 1]} : vector<8x96xf32> to vector<8x32xf32>
    %80 = vector.extract_strided_slice %78 {offsets = [0, 0], sizes = [8, 32], strides = [1, 1]} : vector<8x96xf32> to vector<8x32xf32>
    %81 = arith.addf %79, %80 : vector<8x32xf32>
    %82 = arith.negf %81 : vector<8x32xf32>
    %83 = math.exp %82 : vector<8x32xf32>
    %cst_41 = arith.constant 1.000000e+00 : f32
    %84 = vector.broadcast %cst_41 : f32 to vector<8x32xf32>
    %85 = arith.addf %84, %83 : vector<8x32xf32>
    %86 = arith.divf %84, %85 : vector<8x32xf32>
    %87 = vector.extract_strided_slice %73 {offsets = [0, 32], sizes = [8, 32], strides = [1, 1]} : vector<8x96xf32> to vector<8x32xf32>
    %88 = vector.extract_strided_slice %78 {offsets = [0, 32], sizes = [8, 32], strides = [1, 1]} : vector<8x96xf32> to vector<8x32xf32>
    %89 = arith.addf %87, %88 : vector<8x32xf32>
    %90 = arith.negf %89 : vector<8x32xf32>
    %91 = math.exp %90 : vector<8x32xf32>
    %cst_42 = arith.constant 1.000000e+00 : f32
    %92 = vector.broadcast %cst_42 : f32 to vector<8x32xf32>
    %93 = arith.addf %92, %91 : vector<8x32xf32>
    %94 = arith.divf %92, %93 : vector<8x32xf32>
    %95 = vector.extract_strided_slice %73 {offsets = [0, 64], sizes = [8, 32], strides = [1, 1]} : vector<8x96xf32> to vector<8x32xf32>
    %96 = vector.extract_strided_slice %78 {offsets = [0, 64], sizes = [8, 32], strides = [1, 1]} : vector<8x96xf32> to vector<8x32xf32>
    %97 = arith.mulf %86, %96 : vector<8x32xf32>
    %98 = arith.addf %95, %97 : vector<8x32xf32>
    %99 = math.tanh %98 : vector<8x32xf32>
    %cst_43 = arith.constant 1.000000e+00 : f32
    %100 = vector.broadcast %cst_43 : f32 to vector<8x32xf32>
    %101 = arith.subf %100, %94 : vector<8x32xf32>
    %102 = arith.mulf %101, %99 : vector<8x32xf32>
    %103 = arith.mulf %94, %18 : vector<8x32xf32>
    %104 = arith.addf %102, %103 : vector<8x32xf32>
    %c464 = arith.constant 464 : index
    %c0_44 = arith.constant 0 : index
    %105 = vector.load %arg4[%c464, %c0_44] : memref<576x384xf32, #tpu.memory_space<vmem>>, vector<32x96xf32>
    %cst_45 = arith.constant dense<0.000000e+00> : vector<8x96xf32>
    %106 = tpu.matmul %104, %105, %cst_45 {dimension_numbers = #tpu.dot_dimension_numbers<[1], [0], [0], [1], [0, 0, 1, 1], [], []>} : vector<8x32xf32>, vector<32x96xf32>, vector<8x96xf32> -> vector<8x96xf32>
    %c496 = arith.constant 496 : index
    %c0_46 = arith.constant 0 : index
    %107 = vector.load %arg4[%c496, %c0_46] : memref<576x384xf32, #tpu.memory_space<vmem>>, vector<1x96xf32>
    %108 = vector.broadcast %107 : vector<1x96xf32> to vector<8x96xf32>
    %109 = arith.addf %106, %108 : vector<8x96xf32>
    %110 = vector.extract_strided_slice %109 {offsets = [0, 0], sizes = [8, 32], strides = [1, 1]} : vector<8x96xf32> to vector<8x32xf32>
    %111 = vector.extract_strided_slice %31 {offsets = [0, 0], sizes = [8, 32], strides = [1, 1]} : vector<8x96xf32> to vector<8x32xf32>
    %112 = arith.addf %110, %111 : vector<8x32xf32>
    %113 = arith.negf %112 : vector<8x32xf32>
    %114 = math.exp %113 : vector<8x32xf32>
    %cst_47 = arith.constant 1.000000e+00 : f32
    %115 = vector.broadcast %cst_47 : f32 to vector<8x32xf32>
    %116 = arith.addf %115, %114 : vector<8x32xf32>
    %117 = arith.divf %115, %116 : vector<8x32xf32>
    %118 = vector.extract_strided_slice %109 {offsets = [0, 32], sizes = [8, 32], strides = [1, 1]} : vector<8x96xf32> to vector<8x32xf32>
    %119 = vector.extract_strided_slice %31 {offsets = [0, 32], sizes = [8, 32], strides = [1, 1]} : vector<8x96xf32> to vector<8x32xf32>
    %120 = arith.addf %118, %119 : vector<8x32xf32>
    %121 = arith.negf %120 : vector<8x32xf32>
    %122 = math.exp %121 : vector<8x32xf32>
    %cst_48 = arith.constant 1.000000e+00 : f32
    %123 = vector.broadcast %cst_48 : f32 to vector<8x32xf32>
    %124 = arith.addf %123, %122 : vector<8x32xf32>
    %125 = arith.divf %123, %124 : vector<8x32xf32>
    %126 = vector.extract_strided_slice %109 {offsets = [0, 64], sizes = [8, 32], strides = [1, 1]} : vector<8x96xf32> to vector<8x32xf32>
    %127 = vector.extract_strided_slice %31 {offsets = [0, 64], sizes = [8, 32], strides = [1, 1]} : vector<8x96xf32> to vector<8x32xf32>
    %128 = arith.mulf %117, %127 : vector<8x32xf32>
    %129 = arith.addf %126, %128 : vector<8x32xf32>
    %130 = math.tanh %129 : vector<8x32xf32>
    %cst_49 = arith.constant 1.000000e+00 : f32
    %131 = vector.broadcast %cst_49 : f32 to vector<8x32xf32>
    %132 = arith.subf %131, %125 : vector<8x32xf32>
    %133 = arith.mulf %132, %130 : vector<8x32xf32>
    %134 = arith.mulf %125, %19 : vector<8x32xf32>
    %135 = arith.addf %133, %134 : vector<8x32xf32>
    %136 = vector.extract_strided_slice %13 {offsets = [0, 0, 0], sizes = [1, 8, 8], strides = [1, 1, 1]} : vector<8x8x8xf32> to vector<1x8x8xf32>
    %137 = vector.shape_cast %136 : vector<1x8x8xf32> to vector<8x8xf32>
    %cst_50 = arith.constant dense<0.000000e+00> : vector<8x32xf32>
    %138 = tpu.matmul %137, %135, %cst_50 {dimension_numbers = #tpu.dot_dimension_numbers<[1], [0], [0], [1], [0, 0, 1, 1], [], []>} : vector<8x8xf32>, vector<8x32xf32>, vector<8x32xf32> -> vector<8x32xf32>
    %139 = vector.extract_strided_slice %17 {offsets = [0, 0, 0], sizes = [1, 8, 1], strides = [1, 1, 1]} : vector<8x8x1xf32> to vector<1x8x1xf32>
    %140 = vector.shape_cast %139 : vector<1x8x1xf32> to vector<8x1xf32>
    %141 = vector.broadcast %140 : vector<8x1xf32> to vector<8x32xf32>
    %142 = arith.mulf %138, %141 : vector<8x32xf32>
    %c504 = arith.constant 504 : index
    %c0_51 = arith.constant 0 : index
    %143 = vector.load %arg4[%c504, %c0_51] : memref<576x384xf32, #tpu.memory_space<vmem>>, vector<32x32xf32>
    %cst_52 = arith.constant dense<0.000000e+00> : vector<8x32xf32>
    %144 = tpu.matmul %135, %143, %cst_52 {dimension_numbers = #tpu.dot_dimension_numbers<[1], [0], [0], [1], [0, 0, 1, 1], [], []>} : vector<8x32xf32>, vector<32x32xf32>, vector<8x32xf32> -> vector<8x32xf32>
    %c536 = arith.constant 536 : index
    %c0_53 = arith.constant 0 : index
    %145 = vector.load %arg4[%c536, %c0_53] : memref<576x384xf32, #tpu.memory_space<vmem>>, vector<32x32xf32>
    %cst_54 = arith.constant dense<0.000000e+00> : vector<8x32xf32>
    %146 = tpu.matmul %142, %145, %cst_54 {dimension_numbers = #tpu.dot_dimension_numbers<[1], [0], [0], [1], [0, 0, 1, 1], [], []>} : vector<8x32xf32>, vector<32x32xf32>, vector<8x32xf32> -> vector<8x32xf32>
    %147 = arith.addf %144, %146 : vector<8x32xf32>
    %c568 = arith.constant 568 : index
    %c0_55 = arith.constant 0 : index
    %148 = vector.load %arg4[%c568, %c0_55] : memref<576x384xf32, #tpu.memory_space<vmem>>, vector<1x32xf32>
    %149 = vector.broadcast %148 : vector<1x32xf32> to vector<8x32xf32>
    %150 = arith.addf %147, %149 : vector<8x32xf32>
    %151 = arith.subf %44, %42 : vector<8x16xf32>
    %cst_56 = arith.constant dense<0.000000e+00> : vector<8xf32>
    %152 = vector.multi_reduction <add>, %151, %cst_56 [1] : vector<8x16xf32> to vector<8xf32>
    %153 = vector.shape_cast %152 : vector<8xf32> to vector<8x1xf32>
    %154 = arith.subf %42, %44 : vector<8x16xf32>
    %155 = math.exp %154 : vector<8x16xf32>
    %cst_57 = arith.constant dense<0.000000e+00> : vector<8xf32>
    %156 = vector.multi_reduction <add>, %155, %cst_57 [1] : vector<8x16xf32> to vector<8xf32>
    %157 = vector.shape_cast %156 : vector<8xf32> to vector<8x1xf32>
    %158 = arith.subf %41, %43 : vector<8x16xf32>
    %159 = arith.mulf %158, %158 : vector<8x16xf32>
    %160 = math.exp %44 : vector<8x16xf32>
    %161 = arith.divf %159, %160 : vector<8x16xf32>
    %cst_58 = arith.constant dense<0.000000e+00> : vector<8xf32>
    %162 = vector.multi_reduction <add>, %161, %cst_58 [1] : vector<8x16xf32> to vector<8xf32>
    %163 = vector.shape_cast %162 : vector<8xf32> to vector<8x1xf32>
    %cst_59 = arith.constant 1.600000e+01 : f32
    %164 = vector.broadcast %cst_59 : f32 to vector<8x1xf32>
    %165 = arith.subf %153, %164 : vector<8x1xf32>
    %166 = arith.addf %165, %157 : vector<8x1xf32>
    %167 = arith.addf %166, %163 : vector<8x1xf32>
    %cst_60 = arith.constant 5.000000e-01 : f32
    %168 = vector.broadcast %cst_60 : f32 to vector<8x1xf32>
    %169 = arith.mulf %168, %167 : vector<8x1xf32>
    %170 = arith.addf %20, %169 : vector<8x1xf32>
    %171 = arith.subf %22, %71 : vector<8x2xf32>
    %172 = arith.mulf %171, %171 : vector<8x2xf32>
    %173 = math.exp %72 : vector<8x2xf32>
    %174 = arith.divf %172, %173 : vector<8x2xf32>
    %cst_61 = arith.constant dense<0.000000e+00> : vector<8xf32>
    %175 = vector.multi_reduction <add>, %174, %cst_61 [1] : vector<8x2xf32> to vector<8xf32>
    %176 = vector.shape_cast %175 : vector<8xf32> to vector<8x1xf32>
    %cst_62 = arith.constant dense<0.000000e+00> : vector<8xf32>
    %177 = vector.multi_reduction <add>, %72, %cst_62 [1] : vector<8x2xf32> to vector<8xf32>
    %178 = vector.shape_cast %177 : vector<8xf32> to vector<8x1xf32>
    %cst_63 = arith.constant 3.67575407 : f32
    %179 = vector.broadcast %cst_63 : f32 to vector<8x1xf32>
    %180 = arith.addf %176, %179 : vector<8x1xf32>
    %181 = arith.addf %180, %178 : vector<8x1xf32>
    %cst_64 = arith.constant 5.000000e-01 : f32
    %182 = vector.broadcast %cst_64 : f32 to vector<8x1xf32>
    %183 = arith.mulf %182, %181 : vector<8x1xf32>
    %184 = arith.addf %21, %183 : vector<8x1xf32>
    %185 = vector.extract_strided_slice %0 {offsets = [8, 0], sizes = [8, 2], strides = [1, 1]} : vector<64x2xf32> to vector<8x2xf32>
    %186 = vector.extract_strided_slice %12 {offsets = [8, 0], sizes = [8, 128], strides = [1, 1]} : vector<64x224xf32> to vector<8x128xf32>
    %187 = vector.extract_strided_slice %12 {offsets = [8, 128], sizes = [8, 96], strides = [1, 1]} : vector<64x224xf32> to vector<8x96xf32>
    %c384_65 = arith.constant 384 : index
    %c0_66 = arith.constant 0 : index
    %188 = vector.load %arg4[%c384_65, %c0_66] : memref<576x384xf32, #tpu.memory_space<vmem>>, vector<32x320xf32>
    %cst_67 = arith.constant dense<0.000000e+00> : vector<8x320xf32>
    %189 = tpu.matmul %150, %188, %cst_67 {dimension_numbers = #tpu.dot_dimension_numbers<[1], [0], [0], [1], [0, 0, 1, 1], [], []>} : vector<8x32xf32>, vector<32x320xf32>, vector<8x320xf32> -> vector<8x320xf32>
    %c416_68 = arith.constant 416 : index
    %c0_69 = arith.constant 0 : index
    %190 = vector.load %arg4[%c416_68, %c0_69] : memref<576x384xf32, #tpu.memory_space<vmem>>, vector<1x320xf32>
    %191 = vector.broadcast %190 : vector<1x320xf32> to vector<8x320xf32>
    %192 = arith.addf %189, %191 : vector<8x320xf32>
    %193 = vector.extract_strided_slice %192 {offsets = [0, 0], sizes = [8, 128], strides = [1, 1]} : vector<8x320xf32> to vector<8x128xf32>
    %194 = vector.extract_strided_slice %192 {offsets = [0, 128], sizes = [8, 96], strides = [1, 1]} : vector<8x320xf32> to vector<8x96xf32>
    %195 = vector.extract_strided_slice %192 {offsets = [0, 256], sizes = [8, 64], strides = [1, 1]} : vector<8x320xf32> to vector<8x64xf32>
    %196 = arith.addf %186, %193 : vector<8x128xf32>
    %cst_70 = arith.constant 0.000000e+00 : f32
    %197 = vector.broadcast %cst_70 : f32 to vector<8x128xf32>
    %198 = arith.maximumf %196, %197 : vector<8x128xf32>
    %c88_71 = arith.constant 88 : index
    %c0_72 = arith.constant 0 : index
    %199 = vector.load %arg4[%c88_71, %c0_72] : memref<576x384xf32, #tpu.memory_space<vmem>>, vector<128x64xf32>
    %cst_73 = arith.constant dense<0.000000e+00> : vector<8x64xf32>
    %200 = tpu.matmul %198, %199, %cst_73 {dimension_numbers = #tpu.dot_dimension_numbers<[1], [0], [0], [1], [0, 0, 1, 1], [], []>} : vector<8x128xf32>, vector<128x64xf32>, vector<8x64xf32> -> vector<8x64xf32>
    %c216_74 = arith.constant 216 : index
    %c0_75 = arith.constant 0 : index
    %201 = vector.load %arg4[%c216_74, %c0_75] : memref<576x384xf32, #tpu.memory_space<vmem>>, vector<1x64xf32>
    %202 = vector.broadcast %201 : vector<1x64xf32> to vector<8x64xf32>
    %203 = arith.addf %200, %202 : vector<8x64xf32>
    %204 = vector.extract_strided_slice %203 {offsets = [0, 0], sizes = [8, 16], strides = [1, 1]} : vector<8x64xf32> to vector<8x16xf32>
    %205 = vector.extract_strided_slice %203 {offsets = [0, 16], sizes = [8, 16], strides = [1, 1]} : vector<8x64xf32> to vector<8x16xf32>
    %206 = vector.extract_strided_slice %203 {offsets = [0, 32], sizes = [8, 16], strides = [1, 1]} : vector<8x64xf32> to vector<8x16xf32>
    %207 = vector.extract_strided_slice %203 {offsets = [0, 48], sizes = [8, 16], strides = [1, 1]} : vector<8x64xf32> to vector<8x16xf32>
    %c1 = arith.constant 1 : index
    %c0_76 = arith.constant 0 : index
    %c0_77 = arith.constant 0 : index
    %208 = vector.load %arg3[%c1, %c0_76, %c0_77] : memref<8x8x16xf32, #tpu.memory_space<vmem>>, vector<1x8x16xf32>
    %209 = vector.shape_cast %208 : vector<1x8x16xf32> to vector<8x16xf32>
    %cst_78 = arith.constant 5.000000e-01 : f32
    %210 = vector.broadcast %cst_78 : f32 to vector<8x16xf32>
    %211 = arith.mulf %210, %205 : vector<8x16xf32>
    %212 = math.exp %211 : vector<8x16xf32>
    %213 = arith.mulf %209, %212 : vector<8x16xf32>
    %214 = arith.addf %213, %204 : vector<8x16xf32>
    %c224_79 = arith.constant 224 : index
    %c0_80 = arith.constant 0 : index
    %215 = vector.load %arg4[%c224_79, %c0_80] : memref<576x384xf32, #tpu.memory_space<vmem>>, vector<16x64xf32>
    %cst_81 = arith.constant dense<0.000000e+00> : vector<8x64xf32>
    %216 = tpu.matmul %214, %215, %cst_81 {dimension_numbers = #tpu.dot_dimension_numbers<[1], [0], [0], [1], [0, 0, 1, 1], [], []>} : vector<8x16xf32>, vector<16x64xf32>, vector<8x64xf32> -> vector<8x64xf32>
    %c240_82 = arith.constant 240 : index
    %c0_83 = arith.constant 0 : index
    %217 = vector.load %arg4[%c240_82, %c0_83] : memref<576x384xf32, #tpu.memory_space<vmem>>, vector<1x64xf32>
    %218 = vector.broadcast %217 : vector<1x64xf32> to vector<8x64xf32>
    %219 = arith.addf %216, %218 : vector<8x64xf32>
    %cst_84 = arith.constant 0.000000e+00 : f32
    %220 = vector.broadcast %cst_84 : f32 to vector<8x64xf32>
    %221 = arith.maximumf %219, %220 : vector<8x64xf32>
    %c248_85 = arith.constant 248 : index
    %c0_86 = arith.constant 0 : index
    %222 = vector.load %arg4[%c248_85, %c0_86] : memref<576x384xf32, #tpu.memory_space<vmem>>, vector<64x224xf32>
    %cst_87 = arith.constant dense<0.000000e+00> : vector<8x224xf32>
    %223 = tpu.matmul %221, %222, %cst_87 {dimension_numbers = #tpu.dot_dimension_numbers<[1], [0], [0], [1], [0, 0, 1, 1], [], []>} : vector<8x64xf32>, vector<64x224xf32>, vector<8x224xf32> -> vector<8x224xf32>
    %224 = vector.extract_strided_slice %223 {offsets = [0, 0], sizes = [8, 64], strides = [1, 1]} : vector<8x224xf32> to vector<8x64xf32>
    %225 = vector.extract_strided_slice %223 {offsets = [0, 128], sizes = [8, 96], strides = [1, 1]} : vector<8x224xf32> to vector<8x96xf32>
    %226 = arith.addf %224, %195 : vector<8x64xf32>
    %cst_88 = arith.constant 0.000000e+00 : f32
    %227 = vector.broadcast %cst_88 : f32 to vector<8x64xf32>
    %228 = arith.maximumf %226, %227 : vector<8x64xf32>
    %c312_89 = arith.constant 312 : index
    %c0_90 = arith.constant 0 : index
    %229 = vector.load %arg4[%c312_89, %c0_90] : memref<576x384xf32, #tpu.memory_space<vmem>>, vector<64x4xf32>
    %cst_91 = arith.constant dense<0.000000e+00> : vector<8x4xf32>
    %230 = tpu.matmul %228, %229, %cst_91 {dimension_numbers = #tpu.dot_dimension_numbers<[1], [0], [0], [1], [0, 0, 1, 1], [], []>} : vector<8x64xf32>, vector<64x4xf32>, vector<8x4xf32> -> vector<8x4xf32>
    %c376_92 = arith.constant 376 : index
    %c0_93 = arith.constant 0 : index
    %231 = vector.load %arg4[%c376_92, %c0_93] : memref<576x384xf32, #tpu.memory_space<vmem>>, vector<1x4xf32>
    %232 = vector.broadcast %231 : vector<1x4xf32> to vector<8x4xf32>
    %233 = arith.addf %230, %232 : vector<8x4xf32>
    %234 = vector.extract_strided_slice %233 {offsets = [0, 0], sizes = [8, 2], strides = [1, 1]} : vector<8x4xf32> to vector<8x2xf32>
    %235 = vector.extract_strided_slice %233 {offsets = [0, 2], sizes = [8, 2], strides = [1, 1]} : vector<8x4xf32> to vector<8x2xf32>
    %236 = arith.addf %187, %225 : vector<8x96xf32>
    %c424_94 = arith.constant 424 : index
    %c0_95 = arith.constant 0 : index
    %237 = vector.load %arg4[%c424_94, %c0_95] : memref<576x384xf32, #tpu.memory_space<vmem>>, vector<32x96xf32>
    %cst_96 = arith.constant dense<0.000000e+00> : vector<8x96xf32>
    %238 = tpu.matmul %104, %237, %cst_96 {dimension_numbers = #tpu.dot_dimension_numbers<[1], [0], [0], [1], [0, 0, 1, 1], [], []>} : vector<8x32xf32>, vector<32x96xf32>, vector<8x96xf32> -> vector<8x96xf32>
    %c456_97 = arith.constant 456 : index
    %c0_98 = arith.constant 0 : index
    %239 = vector.load %arg4[%c456_97, %c0_98] : memref<576x384xf32, #tpu.memory_space<vmem>>, vector<1x96xf32>
    %240 = vector.broadcast %239 : vector<1x96xf32> to vector<8x96xf32>
    %241 = arith.addf %238, %240 : vector<8x96xf32>
    %242 = vector.extract_strided_slice %236 {offsets = [0, 0], sizes = [8, 32], strides = [1, 1]} : vector<8x96xf32> to vector<8x32xf32>
    %243 = vector.extract_strided_slice %241 {offsets = [0, 0], sizes = [8, 32], strides = [1, 1]} : vector<8x96xf32> to vector<8x32xf32>
    %244 = arith.addf %242, %243 : vector<8x32xf32>
    %245 = arith.negf %244 : vector<8x32xf32>
    %246 = math.exp %245 : vector<8x32xf32>
    %cst_99 = arith.constant 1.000000e+00 : f32
    %247 = vector.broadcast %cst_99 : f32 to vector<8x32xf32>
    %248 = arith.addf %247, %246 : vector<8x32xf32>
    %249 = arith.divf %247, %248 : vector<8x32xf32>
    %250 = vector.extract_strided_slice %236 {offsets = [0, 32], sizes = [8, 32], strides = [1, 1]} : vector<8x96xf32> to vector<8x32xf32>
    %251 = vector.extract_strided_slice %241 {offsets = [0, 32], sizes = [8, 32], strides = [1, 1]} : vector<8x96xf32> to vector<8x32xf32>
    %252 = arith.addf %250, %251 : vector<8x32xf32>
    %253 = arith.negf %252 : vector<8x32xf32>
    %254 = math.exp %253 : vector<8x32xf32>
    %cst_100 = arith.constant 1.000000e+00 : f32
    %255 = vector.broadcast %cst_100 : f32 to vector<8x32xf32>
    %256 = arith.addf %255, %254 : vector<8x32xf32>
    %257 = arith.divf %255, %256 : vector<8x32xf32>
    %258 = vector.extract_strided_slice %236 {offsets = [0, 64], sizes = [8, 32], strides = [1, 1]} : vector<8x96xf32> to vector<8x32xf32>
    %259 = vector.extract_strided_slice %241 {offsets = [0, 64], sizes = [8, 32], strides = [1, 1]} : vector<8x96xf32> to vector<8x32xf32>
    %260 = arith.mulf %249, %259 : vector<8x32xf32>
    %261 = arith.addf %258, %260 : vector<8x32xf32>
    %262 = math.tanh %261 : vector<8x32xf32>
    %cst_101 = arith.constant 1.000000e+00 : f32
    %263 = vector.broadcast %cst_101 : f32 to vector<8x32xf32>
    %264 = arith.subf %263, %257 : vector<8x32xf32>
    %265 = arith.mulf %264, %262 : vector<8x32xf32>
    %266 = arith.mulf %257, %104 : vector<8x32xf32>
    %267 = arith.addf %265, %266 : vector<8x32xf32>
    %c464_102 = arith.constant 464 : index
    %c0_103 = arith.constant 0 : index
    %268 = vector.load %arg4[%c464_102, %c0_103] : memref<576x384xf32, #tpu.memory_space<vmem>>, vector<32x96xf32>
    %cst_104 = arith.constant dense<0.000000e+00> : vector<8x96xf32>
    %269 = tpu.matmul %267, %268, %cst_104 {dimension_numbers = #tpu.dot_dimension_numbers<[1], [0], [0], [1], [0, 0, 1, 1], [], []>} : vector<8x32xf32>, vector<32x96xf32>, vector<8x96xf32> -> vector<8x96xf32>
    %c496_105 = arith.constant 496 : index
    %c0_106 = arith.constant 0 : index
    %270 = vector.load %arg4[%c496_105, %c0_106] : memref<576x384xf32, #tpu.memory_space<vmem>>, vector<1x96xf32>
    %271 = vector.broadcast %270 : vector<1x96xf32> to vector<8x96xf32>
    %272 = arith.addf %269, %271 : vector<8x96xf32>
    %273 = vector.extract_strided_slice %272 {offsets = [0, 0], sizes = [8, 32], strides = [1, 1]} : vector<8x96xf32> to vector<8x32xf32>
    %274 = vector.extract_strided_slice %194 {offsets = [0, 0], sizes = [8, 32], strides = [1, 1]} : vector<8x96xf32> to vector<8x32xf32>
    %275 = arith.addf %273, %274 : vector<8x32xf32>
    %276 = arith.negf %275 : vector<8x32xf32>
    %277 = math.exp %276 : vector<8x32xf32>
    %cst_107 = arith.constant 1.000000e+00 : f32
    %278 = vector.broadcast %cst_107 : f32 to vector<8x32xf32>
    %279 = arith.addf %278, %277 : vector<8x32xf32>
    %280 = arith.divf %278, %279 : vector<8x32xf32>
    %281 = vector.extract_strided_slice %272 {offsets = [0, 32], sizes = [8, 32], strides = [1, 1]} : vector<8x96xf32> to vector<8x32xf32>
    %282 = vector.extract_strided_slice %194 {offsets = [0, 32], sizes = [8, 32], strides = [1, 1]} : vector<8x96xf32> to vector<8x32xf32>
    %283 = arith.addf %281, %282 : vector<8x32xf32>
    %284 = arith.negf %283 : vector<8x32xf32>
    %285 = math.exp %284 : vector<8x32xf32>
    %cst_108 = arith.constant 1.000000e+00 : f32
    %286 = vector.broadcast %cst_108 : f32 to vector<8x32xf32>
    %287 = arith.addf %286, %285 : vector<8x32xf32>
    %288 = arith.divf %286, %287 : vector<8x32xf32>
    %289 = vector.extract_strided_slice %272 {offsets = [0, 64], sizes = [8, 32], strides = [1, 1]} : vector<8x96xf32> to vector<8x32xf32>
    %290 = vector.extract_strided_slice %194 {offsets = [0, 64], sizes = [8, 32], strides = [1, 1]} : vector<8x96xf32> to vector<8x32xf32>
    %291 = arith.mulf %280, %290 : vector<8x32xf32>
    %292 = arith.addf %289, %291 : vector<8x32xf32>
    %293 = math.tanh %292 : vector<8x32xf32>
    %cst_109 = arith.constant 1.000000e+00 : f32
    %294 = vector.broadcast %cst_109 : f32 to vector<8x32xf32>
    %295 = arith.subf %294, %288 : vector<8x32xf32>
    %296 = arith.mulf %295, %293 : vector<8x32xf32>
    %297 = arith.mulf %288, %150 : vector<8x32xf32>
    %298 = arith.addf %296, %297 : vector<8x32xf32>
    %299 = vector.extract_strided_slice %13 {offsets = [1, 0, 0], sizes = [1, 8, 8], strides = [1, 1, 1]} : vector<8x8x8xf32> to vector<1x8x8xf32>
    %300 = vector.shape_cast %299 : vector<1x8x8xf32> to vector<8x8xf32>
    %cst_110 = arith.constant dense<0.000000e+00> : vector<8x32xf32>
    %301 = tpu.matmul %300, %298, %cst_110 {dimension_numbers = #tpu.dot_dimension_numbers<[1], [0], [0], [1], [0, 0, 1, 1], [], []>} : vector<8x8xf32>, vector<8x32xf32>, vector<8x32xf32> -> vector<8x32xf32>
    %302 = vector.extract_strided_slice %17 {offsets = [1, 0, 0], sizes = [1, 8, 1], strides = [1, 1, 1]} : vector<8x8x1xf32> to vector<1x8x1xf32>
    %303 = vector.shape_cast %302 : vector<1x8x1xf32> to vector<8x1xf32>
    %304 = vector.broadcast %303 : vector<8x1xf32> to vector<8x32xf32>
    %305 = arith.mulf %301, %304 : vector<8x32xf32>
    %c504_111 = arith.constant 504 : index
    %c0_112 = arith.constant 0 : index
    %306 = vector.load %arg4[%c504_111, %c0_112] : memref<576x384xf32, #tpu.memory_space<vmem>>, vector<32x32xf32>
    %cst_113 = arith.constant dense<0.000000e+00> : vector<8x32xf32>
    %307 = tpu.matmul %298, %306, %cst_113 {dimension_numbers = #tpu.dot_dimension_numbers<[1], [0], [0], [1], [0, 0, 1, 1], [], []>} : vector<8x32xf32>, vector<32x32xf32>, vector<8x32xf32> -> vector<8x32xf32>
    %c536_114 = arith.constant 536 : index
    %c0_115 = arith.constant 0 : index
    %308 = vector.load %arg4[%c536_114, %c0_115] : memref<576x384xf32, #tpu.memory_space<vmem>>, vector<32x32xf32>
    %cst_116 = arith.constant dense<0.000000e+00> : vector<8x32xf32>
    %309 = tpu.matmul %305, %308, %cst_116 {dimension_numbers = #tpu.dot_dimension_numbers<[1], [0], [0], [1], [0, 0, 1, 1], [], []>} : vector<8x32xf32>, vector<32x32xf32>, vector<8x32xf32> -> vector<8x32xf32>
    %310 = arith.addf %307, %309 : vector<8x32xf32>
    %c568_117 = arith.constant 568 : index
    %c0_118 = arith.constant 0 : index
    %311 = vector.load %arg4[%c568_117, %c0_118] : memref<576x384xf32, #tpu.memory_space<vmem>>, vector<1x32xf32>
    %312 = vector.broadcast %311 : vector<1x32xf32> to vector<8x32xf32>
    %313 = arith.addf %310, %312 : vector<8x32xf32>
    %314 = arith.subf %207, %205 : vector<8x16xf32>
    %cst_119 = arith.constant dense<0.000000e+00> : vector<8xf32>
    %315 = vector.multi_reduction <add>, %314, %cst_119 [1] : vector<8x16xf32> to vector<8xf32>
    %316 = vector.shape_cast %315 : vector<8xf32> to vector<8x1xf32>
    %317 = arith.subf %205, %207 : vector<8x16xf32>
    %318 = math.exp %317 : vector<8x16xf32>
    %cst_120 = arith.constant dense<0.000000e+00> : vector<8xf32>
    %319 = vector.multi_reduction <add>, %318, %cst_120 [1] : vector<8x16xf32> to vector<8xf32>
    %320 = vector.shape_cast %319 : vector<8xf32> to vector<8x1xf32>
    %321 = arith.subf %204, %206 : vector<8x16xf32>
    %322 = arith.mulf %321, %321 : vector<8x16xf32>
    %323 = math.exp %207 : vector<8x16xf32>
    %324 = arith.divf %322, %323 : vector<8x16xf32>
    %cst_121 = arith.constant dense<0.000000e+00> : vector<8xf32>
    %325 = vector.multi_reduction <add>, %324, %cst_121 [1] : vector<8x16xf32> to vector<8xf32>
    %326 = vector.shape_cast %325 : vector<8xf32> to vector<8x1xf32>
    %cst_122 = arith.constant 1.600000e+01 : f32
    %327 = vector.broadcast %cst_122 : f32 to vector<8x1xf32>
    %328 = arith.subf %316, %327 : vector<8x1xf32>
    %329 = arith.addf %328, %320 : vector<8x1xf32>
    %330 = arith.addf %329, %326 : vector<8x1xf32>
    %cst_123 = arith.constant 5.000000e-01 : f32
    %331 = vector.broadcast %cst_123 : f32 to vector<8x1xf32>
    %332 = arith.mulf %331, %330 : vector<8x1xf32>
    %333 = arith.addf %170, %332 : vector<8x1xf32>
    %334 = arith.subf %185, %234 : vector<8x2xf32>
    %335 = arith.mulf %334, %334 : vector<8x2xf32>
    %336 = math.exp %235 : vector<8x2xf32>
    %337 = arith.divf %335, %336 : vector<8x2xf32>
    %cst_124 = arith.constant dense<0.000000e+00> : vector<8xf32>
    %338 = vector.multi_reduction <add>, %337, %cst_124 [1] : vector<8x2xf32> to vector<8xf32>
    %339 = vector.shape_cast %338 : vector<8xf32> to vector<8x1xf32>
    %cst_125 = arith.constant dense<0.000000e+00> : vector<8xf32>
    %340 = vector.multi_reduction <add>, %235, %cst_125 [1] : vector<8x2xf32> to vector<8xf32>
    %341 = vector.shape_cast %340 : vector<8xf32> to vector<8x1xf32>
    %cst_126 = arith.constant 3.67575407 : f32
    %342 = vector.broadcast %cst_126 : f32 to vector<8x1xf32>
    %343 = arith.addf %339, %342 : vector<8x1xf32>
    %344 = arith.addf %343, %341 : vector<8x1xf32>
    %cst_127 = arith.constant 5.000000e-01 : f32
    %345 = vector.broadcast %cst_127 : f32 to vector<8x1xf32>
    %346 = arith.mulf %345, %344 : vector<8x1xf32>
    %347 = arith.addf %184, %346 : vector<8x1xf32>
    %348 = vector.extract_strided_slice %0 {offsets = [16, 0], sizes = [8, 2], strides = [1, 1]} : vector<64x2xf32> to vector<8x2xf32>
    %349 = vector.extract_strided_slice %12 {offsets = [16, 0], sizes = [8, 128], strides = [1, 1]} : vector<64x224xf32> to vector<8x128xf32>
    %350 = vector.extract_strided_slice %12 {offsets = [16, 128], sizes = [8, 96], strides = [1, 1]} : vector<64x224xf32> to vector<8x96xf32>
    %c384_128 = arith.constant 384 : index
    %c0_129 = arith.constant 0 : index
    %351 = vector.load %arg4[%c384_128, %c0_129] : memref<576x384xf32, #tpu.memory_space<vmem>>, vector<32x320xf32>
    %cst_130 = arith.constant dense<0.000000e+00> : vector<8x320xf32>
    %352 = tpu.matmul %313, %351, %cst_130 {dimension_numbers = #tpu.dot_dimension_numbers<[1], [0], [0], [1], [0, 0, 1, 1], [], []>} : vector<8x32xf32>, vector<32x320xf32>, vector<8x320xf32> -> vector<8x320xf32>
    %c416_131 = arith.constant 416 : index
    %c0_132 = arith.constant 0 : index
    %353 = vector.load %arg4[%c416_131, %c0_132] : memref<576x384xf32, #tpu.memory_space<vmem>>, vector<1x320xf32>
    %354 = vector.broadcast %353 : vector<1x320xf32> to vector<8x320xf32>
    %355 = arith.addf %352, %354 : vector<8x320xf32>
    %356 = vector.extract_strided_slice %355 {offsets = [0, 0], sizes = [8, 128], strides = [1, 1]} : vector<8x320xf32> to vector<8x128xf32>
    %357 = vector.extract_strided_slice %355 {offsets = [0, 128], sizes = [8, 96], strides = [1, 1]} : vector<8x320xf32> to vector<8x96xf32>
    %358 = vector.extract_strided_slice %355 {offsets = [0, 256], sizes = [8, 64], strides = [1, 1]} : vector<8x320xf32> to vector<8x64xf32>
    %359 = arith.addf %349, %356 : vector<8x128xf32>
    %cst_133 = arith.constant 0.000000e+00 : f32
    %360 = vector.broadcast %cst_133 : f32 to vector<8x128xf32>
    %361 = arith.maximumf %359, %360 : vector<8x128xf32>
    %c88_134 = arith.constant 88 : index
    %c0_135 = arith.constant 0 : index
    %362 = vector.load %arg4[%c88_134, %c0_135] : memref<576x384xf32, #tpu.memory_space<vmem>>, vector<128x64xf32>
    %cst_136 = arith.constant dense<0.000000e+00> : vector<8x64xf32>
    %363 = tpu.matmul %361, %362, %cst_136 {dimension_numbers = #tpu.dot_dimension_numbers<[1], [0], [0], [1], [0, 0, 1, 1], [], []>} : vector<8x128xf32>, vector<128x64xf32>, vector<8x64xf32> -> vector<8x64xf32>
    %c216_137 = arith.constant 216 : index
    %c0_138 = arith.constant 0 : index
    %364 = vector.load %arg4[%c216_137, %c0_138] : memref<576x384xf32, #tpu.memory_space<vmem>>, vector<1x64xf32>
    %365 = vector.broadcast %364 : vector<1x64xf32> to vector<8x64xf32>
    %366 = arith.addf %363, %365 : vector<8x64xf32>
    %367 = vector.extract_strided_slice %366 {offsets = [0, 0], sizes = [8, 16], strides = [1, 1]} : vector<8x64xf32> to vector<8x16xf32>
    %368 = vector.extract_strided_slice %366 {offsets = [0, 16], sizes = [8, 16], strides = [1, 1]} : vector<8x64xf32> to vector<8x16xf32>
    %369 = vector.extract_strided_slice %366 {offsets = [0, 32], sizes = [8, 16], strides = [1, 1]} : vector<8x64xf32> to vector<8x16xf32>
    %370 = vector.extract_strided_slice %366 {offsets = [0, 48], sizes = [8, 16], strides = [1, 1]} : vector<8x64xf32> to vector<8x16xf32>
    %c2 = arith.constant 2 : index
    %c0_139 = arith.constant 0 : index
    %c0_140 = arith.constant 0 : index
    %371 = vector.load %arg3[%c2, %c0_139, %c0_140] : memref<8x8x16xf32, #tpu.memory_space<vmem>>, vector<1x8x16xf32>
    %372 = vector.shape_cast %371 : vector<1x8x16xf32> to vector<8x16xf32>
    %cst_141 = arith.constant 5.000000e-01 : f32
    %373 = vector.broadcast %cst_141 : f32 to vector<8x16xf32>
    %374 = arith.mulf %373, %368 : vector<8x16xf32>
    %375 = math.exp %374 : vector<8x16xf32>
    %376 = arith.mulf %372, %375 : vector<8x16xf32>
    %377 = arith.addf %376, %367 : vector<8x16xf32>
    %c224_142 = arith.constant 224 : index
    %c0_143 = arith.constant 0 : index
    %378 = vector.load %arg4[%c224_142, %c0_143] : memref<576x384xf32, #tpu.memory_space<vmem>>, vector<16x64xf32>
    %cst_144 = arith.constant dense<0.000000e+00> : vector<8x64xf32>
    %379 = tpu.matmul %377, %378, %cst_144 {dimension_numbers = #tpu.dot_dimension_numbers<[1], [0], [0], [1], [0, 0, 1, 1], [], []>} : vector<8x16xf32>, vector<16x64xf32>, vector<8x64xf32> -> vector<8x64xf32>
    %c240_145 = arith.constant 240 : index
    %c0_146 = arith.constant 0 : index
    %380 = vector.load %arg4[%c240_145, %c0_146] : memref<576x384xf32, #tpu.memory_space<vmem>>, vector<1x64xf32>
    %381 = vector.broadcast %380 : vector<1x64xf32> to vector<8x64xf32>
    %382 = arith.addf %379, %381 : vector<8x64xf32>
    %cst_147 = arith.constant 0.000000e+00 : f32
    %383 = vector.broadcast %cst_147 : f32 to vector<8x64xf32>
    %384 = arith.maximumf %382, %383 : vector<8x64xf32>
    %c248_148 = arith.constant 248 : index
    %c0_149 = arith.constant 0 : index
    %385 = vector.load %arg4[%c248_148, %c0_149] : memref<576x384xf32, #tpu.memory_space<vmem>>, vector<64x224xf32>
    %cst_150 = arith.constant dense<0.000000e+00> : vector<8x224xf32>
    %386 = tpu.matmul %384, %385, %cst_150 {dimension_numbers = #tpu.dot_dimension_numbers<[1], [0], [0], [1], [0, 0, 1, 1], [], []>} : vector<8x64xf32>, vector<64x224xf32>, vector<8x224xf32> -> vector<8x224xf32>
    %387 = vector.extract_strided_slice %386 {offsets = [0, 0], sizes = [8, 64], strides = [1, 1]} : vector<8x224xf32> to vector<8x64xf32>
    %388 = vector.extract_strided_slice %386 {offsets = [0, 128], sizes = [8, 96], strides = [1, 1]} : vector<8x224xf32> to vector<8x96xf32>
    %389 = arith.addf %387, %358 : vector<8x64xf32>
    %cst_151 = arith.constant 0.000000e+00 : f32
    %390 = vector.broadcast %cst_151 : f32 to vector<8x64xf32>
    %391 = arith.maximumf %389, %390 : vector<8x64xf32>
    %c312_152 = arith.constant 312 : index
    %c0_153 = arith.constant 0 : index
    %392 = vector.load %arg4[%c312_152, %c0_153] : memref<576x384xf32, #tpu.memory_space<vmem>>, vector<64x4xf32>
    %cst_154 = arith.constant dense<0.000000e+00> : vector<8x4xf32>
    %393 = tpu.matmul %391, %392, %cst_154 {dimension_numbers = #tpu.dot_dimension_numbers<[1], [0], [0], [1], [0, 0, 1, 1], [], []>} : vector<8x64xf32>, vector<64x4xf32>, vector<8x4xf32> -> vector<8x4xf32>
    %c376_155 = arith.constant 376 : index
    %c0_156 = arith.constant 0 : index
    %394 = vector.load %arg4[%c376_155, %c0_156] : memref<576x384xf32, #tpu.memory_space<vmem>>, vector<1x4xf32>
    %395 = vector.broadcast %394 : vector<1x4xf32> to vector<8x4xf32>
    %396 = arith.addf %393, %395 : vector<8x4xf32>
    %397 = vector.extract_strided_slice %396 {offsets = [0, 0], sizes = [8, 2], strides = [1, 1]} : vector<8x4xf32> to vector<8x2xf32>
    %398 = vector.extract_strided_slice %396 {offsets = [0, 2], sizes = [8, 2], strides = [1, 1]} : vector<8x4xf32> to vector<8x2xf32>
    %399 = arith.addf %350, %388 : vector<8x96xf32>
    %c424_157 = arith.constant 424 : index
    %c0_158 = arith.constant 0 : index
    %400 = vector.load %arg4[%c424_157, %c0_158] : memref<576x384xf32, #tpu.memory_space<vmem>>, vector<32x96xf32>
    %cst_159 = arith.constant dense<0.000000e+00> : vector<8x96xf32>
    %401 = tpu.matmul %267, %400, %cst_159 {dimension_numbers = #tpu.dot_dimension_numbers<[1], [0], [0], [1], [0, 0, 1, 1], [], []>} : vector<8x32xf32>, vector<32x96xf32>, vector<8x96xf32> -> vector<8x96xf32>
    %c456_160 = arith.constant 456 : index
    %c0_161 = arith.constant 0 : index
    %402 = vector.load %arg4[%c456_160, %c0_161] : memref<576x384xf32, #tpu.memory_space<vmem>>, vector<1x96xf32>
    %403 = vector.broadcast %402 : vector<1x96xf32> to vector<8x96xf32>
    %404 = arith.addf %401, %403 : vector<8x96xf32>
    %405 = vector.extract_strided_slice %399 {offsets = [0, 0], sizes = [8, 32], strides = [1, 1]} : vector<8x96xf32> to vector<8x32xf32>
    %406 = vector.extract_strided_slice %404 {offsets = [0, 0], sizes = [8, 32], strides = [1, 1]} : vector<8x96xf32> to vector<8x32xf32>
    %407 = arith.addf %405, %406 : vector<8x32xf32>
    %408 = arith.negf %407 : vector<8x32xf32>
    %409 = math.exp %408 : vector<8x32xf32>
    %cst_162 = arith.constant 1.000000e+00 : f32
    %410 = vector.broadcast %cst_162 : f32 to vector<8x32xf32>
    %411 = arith.addf %410, %409 : vector<8x32xf32>
    %412 = arith.divf %410, %411 : vector<8x32xf32>
    %413 = vector.extract_strided_slice %399 {offsets = [0, 32], sizes = [8, 32], strides = [1, 1]} : vector<8x96xf32> to vector<8x32xf32>
    %414 = vector.extract_strided_slice %404 {offsets = [0, 32], sizes = [8, 32], strides = [1, 1]} : vector<8x96xf32> to vector<8x32xf32>
    %415 = arith.addf %413, %414 : vector<8x32xf32>
    %416 = arith.negf %415 : vector<8x32xf32>
    %417 = math.exp %416 : vector<8x32xf32>
    %cst_163 = arith.constant 1.000000e+00 : f32
    %418 = vector.broadcast %cst_163 : f32 to vector<8x32xf32>
    %419 = arith.addf %418, %417 : vector<8x32xf32>
    %420 = arith.divf %418, %419 : vector<8x32xf32>
    %421 = vector.extract_strided_slice %399 {offsets = [0, 64], sizes = [8, 32], strides = [1, 1]} : vector<8x96xf32> to vector<8x32xf32>
    %422 = vector.extract_strided_slice %404 {offsets = [0, 64], sizes = [8, 32], strides = [1, 1]} : vector<8x96xf32> to vector<8x32xf32>
    %423 = arith.mulf %412, %422 : vector<8x32xf32>
    %424 = arith.addf %421, %423 : vector<8x32xf32>
    %425 = math.tanh %424 : vector<8x32xf32>
    %cst_164 = arith.constant 1.000000e+00 : f32
    %426 = vector.broadcast %cst_164 : f32 to vector<8x32xf32>
    %427 = arith.subf %426, %420 : vector<8x32xf32>
    %428 = arith.mulf %427, %425 : vector<8x32xf32>
    %429 = arith.mulf %420, %267 : vector<8x32xf32>
    %430 = arith.addf %428, %429 : vector<8x32xf32>
    %c464_165 = arith.constant 464 : index
    %c0_166 = arith.constant 0 : index
    %431 = vector.load %arg4[%c464_165, %c0_166] : memref<576x384xf32, #tpu.memory_space<vmem>>, vector<32x96xf32>
    %cst_167 = arith.constant dense<0.000000e+00> : vector<8x96xf32>
    %432 = tpu.matmul %430, %431, %cst_167 {dimension_numbers = #tpu.dot_dimension_numbers<[1], [0], [0], [1], [0, 0, 1, 1], [], []>} : vector<8x32xf32>, vector<32x96xf32>, vector<8x96xf32> -> vector<8x96xf32>
    %c496_168 = arith.constant 496 : index
    %c0_169 = arith.constant 0 : index
    %433 = vector.load %arg4[%c496_168, %c0_169] : memref<576x384xf32, #tpu.memory_space<vmem>>, vector<1x96xf32>
    %434 = vector.broadcast %433 : vector<1x96xf32> to vector<8x96xf32>
    %435 = arith.addf %432, %434 : vector<8x96xf32>
    %436 = vector.extract_strided_slice %435 {offsets = [0, 0], sizes = [8, 32], strides = [1, 1]} : vector<8x96xf32> to vector<8x32xf32>
    %437 = vector.extract_strided_slice %357 {offsets = [0, 0], sizes = [8, 32], strides = [1, 1]} : vector<8x96xf32> to vector<8x32xf32>
    %438 = arith.addf %436, %437 : vector<8x32xf32>
    %439 = arith.negf %438 : vector<8x32xf32>
    %440 = math.exp %439 : vector<8x32xf32>
    %cst_170 = arith.constant 1.000000e+00 : f32
    %441 = vector.broadcast %cst_170 : f32 to vector<8x32xf32>
    %442 = arith.addf %441, %440 : vector<8x32xf32>
    %443 = arith.divf %441, %442 : vector<8x32xf32>
    %444 = vector.extract_strided_slice %435 {offsets = [0, 32], sizes = [8, 32], strides = [1, 1]} : vector<8x96xf32> to vector<8x32xf32>
    %445 = vector.extract_strided_slice %357 {offsets = [0, 32], sizes = [8, 32], strides = [1, 1]} : vector<8x96xf32> to vector<8x32xf32>
    %446 = arith.addf %444, %445 : vector<8x32xf32>
    %447 = arith.negf %446 : vector<8x32xf32>
    %448 = math.exp %447 : vector<8x32xf32>
    %cst_171 = arith.constant 1.000000e+00 : f32
    %449 = vector.broadcast %cst_171 : f32 to vector<8x32xf32>
    %450 = arith.addf %449, %448 : vector<8x32xf32>
    %451 = arith.divf %449, %450 : vector<8x32xf32>
    %452 = vector.extract_strided_slice %435 {offsets = [0, 64], sizes = [8, 32], strides = [1, 1]} : vector<8x96xf32> to vector<8x32xf32>
    %453 = vector.extract_strided_slice %357 {offsets = [0, 64], sizes = [8, 32], strides = [1, 1]} : vector<8x96xf32> to vector<8x32xf32>
    %454 = arith.mulf %443, %453 : vector<8x32xf32>
    %455 = arith.addf %452, %454 : vector<8x32xf32>
    %456 = math.tanh %455 : vector<8x32xf32>
    %cst_172 = arith.constant 1.000000e+00 : f32
    %457 = vector.broadcast %cst_172 : f32 to vector<8x32xf32>
    %458 = arith.subf %457, %451 : vector<8x32xf32>
    %459 = arith.mulf %458, %456 : vector<8x32xf32>
    %460 = arith.mulf %451, %313 : vector<8x32xf32>
    %461 = arith.addf %459, %460 : vector<8x32xf32>
    %462 = vector.extract_strided_slice %13 {offsets = [2, 0, 0], sizes = [1, 8, 8], strides = [1, 1, 1]} : vector<8x8x8xf32> to vector<1x8x8xf32>
    %463 = vector.shape_cast %462 : vector<1x8x8xf32> to vector<8x8xf32>
    %cst_173 = arith.constant dense<0.000000e+00> : vector<8x32xf32>
    %464 = tpu.matmul %463, %461, %cst_173 {dimension_numbers = #tpu.dot_dimension_numbers<[1], [0], [0], [1], [0, 0, 1, 1], [], []>} : vector<8x8xf32>, vector<8x32xf32>, vector<8x32xf32> -> vector<8x32xf32>
    %465 = vector.extract_strided_slice %17 {offsets = [2, 0, 0], sizes = [1, 8, 1], strides = [1, 1, 1]} : vector<8x8x1xf32> to vector<1x8x1xf32>
    %466 = vector.shape_cast %465 : vector<1x8x1xf32> to vector<8x1xf32>
    %467 = vector.broadcast %466 : vector<8x1xf32> to vector<8x32xf32>
    %468 = arith.mulf %464, %467 : vector<8x32xf32>
    %c504_174 = arith.constant 504 : index
    %c0_175 = arith.constant 0 : index
    %469 = vector.load %arg4[%c504_174, %c0_175] : memref<576x384xf32, #tpu.memory_space<vmem>>, vector<32x32xf32>
    %cst_176 = arith.constant dense<0.000000e+00> : vector<8x32xf32>
    %470 = tpu.matmul %461, %469, %cst_176 {dimension_numbers = #tpu.dot_dimension_numbers<[1], [0], [0], [1], [0, 0, 1, 1], [], []>} : vector<8x32xf32>, vector<32x32xf32>, vector<8x32xf32> -> vector<8x32xf32>
    %c536_177 = arith.constant 536 : index
    %c0_178 = arith.constant 0 : index
    %471 = vector.load %arg4[%c536_177, %c0_178] : memref<576x384xf32, #tpu.memory_space<vmem>>, vector<32x32xf32>
    %cst_179 = arith.constant dense<0.000000e+00> : vector<8x32xf32>
    %472 = tpu.matmul %468, %471, %cst_179 {dimension_numbers = #tpu.dot_dimension_numbers<[1], [0], [0], [1], [0, 0, 1, 1], [], []>} : vector<8x32xf32>, vector<32x32xf32>, vector<8x32xf32> -> vector<8x32xf32>
    %473 = arith.addf %470, %472 : vector<8x32xf32>
    %c568_180 = arith.constant 568 : index
    %c0_181 = arith.constant 0 : index
    %474 = vector.load %arg4[%c568_180, %c0_181] : memref<576x384xf32, #tpu.memory_space<vmem>>, vector<1x32xf32>
    %475 = vector.broadcast %474 : vector<1x32xf32> to vector<8x32xf32>
    %476 = arith.addf %473, %475 : vector<8x32xf32>
    %477 = arith.subf %370, %368 : vector<8x16xf32>
    %cst_182 = arith.constant dense<0.000000e+00> : vector<8xf32>
    %478 = vector.multi_reduction <add>, %477, %cst_182 [1] : vector<8x16xf32> to vector<8xf32>
    %479 = vector.shape_cast %478 : vector<8xf32> to vector<8x1xf32>
    %480 = arith.subf %368, %370 : vector<8x16xf32>
    %481 = math.exp %480 : vector<8x16xf32>
    %cst_183 = arith.constant dense<0.000000e+00> : vector<8xf32>
    %482 = vector.multi_reduction <add>, %481, %cst_183 [1] : vector<8x16xf32> to vector<8xf32>
    %483 = vector.shape_cast %482 : vector<8xf32> to vector<8x1xf32>
    %484 = arith.subf %367, %369 : vector<8x16xf32>
    %485 = arith.mulf %484, %484 : vector<8x16xf32>
    %486 = math.exp %370 : vector<8x16xf32>
    %487 = arith.divf %485, %486 : vector<8x16xf32>
    %cst_184 = arith.constant dense<0.000000e+00> : vector<8xf32>
    %488 = vector.multi_reduction <add>, %487, %cst_184 [1] : vector<8x16xf32> to vector<8xf32>
    %489 = vector.shape_cast %488 : vector<8xf32> to vector<8x1xf32>
    %cst_185 = arith.constant 1.600000e+01 : f32
    %490 = vector.broadcast %cst_185 : f32 to vector<8x1xf32>
    %491 = arith.subf %479, %490 : vector<8x1xf32>
    %492 = arith.addf %491, %483 : vector<8x1xf32>
    %493 = arith.addf %492, %489 : vector<8x1xf32>
    %cst_186 = arith.constant 5.000000e-01 : f32
    %494 = vector.broadcast %cst_186 : f32 to vector<8x1xf32>
    %495 = arith.mulf %494, %493 : vector<8x1xf32>
    %496 = arith.addf %333, %495 : vector<8x1xf32>
    %497 = arith.subf %348, %397 : vector<8x2xf32>
    %498 = arith.mulf %497, %497 : vector<8x2xf32>
    %499 = math.exp %398 : vector<8x2xf32>
    %500 = arith.divf %498, %499 : vector<8x2xf32>
    %cst_187 = arith.constant dense<0.000000e+00> : vector<8xf32>
    %501 = vector.multi_reduction <add>, %500, %cst_187 [1] : vector<8x2xf32> to vector<8xf32>
    %502 = vector.shape_cast %501 : vector<8xf32> to vector<8x1xf32>
    %cst_188 = arith.constant dense<0.000000e+00> : vector<8xf32>
    %503 = vector.multi_reduction <add>, %398, %cst_188 [1] : vector<8x2xf32> to vector<8xf32>
    %504 = vector.shape_cast %503 : vector<8xf32> to vector<8x1xf32>
    %cst_189 = arith.constant 3.67575407 : f32
    %505 = vector.broadcast %cst_189 : f32 to vector<8x1xf32>
    %506 = arith.addf %502, %505 : vector<8x1xf32>
    %507 = arith.addf %506, %504 : vector<8x1xf32>
    %cst_190 = arith.constant 5.000000e-01 : f32
    %508 = vector.broadcast %cst_190 : f32 to vector<8x1xf32>
    %509 = arith.mulf %508, %507 : vector<8x1xf32>
    %510 = arith.addf %347, %509 : vector<8x1xf32>
    %511 = vector.extract_strided_slice %0 {offsets = [24, 0], sizes = [8, 2], strides = [1, 1]} : vector<64x2xf32> to vector<8x2xf32>
    %512 = vector.extract_strided_slice %12 {offsets = [24, 0], sizes = [8, 128], strides = [1, 1]} : vector<64x224xf32> to vector<8x128xf32>
    %513 = vector.extract_strided_slice %12 {offsets = [24, 128], sizes = [8, 96], strides = [1, 1]} : vector<64x224xf32> to vector<8x96xf32>
    %c384_191 = arith.constant 384 : index
    %c0_192 = arith.constant 0 : index
    %514 = vector.load %arg4[%c384_191, %c0_192] : memref<576x384xf32, #tpu.memory_space<vmem>>, vector<32x320xf32>
    %cst_193 = arith.constant dense<0.000000e+00> : vector<8x320xf32>
    %515 = tpu.matmul %476, %514, %cst_193 {dimension_numbers = #tpu.dot_dimension_numbers<[1], [0], [0], [1], [0, 0, 1, 1], [], []>} : vector<8x32xf32>, vector<32x320xf32>, vector<8x320xf32> -> vector<8x320xf32>
    %c416_194 = arith.constant 416 : index
    %c0_195 = arith.constant 0 : index
    %516 = vector.load %arg4[%c416_194, %c0_195] : memref<576x384xf32, #tpu.memory_space<vmem>>, vector<1x320xf32>
    %517 = vector.broadcast %516 : vector<1x320xf32> to vector<8x320xf32>
    %518 = arith.addf %515, %517 : vector<8x320xf32>
    %519 = vector.extract_strided_slice %518 {offsets = [0, 0], sizes = [8, 128], strides = [1, 1]} : vector<8x320xf32> to vector<8x128xf32>
    %520 = vector.extract_strided_slice %518 {offsets = [0, 128], sizes = [8, 96], strides = [1, 1]} : vector<8x320xf32> to vector<8x96xf32>
    %521 = vector.extract_strided_slice %518 {offsets = [0, 256], sizes = [8, 64], strides = [1, 1]} : vector<8x320xf32> to vector<8x64xf32>
    %522 = arith.addf %512, %519 : vector<8x128xf32>
    %cst_196 = arith.constant 0.000000e+00 : f32
    %523 = vector.broadcast %cst_196 : f32 to vector<8x128xf32>
    %524 = arith.maximumf %522, %523 : vector<8x128xf32>
    %c88_197 = arith.constant 88 : index
    %c0_198 = arith.constant 0 : index
    %525 = vector.load %arg4[%c88_197, %c0_198] : memref<576x384xf32, #tpu.memory_space<vmem>>, vector<128x64xf32>
    %cst_199 = arith.constant dense<0.000000e+00> : vector<8x64xf32>
    %526 = tpu.matmul %524, %525, %cst_199 {dimension_numbers = #tpu.dot_dimension_numbers<[1], [0], [0], [1], [0, 0, 1, 1], [], []>} : vector<8x128xf32>, vector<128x64xf32>, vector<8x64xf32> -> vector<8x64xf32>
    %c216_200 = arith.constant 216 : index
    %c0_201 = arith.constant 0 : index
    %527 = vector.load %arg4[%c216_200, %c0_201] : memref<576x384xf32, #tpu.memory_space<vmem>>, vector<1x64xf32>
    %528 = vector.broadcast %527 : vector<1x64xf32> to vector<8x64xf32>
    %529 = arith.addf %526, %528 : vector<8x64xf32>
    %530 = vector.extract_strided_slice %529 {offsets = [0, 0], sizes = [8, 16], strides = [1, 1]} : vector<8x64xf32> to vector<8x16xf32>
    %531 = vector.extract_strided_slice %529 {offsets = [0, 16], sizes = [8, 16], strides = [1, 1]} : vector<8x64xf32> to vector<8x16xf32>
    %532 = vector.extract_strided_slice %529 {offsets = [0, 32], sizes = [8, 16], strides = [1, 1]} : vector<8x64xf32> to vector<8x16xf32>
    %533 = vector.extract_strided_slice %529 {offsets = [0, 48], sizes = [8, 16], strides = [1, 1]} : vector<8x64xf32> to vector<8x16xf32>
    %c3 = arith.constant 3 : index
    %c0_202 = arith.constant 0 : index
    %c0_203 = arith.constant 0 : index
    %534 = vector.load %arg3[%c3, %c0_202, %c0_203] : memref<8x8x16xf32, #tpu.memory_space<vmem>>, vector<1x8x16xf32>
    %535 = vector.shape_cast %534 : vector<1x8x16xf32> to vector<8x16xf32>
    %cst_204 = arith.constant 5.000000e-01 : f32
    %536 = vector.broadcast %cst_204 : f32 to vector<8x16xf32>
    %537 = arith.mulf %536, %531 : vector<8x16xf32>
    %538 = math.exp %537 : vector<8x16xf32>
    %539 = arith.mulf %535, %538 : vector<8x16xf32>
    %540 = arith.addf %539, %530 : vector<8x16xf32>
    %c224_205 = arith.constant 224 : index
    %c0_206 = arith.constant 0 : index
    %541 = vector.load %arg4[%c224_205, %c0_206] : memref<576x384xf32, #tpu.memory_space<vmem>>, vector<16x64xf32>
    %cst_207 = arith.constant dense<0.000000e+00> : vector<8x64xf32>
    %542 = tpu.matmul %540, %541, %cst_207 {dimension_numbers = #tpu.dot_dimension_numbers<[1], [0], [0], [1], [0, 0, 1, 1], [], []>} : vector<8x16xf32>, vector<16x64xf32>, vector<8x64xf32> -> vector<8x64xf32>
    %c240_208 = arith.constant 240 : index
    %c0_209 = arith.constant 0 : index
    %543 = vector.load %arg4[%c240_208, %c0_209] : memref<576x384xf32, #tpu.memory_space<vmem>>, vector<1x64xf32>
    %544 = vector.broadcast %543 : vector<1x64xf32> to vector<8x64xf32>
    %545 = arith.addf %542, %544 : vector<8x64xf32>
    %cst_210 = arith.constant 0.000000e+00 : f32
    %546 = vector.broadcast %cst_210 : f32 to vector<8x64xf32>
    %547 = arith.maximumf %545, %546 : vector<8x64xf32>
    %c248_211 = arith.constant 248 : index
    %c0_212 = arith.constant 0 : index
    %548 = vector.load %arg4[%c248_211, %c0_212] : memref<576x384xf32, #tpu.memory_space<vmem>>, vector<64x224xf32>
    %cst_213 = arith.constant dense<0.000000e+00> : vector<8x224xf32>
    %549 = tpu.matmul %547, %548, %cst_213 {dimension_numbers = #tpu.dot_dimension_numbers<[1], [0], [0], [1], [0, 0, 1, 1], [], []>} : vector<8x64xf32>, vector<64x224xf32>, vector<8x224xf32> -> vector<8x224xf32>
    %550 = vector.extract_strided_slice %549 {offsets = [0, 0], sizes = [8, 64], strides = [1, 1]} : vector<8x224xf32> to vector<8x64xf32>
    %551 = vector.extract_strided_slice %549 {offsets = [0, 128], sizes = [8, 96], strides = [1, 1]} : vector<8x224xf32> to vector<8x96xf32>
    %552 = arith.addf %550, %521 : vector<8x64xf32>
    %cst_214 = arith.constant 0.000000e+00 : f32
    %553 = vector.broadcast %cst_214 : f32 to vector<8x64xf32>
    %554 = arith.maximumf %552, %553 : vector<8x64xf32>
    %c312_215 = arith.constant 312 : index
    %c0_216 = arith.constant 0 : index
    %555 = vector.load %arg4[%c312_215, %c0_216] : memref<576x384xf32, #tpu.memory_space<vmem>>, vector<64x4xf32>
    %cst_217 = arith.constant dense<0.000000e+00> : vector<8x4xf32>
    %556 = tpu.matmul %554, %555, %cst_217 {dimension_numbers = #tpu.dot_dimension_numbers<[1], [0], [0], [1], [0, 0, 1, 1], [], []>} : vector<8x64xf32>, vector<64x4xf32>, vector<8x4xf32> -> vector<8x4xf32>
    %c376_218 = arith.constant 376 : index
    %c0_219 = arith.constant 0 : index
    %557 = vector.load %arg4[%c376_218, %c0_219] : memref<576x384xf32, #tpu.memory_space<vmem>>, vector<1x4xf32>
    %558 = vector.broadcast %557 : vector<1x4xf32> to vector<8x4xf32>
    %559 = arith.addf %556, %558 : vector<8x4xf32>
    %560 = vector.extract_strided_slice %559 {offsets = [0, 0], sizes = [8, 2], strides = [1, 1]} : vector<8x4xf32> to vector<8x2xf32>
    %561 = vector.extract_strided_slice %559 {offsets = [0, 2], sizes = [8, 2], strides = [1, 1]} : vector<8x4xf32> to vector<8x2xf32>
    %562 = arith.addf %513, %551 : vector<8x96xf32>
    %c424_220 = arith.constant 424 : index
    %c0_221 = arith.constant 0 : index
    %563 = vector.load %arg4[%c424_220, %c0_221] : memref<576x384xf32, #tpu.memory_space<vmem>>, vector<32x96xf32>
    %cst_222 = arith.constant dense<0.000000e+00> : vector<8x96xf32>
    %564 = tpu.matmul %430, %563, %cst_222 {dimension_numbers = #tpu.dot_dimension_numbers<[1], [0], [0], [1], [0, 0, 1, 1], [], []>} : vector<8x32xf32>, vector<32x96xf32>, vector<8x96xf32> -> vector<8x96xf32>
    %c456_223 = arith.constant 456 : index
    %c0_224 = arith.constant 0 : index
    %565 = vector.load %arg4[%c456_223, %c0_224] : memref<576x384xf32, #tpu.memory_space<vmem>>, vector<1x96xf32>
    %566 = vector.broadcast %565 : vector<1x96xf32> to vector<8x96xf32>
    %567 = arith.addf %564, %566 : vector<8x96xf32>
    %568 = vector.extract_strided_slice %562 {offsets = [0, 0], sizes = [8, 32], strides = [1, 1]} : vector<8x96xf32> to vector<8x32xf32>
    %569 = vector.extract_strided_slice %567 {offsets = [0, 0], sizes = [8, 32], strides = [1, 1]} : vector<8x96xf32> to vector<8x32xf32>
    %570 = arith.addf %568, %569 : vector<8x32xf32>
    %571 = arith.negf %570 : vector<8x32xf32>
    %572 = math.exp %571 : vector<8x32xf32>
    %cst_225 = arith.constant 1.000000e+00 : f32
    %573 = vector.broadcast %cst_225 : f32 to vector<8x32xf32>
    %574 = arith.addf %573, %572 : vector<8x32xf32>
    %575 = arith.divf %573, %574 : vector<8x32xf32>
    %576 = vector.extract_strided_slice %562 {offsets = [0, 32], sizes = [8, 32], strides = [1, 1]} : vector<8x96xf32> to vector<8x32xf32>
    %577 = vector.extract_strided_slice %567 {offsets = [0, 32], sizes = [8, 32], strides = [1, 1]} : vector<8x96xf32> to vector<8x32xf32>
    %578 = arith.addf %576, %577 : vector<8x32xf32>
    %579 = arith.negf %578 : vector<8x32xf32>
    %580 = math.exp %579 : vector<8x32xf32>
    %cst_226 = arith.constant 1.000000e+00 : f32
    %581 = vector.broadcast %cst_226 : f32 to vector<8x32xf32>
    %582 = arith.addf %581, %580 : vector<8x32xf32>
    %583 = arith.divf %581, %582 : vector<8x32xf32>
    %584 = vector.extract_strided_slice %562 {offsets = [0, 64], sizes = [8, 32], strides = [1, 1]} : vector<8x96xf32> to vector<8x32xf32>
    %585 = vector.extract_strided_slice %567 {offsets = [0, 64], sizes = [8, 32], strides = [1, 1]} : vector<8x96xf32> to vector<8x32xf32>
    %586 = arith.mulf %575, %585 : vector<8x32xf32>
    %587 = arith.addf %584, %586 : vector<8x32xf32>
    %588 = math.tanh %587 : vector<8x32xf32>
    %cst_227 = arith.constant 1.000000e+00 : f32
    %589 = vector.broadcast %cst_227 : f32 to vector<8x32xf32>
    %590 = arith.subf %589, %583 : vector<8x32xf32>
    %591 = arith.mulf %590, %588 : vector<8x32xf32>
    %592 = arith.mulf %583, %430 : vector<8x32xf32>
    %593 = arith.addf %591, %592 : vector<8x32xf32>
    %c464_228 = arith.constant 464 : index
    %c0_229 = arith.constant 0 : index
    %594 = vector.load %arg4[%c464_228, %c0_229] : memref<576x384xf32, #tpu.memory_space<vmem>>, vector<32x96xf32>
    %cst_230 = arith.constant dense<0.000000e+00> : vector<8x96xf32>
    %595 = tpu.matmul %593, %594, %cst_230 {dimension_numbers = #tpu.dot_dimension_numbers<[1], [0], [0], [1], [0, 0, 1, 1], [], []>} : vector<8x32xf32>, vector<32x96xf32>, vector<8x96xf32> -> vector<8x96xf32>
    %c496_231 = arith.constant 496 : index
    %c0_232 = arith.constant 0 : index
    %596 = vector.load %arg4[%c496_231, %c0_232] : memref<576x384xf32, #tpu.memory_space<vmem>>, vector<1x96xf32>
    %597 = vector.broadcast %596 : vector<1x96xf32> to vector<8x96xf32>
    %598 = arith.addf %595, %597 : vector<8x96xf32>
    %599 = vector.extract_strided_slice %598 {offsets = [0, 0], sizes = [8, 32], strides = [1, 1]} : vector<8x96xf32> to vector<8x32xf32>
    %600 = vector.extract_strided_slice %520 {offsets = [0, 0], sizes = [8, 32], strides = [1, 1]} : vector<8x96xf32> to vector<8x32xf32>
    %601 = arith.addf %599, %600 : vector<8x32xf32>
    %602 = arith.negf %601 : vector<8x32xf32>
    %603 = math.exp %602 : vector<8x32xf32>
    %cst_233 = arith.constant 1.000000e+00 : f32
    %604 = vector.broadcast %cst_233 : f32 to vector<8x32xf32>
    %605 = arith.addf %604, %603 : vector<8x32xf32>
    %606 = arith.divf %604, %605 : vector<8x32xf32>
    %607 = vector.extract_strided_slice %598 {offsets = [0, 32], sizes = [8, 32], strides = [1, 1]} : vector<8x96xf32> to vector<8x32xf32>
    %608 = vector.extract_strided_slice %520 {offsets = [0, 32], sizes = [8, 32], strides = [1, 1]} : vector<8x96xf32> to vector<8x32xf32>
    %609 = arith.addf %607, %608 : vector<8x32xf32>
    %610 = arith.negf %609 : vector<8x32xf32>
    %611 = math.exp %610 : vector<8x32xf32>
    %cst_234 = arith.constant 1.000000e+00 : f32
    %612 = vector.broadcast %cst_234 : f32 to vector<8x32xf32>
    %613 = arith.addf %612, %611 : vector<8x32xf32>
    %614 = arith.divf %612, %613 : vector<8x32xf32>
    %615 = vector.extract_strided_slice %598 {offsets = [0, 64], sizes = [8, 32], strides = [1, 1]} : vector<8x96xf32> to vector<8x32xf32>
    %616 = vector.extract_strided_slice %520 {offsets = [0, 64], sizes = [8, 32], strides = [1, 1]} : vector<8x96xf32> to vector<8x32xf32>
    %617 = arith.mulf %606, %616 : vector<8x32xf32>
    %618 = arith.addf %615, %617 : vector<8x32xf32>
    %619 = math.tanh %618 : vector<8x32xf32>
    %cst_235 = arith.constant 1.000000e+00 : f32
    %620 = vector.broadcast %cst_235 : f32 to vector<8x32xf32>
    %621 = arith.subf %620, %614 : vector<8x32xf32>
    %622 = arith.mulf %621, %619 : vector<8x32xf32>
    %623 = arith.mulf %614, %476 : vector<8x32xf32>
    %624 = arith.addf %622, %623 : vector<8x32xf32>
    %625 = vector.extract_strided_slice %13 {offsets = [3, 0, 0], sizes = [1, 8, 8], strides = [1, 1, 1]} : vector<8x8x8xf32> to vector<1x8x8xf32>
    %626 = vector.shape_cast %625 : vector<1x8x8xf32> to vector<8x8xf32>
    %cst_236 = arith.constant dense<0.000000e+00> : vector<8x32xf32>
    %627 = tpu.matmul %626, %624, %cst_236 {dimension_numbers = #tpu.dot_dimension_numbers<[1], [0], [0], [1], [0, 0, 1, 1], [], []>} : vector<8x8xf32>, vector<8x32xf32>, vector<8x32xf32> -> vector<8x32xf32>
    %628 = vector.extract_strided_slice %17 {offsets = [3, 0, 0], sizes = [1, 8, 1], strides = [1, 1, 1]} : vector<8x8x1xf32> to vector<1x8x1xf32>
    %629 = vector.shape_cast %628 : vector<1x8x1xf32> to vector<8x1xf32>
    %630 = vector.broadcast %629 : vector<8x1xf32> to vector<8x32xf32>
    %631 = arith.mulf %627, %630 : vector<8x32xf32>
    %c504_237 = arith.constant 504 : index
    %c0_238 = arith.constant 0 : index
    %632 = vector.load %arg4[%c504_237, %c0_238] : memref<576x384xf32, #tpu.memory_space<vmem>>, vector<32x32xf32>
    %cst_239 = arith.constant dense<0.000000e+00> : vector<8x32xf32>
    %633 = tpu.matmul %624, %632, %cst_239 {dimension_numbers = #tpu.dot_dimension_numbers<[1], [0], [0], [1], [0, 0, 1, 1], [], []>} : vector<8x32xf32>, vector<32x32xf32>, vector<8x32xf32> -> vector<8x32xf32>
    %c536_240 = arith.constant 536 : index
    %c0_241 = arith.constant 0 : index
    %634 = vector.load %arg4[%c536_240, %c0_241] : memref<576x384xf32, #tpu.memory_space<vmem>>, vector<32x32xf32>
    %cst_242 = arith.constant dense<0.000000e+00> : vector<8x32xf32>
    %635 = tpu.matmul %631, %634, %cst_242 {dimension_numbers = #tpu.dot_dimension_numbers<[1], [0], [0], [1], [0, 0, 1, 1], [], []>} : vector<8x32xf32>, vector<32x32xf32>, vector<8x32xf32> -> vector<8x32xf32>
    %636 = arith.addf %633, %635 : vector<8x32xf32>
    %c568_243 = arith.constant 568 : index
    %c0_244 = arith.constant 0 : index
    %637 = vector.load %arg4[%c568_243, %c0_244] : memref<576x384xf32, #tpu.memory_space<vmem>>, vector<1x32xf32>
    %638 = vector.broadcast %637 : vector<1x32xf32> to vector<8x32xf32>
    %639 = arith.addf %636, %638 : vector<8x32xf32>
    %640 = arith.subf %533, %531 : vector<8x16xf32>
    %cst_245 = arith.constant dense<0.000000e+00> : vector<8xf32>
    %641 = vector.multi_reduction <add>, %640, %cst_245 [1] : vector<8x16xf32> to vector<8xf32>
    %642 = vector.shape_cast %641 : vector<8xf32> to vector<8x1xf32>
    %643 = arith.subf %531, %533 : vector<8x16xf32>
    %644 = math.exp %643 : vector<8x16xf32>
    %cst_246 = arith.constant dense<0.000000e+00> : vector<8xf32>
    %645 = vector.multi_reduction <add>, %644, %cst_246 [1] : vector<8x16xf32> to vector<8xf32>
    %646 = vector.shape_cast %645 : vector<8xf32> to vector<8x1xf32>
    %647 = arith.subf %530, %532 : vector<8x16xf32>
    %648 = arith.mulf %647, %647 : vector<8x16xf32>
    %649 = math.exp %533 : vector<8x16xf32>
    %650 = arith.divf %648, %649 : vector<8x16xf32>
    %cst_247 = arith.constant dense<0.000000e+00> : vector<8xf32>
    %651 = vector.multi_reduction <add>, %650, %cst_247 [1] : vector<8x16xf32> to vector<8xf32>
    %652 = vector.shape_cast %651 : vector<8xf32> to vector<8x1xf32>
    %cst_248 = arith.constant 1.600000e+01 : f32
    %653 = vector.broadcast %cst_248 : f32 to vector<8x1xf32>
    %654 = arith.subf %642, %653 : vector<8x1xf32>
    %655 = arith.addf %654, %646 : vector<8x1xf32>
    %656 = arith.addf %655, %652 : vector<8x1xf32>
    %cst_249 = arith.constant 5.000000e-01 : f32
    %657 = vector.broadcast %cst_249 : f32 to vector<8x1xf32>
    %658 = arith.mulf %657, %656 : vector<8x1xf32>
    %659 = arith.addf %496, %658 : vector<8x1xf32>
    %660 = arith.subf %511, %560 : vector<8x2xf32>
    %661 = arith.mulf %660, %660 : vector<8x2xf32>
    %662 = math.exp %561 : vector<8x2xf32>
    %663 = arith.divf %661, %662 : vector<8x2xf32>
    %cst_250 = arith.constant dense<0.000000e+00> : vector<8xf32>
    %664 = vector.multi_reduction <add>, %663, %cst_250 [1] : vector<8x2xf32> to vector<8xf32>
    %665 = vector.shape_cast %664 : vector<8xf32> to vector<8x1xf32>
    %cst_251 = arith.constant dense<0.000000e+00> : vector<8xf32>
    %666 = vector.multi_reduction <add>, %561, %cst_251 [1] : vector<8x2xf32> to vector<8xf32>
    %667 = vector.shape_cast %666 : vector<8xf32> to vector<8x1xf32>
    %cst_252 = arith.constant 3.67575407 : f32
    %668 = vector.broadcast %cst_252 : f32 to vector<8x1xf32>
    %669 = arith.addf %665, %668 : vector<8x1xf32>
    %670 = arith.addf %669, %667 : vector<8x1xf32>
    %cst_253 = arith.constant 5.000000e-01 : f32
    %671 = vector.broadcast %cst_253 : f32 to vector<8x1xf32>
    %672 = arith.mulf %671, %670 : vector<8x1xf32>
    %673 = arith.addf %510, %672 : vector<8x1xf32>
    %674 = vector.extract_strided_slice %0 {offsets = [32, 0], sizes = [8, 2], strides = [1, 1]} : vector<64x2xf32> to vector<8x2xf32>
    %675 = vector.extract_strided_slice %12 {offsets = [32, 0], sizes = [8, 128], strides = [1, 1]} : vector<64x224xf32> to vector<8x128xf32>
    %676 = vector.extract_strided_slice %12 {offsets = [32, 128], sizes = [8, 96], strides = [1, 1]} : vector<64x224xf32> to vector<8x96xf32>
    %c384_254 = arith.constant 384 : index
    %c0_255 = arith.constant 0 : index
    %677 = vector.load %arg4[%c384_254, %c0_255] : memref<576x384xf32, #tpu.memory_space<vmem>>, vector<32x320xf32>
    %cst_256 = arith.constant dense<0.000000e+00> : vector<8x320xf32>
    %678 = tpu.matmul %639, %677, %cst_256 {dimension_numbers = #tpu.dot_dimension_numbers<[1], [0], [0], [1], [0, 0, 1, 1], [], []>} : vector<8x32xf32>, vector<32x320xf32>, vector<8x320xf32> -> vector<8x320xf32>
    %c416_257 = arith.constant 416 : index
    %c0_258 = arith.constant 0 : index
    %679 = vector.load %arg4[%c416_257, %c0_258] : memref<576x384xf32, #tpu.memory_space<vmem>>, vector<1x320xf32>
    %680 = vector.broadcast %679 : vector<1x320xf32> to vector<8x320xf32>
    %681 = arith.addf %678, %680 : vector<8x320xf32>
    %682 = vector.extract_strided_slice %681 {offsets = [0, 0], sizes = [8, 128], strides = [1, 1]} : vector<8x320xf32> to vector<8x128xf32>
    %683 = vector.extract_strided_slice %681 {offsets = [0, 128], sizes = [8, 96], strides = [1, 1]} : vector<8x320xf32> to vector<8x96xf32>
    %684 = vector.extract_strided_slice %681 {offsets = [0, 256], sizes = [8, 64], strides = [1, 1]} : vector<8x320xf32> to vector<8x64xf32>
    %685 = arith.addf %675, %682 : vector<8x128xf32>
    %cst_259 = arith.constant 0.000000e+00 : f32
    %686 = vector.broadcast %cst_259 : f32 to vector<8x128xf32>
    %687 = arith.maximumf %685, %686 : vector<8x128xf32>
    %c88_260 = arith.constant 88 : index
    %c0_261 = arith.constant 0 : index
    %688 = vector.load %arg4[%c88_260, %c0_261] : memref<576x384xf32, #tpu.memory_space<vmem>>, vector<128x64xf32>
    %cst_262 = arith.constant dense<0.000000e+00> : vector<8x64xf32>
    %689 = tpu.matmul %687, %688, %cst_262 {dimension_numbers = #tpu.dot_dimension_numbers<[1], [0], [0], [1], [0, 0, 1, 1], [], []>} : vector<8x128xf32>, vector<128x64xf32>, vector<8x64xf32> -> vector<8x64xf32>
    %c216_263 = arith.constant 216 : index
    %c0_264 = arith.constant 0 : index
    %690 = vector.load %arg4[%c216_263, %c0_264] : memref<576x384xf32, #tpu.memory_space<vmem>>, vector<1x64xf32>
    %691 = vector.broadcast %690 : vector<1x64xf32> to vector<8x64xf32>
    %692 = arith.addf %689, %691 : vector<8x64xf32>
    %693 = vector.extract_strided_slice %692 {offsets = [0, 0], sizes = [8, 16], strides = [1, 1]} : vector<8x64xf32> to vector<8x16xf32>
    %694 = vector.extract_strided_slice %692 {offsets = [0, 16], sizes = [8, 16], strides = [1, 1]} : vector<8x64xf32> to vector<8x16xf32>
    %695 = vector.extract_strided_slice %692 {offsets = [0, 32], sizes = [8, 16], strides = [1, 1]} : vector<8x64xf32> to vector<8x16xf32>
    %696 = vector.extract_strided_slice %692 {offsets = [0, 48], sizes = [8, 16], strides = [1, 1]} : vector<8x64xf32> to vector<8x16xf32>
    %c4 = arith.constant 4 : index
    %c0_265 = arith.constant 0 : index
    %c0_266 = arith.constant 0 : index
    %697 = vector.load %arg3[%c4, %c0_265, %c0_266] : memref<8x8x16xf32, #tpu.memory_space<vmem>>, vector<1x8x16xf32>
    %698 = vector.shape_cast %697 : vector<1x8x16xf32> to vector<8x16xf32>
    %cst_267 = arith.constant 5.000000e-01 : f32
    %699 = vector.broadcast %cst_267 : f32 to vector<8x16xf32>
    %700 = arith.mulf %699, %694 : vector<8x16xf32>
    %701 = math.exp %700 : vector<8x16xf32>
    %702 = arith.mulf %698, %701 : vector<8x16xf32>
    %703 = arith.addf %702, %693 : vector<8x16xf32>
    %c224_268 = arith.constant 224 : index
    %c0_269 = arith.constant 0 : index
    %704 = vector.load %arg4[%c224_268, %c0_269] : memref<576x384xf32, #tpu.memory_space<vmem>>, vector<16x64xf32>
    %cst_270 = arith.constant dense<0.000000e+00> : vector<8x64xf32>
    %705 = tpu.matmul %703, %704, %cst_270 {dimension_numbers = #tpu.dot_dimension_numbers<[1], [0], [0], [1], [0, 0, 1, 1], [], []>} : vector<8x16xf32>, vector<16x64xf32>, vector<8x64xf32> -> vector<8x64xf32>
    %c240_271 = arith.constant 240 : index
    %c0_272 = arith.constant 0 : index
    %706 = vector.load %arg4[%c240_271, %c0_272] : memref<576x384xf32, #tpu.memory_space<vmem>>, vector<1x64xf32>
    %707 = vector.broadcast %706 : vector<1x64xf32> to vector<8x64xf32>
    %708 = arith.addf %705, %707 : vector<8x64xf32>
    %cst_273 = arith.constant 0.000000e+00 : f32
    %709 = vector.broadcast %cst_273 : f32 to vector<8x64xf32>
    %710 = arith.maximumf %708, %709 : vector<8x64xf32>
    %c248_274 = arith.constant 248 : index
    %c0_275 = arith.constant 0 : index
    %711 = vector.load %arg4[%c248_274, %c0_275] : memref<576x384xf32, #tpu.memory_space<vmem>>, vector<64x224xf32>
    %cst_276 = arith.constant dense<0.000000e+00> : vector<8x224xf32>
    %712 = tpu.matmul %710, %711, %cst_276 {dimension_numbers = #tpu.dot_dimension_numbers<[1], [0], [0], [1], [0, 0, 1, 1], [], []>} : vector<8x64xf32>, vector<64x224xf32>, vector<8x224xf32> -> vector<8x224xf32>
    %713 = vector.extract_strided_slice %712 {offsets = [0, 0], sizes = [8, 64], strides = [1, 1]} : vector<8x224xf32> to vector<8x64xf32>
    %714 = vector.extract_strided_slice %712 {offsets = [0, 128], sizes = [8, 96], strides = [1, 1]} : vector<8x224xf32> to vector<8x96xf32>
    %715 = arith.addf %713, %684 : vector<8x64xf32>
    %cst_277 = arith.constant 0.000000e+00 : f32
    %716 = vector.broadcast %cst_277 : f32 to vector<8x64xf32>
    %717 = arith.maximumf %715, %716 : vector<8x64xf32>
    %c312_278 = arith.constant 312 : index
    %c0_279 = arith.constant 0 : index
    %718 = vector.load %arg4[%c312_278, %c0_279] : memref<576x384xf32, #tpu.memory_space<vmem>>, vector<64x4xf32>
    %cst_280 = arith.constant dense<0.000000e+00> : vector<8x4xf32>
    %719 = tpu.matmul %717, %718, %cst_280 {dimension_numbers = #tpu.dot_dimension_numbers<[1], [0], [0], [1], [0, 0, 1, 1], [], []>} : vector<8x64xf32>, vector<64x4xf32>, vector<8x4xf32> -> vector<8x4xf32>
    %c376_281 = arith.constant 376 : index
    %c0_282 = arith.constant 0 : index
    %720 = vector.load %arg4[%c376_281, %c0_282] : memref<576x384xf32, #tpu.memory_space<vmem>>, vector<1x4xf32>
    %721 = vector.broadcast %720 : vector<1x4xf32> to vector<8x4xf32>
    %722 = arith.addf %719, %721 : vector<8x4xf32>
    %723 = vector.extract_strided_slice %722 {offsets = [0, 0], sizes = [8, 2], strides = [1, 1]} : vector<8x4xf32> to vector<8x2xf32>
    %724 = vector.extract_strided_slice %722 {offsets = [0, 2], sizes = [8, 2], strides = [1, 1]} : vector<8x4xf32> to vector<8x2xf32>
    %725 = arith.addf %676, %714 : vector<8x96xf32>
    %c424_283 = arith.constant 424 : index
    %c0_284 = arith.constant 0 : index
    %726 = vector.load %arg4[%c424_283, %c0_284] : memref<576x384xf32, #tpu.memory_space<vmem>>, vector<32x96xf32>
    %cst_285 = arith.constant dense<0.000000e+00> : vector<8x96xf32>
    %727 = tpu.matmul %593, %726, %cst_285 {dimension_numbers = #tpu.dot_dimension_numbers<[1], [0], [0], [1], [0, 0, 1, 1], [], []>} : vector<8x32xf32>, vector<32x96xf32>, vector<8x96xf32> -> vector<8x96xf32>
    %c456_286 = arith.constant 456 : index
    %c0_287 = arith.constant 0 : index
    %728 = vector.load %arg4[%c456_286, %c0_287] : memref<576x384xf32, #tpu.memory_space<vmem>>, vector<1x96xf32>
    %729 = vector.broadcast %728 : vector<1x96xf32> to vector<8x96xf32>
    %730 = arith.addf %727, %729 : vector<8x96xf32>
    %731 = vector.extract_strided_slice %725 {offsets = [0, 0], sizes = [8, 32], strides = [1, 1]} : vector<8x96xf32> to vector<8x32xf32>
    %732 = vector.extract_strided_slice %730 {offsets = [0, 0], sizes = [8, 32], strides = [1, 1]} : vector<8x96xf32> to vector<8x32xf32>
    %733 = arith.addf %731, %732 : vector<8x32xf32>
    %734 = arith.negf %733 : vector<8x32xf32>
    %735 = math.exp %734 : vector<8x32xf32>
    %cst_288 = arith.constant 1.000000e+00 : f32
    %736 = vector.broadcast %cst_288 : f32 to vector<8x32xf32>
    %737 = arith.addf %736, %735 : vector<8x32xf32>
    %738 = arith.divf %736, %737 : vector<8x32xf32>
    %739 = vector.extract_strided_slice %725 {offsets = [0, 32], sizes = [8, 32], strides = [1, 1]} : vector<8x96xf32> to vector<8x32xf32>
    %740 = vector.extract_strided_slice %730 {offsets = [0, 32], sizes = [8, 32], strides = [1, 1]} : vector<8x96xf32> to vector<8x32xf32>
    %741 = arith.addf %739, %740 : vector<8x32xf32>
    %742 = arith.negf %741 : vector<8x32xf32>
    %743 = math.exp %742 : vector<8x32xf32>
    %cst_289 = arith.constant 1.000000e+00 : f32
    %744 = vector.broadcast %cst_289 : f32 to vector<8x32xf32>
    %745 = arith.addf %744, %743 : vector<8x32xf32>
    %746 = arith.divf %744, %745 : vector<8x32xf32>
    %747 = vector.extract_strided_slice %725 {offsets = [0, 64], sizes = [8, 32], strides = [1, 1]} : vector<8x96xf32> to vector<8x32xf32>
    %748 = vector.extract_strided_slice %730 {offsets = [0, 64], sizes = [8, 32], strides = [1, 1]} : vector<8x96xf32> to vector<8x32xf32>
    %749 = arith.mulf %738, %748 : vector<8x32xf32>
    %750 = arith.addf %747, %749 : vector<8x32xf32>
    %751 = math.tanh %750 : vector<8x32xf32>
    %cst_290 = arith.constant 1.000000e+00 : f32
    %752 = vector.broadcast %cst_290 : f32 to vector<8x32xf32>
    %753 = arith.subf %752, %746 : vector<8x32xf32>
    %754 = arith.mulf %753, %751 : vector<8x32xf32>
    %755 = arith.mulf %746, %593 : vector<8x32xf32>
    %756 = arith.addf %754, %755 : vector<8x32xf32>
    %c464_291 = arith.constant 464 : index
    %c0_292 = arith.constant 0 : index
    %757 = vector.load %arg4[%c464_291, %c0_292] : memref<576x384xf32, #tpu.memory_space<vmem>>, vector<32x96xf32>
    %cst_293 = arith.constant dense<0.000000e+00> : vector<8x96xf32>
    %758 = tpu.matmul %756, %757, %cst_293 {dimension_numbers = #tpu.dot_dimension_numbers<[1], [0], [0], [1], [0, 0, 1, 1], [], []>} : vector<8x32xf32>, vector<32x96xf32>, vector<8x96xf32> -> vector<8x96xf32>
    %c496_294 = arith.constant 496 : index
    %c0_295 = arith.constant 0 : index
    %759 = vector.load %arg4[%c496_294, %c0_295] : memref<576x384xf32, #tpu.memory_space<vmem>>, vector<1x96xf32>
    %760 = vector.broadcast %759 : vector<1x96xf32> to vector<8x96xf32>
    %761 = arith.addf %758, %760 : vector<8x96xf32>
    %762 = vector.extract_strided_slice %761 {offsets = [0, 0], sizes = [8, 32], strides = [1, 1]} : vector<8x96xf32> to vector<8x32xf32>
    %763 = vector.extract_strided_slice %683 {offsets = [0, 0], sizes = [8, 32], strides = [1, 1]} : vector<8x96xf32> to vector<8x32xf32>
    %764 = arith.addf %762, %763 : vector<8x32xf32>
    %765 = arith.negf %764 : vector<8x32xf32>
    %766 = math.exp %765 : vector<8x32xf32>
    %cst_296 = arith.constant 1.000000e+00 : f32
    %767 = vector.broadcast %cst_296 : f32 to vector<8x32xf32>
    %768 = arith.addf %767, %766 : vector<8x32xf32>
    %769 = arith.divf %767, %768 : vector<8x32xf32>
    %770 = vector.extract_strided_slice %761 {offsets = [0, 32], sizes = [8, 32], strides = [1, 1]} : vector<8x96xf32> to vector<8x32xf32>
    %771 = vector.extract_strided_slice %683 {offsets = [0, 32], sizes = [8, 32], strides = [1, 1]} : vector<8x96xf32> to vector<8x32xf32>
    %772 = arith.addf %770, %771 : vector<8x32xf32>
    %773 = arith.negf %772 : vector<8x32xf32>
    %774 = math.exp %773 : vector<8x32xf32>
    %cst_297 = arith.constant 1.000000e+00 : f32
    %775 = vector.broadcast %cst_297 : f32 to vector<8x32xf32>
    %776 = arith.addf %775, %774 : vector<8x32xf32>
    %777 = arith.divf %775, %776 : vector<8x32xf32>
    %778 = vector.extract_strided_slice %761 {offsets = [0, 64], sizes = [8, 32], strides = [1, 1]} : vector<8x96xf32> to vector<8x32xf32>
    %779 = vector.extract_strided_slice %683 {offsets = [0, 64], sizes = [8, 32], strides = [1, 1]} : vector<8x96xf32> to vector<8x32xf32>
    %780 = arith.mulf %769, %779 : vector<8x32xf32>
    %781 = arith.addf %778, %780 : vector<8x32xf32>
    %782 = math.tanh %781 : vector<8x32xf32>
    %cst_298 = arith.constant 1.000000e+00 : f32
    %783 = vector.broadcast %cst_298 : f32 to vector<8x32xf32>
    %784 = arith.subf %783, %777 : vector<8x32xf32>
    %785 = arith.mulf %784, %782 : vector<8x32xf32>
    %786 = arith.mulf %777, %639 : vector<8x32xf32>
    %787 = arith.addf %785, %786 : vector<8x32xf32>
    %788 = vector.extract_strided_slice %13 {offsets = [4, 0, 0], sizes = [1, 8, 8], strides = [1, 1, 1]} : vector<8x8x8xf32> to vector<1x8x8xf32>
    %789 = vector.shape_cast %788 : vector<1x8x8xf32> to vector<8x8xf32>
    %cst_299 = arith.constant dense<0.000000e+00> : vector<8x32xf32>
    %790 = tpu.matmul %789, %787, %cst_299 {dimension_numbers = #tpu.dot_dimension_numbers<[1], [0], [0], [1], [0, 0, 1, 1], [], []>} : vector<8x8xf32>, vector<8x32xf32>, vector<8x32xf32> -> vector<8x32xf32>
    %791 = vector.extract_strided_slice %17 {offsets = [4, 0, 0], sizes = [1, 8, 1], strides = [1, 1, 1]} : vector<8x8x1xf32> to vector<1x8x1xf32>
    %792 = vector.shape_cast %791 : vector<1x8x1xf32> to vector<8x1xf32>
    %793 = vector.broadcast %792 : vector<8x1xf32> to vector<8x32xf32>
    %794 = arith.mulf %790, %793 : vector<8x32xf32>
    %c504_300 = arith.constant 504 : index
    %c0_301 = arith.constant 0 : index
    %795 = vector.load %arg4[%c504_300, %c0_301] : memref<576x384xf32, #tpu.memory_space<vmem>>, vector<32x32xf32>
    %cst_302 = arith.constant dense<0.000000e+00> : vector<8x32xf32>
    %796 = tpu.matmul %787, %795, %cst_302 {dimension_numbers = #tpu.dot_dimension_numbers<[1], [0], [0], [1], [0, 0, 1, 1], [], []>} : vector<8x32xf32>, vector<32x32xf32>, vector<8x32xf32> -> vector<8x32xf32>
    %c536_303 = arith.constant 536 : index
    %c0_304 = arith.constant 0 : index
    %797 = vector.load %arg4[%c536_303, %c0_304] : memref<576x384xf32, #tpu.memory_space<vmem>>, vector<32x32xf32>
    %cst_305 = arith.constant dense<0.000000e+00> : vector<8x32xf32>
    %798 = tpu.matmul %794, %797, %cst_305 {dimension_numbers = #tpu.dot_dimension_numbers<[1], [0], [0], [1], [0, 0, 1, 1], [], []>} : vector<8x32xf32>, vector<32x32xf32>, vector<8x32xf32> -> vector<8x32xf32>
    %799 = arith.addf %796, %798 : vector<8x32xf32>
    %c568_306 = arith.constant 568 : index
    %c0_307 = arith.constant 0 : index
    %800 = vector.load %arg4[%c568_306, %c0_307] : memref<576x384xf32, #tpu.memory_space<vmem>>, vector<1x32xf32>
    %801 = vector.broadcast %800 : vector<1x32xf32> to vector<8x32xf32>
    %802 = arith.addf %799, %801 : vector<8x32xf32>
    %803 = arith.subf %696, %694 : vector<8x16xf32>
    %cst_308 = arith.constant dense<0.000000e+00> : vector<8xf32>
    %804 = vector.multi_reduction <add>, %803, %cst_308 [1] : vector<8x16xf32> to vector<8xf32>
    %805 = vector.shape_cast %804 : vector<8xf32> to vector<8x1xf32>
    %806 = arith.subf %694, %696 : vector<8x16xf32>
    %807 = math.exp %806 : vector<8x16xf32>
    %cst_309 = arith.constant dense<0.000000e+00> : vector<8xf32>
    %808 = vector.multi_reduction <add>, %807, %cst_309 [1] : vector<8x16xf32> to vector<8xf32>
    %809 = vector.shape_cast %808 : vector<8xf32> to vector<8x1xf32>
    %810 = arith.subf %693, %695 : vector<8x16xf32>
    %811 = arith.mulf %810, %810 : vector<8x16xf32>
    %812 = math.exp %696 : vector<8x16xf32>
    %813 = arith.divf %811, %812 : vector<8x16xf32>
    %cst_310 = arith.constant dense<0.000000e+00> : vector<8xf32>
    %814 = vector.multi_reduction <add>, %813, %cst_310 [1] : vector<8x16xf32> to vector<8xf32>
    %815 = vector.shape_cast %814 : vector<8xf32> to vector<8x1xf32>
    %cst_311 = arith.constant 1.600000e+01 : f32
    %816 = vector.broadcast %cst_311 : f32 to vector<8x1xf32>
    %817 = arith.subf %805, %816 : vector<8x1xf32>
    %818 = arith.addf %817, %809 : vector<8x1xf32>
    %819 = arith.addf %818, %815 : vector<8x1xf32>
    %cst_312 = arith.constant 5.000000e-01 : f32
    %820 = vector.broadcast %cst_312 : f32 to vector<8x1xf32>
    %821 = arith.mulf %820, %819 : vector<8x1xf32>
    %822 = arith.addf %659, %821 : vector<8x1xf32>
    %823 = arith.subf %674, %723 : vector<8x2xf32>
    %824 = arith.mulf %823, %823 : vector<8x2xf32>
    %825 = math.exp %724 : vector<8x2xf32>
    %826 = arith.divf %824, %825 : vector<8x2xf32>
    %cst_313 = arith.constant dense<0.000000e+00> : vector<8xf32>
    %827 = vector.multi_reduction <add>, %826, %cst_313 [1] : vector<8x2xf32> to vector<8xf32>
    %828 = vector.shape_cast %827 : vector<8xf32> to vector<8x1xf32>
    %cst_314 = arith.constant dense<0.000000e+00> : vector<8xf32>
    %829 = vector.multi_reduction <add>, %724, %cst_314 [1] : vector<8x2xf32> to vector<8xf32>
    %830 = vector.shape_cast %829 : vector<8xf32> to vector<8x1xf32>
    %cst_315 = arith.constant 3.67575407 : f32
    %831 = vector.broadcast %cst_315 : f32 to vector<8x1xf32>
    %832 = arith.addf %828, %831 : vector<8x1xf32>
    %833 = arith.addf %832, %830 : vector<8x1xf32>
    %cst_316 = arith.constant 5.000000e-01 : f32
    %834 = vector.broadcast %cst_316 : f32 to vector<8x1xf32>
    %835 = arith.mulf %834, %833 : vector<8x1xf32>
    %836 = arith.addf %673, %835 : vector<8x1xf32>
    %837 = vector.extract_strided_slice %0 {offsets = [40, 0], sizes = [8, 2], strides = [1, 1]} : vector<64x2xf32> to vector<8x2xf32>
    %838 = vector.extract_strided_slice %12 {offsets = [40, 0], sizes = [8, 128], strides = [1, 1]} : vector<64x224xf32> to vector<8x128xf32>
    %839 = vector.extract_strided_slice %12 {offsets = [40, 128], sizes = [8, 96], strides = [1, 1]} : vector<64x224xf32> to vector<8x96xf32>
    %c384_317 = arith.constant 384 : index
    %c0_318 = arith.constant 0 : index
    %840 = vector.load %arg4[%c384_317, %c0_318] : memref<576x384xf32, #tpu.memory_space<vmem>>, vector<32x320xf32>
    %cst_319 = arith.constant dense<0.000000e+00> : vector<8x320xf32>
    %841 = tpu.matmul %802, %840, %cst_319 {dimension_numbers = #tpu.dot_dimension_numbers<[1], [0], [0], [1], [0, 0, 1, 1], [], []>} : vector<8x32xf32>, vector<32x320xf32>, vector<8x320xf32> -> vector<8x320xf32>
    %c416_320 = arith.constant 416 : index
    %c0_321 = arith.constant 0 : index
    %842 = vector.load %arg4[%c416_320, %c0_321] : memref<576x384xf32, #tpu.memory_space<vmem>>, vector<1x320xf32>
    %843 = vector.broadcast %842 : vector<1x320xf32> to vector<8x320xf32>
    %844 = arith.addf %841, %843 : vector<8x320xf32>
    %845 = vector.extract_strided_slice %844 {offsets = [0, 0], sizes = [8, 128], strides = [1, 1]} : vector<8x320xf32> to vector<8x128xf32>
    %846 = vector.extract_strided_slice %844 {offsets = [0, 128], sizes = [8, 96], strides = [1, 1]} : vector<8x320xf32> to vector<8x96xf32>
    %847 = vector.extract_strided_slice %844 {offsets = [0, 256], sizes = [8, 64], strides = [1, 1]} : vector<8x320xf32> to vector<8x64xf32>
    %848 = arith.addf %838, %845 : vector<8x128xf32>
    %cst_322 = arith.constant 0.000000e+00 : f32
    %849 = vector.broadcast %cst_322 : f32 to vector<8x128xf32>
    %850 = arith.maximumf %848, %849 : vector<8x128xf32>
    %c88_323 = arith.constant 88 : index
    %c0_324 = arith.constant 0 : index
    %851 = vector.load %arg4[%c88_323, %c0_324] : memref<576x384xf32, #tpu.memory_space<vmem>>, vector<128x64xf32>
    %cst_325 = arith.constant dense<0.000000e+00> : vector<8x64xf32>
    %852 = tpu.matmul %850, %851, %cst_325 {dimension_numbers = #tpu.dot_dimension_numbers<[1], [0], [0], [1], [0, 0, 1, 1], [], []>} : vector<8x128xf32>, vector<128x64xf32>, vector<8x64xf32> -> vector<8x64xf32>
    %c216_326 = arith.constant 216 : index
    %c0_327 = arith.constant 0 : index
    %853 = vector.load %arg4[%c216_326, %c0_327] : memref<576x384xf32, #tpu.memory_space<vmem>>, vector<1x64xf32>
    %854 = vector.broadcast %853 : vector<1x64xf32> to vector<8x64xf32>
    %855 = arith.addf %852, %854 : vector<8x64xf32>
    %856 = vector.extract_strided_slice %855 {offsets = [0, 0], sizes = [8, 16], strides = [1, 1]} : vector<8x64xf32> to vector<8x16xf32>
    %857 = vector.extract_strided_slice %855 {offsets = [0, 16], sizes = [8, 16], strides = [1, 1]} : vector<8x64xf32> to vector<8x16xf32>
    %858 = vector.extract_strided_slice %855 {offsets = [0, 32], sizes = [8, 16], strides = [1, 1]} : vector<8x64xf32> to vector<8x16xf32>
    %859 = vector.extract_strided_slice %855 {offsets = [0, 48], sizes = [8, 16], strides = [1, 1]} : vector<8x64xf32> to vector<8x16xf32>
    %c5 = arith.constant 5 : index
    %c0_328 = arith.constant 0 : index
    %c0_329 = arith.constant 0 : index
    %860 = vector.load %arg3[%c5, %c0_328, %c0_329] : memref<8x8x16xf32, #tpu.memory_space<vmem>>, vector<1x8x16xf32>
    %861 = vector.shape_cast %860 : vector<1x8x16xf32> to vector<8x16xf32>
    %cst_330 = arith.constant 5.000000e-01 : f32
    %862 = vector.broadcast %cst_330 : f32 to vector<8x16xf32>
    %863 = arith.mulf %862, %857 : vector<8x16xf32>
    %864 = math.exp %863 : vector<8x16xf32>
    %865 = arith.mulf %861, %864 : vector<8x16xf32>
    %866 = arith.addf %865, %856 : vector<8x16xf32>
    %c224_331 = arith.constant 224 : index
    %c0_332 = arith.constant 0 : index
    %867 = vector.load %arg4[%c224_331, %c0_332] : memref<576x384xf32, #tpu.memory_space<vmem>>, vector<16x64xf32>
    %cst_333 = arith.constant dense<0.000000e+00> : vector<8x64xf32>
    %868 = tpu.matmul %866, %867, %cst_333 {dimension_numbers = #tpu.dot_dimension_numbers<[1], [0], [0], [1], [0, 0, 1, 1], [], []>} : vector<8x16xf32>, vector<16x64xf32>, vector<8x64xf32> -> vector<8x64xf32>
    %c240_334 = arith.constant 240 : index
    %c0_335 = arith.constant 0 : index
    %869 = vector.load %arg4[%c240_334, %c0_335] : memref<576x384xf32, #tpu.memory_space<vmem>>, vector<1x64xf32>
    %870 = vector.broadcast %869 : vector<1x64xf32> to vector<8x64xf32>
    %871 = arith.addf %868, %870 : vector<8x64xf32>
    %cst_336 = arith.constant 0.000000e+00 : f32
    %872 = vector.broadcast %cst_336 : f32 to vector<8x64xf32>
    %873 = arith.maximumf %871, %872 : vector<8x64xf32>
    %c248_337 = arith.constant 248 : index
    %c0_338 = arith.constant 0 : index
    %874 = vector.load %arg4[%c248_337, %c0_338] : memref<576x384xf32, #tpu.memory_space<vmem>>, vector<64x224xf32>
    %cst_339 = arith.constant dense<0.000000e+00> : vector<8x224xf32>
    %875 = tpu.matmul %873, %874, %cst_339 {dimension_numbers = #tpu.dot_dimension_numbers<[1], [0], [0], [1], [0, 0, 1, 1], [], []>} : vector<8x64xf32>, vector<64x224xf32>, vector<8x224xf32> -> vector<8x224xf32>
    %876 = vector.extract_strided_slice %875 {offsets = [0, 0], sizes = [8, 64], strides = [1, 1]} : vector<8x224xf32> to vector<8x64xf32>
    %877 = vector.extract_strided_slice %875 {offsets = [0, 128], sizes = [8, 96], strides = [1, 1]} : vector<8x224xf32> to vector<8x96xf32>
    %878 = arith.addf %876, %847 : vector<8x64xf32>
    %cst_340 = arith.constant 0.000000e+00 : f32
    %879 = vector.broadcast %cst_340 : f32 to vector<8x64xf32>
    %880 = arith.maximumf %878, %879 : vector<8x64xf32>
    %c312_341 = arith.constant 312 : index
    %c0_342 = arith.constant 0 : index
    %881 = vector.load %arg4[%c312_341, %c0_342] : memref<576x384xf32, #tpu.memory_space<vmem>>, vector<64x4xf32>
    %cst_343 = arith.constant dense<0.000000e+00> : vector<8x4xf32>
    %882 = tpu.matmul %880, %881, %cst_343 {dimension_numbers = #tpu.dot_dimension_numbers<[1], [0], [0], [1], [0, 0, 1, 1], [], []>} : vector<8x64xf32>, vector<64x4xf32>, vector<8x4xf32> -> vector<8x4xf32>
    %c376_344 = arith.constant 376 : index
    %c0_345 = arith.constant 0 : index
    %883 = vector.load %arg4[%c376_344, %c0_345] : memref<576x384xf32, #tpu.memory_space<vmem>>, vector<1x4xf32>
    %884 = vector.broadcast %883 : vector<1x4xf32> to vector<8x4xf32>
    %885 = arith.addf %882, %884 : vector<8x4xf32>
    %886 = vector.extract_strided_slice %885 {offsets = [0, 0], sizes = [8, 2], strides = [1, 1]} : vector<8x4xf32> to vector<8x2xf32>
    %887 = vector.extract_strided_slice %885 {offsets = [0, 2], sizes = [8, 2], strides = [1, 1]} : vector<8x4xf32> to vector<8x2xf32>
    %888 = arith.addf %839, %877 : vector<8x96xf32>
    %c424_346 = arith.constant 424 : index
    %c0_347 = arith.constant 0 : index
    %889 = vector.load %arg4[%c424_346, %c0_347] : memref<576x384xf32, #tpu.memory_space<vmem>>, vector<32x96xf32>
    %cst_348 = arith.constant dense<0.000000e+00> : vector<8x96xf32>
    %890 = tpu.matmul %756, %889, %cst_348 {dimension_numbers = #tpu.dot_dimension_numbers<[1], [0], [0], [1], [0, 0, 1, 1], [], []>} : vector<8x32xf32>, vector<32x96xf32>, vector<8x96xf32> -> vector<8x96xf32>
    %c456_349 = arith.constant 456 : index
    %c0_350 = arith.constant 0 : index
    %891 = vector.load %arg4[%c456_349, %c0_350] : memref<576x384xf32, #tpu.memory_space<vmem>>, vector<1x96xf32>
    %892 = vector.broadcast %891 : vector<1x96xf32> to vector<8x96xf32>
    %893 = arith.addf %890, %892 : vector<8x96xf32>
    %894 = vector.extract_strided_slice %888 {offsets = [0, 0], sizes = [8, 32], strides = [1, 1]} : vector<8x96xf32> to vector<8x32xf32>
    %895 = vector.extract_strided_slice %893 {offsets = [0, 0], sizes = [8, 32], strides = [1, 1]} : vector<8x96xf32> to vector<8x32xf32>
    %896 = arith.addf %894, %895 : vector<8x32xf32>
    %897 = arith.negf %896 : vector<8x32xf32>
    %898 = math.exp %897 : vector<8x32xf32>
    %cst_351 = arith.constant 1.000000e+00 : f32
    %899 = vector.broadcast %cst_351 : f32 to vector<8x32xf32>
    %900 = arith.addf %899, %898 : vector<8x32xf32>
    %901 = arith.divf %899, %900 : vector<8x32xf32>
    %902 = vector.extract_strided_slice %888 {offsets = [0, 32], sizes = [8, 32], strides = [1, 1]} : vector<8x96xf32> to vector<8x32xf32>
    %903 = vector.extract_strided_slice %893 {offsets = [0, 32], sizes = [8, 32], strides = [1, 1]} : vector<8x96xf32> to vector<8x32xf32>
    %904 = arith.addf %902, %903 : vector<8x32xf32>
    %905 = arith.negf %904 : vector<8x32xf32>
    %906 = math.exp %905 : vector<8x32xf32>
    %cst_352 = arith.constant 1.000000e+00 : f32
    %907 = vector.broadcast %cst_352 : f32 to vector<8x32xf32>
    %908 = arith.addf %907, %906 : vector<8x32xf32>
    %909 = arith.divf %907, %908 : vector<8x32xf32>
    %910 = vector.extract_strided_slice %888 {offsets = [0, 64], sizes = [8, 32], strides = [1, 1]} : vector<8x96xf32> to vector<8x32xf32>
    %911 = vector.extract_strided_slice %893 {offsets = [0, 64], sizes = [8, 32], strides = [1, 1]} : vector<8x96xf32> to vector<8x32xf32>
    %912 = arith.mulf %901, %911 : vector<8x32xf32>
    %913 = arith.addf %910, %912 : vector<8x32xf32>
    %914 = math.tanh %913 : vector<8x32xf32>
    %cst_353 = arith.constant 1.000000e+00 : f32
    %915 = vector.broadcast %cst_353 : f32 to vector<8x32xf32>
    %916 = arith.subf %915, %909 : vector<8x32xf32>
    %917 = arith.mulf %916, %914 : vector<8x32xf32>
    %918 = arith.mulf %909, %756 : vector<8x32xf32>
    %919 = arith.addf %917, %918 : vector<8x32xf32>
    %c464_354 = arith.constant 464 : index
    %c0_355 = arith.constant 0 : index
    %920 = vector.load %arg4[%c464_354, %c0_355] : memref<576x384xf32, #tpu.memory_space<vmem>>, vector<32x96xf32>
    %cst_356 = arith.constant dense<0.000000e+00> : vector<8x96xf32>
    %921 = tpu.matmul %919, %920, %cst_356 {dimension_numbers = #tpu.dot_dimension_numbers<[1], [0], [0], [1], [0, 0, 1, 1], [], []>} : vector<8x32xf32>, vector<32x96xf32>, vector<8x96xf32> -> vector<8x96xf32>
    %c496_357 = arith.constant 496 : index
    %c0_358 = arith.constant 0 : index
    %922 = vector.load %arg4[%c496_357, %c0_358] : memref<576x384xf32, #tpu.memory_space<vmem>>, vector<1x96xf32>
    %923 = vector.broadcast %922 : vector<1x96xf32> to vector<8x96xf32>
    %924 = arith.addf %921, %923 : vector<8x96xf32>
    %925 = vector.extract_strided_slice %924 {offsets = [0, 0], sizes = [8, 32], strides = [1, 1]} : vector<8x96xf32> to vector<8x32xf32>
    %926 = vector.extract_strided_slice %846 {offsets = [0, 0], sizes = [8, 32], strides = [1, 1]} : vector<8x96xf32> to vector<8x32xf32>
    %927 = arith.addf %925, %926 : vector<8x32xf32>
    %928 = arith.negf %927 : vector<8x32xf32>
    %929 = math.exp %928 : vector<8x32xf32>
    %cst_359 = arith.constant 1.000000e+00 : f32
    %930 = vector.broadcast %cst_359 : f32 to vector<8x32xf32>
    %931 = arith.addf %930, %929 : vector<8x32xf32>
    %932 = arith.divf %930, %931 : vector<8x32xf32>
    %933 = vector.extract_strided_slice %924 {offsets = [0, 32], sizes = [8, 32], strides = [1, 1]} : vector<8x96xf32> to vector<8x32xf32>
    %934 = vector.extract_strided_slice %846 {offsets = [0, 32], sizes = [8, 32], strides = [1, 1]} : vector<8x96xf32> to vector<8x32xf32>
    %935 = arith.addf %933, %934 : vector<8x32xf32>
    %936 = arith.negf %935 : vector<8x32xf32>
    %937 = math.exp %936 : vector<8x32xf32>
    %cst_360 = arith.constant 1.000000e+00 : f32
    %938 = vector.broadcast %cst_360 : f32 to vector<8x32xf32>
    %939 = arith.addf %938, %937 : vector<8x32xf32>
    %940 = arith.divf %938, %939 : vector<8x32xf32>
    %941 = vector.extract_strided_slice %924 {offsets = [0, 64], sizes = [8, 32], strides = [1, 1]} : vector<8x96xf32> to vector<8x32xf32>
    %942 = vector.extract_strided_slice %846 {offsets = [0, 64], sizes = [8, 32], strides = [1, 1]} : vector<8x96xf32> to vector<8x32xf32>
    %943 = arith.mulf %932, %942 : vector<8x32xf32>
    %944 = arith.addf %941, %943 : vector<8x32xf32>
    %945 = math.tanh %944 : vector<8x32xf32>
    %cst_361 = arith.constant 1.000000e+00 : f32
    %946 = vector.broadcast %cst_361 : f32 to vector<8x32xf32>
    %947 = arith.subf %946, %940 : vector<8x32xf32>
    %948 = arith.mulf %947, %945 : vector<8x32xf32>
    %949 = arith.mulf %940, %802 : vector<8x32xf32>
    %950 = arith.addf %948, %949 : vector<8x32xf32>
    %951 = vector.extract_strided_slice %13 {offsets = [5, 0, 0], sizes = [1, 8, 8], strides = [1, 1, 1]} : vector<8x8x8xf32> to vector<1x8x8xf32>
    %952 = vector.shape_cast %951 : vector<1x8x8xf32> to vector<8x8xf32>
    %cst_362 = arith.constant dense<0.000000e+00> : vector<8x32xf32>
    %953 = tpu.matmul %952, %950, %cst_362 {dimension_numbers = #tpu.dot_dimension_numbers<[1], [0], [0], [1], [0, 0, 1, 1], [], []>} : vector<8x8xf32>, vector<8x32xf32>, vector<8x32xf32> -> vector<8x32xf32>
    %954 = vector.extract_strided_slice %17 {offsets = [5, 0, 0], sizes = [1, 8, 1], strides = [1, 1, 1]} : vector<8x8x1xf32> to vector<1x8x1xf32>
    %955 = vector.shape_cast %954 : vector<1x8x1xf32> to vector<8x1xf32>
    %956 = vector.broadcast %955 : vector<8x1xf32> to vector<8x32xf32>
    %957 = arith.mulf %953, %956 : vector<8x32xf32>
    %c504_363 = arith.constant 504 : index
    %c0_364 = arith.constant 0 : index
    %958 = vector.load %arg4[%c504_363, %c0_364] : memref<576x384xf32, #tpu.memory_space<vmem>>, vector<32x32xf32>
    %cst_365 = arith.constant dense<0.000000e+00> : vector<8x32xf32>
    %959 = tpu.matmul %950, %958, %cst_365 {dimension_numbers = #tpu.dot_dimension_numbers<[1], [0], [0], [1], [0, 0, 1, 1], [], []>} : vector<8x32xf32>, vector<32x32xf32>, vector<8x32xf32> -> vector<8x32xf32>
    %c536_366 = arith.constant 536 : index
    %c0_367 = arith.constant 0 : index
    %960 = vector.load %arg4[%c536_366, %c0_367] : memref<576x384xf32, #tpu.memory_space<vmem>>, vector<32x32xf32>
    %cst_368 = arith.constant dense<0.000000e+00> : vector<8x32xf32>
    %961 = tpu.matmul %957, %960, %cst_368 {dimension_numbers = #tpu.dot_dimension_numbers<[1], [0], [0], [1], [0, 0, 1, 1], [], []>} : vector<8x32xf32>, vector<32x32xf32>, vector<8x32xf32> -> vector<8x32xf32>
    %962 = arith.addf %959, %961 : vector<8x32xf32>
    %c568_369 = arith.constant 568 : index
    %c0_370 = arith.constant 0 : index
    %963 = vector.load %arg4[%c568_369, %c0_370] : memref<576x384xf32, #tpu.memory_space<vmem>>, vector<1x32xf32>
    %964 = vector.broadcast %963 : vector<1x32xf32> to vector<8x32xf32>
    %965 = arith.addf %962, %964 : vector<8x32xf32>
    %966 = arith.subf %859, %857 : vector<8x16xf32>
    %cst_371 = arith.constant dense<0.000000e+00> : vector<8xf32>
    %967 = vector.multi_reduction <add>, %966, %cst_371 [1] : vector<8x16xf32> to vector<8xf32>
    %968 = vector.shape_cast %967 : vector<8xf32> to vector<8x1xf32>
    %969 = arith.subf %857, %859 : vector<8x16xf32>
    %970 = math.exp %969 : vector<8x16xf32>
    %cst_372 = arith.constant dense<0.000000e+00> : vector<8xf32>
    %971 = vector.multi_reduction <add>, %970, %cst_372 [1] : vector<8x16xf32> to vector<8xf32>
    %972 = vector.shape_cast %971 : vector<8xf32> to vector<8x1xf32>
    %973 = arith.subf %856, %858 : vector<8x16xf32>
    %974 = arith.mulf %973, %973 : vector<8x16xf32>
    %975 = math.exp %859 : vector<8x16xf32>
    %976 = arith.divf %974, %975 : vector<8x16xf32>
    %cst_373 = arith.constant dense<0.000000e+00> : vector<8xf32>
    %977 = vector.multi_reduction <add>, %976, %cst_373 [1] : vector<8x16xf32> to vector<8xf32>
    %978 = vector.shape_cast %977 : vector<8xf32> to vector<8x1xf32>
    %cst_374 = arith.constant 1.600000e+01 : f32
    %979 = vector.broadcast %cst_374 : f32 to vector<8x1xf32>
    %980 = arith.subf %968, %979 : vector<8x1xf32>
    %981 = arith.addf %980, %972 : vector<8x1xf32>
    %982 = arith.addf %981, %978 : vector<8x1xf32>
    %cst_375 = arith.constant 5.000000e-01 : f32
    %983 = vector.broadcast %cst_375 : f32 to vector<8x1xf32>
    %984 = arith.mulf %983, %982 : vector<8x1xf32>
    %985 = arith.addf %822, %984 : vector<8x1xf32>
    %986 = arith.subf %837, %886 : vector<8x2xf32>
    %987 = arith.mulf %986, %986 : vector<8x2xf32>
    %988 = math.exp %887 : vector<8x2xf32>
    %989 = arith.divf %987, %988 : vector<8x2xf32>
    %cst_376 = arith.constant dense<0.000000e+00> : vector<8xf32>
    %990 = vector.multi_reduction <add>, %989, %cst_376 [1] : vector<8x2xf32> to vector<8xf32>
    %991 = vector.shape_cast %990 : vector<8xf32> to vector<8x1xf32>
    %cst_377 = arith.constant dense<0.000000e+00> : vector<8xf32>
    %992 = vector.multi_reduction <add>, %887, %cst_377 [1] : vector<8x2xf32> to vector<8xf32>
    %993 = vector.shape_cast %992 : vector<8xf32> to vector<8x1xf32>
    %cst_378 = arith.constant 3.67575407 : f32
    %994 = vector.broadcast %cst_378 : f32 to vector<8x1xf32>
    %995 = arith.addf %991, %994 : vector<8x1xf32>
    %996 = arith.addf %995, %993 : vector<8x1xf32>
    %cst_379 = arith.constant 5.000000e-01 : f32
    %997 = vector.broadcast %cst_379 : f32 to vector<8x1xf32>
    %998 = arith.mulf %997, %996 : vector<8x1xf32>
    %999 = arith.addf %836, %998 : vector<8x1xf32>
    %1000 = vector.extract_strided_slice %0 {offsets = [48, 0], sizes = [8, 2], strides = [1, 1]} : vector<64x2xf32> to vector<8x2xf32>
    %1001 = vector.extract_strided_slice %12 {offsets = [48, 0], sizes = [8, 128], strides = [1, 1]} : vector<64x224xf32> to vector<8x128xf32>
    %1002 = vector.extract_strided_slice %12 {offsets = [48, 128], sizes = [8, 96], strides = [1, 1]} : vector<64x224xf32> to vector<8x96xf32>
    %c384_380 = arith.constant 384 : index
    %c0_381 = arith.constant 0 : index
    %1003 = vector.load %arg4[%c384_380, %c0_381] : memref<576x384xf32, #tpu.memory_space<vmem>>, vector<32x320xf32>
    %cst_382 = arith.constant dense<0.000000e+00> : vector<8x320xf32>
    %1004 = tpu.matmul %965, %1003, %cst_382 {dimension_numbers = #tpu.dot_dimension_numbers<[1], [0], [0], [1], [0, 0, 1, 1], [], []>} : vector<8x32xf32>, vector<32x320xf32>, vector<8x320xf32> -> vector<8x320xf32>
    %c416_383 = arith.constant 416 : index
    %c0_384 = arith.constant 0 : index
    %1005 = vector.load %arg4[%c416_383, %c0_384] : memref<576x384xf32, #tpu.memory_space<vmem>>, vector<1x320xf32>
    %1006 = vector.broadcast %1005 : vector<1x320xf32> to vector<8x320xf32>
    %1007 = arith.addf %1004, %1006 : vector<8x320xf32>
    %1008 = vector.extract_strided_slice %1007 {offsets = [0, 0], sizes = [8, 128], strides = [1, 1]} : vector<8x320xf32> to vector<8x128xf32>
    %1009 = vector.extract_strided_slice %1007 {offsets = [0, 128], sizes = [8, 96], strides = [1, 1]} : vector<8x320xf32> to vector<8x96xf32>
    %1010 = vector.extract_strided_slice %1007 {offsets = [0, 256], sizes = [8, 64], strides = [1, 1]} : vector<8x320xf32> to vector<8x64xf32>
    %1011 = arith.addf %1001, %1008 : vector<8x128xf32>
    %cst_385 = arith.constant 0.000000e+00 : f32
    %1012 = vector.broadcast %cst_385 : f32 to vector<8x128xf32>
    %1013 = arith.maximumf %1011, %1012 : vector<8x128xf32>
    %c88_386 = arith.constant 88 : index
    %c0_387 = arith.constant 0 : index
    %1014 = vector.load %arg4[%c88_386, %c0_387] : memref<576x384xf32, #tpu.memory_space<vmem>>, vector<128x64xf32>
    %cst_388 = arith.constant dense<0.000000e+00> : vector<8x64xf32>
    %1015 = tpu.matmul %1013, %1014, %cst_388 {dimension_numbers = #tpu.dot_dimension_numbers<[1], [0], [0], [1], [0, 0, 1, 1], [], []>} : vector<8x128xf32>, vector<128x64xf32>, vector<8x64xf32> -> vector<8x64xf32>
    %c216_389 = arith.constant 216 : index
    %c0_390 = arith.constant 0 : index
    %1016 = vector.load %arg4[%c216_389, %c0_390] : memref<576x384xf32, #tpu.memory_space<vmem>>, vector<1x64xf32>
    %1017 = vector.broadcast %1016 : vector<1x64xf32> to vector<8x64xf32>
    %1018 = arith.addf %1015, %1017 : vector<8x64xf32>
    %1019 = vector.extract_strided_slice %1018 {offsets = [0, 0], sizes = [8, 16], strides = [1, 1]} : vector<8x64xf32> to vector<8x16xf32>
    %1020 = vector.extract_strided_slice %1018 {offsets = [0, 16], sizes = [8, 16], strides = [1, 1]} : vector<8x64xf32> to vector<8x16xf32>
    %1021 = vector.extract_strided_slice %1018 {offsets = [0, 32], sizes = [8, 16], strides = [1, 1]} : vector<8x64xf32> to vector<8x16xf32>
    %1022 = vector.extract_strided_slice %1018 {offsets = [0, 48], sizes = [8, 16], strides = [1, 1]} : vector<8x64xf32> to vector<8x16xf32>
    %c6 = arith.constant 6 : index
    %c0_391 = arith.constant 0 : index
    %c0_392 = arith.constant 0 : index
    %1023 = vector.load %arg3[%c6, %c0_391, %c0_392] : memref<8x8x16xf32, #tpu.memory_space<vmem>>, vector<1x8x16xf32>
    %1024 = vector.shape_cast %1023 : vector<1x8x16xf32> to vector<8x16xf32>
    %cst_393 = arith.constant 5.000000e-01 : f32
    %1025 = vector.broadcast %cst_393 : f32 to vector<8x16xf32>
    %1026 = arith.mulf %1025, %1020 : vector<8x16xf32>
    %1027 = math.exp %1026 : vector<8x16xf32>
    %1028 = arith.mulf %1024, %1027 : vector<8x16xf32>
    %1029 = arith.addf %1028, %1019 : vector<8x16xf32>
    %c224_394 = arith.constant 224 : index
    %c0_395 = arith.constant 0 : index
    %1030 = vector.load %arg4[%c224_394, %c0_395] : memref<576x384xf32, #tpu.memory_space<vmem>>, vector<16x64xf32>
    %cst_396 = arith.constant dense<0.000000e+00> : vector<8x64xf32>
    %1031 = tpu.matmul %1029, %1030, %cst_396 {dimension_numbers = #tpu.dot_dimension_numbers<[1], [0], [0], [1], [0, 0, 1, 1], [], []>} : vector<8x16xf32>, vector<16x64xf32>, vector<8x64xf32> -> vector<8x64xf32>
    %c240_397 = arith.constant 240 : index
    %c0_398 = arith.constant 0 : index
    %1032 = vector.load %arg4[%c240_397, %c0_398] : memref<576x384xf32, #tpu.memory_space<vmem>>, vector<1x64xf32>
    %1033 = vector.broadcast %1032 : vector<1x64xf32> to vector<8x64xf32>
    %1034 = arith.addf %1031, %1033 : vector<8x64xf32>
    %cst_399 = arith.constant 0.000000e+00 : f32
    %1035 = vector.broadcast %cst_399 : f32 to vector<8x64xf32>
    %1036 = arith.maximumf %1034, %1035 : vector<8x64xf32>
    %c248_400 = arith.constant 248 : index
    %c0_401 = arith.constant 0 : index
    %1037 = vector.load %arg4[%c248_400, %c0_401] : memref<576x384xf32, #tpu.memory_space<vmem>>, vector<64x224xf32>
    %cst_402 = arith.constant dense<0.000000e+00> : vector<8x224xf32>
    %1038 = tpu.matmul %1036, %1037, %cst_402 {dimension_numbers = #tpu.dot_dimension_numbers<[1], [0], [0], [1], [0, 0, 1, 1], [], []>} : vector<8x64xf32>, vector<64x224xf32>, vector<8x224xf32> -> vector<8x224xf32>
    %1039 = vector.extract_strided_slice %1038 {offsets = [0, 0], sizes = [8, 64], strides = [1, 1]} : vector<8x224xf32> to vector<8x64xf32>
    %1040 = vector.extract_strided_slice %1038 {offsets = [0, 128], sizes = [8, 96], strides = [1, 1]} : vector<8x224xf32> to vector<8x96xf32>
    %1041 = arith.addf %1039, %1010 : vector<8x64xf32>
    %cst_403 = arith.constant 0.000000e+00 : f32
    %1042 = vector.broadcast %cst_403 : f32 to vector<8x64xf32>
    %1043 = arith.maximumf %1041, %1042 : vector<8x64xf32>
    %c312_404 = arith.constant 312 : index
    %c0_405 = arith.constant 0 : index
    %1044 = vector.load %arg4[%c312_404, %c0_405] : memref<576x384xf32, #tpu.memory_space<vmem>>, vector<64x4xf32>
    %cst_406 = arith.constant dense<0.000000e+00> : vector<8x4xf32>
    %1045 = tpu.matmul %1043, %1044, %cst_406 {dimension_numbers = #tpu.dot_dimension_numbers<[1], [0], [0], [1], [0, 0, 1, 1], [], []>} : vector<8x64xf32>, vector<64x4xf32>, vector<8x4xf32> -> vector<8x4xf32>
    %c376_407 = arith.constant 376 : index
    %c0_408 = arith.constant 0 : index
    %1046 = vector.load %arg4[%c376_407, %c0_408] : memref<576x384xf32, #tpu.memory_space<vmem>>, vector<1x4xf32>
    %1047 = vector.broadcast %1046 : vector<1x4xf32> to vector<8x4xf32>
    %1048 = arith.addf %1045, %1047 : vector<8x4xf32>
    %1049 = vector.extract_strided_slice %1048 {offsets = [0, 0], sizes = [8, 2], strides = [1, 1]} : vector<8x4xf32> to vector<8x2xf32>
    %1050 = vector.extract_strided_slice %1048 {offsets = [0, 2], sizes = [8, 2], strides = [1, 1]} : vector<8x4xf32> to vector<8x2xf32>
    %1051 = arith.addf %1002, %1040 : vector<8x96xf32>
    %c424_409 = arith.constant 424 : index
    %c0_410 = arith.constant 0 : index
    %1052 = vector.load %arg4[%c424_409, %c0_410] : memref<576x384xf32, #tpu.memory_space<vmem>>, vector<32x96xf32>
    %cst_411 = arith.constant dense<0.000000e+00> : vector<8x96xf32>
    %1053 = tpu.matmul %919, %1052, %cst_411 {dimension_numbers = #tpu.dot_dimension_numbers<[1], [0], [0], [1], [0, 0, 1, 1], [], []>} : vector<8x32xf32>, vector<32x96xf32>, vector<8x96xf32> -> vector<8x96xf32>
    %c456_412 = arith.constant 456 : index
    %c0_413 = arith.constant 0 : index
    %1054 = vector.load %arg4[%c456_412, %c0_413] : memref<576x384xf32, #tpu.memory_space<vmem>>, vector<1x96xf32>
    %1055 = vector.broadcast %1054 : vector<1x96xf32> to vector<8x96xf32>
    %1056 = arith.addf %1053, %1055 : vector<8x96xf32>
    %1057 = vector.extract_strided_slice %1051 {offsets = [0, 0], sizes = [8, 32], strides = [1, 1]} : vector<8x96xf32> to vector<8x32xf32>
    %1058 = vector.extract_strided_slice %1056 {offsets = [0, 0], sizes = [8, 32], strides = [1, 1]} : vector<8x96xf32> to vector<8x32xf32>
    %1059 = arith.addf %1057, %1058 : vector<8x32xf32>
    %1060 = arith.negf %1059 : vector<8x32xf32>
    %1061 = math.exp %1060 : vector<8x32xf32>
    %cst_414 = arith.constant 1.000000e+00 : f32
    %1062 = vector.broadcast %cst_414 : f32 to vector<8x32xf32>
    %1063 = arith.addf %1062, %1061 : vector<8x32xf32>
    %1064 = arith.divf %1062, %1063 : vector<8x32xf32>
    %1065 = vector.extract_strided_slice %1051 {offsets = [0, 32], sizes = [8, 32], strides = [1, 1]} : vector<8x96xf32> to vector<8x32xf32>
    %1066 = vector.extract_strided_slice %1056 {offsets = [0, 32], sizes = [8, 32], strides = [1, 1]} : vector<8x96xf32> to vector<8x32xf32>
    %1067 = arith.addf %1065, %1066 : vector<8x32xf32>
    %1068 = arith.negf %1067 : vector<8x32xf32>
    %1069 = math.exp %1068 : vector<8x32xf32>
    %cst_415 = arith.constant 1.000000e+00 : f32
    %1070 = vector.broadcast %cst_415 : f32 to vector<8x32xf32>
    %1071 = arith.addf %1070, %1069 : vector<8x32xf32>
    %1072 = arith.divf %1070, %1071 : vector<8x32xf32>
    %1073 = vector.extract_strided_slice %1051 {offsets = [0, 64], sizes = [8, 32], strides = [1, 1]} : vector<8x96xf32> to vector<8x32xf32>
    %1074 = vector.extract_strided_slice %1056 {offsets = [0, 64], sizes = [8, 32], strides = [1, 1]} : vector<8x96xf32> to vector<8x32xf32>
    %1075 = arith.mulf %1064, %1074 : vector<8x32xf32>
    %1076 = arith.addf %1073, %1075 : vector<8x32xf32>
    %1077 = math.tanh %1076 : vector<8x32xf32>
    %cst_416 = arith.constant 1.000000e+00 : f32
    %1078 = vector.broadcast %cst_416 : f32 to vector<8x32xf32>
    %1079 = arith.subf %1078, %1072 : vector<8x32xf32>
    %1080 = arith.mulf %1079, %1077 : vector<8x32xf32>
    %1081 = arith.mulf %1072, %919 : vector<8x32xf32>
    %1082 = arith.addf %1080, %1081 : vector<8x32xf32>
    %c464_417 = arith.constant 464 : index
    %c0_418 = arith.constant 0 : index
    %1083 = vector.load %arg4[%c464_417, %c0_418] : memref<576x384xf32, #tpu.memory_space<vmem>>, vector<32x96xf32>
    %cst_419 = arith.constant dense<0.000000e+00> : vector<8x96xf32>
    %1084 = tpu.matmul %1082, %1083, %cst_419 {dimension_numbers = #tpu.dot_dimension_numbers<[1], [0], [0], [1], [0, 0, 1, 1], [], []>} : vector<8x32xf32>, vector<32x96xf32>, vector<8x96xf32> -> vector<8x96xf32>
    %c496_420 = arith.constant 496 : index
    %c0_421 = arith.constant 0 : index
    %1085 = vector.load %arg4[%c496_420, %c0_421] : memref<576x384xf32, #tpu.memory_space<vmem>>, vector<1x96xf32>
    %1086 = vector.broadcast %1085 : vector<1x96xf32> to vector<8x96xf32>
    %1087 = arith.addf %1084, %1086 : vector<8x96xf32>
    %1088 = vector.extract_strided_slice %1087 {offsets = [0, 0], sizes = [8, 32], strides = [1, 1]} : vector<8x96xf32> to vector<8x32xf32>
    %1089 = vector.extract_strided_slice %1009 {offsets = [0, 0], sizes = [8, 32], strides = [1, 1]} : vector<8x96xf32> to vector<8x32xf32>
    %1090 = arith.addf %1088, %1089 : vector<8x32xf32>
    %1091 = arith.negf %1090 : vector<8x32xf32>
    %1092 = math.exp %1091 : vector<8x32xf32>
    %cst_422 = arith.constant 1.000000e+00 : f32
    %1093 = vector.broadcast %cst_422 : f32 to vector<8x32xf32>
    %1094 = arith.addf %1093, %1092 : vector<8x32xf32>
    %1095 = arith.divf %1093, %1094 : vector<8x32xf32>
    %1096 = vector.extract_strided_slice %1087 {offsets = [0, 32], sizes = [8, 32], strides = [1, 1]} : vector<8x96xf32> to vector<8x32xf32>
    %1097 = vector.extract_strided_slice %1009 {offsets = [0, 32], sizes = [8, 32], strides = [1, 1]} : vector<8x96xf32> to vector<8x32xf32>
    %1098 = arith.addf %1096, %1097 : vector<8x32xf32>
    %1099 = arith.negf %1098 : vector<8x32xf32>
    %1100 = math.exp %1099 : vector<8x32xf32>
    %cst_423 = arith.constant 1.000000e+00 : f32
    %1101 = vector.broadcast %cst_423 : f32 to vector<8x32xf32>
    %1102 = arith.addf %1101, %1100 : vector<8x32xf32>
    %1103 = arith.divf %1101, %1102 : vector<8x32xf32>
    %1104 = vector.extract_strided_slice %1087 {offsets = [0, 64], sizes = [8, 32], strides = [1, 1]} : vector<8x96xf32> to vector<8x32xf32>
    %1105 = vector.extract_strided_slice %1009 {offsets = [0, 64], sizes = [8, 32], strides = [1, 1]} : vector<8x96xf32> to vector<8x32xf32>
    %1106 = arith.mulf %1095, %1105 : vector<8x32xf32>
    %1107 = arith.addf %1104, %1106 : vector<8x32xf32>
    %1108 = math.tanh %1107 : vector<8x32xf32>
    %cst_424 = arith.constant 1.000000e+00 : f32
    %1109 = vector.broadcast %cst_424 : f32 to vector<8x32xf32>
    %1110 = arith.subf %1109, %1103 : vector<8x32xf32>
    %1111 = arith.mulf %1110, %1108 : vector<8x32xf32>
    %1112 = arith.mulf %1103, %965 : vector<8x32xf32>
    %1113 = arith.addf %1111, %1112 : vector<8x32xf32>
    %1114 = vector.extract_strided_slice %13 {offsets = [6, 0, 0], sizes = [1, 8, 8], strides = [1, 1, 1]} : vector<8x8x8xf32> to vector<1x8x8xf32>
    %1115 = vector.shape_cast %1114 : vector<1x8x8xf32> to vector<8x8xf32>
    %cst_425 = arith.constant dense<0.000000e+00> : vector<8x32xf32>
    %1116 = tpu.matmul %1115, %1113, %cst_425 {dimension_numbers = #tpu.dot_dimension_numbers<[1], [0], [0], [1], [0, 0, 1, 1], [], []>} : vector<8x8xf32>, vector<8x32xf32>, vector<8x32xf32> -> vector<8x32xf32>
    %1117 = vector.extract_strided_slice %17 {offsets = [6, 0, 0], sizes = [1, 8, 1], strides = [1, 1, 1]} : vector<8x8x1xf32> to vector<1x8x1xf32>
    %1118 = vector.shape_cast %1117 : vector<1x8x1xf32> to vector<8x1xf32>
    %1119 = vector.broadcast %1118 : vector<8x1xf32> to vector<8x32xf32>
    %1120 = arith.mulf %1116, %1119 : vector<8x32xf32>
    %c504_426 = arith.constant 504 : index
    %c0_427 = arith.constant 0 : index
    %1121 = vector.load %arg4[%c504_426, %c0_427] : memref<576x384xf32, #tpu.memory_space<vmem>>, vector<32x32xf32>
    %cst_428 = arith.constant dense<0.000000e+00> : vector<8x32xf32>
    %1122 = tpu.matmul %1113, %1121, %cst_428 {dimension_numbers = #tpu.dot_dimension_numbers<[1], [0], [0], [1], [0, 0, 1, 1], [], []>} : vector<8x32xf32>, vector<32x32xf32>, vector<8x32xf32> -> vector<8x32xf32>
    %c536_429 = arith.constant 536 : index
    %c0_430 = arith.constant 0 : index
    %1123 = vector.load %arg4[%c536_429, %c0_430] : memref<576x384xf32, #tpu.memory_space<vmem>>, vector<32x32xf32>
    %cst_431 = arith.constant dense<0.000000e+00> : vector<8x32xf32>
    %1124 = tpu.matmul %1120, %1123, %cst_431 {dimension_numbers = #tpu.dot_dimension_numbers<[1], [0], [0], [1], [0, 0, 1, 1], [], []>} : vector<8x32xf32>, vector<32x32xf32>, vector<8x32xf32> -> vector<8x32xf32>
    %1125 = arith.addf %1122, %1124 : vector<8x32xf32>
    %c568_432 = arith.constant 568 : index
    %c0_433 = arith.constant 0 : index
    %1126 = vector.load %arg4[%c568_432, %c0_433] : memref<576x384xf32, #tpu.memory_space<vmem>>, vector<1x32xf32>
    %1127 = vector.broadcast %1126 : vector<1x32xf32> to vector<8x32xf32>
    %1128 = arith.addf %1125, %1127 : vector<8x32xf32>
    %1129 = arith.subf %1022, %1020 : vector<8x16xf32>
    %cst_434 = arith.constant dense<0.000000e+00> : vector<8xf32>
    %1130 = vector.multi_reduction <add>, %1129, %cst_434 [1] : vector<8x16xf32> to vector<8xf32>
    %1131 = vector.shape_cast %1130 : vector<8xf32> to vector<8x1xf32>
    %1132 = arith.subf %1020, %1022 : vector<8x16xf32>
    %1133 = math.exp %1132 : vector<8x16xf32>
    %cst_435 = arith.constant dense<0.000000e+00> : vector<8xf32>
    %1134 = vector.multi_reduction <add>, %1133, %cst_435 [1] : vector<8x16xf32> to vector<8xf32>
    %1135 = vector.shape_cast %1134 : vector<8xf32> to vector<8x1xf32>
    %1136 = arith.subf %1019, %1021 : vector<8x16xf32>
    %1137 = arith.mulf %1136, %1136 : vector<8x16xf32>
    %1138 = math.exp %1022 : vector<8x16xf32>
    %1139 = arith.divf %1137, %1138 : vector<8x16xf32>
    %cst_436 = arith.constant dense<0.000000e+00> : vector<8xf32>
    %1140 = vector.multi_reduction <add>, %1139, %cst_436 [1] : vector<8x16xf32> to vector<8xf32>
    %1141 = vector.shape_cast %1140 : vector<8xf32> to vector<8x1xf32>
    %cst_437 = arith.constant 1.600000e+01 : f32
    %1142 = vector.broadcast %cst_437 : f32 to vector<8x1xf32>
    %1143 = arith.subf %1131, %1142 : vector<8x1xf32>
    %1144 = arith.addf %1143, %1135 : vector<8x1xf32>
    %1145 = arith.addf %1144, %1141 : vector<8x1xf32>
    %cst_438 = arith.constant 5.000000e-01 : f32
    %1146 = vector.broadcast %cst_438 : f32 to vector<8x1xf32>
    %1147 = arith.mulf %1146, %1145 : vector<8x1xf32>
    %1148 = arith.addf %985, %1147 : vector<8x1xf32>
    %1149 = arith.subf %1000, %1049 : vector<8x2xf32>
    %1150 = arith.mulf %1149, %1149 : vector<8x2xf32>
    %1151 = math.exp %1050 : vector<8x2xf32>
    %1152 = arith.divf %1150, %1151 : vector<8x2xf32>
    %cst_439 = arith.constant dense<0.000000e+00> : vector<8xf32>
    %1153 = vector.multi_reduction <add>, %1152, %cst_439 [1] : vector<8x2xf32> to vector<8xf32>
    %1154 = vector.shape_cast %1153 : vector<8xf32> to vector<8x1xf32>
    %cst_440 = arith.constant dense<0.000000e+00> : vector<8xf32>
    %1155 = vector.multi_reduction <add>, %1050, %cst_440 [1] : vector<8x2xf32> to vector<8xf32>
    %1156 = vector.shape_cast %1155 : vector<8xf32> to vector<8x1xf32>
    %cst_441 = arith.constant 3.67575407 : f32
    %1157 = vector.broadcast %cst_441 : f32 to vector<8x1xf32>
    %1158 = arith.addf %1154, %1157 : vector<8x1xf32>
    %1159 = arith.addf %1158, %1156 : vector<8x1xf32>
    %cst_442 = arith.constant 5.000000e-01 : f32
    %1160 = vector.broadcast %cst_442 : f32 to vector<8x1xf32>
    %1161 = arith.mulf %1160, %1159 : vector<8x1xf32>
    %1162 = arith.addf %999, %1161 : vector<8x1xf32>
    %1163 = vector.extract_strided_slice %0 {offsets = [56, 0], sizes = [8, 2], strides = [1, 1]} : vector<64x2xf32> to vector<8x2xf32>
    %1164 = vector.extract_strided_slice %12 {offsets = [56, 0], sizes = [8, 128], strides = [1, 1]} : vector<64x224xf32> to vector<8x128xf32>
    %1165 = vector.extract_strided_slice %12 {offsets = [56, 128], sizes = [8, 96], strides = [1, 1]} : vector<64x224xf32> to vector<8x96xf32>
    %c384_443 = arith.constant 384 : index
    %c0_444 = arith.constant 0 : index
    %1166 = vector.load %arg4[%c384_443, %c0_444] : memref<576x384xf32, #tpu.memory_space<vmem>>, vector<32x320xf32>
    %cst_445 = arith.constant dense<0.000000e+00> : vector<8x320xf32>
    %1167 = tpu.matmul %1128, %1166, %cst_445 {dimension_numbers = #tpu.dot_dimension_numbers<[1], [0], [0], [1], [0, 0, 1, 1], [], []>} : vector<8x32xf32>, vector<32x320xf32>, vector<8x320xf32> -> vector<8x320xf32>
    %c416_446 = arith.constant 416 : index
    %c0_447 = arith.constant 0 : index
    %1168 = vector.load %arg4[%c416_446, %c0_447] : memref<576x384xf32, #tpu.memory_space<vmem>>, vector<1x320xf32>
    %1169 = vector.broadcast %1168 : vector<1x320xf32> to vector<8x320xf32>
    %1170 = arith.addf %1167, %1169 : vector<8x320xf32>
    %1171 = vector.extract_strided_slice %1170 {offsets = [0, 0], sizes = [8, 128], strides = [1, 1]} : vector<8x320xf32> to vector<8x128xf32>
    %1172 = vector.extract_strided_slice %1170 {offsets = [0, 128], sizes = [8, 96], strides = [1, 1]} : vector<8x320xf32> to vector<8x96xf32>
    %1173 = vector.extract_strided_slice %1170 {offsets = [0, 256], sizes = [8, 64], strides = [1, 1]} : vector<8x320xf32> to vector<8x64xf32>
    %1174 = arith.addf %1164, %1171 : vector<8x128xf32>
    %cst_448 = arith.constant 0.000000e+00 : f32
    %1175 = vector.broadcast %cst_448 : f32 to vector<8x128xf32>
    %1176 = arith.maximumf %1174, %1175 : vector<8x128xf32>
    %c88_449 = arith.constant 88 : index
    %c0_450 = arith.constant 0 : index
    %1177 = vector.load %arg4[%c88_449, %c0_450] : memref<576x384xf32, #tpu.memory_space<vmem>>, vector<128x64xf32>
    %cst_451 = arith.constant dense<0.000000e+00> : vector<8x64xf32>
    %1178 = tpu.matmul %1176, %1177, %cst_451 {dimension_numbers = #tpu.dot_dimension_numbers<[1], [0], [0], [1], [0, 0, 1, 1], [], []>} : vector<8x128xf32>, vector<128x64xf32>, vector<8x64xf32> -> vector<8x64xf32>
    %c216_452 = arith.constant 216 : index
    %c0_453 = arith.constant 0 : index
    %1179 = vector.load %arg4[%c216_452, %c0_453] : memref<576x384xf32, #tpu.memory_space<vmem>>, vector<1x64xf32>
    %1180 = vector.broadcast %1179 : vector<1x64xf32> to vector<8x64xf32>
    %1181 = arith.addf %1178, %1180 : vector<8x64xf32>
    %1182 = vector.extract_strided_slice %1181 {offsets = [0, 0], sizes = [8, 16], strides = [1, 1]} : vector<8x64xf32> to vector<8x16xf32>
    %1183 = vector.extract_strided_slice %1181 {offsets = [0, 16], sizes = [8, 16], strides = [1, 1]} : vector<8x64xf32> to vector<8x16xf32>
    %1184 = vector.extract_strided_slice %1181 {offsets = [0, 32], sizes = [8, 16], strides = [1, 1]} : vector<8x64xf32> to vector<8x16xf32>
    %1185 = vector.extract_strided_slice %1181 {offsets = [0, 48], sizes = [8, 16], strides = [1, 1]} : vector<8x64xf32> to vector<8x16xf32>
    %c7 = arith.constant 7 : index
    %c0_454 = arith.constant 0 : index
    %c0_455 = arith.constant 0 : index
    %1186 = vector.load %arg3[%c7, %c0_454, %c0_455] : memref<8x8x16xf32, #tpu.memory_space<vmem>>, vector<1x8x16xf32>
    %1187 = vector.shape_cast %1186 : vector<1x8x16xf32> to vector<8x16xf32>
    %cst_456 = arith.constant 5.000000e-01 : f32
    %1188 = vector.broadcast %cst_456 : f32 to vector<8x16xf32>
    %1189 = arith.mulf %1188, %1183 : vector<8x16xf32>
    %1190 = math.exp %1189 : vector<8x16xf32>
    %1191 = arith.mulf %1187, %1190 : vector<8x16xf32>
    %1192 = arith.addf %1191, %1182 : vector<8x16xf32>
    %c224_457 = arith.constant 224 : index
    %c0_458 = arith.constant 0 : index
    %1193 = vector.load %arg4[%c224_457, %c0_458] : memref<576x384xf32, #tpu.memory_space<vmem>>, vector<16x64xf32>
    %cst_459 = arith.constant dense<0.000000e+00> : vector<8x64xf32>
    %1194 = tpu.matmul %1192, %1193, %cst_459 {dimension_numbers = #tpu.dot_dimension_numbers<[1], [0], [0], [1], [0, 0, 1, 1], [], []>} : vector<8x16xf32>, vector<16x64xf32>, vector<8x64xf32> -> vector<8x64xf32>
    %c240_460 = arith.constant 240 : index
    %c0_461 = arith.constant 0 : index
    %1195 = vector.load %arg4[%c240_460, %c0_461] : memref<576x384xf32, #tpu.memory_space<vmem>>, vector<1x64xf32>
    %1196 = vector.broadcast %1195 : vector<1x64xf32> to vector<8x64xf32>
    %1197 = arith.addf %1194, %1196 : vector<8x64xf32>
    %cst_462 = arith.constant 0.000000e+00 : f32
    %1198 = vector.broadcast %cst_462 : f32 to vector<8x64xf32>
    %1199 = arith.maximumf %1197, %1198 : vector<8x64xf32>
    %c248_463 = arith.constant 248 : index
    %c0_464 = arith.constant 0 : index
    %1200 = vector.load %arg4[%c248_463, %c0_464] : memref<576x384xf32, #tpu.memory_space<vmem>>, vector<64x224xf32>
    %cst_465 = arith.constant dense<0.000000e+00> : vector<8x224xf32>
    %1201 = tpu.matmul %1199, %1200, %cst_465 {dimension_numbers = #tpu.dot_dimension_numbers<[1], [0], [0], [1], [0, 0, 1, 1], [], []>} : vector<8x64xf32>, vector<64x224xf32>, vector<8x224xf32> -> vector<8x224xf32>
    %1202 = vector.extract_strided_slice %1201 {offsets = [0, 0], sizes = [8, 64], strides = [1, 1]} : vector<8x224xf32> to vector<8x64xf32>
    %1203 = vector.extract_strided_slice %1201 {offsets = [0, 128], sizes = [8, 96], strides = [1, 1]} : vector<8x224xf32> to vector<8x96xf32>
    %1204 = arith.addf %1202, %1173 : vector<8x64xf32>
    %cst_466 = arith.constant 0.000000e+00 : f32
    %1205 = vector.broadcast %cst_466 : f32 to vector<8x64xf32>
    %1206 = arith.maximumf %1204, %1205 : vector<8x64xf32>
    %c312_467 = arith.constant 312 : index
    %c0_468 = arith.constant 0 : index
    %1207 = vector.load %arg4[%c312_467, %c0_468] : memref<576x384xf32, #tpu.memory_space<vmem>>, vector<64x4xf32>
    %cst_469 = arith.constant dense<0.000000e+00> : vector<8x4xf32>
    %1208 = tpu.matmul %1206, %1207, %cst_469 {dimension_numbers = #tpu.dot_dimension_numbers<[1], [0], [0], [1], [0, 0, 1, 1], [], []>} : vector<8x64xf32>, vector<64x4xf32>, vector<8x4xf32> -> vector<8x4xf32>
    %c376_470 = arith.constant 376 : index
    %c0_471 = arith.constant 0 : index
    %1209 = vector.load %arg4[%c376_470, %c0_471] : memref<576x384xf32, #tpu.memory_space<vmem>>, vector<1x4xf32>
    %1210 = vector.broadcast %1209 : vector<1x4xf32> to vector<8x4xf32>
    %1211 = arith.addf %1208, %1210 : vector<8x4xf32>
    %1212 = vector.extract_strided_slice %1211 {offsets = [0, 0], sizes = [8, 2], strides = [1, 1]} : vector<8x4xf32> to vector<8x2xf32>
    %1213 = vector.extract_strided_slice %1211 {offsets = [0, 2], sizes = [8, 2], strides = [1, 1]} : vector<8x4xf32> to vector<8x2xf32>
    %1214 = arith.addf %1165, %1203 : vector<8x96xf32>
    %c424_472 = arith.constant 424 : index
    %c0_473 = arith.constant 0 : index
    %1215 = vector.load %arg4[%c424_472, %c0_473] : memref<576x384xf32, #tpu.memory_space<vmem>>, vector<32x96xf32>
    %cst_474 = arith.constant dense<0.000000e+00> : vector<8x96xf32>
    %1216 = tpu.matmul %1082, %1215, %cst_474 {dimension_numbers = #tpu.dot_dimension_numbers<[1], [0], [0], [1], [0, 0, 1, 1], [], []>} : vector<8x32xf32>, vector<32x96xf32>, vector<8x96xf32> -> vector<8x96xf32>
    %c456_475 = arith.constant 456 : index
    %c0_476 = arith.constant 0 : index
    %1217 = vector.load %arg4[%c456_475, %c0_476] : memref<576x384xf32, #tpu.memory_space<vmem>>, vector<1x96xf32>
    %1218 = vector.broadcast %1217 : vector<1x96xf32> to vector<8x96xf32>
    %1219 = arith.addf %1216, %1218 : vector<8x96xf32>
    %1220 = vector.extract_strided_slice %1214 {offsets = [0, 0], sizes = [8, 32], strides = [1, 1]} : vector<8x96xf32> to vector<8x32xf32>
    %1221 = vector.extract_strided_slice %1219 {offsets = [0, 0], sizes = [8, 32], strides = [1, 1]} : vector<8x96xf32> to vector<8x32xf32>
    %1222 = arith.addf %1220, %1221 : vector<8x32xf32>
    %1223 = arith.negf %1222 : vector<8x32xf32>
    %1224 = math.exp %1223 : vector<8x32xf32>
    %cst_477 = arith.constant 1.000000e+00 : f32
    %1225 = vector.broadcast %cst_477 : f32 to vector<8x32xf32>
    %1226 = arith.addf %1225, %1224 : vector<8x32xf32>
    %1227 = arith.divf %1225, %1226 : vector<8x32xf32>
    %1228 = vector.extract_strided_slice %1214 {offsets = [0, 32], sizes = [8, 32], strides = [1, 1]} : vector<8x96xf32> to vector<8x32xf32>
    %1229 = vector.extract_strided_slice %1219 {offsets = [0, 32], sizes = [8, 32], strides = [1, 1]} : vector<8x96xf32> to vector<8x32xf32>
    %1230 = arith.addf %1228, %1229 : vector<8x32xf32>
    %1231 = arith.negf %1230 : vector<8x32xf32>
    %1232 = math.exp %1231 : vector<8x32xf32>
    %cst_478 = arith.constant 1.000000e+00 : f32
    %1233 = vector.broadcast %cst_478 : f32 to vector<8x32xf32>
    %1234 = arith.addf %1233, %1232 : vector<8x32xf32>
    %1235 = arith.divf %1233, %1234 : vector<8x32xf32>
    %1236 = vector.extract_strided_slice %1214 {offsets = [0, 64], sizes = [8, 32], strides = [1, 1]} : vector<8x96xf32> to vector<8x32xf32>
    %1237 = vector.extract_strided_slice %1219 {offsets = [0, 64], sizes = [8, 32], strides = [1, 1]} : vector<8x96xf32> to vector<8x32xf32>
    %1238 = arith.mulf %1227, %1237 : vector<8x32xf32>
    %1239 = arith.addf %1236, %1238 : vector<8x32xf32>
    %1240 = math.tanh %1239 : vector<8x32xf32>
    %cst_479 = arith.constant 1.000000e+00 : f32
    %1241 = vector.broadcast %cst_479 : f32 to vector<8x32xf32>
    %1242 = arith.subf %1241, %1235 : vector<8x32xf32>
    %1243 = arith.mulf %1242, %1240 : vector<8x32xf32>
    %1244 = arith.mulf %1235, %1082 : vector<8x32xf32>
    %1245 = arith.addf %1243, %1244 : vector<8x32xf32>
    %c464_480 = arith.constant 464 : index
    %c0_481 = arith.constant 0 : index
    %1246 = vector.load %arg4[%c464_480, %c0_481] : memref<576x384xf32, #tpu.memory_space<vmem>>, vector<32x96xf32>
    %cst_482 = arith.constant dense<0.000000e+00> : vector<8x96xf32>
    %1247 = tpu.matmul %1245, %1246, %cst_482 {dimension_numbers = #tpu.dot_dimension_numbers<[1], [0], [0], [1], [0, 0, 1, 1], [], []>} : vector<8x32xf32>, vector<32x96xf32>, vector<8x96xf32> -> vector<8x96xf32>
    %c496_483 = arith.constant 496 : index
    %c0_484 = arith.constant 0 : index
    %1248 = vector.load %arg4[%c496_483, %c0_484] : memref<576x384xf32, #tpu.memory_space<vmem>>, vector<1x96xf32>
    %1249 = vector.broadcast %1248 : vector<1x96xf32> to vector<8x96xf32>
    %1250 = arith.addf %1247, %1249 : vector<8x96xf32>
    %1251 = vector.extract_strided_slice %1250 {offsets = [0, 0], sizes = [8, 32], strides = [1, 1]} : vector<8x96xf32> to vector<8x32xf32>
    %1252 = vector.extract_strided_slice %1172 {offsets = [0, 0], sizes = [8, 32], strides = [1, 1]} : vector<8x96xf32> to vector<8x32xf32>
    %1253 = arith.addf %1251, %1252 : vector<8x32xf32>
    %1254 = arith.negf %1253 : vector<8x32xf32>
    %1255 = math.exp %1254 : vector<8x32xf32>
    %cst_485 = arith.constant 1.000000e+00 : f32
    %1256 = vector.broadcast %cst_485 : f32 to vector<8x32xf32>
    %1257 = arith.addf %1256, %1255 : vector<8x32xf32>
    %1258 = arith.divf %1256, %1257 : vector<8x32xf32>
    %1259 = vector.extract_strided_slice %1250 {offsets = [0, 32], sizes = [8, 32], strides = [1, 1]} : vector<8x96xf32> to vector<8x32xf32>
    %1260 = vector.extract_strided_slice %1172 {offsets = [0, 32], sizes = [8, 32], strides = [1, 1]} : vector<8x96xf32> to vector<8x32xf32>
    %1261 = arith.addf %1259, %1260 : vector<8x32xf32>
    %1262 = arith.negf %1261 : vector<8x32xf32>
    %1263 = math.exp %1262 : vector<8x32xf32>
    %cst_486 = arith.constant 1.000000e+00 : f32
    %1264 = vector.broadcast %cst_486 : f32 to vector<8x32xf32>
    %1265 = arith.addf %1264, %1263 : vector<8x32xf32>
    %1266 = arith.divf %1264, %1265 : vector<8x32xf32>
    %1267 = vector.extract_strided_slice %1250 {offsets = [0, 64], sizes = [8, 32], strides = [1, 1]} : vector<8x96xf32> to vector<8x32xf32>
    %1268 = vector.extract_strided_slice %1172 {offsets = [0, 64], sizes = [8, 32], strides = [1, 1]} : vector<8x96xf32> to vector<8x32xf32>
    %1269 = arith.mulf %1258, %1268 : vector<8x32xf32>
    %1270 = arith.addf %1267, %1269 : vector<8x32xf32>
    %1271 = math.tanh %1270 : vector<8x32xf32>
    %cst_487 = arith.constant 1.000000e+00 : f32
    %1272 = vector.broadcast %cst_487 : f32 to vector<8x32xf32>
    %1273 = arith.subf %1272, %1266 : vector<8x32xf32>
    %1274 = arith.mulf %1273, %1271 : vector<8x32xf32>
    %1275 = arith.mulf %1266, %1128 : vector<8x32xf32>
    %1276 = arith.addf %1274, %1275 : vector<8x32xf32>
    %1277 = vector.extract_strided_slice %13 {offsets = [7, 0, 0], sizes = [1, 8, 8], strides = [1, 1, 1]} : vector<8x8x8xf32> to vector<1x8x8xf32>
    %1278 = vector.shape_cast %1277 : vector<1x8x8xf32> to vector<8x8xf32>
    %cst_488 = arith.constant dense<0.000000e+00> : vector<8x32xf32>
    %1279 = tpu.matmul %1278, %1276, %cst_488 {dimension_numbers = #tpu.dot_dimension_numbers<[1], [0], [0], [1], [0, 0, 1, 1], [], []>} : vector<8x8xf32>, vector<8x32xf32>, vector<8x32xf32> -> vector<8x32xf32>
    %1280 = vector.extract_strided_slice %17 {offsets = [7, 0, 0], sizes = [1, 8, 1], strides = [1, 1, 1]} : vector<8x8x1xf32> to vector<1x8x1xf32>
    %1281 = vector.shape_cast %1280 : vector<1x8x1xf32> to vector<8x1xf32>
    %1282 = vector.broadcast %1281 : vector<8x1xf32> to vector<8x32xf32>
    %1283 = arith.mulf %1279, %1282 : vector<8x32xf32>
    %c504_489 = arith.constant 504 : index
    %c0_490 = arith.constant 0 : index
    %1284 = vector.load %arg4[%c504_489, %c0_490] : memref<576x384xf32, #tpu.memory_space<vmem>>, vector<32x32xf32>
    %cst_491 = arith.constant dense<0.000000e+00> : vector<8x32xf32>
    %1285 = tpu.matmul %1276, %1284, %cst_491 {dimension_numbers = #tpu.dot_dimension_numbers<[1], [0], [0], [1], [0, 0, 1, 1], [], []>} : vector<8x32xf32>, vector<32x32xf32>, vector<8x32xf32> -> vector<8x32xf32>
    %c536_492 = arith.constant 536 : index
    %c0_493 = arith.constant 0 : index
    %1286 = vector.load %arg4[%c536_492, %c0_493] : memref<576x384xf32, #tpu.memory_space<vmem>>, vector<32x32xf32>
    %cst_494 = arith.constant dense<0.000000e+00> : vector<8x32xf32>
    %1287 = tpu.matmul %1283, %1286, %cst_494 {dimension_numbers = #tpu.dot_dimension_numbers<[1], [0], [0], [1], [0, 0, 1, 1], [], []>} : vector<8x32xf32>, vector<32x32xf32>, vector<8x32xf32> -> vector<8x32xf32>
    %1288 = arith.addf %1285, %1287 : vector<8x32xf32>
    %c568_495 = arith.constant 568 : index
    %c0_496 = arith.constant 0 : index
    %1289 = vector.load %arg4[%c568_495, %c0_496] : memref<576x384xf32, #tpu.memory_space<vmem>>, vector<1x32xf32>
    %1290 = vector.broadcast %1289 : vector<1x32xf32> to vector<8x32xf32>
    %1291 = arith.addf %1288, %1290 : vector<8x32xf32>
    %1292 = arith.subf %1185, %1183 : vector<8x16xf32>
    %cst_497 = arith.constant dense<0.000000e+00> : vector<8xf32>
    %1293 = vector.multi_reduction <add>, %1292, %cst_497 [1] : vector<8x16xf32> to vector<8xf32>
    %1294 = vector.shape_cast %1293 : vector<8xf32> to vector<8x1xf32>
    %1295 = arith.subf %1183, %1185 : vector<8x16xf32>
    %1296 = math.exp %1295 : vector<8x16xf32>
    %cst_498 = arith.constant dense<0.000000e+00> : vector<8xf32>
    %1297 = vector.multi_reduction <add>, %1296, %cst_498 [1] : vector<8x16xf32> to vector<8xf32>
    %1298 = vector.shape_cast %1297 : vector<8xf32> to vector<8x1xf32>
    %1299 = arith.subf %1182, %1184 : vector<8x16xf32>
    %1300 = arith.mulf %1299, %1299 : vector<8x16xf32>
    %1301 = math.exp %1185 : vector<8x16xf32>
    %1302 = arith.divf %1300, %1301 : vector<8x16xf32>
    %cst_499 = arith.constant dense<0.000000e+00> : vector<8xf32>
    %1303 = vector.multi_reduction <add>, %1302, %cst_499 [1] : vector<8x16xf32> to vector<8xf32>
    %1304 = vector.shape_cast %1303 : vector<8xf32> to vector<8x1xf32>
    %cst_500 = arith.constant 1.600000e+01 : f32
    %1305 = vector.broadcast %cst_500 : f32 to vector<8x1xf32>
    %1306 = arith.subf %1294, %1305 : vector<8x1xf32>
    %1307 = arith.addf %1306, %1298 : vector<8x1xf32>
    %1308 = arith.addf %1307, %1304 : vector<8x1xf32>
    %cst_501 = arith.constant 5.000000e-01 : f32
    %1309 = vector.broadcast %cst_501 : f32 to vector<8x1xf32>
    %1310 = arith.mulf %1309, %1308 : vector<8x1xf32>
    %1311 = arith.addf %1148, %1310 : vector<8x1xf32>
    %1312 = arith.subf %1163, %1212 : vector<8x2xf32>
    %1313 = arith.mulf %1312, %1312 : vector<8x2xf32>
    %1314 = math.exp %1213 : vector<8x2xf32>
    %1315 = arith.divf %1313, %1314 : vector<8x2xf32>
    %cst_502 = arith.constant dense<0.000000e+00> : vector<8xf32>
    %1316 = vector.multi_reduction <add>, %1315, %cst_502 [1] : vector<8x2xf32> to vector<8xf32>
    %1317 = vector.shape_cast %1316 : vector<8xf32> to vector<8x1xf32>
    %cst_503 = arith.constant dense<0.000000e+00> : vector<8xf32>
    %1318 = vector.multi_reduction <add>, %1213, %cst_503 [1] : vector<8x2xf32> to vector<8xf32>
    %1319 = vector.shape_cast %1318 : vector<8xf32> to vector<8x1xf32>
    %cst_504 = arith.constant 3.67575407 : f32
    %1320 = vector.broadcast %cst_504 : f32 to vector<8x1xf32>
    %1321 = arith.addf %1317, %1320 : vector<8x1xf32>
    %1322 = arith.addf %1321, %1319 : vector<8x1xf32>
    %cst_505 = arith.constant 5.000000e-01 : f32
    %1323 = vector.broadcast %cst_505 : f32 to vector<8x1xf32>
    %1324 = arith.mulf %1323, %1322 : vector<8x1xf32>
    %1325 = arith.addf %1162, %1324 : vector<8x1xf32>
    %1326 = vector.shape_cast %1311 : vector<8x1xf32> to vector<1x8x1xf32>
    %cst_506 = arith.constant dense<0.000000e+00> : vector<1xf32>
    %1327 = vector.multi_reduction <add>, %1326, %cst_506 [1, 2] : vector<1x8x1xf32> to vector<1xf32>
    %1328 = vector.shape_cast %1327 : vector<1xf32> to vector<1x1x1xf32>
    %1329 = vector.extract %1328[0, 0, 0] : f32 from vector<1x1x1xf32>
    %1330 = vector.broadcast %1329 : f32 to vector<1x1xf32>
    %cst_507 = arith.constant 1.250000e-01 : f32
    %1331 = vector.broadcast %cst_507 : f32 to vector<1x1xf32>
    %1332 = arith.mulf %1330, %1331 : vector<1x1xf32>
    %c0_508 = arith.constant 0 : index
    %c0_509 = arith.constant 0 : index
    %1333 = vector.load %arg5[%c0_508, %c0_509] : memref<1x1xf32, #tpu.memory_space<vmem>>, vector<1x1xf32>
    tpu.vector_store %arg5[%c0_508, %c0_509], %1332 {strides = array<i32>} : memref<1x1xf32, #tpu.memory_space<vmem>>, vector<1x1xf32>,
    %1334 = vector.shape_cast %1325 : vector<8x1xf32> to vector<1x8x1xf32>
    %cst_510 = arith.constant dense<0.000000e+00> : vector<1xf32>
    %1335 = vector.multi_reduction <add>, %1334, %cst_510 [1, 2] : vector<1x8x1xf32> to vector<1xf32>
    %1336 = vector.shape_cast %1335 : vector<1xf32> to vector<1x1x1xf32>
    %1337 = vector.extract %1336[0, 0, 0] : f32 from vector<1x1x1xf32>
    %1338 = vector.broadcast %1337 : f32 to vector<1x1xf32>
    %cst_511 = arith.constant 1.250000e-01 : f32
    %1339 = vector.broadcast %cst_511 : f32 to vector<1x1xf32>
    %1340 = arith.mulf %1338, %1339 : vector<1x1xf32>
    %c0_512 = arith.constant 0 : index
    %c0_513 = arith.constant 0 : index
    %1341 = vector.load %arg6[%c0_512, %c0_513] : memref<1x1xf32, #tpu.memory_space<vmem>>, vector<1x1xf32>
    tpu.vector_store %arg6[%c0_512, %c0_513], %1340 {strides = array<i32>} : memref<1x1xf32, #tpu.memory_space<vmem>>, vector<1x1xf32>,
    %c0_514 = arith.constant 0 : index
    %c0_515 = arith.constant 0 : index
    %c0_516 = arith.constant 0 : index
    %1342 = vector.load %arg7[%c0_514, %c0_515, %c0_516] : memref<2x8x32xf32, #tpu.memory_space<vmem>>, vector<1x8x32xf32>
    %1343 = vector.shape_cast %1342 : vector<1x8x32xf32> to vector<8x32xf32>
    %1344 = vector.shape_cast %1245 : vector<8x32xf32> to vector<1x8x32xf32>
    tpu.vector_store %arg7[%c0_514, %c0_515, %c0_516], %1344 {strides = array<i32>} : memref<2x8x32xf32, #tpu.memory_space<vmem>>, vector<1x8x32xf32>,
    %c1_517 = arith.constant 1 : index
    %c0_518 = arith.constant 0 : index
    %c0_519 = arith.constant 0 : index
    %1345 = vector.load %arg7[%c1_517, %c0_518, %c0_519] : memref<2x8x32xf32, #tpu.memory_space<vmem>>, vector<1x8x32xf32>
    %1346 = vector.shape_cast %1345 : vector<1x8x32xf32> to vector<8x32xf32>
    %1347 = vector.shape_cast %1291 : vector<8x32xf32> to vector<1x8x32xf32>
    tpu.vector_store %arg7[%c1_517, %c0_518, %c0_519], %1347 {strides = array<i32>} : memref<2x8x32xf32, #tpu.memory_space<vmem>>, vector<1x8x32xf32>,
    return
  }
  func.func @transform_0(%arg0: i32) -> (i32, i32) {
    %c0_i32 = arith.constant 0 : i32
    %c0_i32_0 = arith.constant 0 : i32
    %c0_i32_1 = arith.constant 0 : i32
    return %c0_i32, %c0_i32_0 : i32, i32
  }
  func.func @transform_1(%arg0: i32) -> (i32, i32, i32) {
    %c0_i32 = arith.constant 0 : i32
    %c0_i32_0 = arith.constant 0 : i32
    %c0_i32_1 = arith.constant 0 : i32
    %c0_i32_2 = arith.constant 0 : i32
    return %c0_i32, %c0_i32_0, %c0_i32_1 : i32, i32, i32
  }
  func.func @transform_2(%arg0: i32) -> (i32, i32, i32) {
    %c0_i32 = arith.constant 0 : i32
    %c0_i32_0 = arith.constant 0 : i32
    %c0_i32_1 = arith.constant 0 : i32
    %c0_i32_2 = arith.constant 0 : i32
    return %c0_i32, %c0_i32_0, %c0_i32_1 : i32, i32, i32
  }
  func.func @transform_3(%arg0: i32) -> (i32, i32) {
    %c0_i32 = arith.constant 0 : i32
    %c0_i32_0 = arith.constant 0 : i32
    %c0_i32_1 = arith.constant 0 : i32
    return %c0_i32, %c0_i32_0 : i32, i32
  }
  func.func @transform_4(%arg0: i32) -> (i32, i32) {
    %c0_i32 = arith.constant 0 : i32
    %c0_i32_0 = arith.constant 0 : i32
    %c0_i32_1 = arith.constant 0 : i32
    return %c0_i32, %c0_i32_0 : i32, i32
  }
  func.func @transform_5(%arg0: i32) -> (i32, i32) {
    %c0_i32 = arith.constant 0 : i32
    %c0_i32_0 = arith.constant 0 : i32
    %c0_i32_1 = arith.constant 0 : i32
    return %c0_i32, %c0_i32_0 : i32, i32
  }
  func.func @transform_6(%arg0: i32) -> (i32, i32, i32) {
    %c0_i32 = arith.constant 0 : i32
    %c0_i32_0 = arith.constant 0 : i32
    %c0_i32_1 = arith.constant 0 : i32
    %c0_i32_2 = arith.constant 0 : i32
    return %c0_i32, %c0_i32_0, %c0_i32_1 : i32, i32, i32
  }
}

</mosaic_0001>

<bundles_post_ra>
// kernel: tpu_custom_call.1
= control target key start
LH: loop header
LB: loop body
LE: loop exit
PB: predicated region body
PF: predicated region fallthrough
CT: control target
= control target key end

     0   :  { %12 = vsyncpa [#allocation3], 0  ;;  %s12627_s0 = inlined_call_operand.vmem [shape: f32[64,2], index: 0, kind: input, shape index: {}]   ;;  %s12628_s1 = inlined_call_operand.vmem [shape: f32[8,8,8], index: 1, kind: input, shape index: {}]   ;;  %s12629_s2 = inlined_call_operand.hbm [shape: f32[8,8,16], index: 2, kind: input, shape index: {}]   ;;  %s12630_s3 = inlined_call_operand.hbm [shape: f32[576,384], index: 3, kind: input, shape index: {}]   ;;  %s12631_s4 = inlined_call_operand.hbm [shape: f32[1,1], index: 4, kind: output, shape index: {0}]   ;;  %s12632_s5 = inlined_call_operand.hbm [shape: f32[1,1], index: 5, kind: output, shape index: {1}]   ;;  %s12633_s6 = inlined_call_operand.hbm [shape: f32[2,8,32], index: 6, kind: output, shape index: {2}]  }
   0x1   :  { %13 = vsyncpa [#allocation6], 0 }
   0x2   :  { %14 = vsyncpa [#allocation4], 0 }
   0x3   :  { %15 = vsyncpa [#allocation9], 0  ;;  %s10168_s21 = smov [#allocation2]  }
   0x4   :  { %s25_s22 = sshll.u32 %s10168_s21, 4  ;;  %s26_s22 = int_to_ptr.vmem [resolvable:$true] %s25_s22 }
   0x5   :  { %s10068_s23 = scalar_lea.vmem %s26_s22, 1024  ;;  %p10073_p1 = scmp.lt.s32.totalorder %s26_s22, %s26_s22 }
   0x6   :  { %p10069_p0 = scmp.ne.s32.totalorder %s26_s22, %s10068_s23  ;;  %p10074_p2 = scmp.lt.s32.totalorder %s10068_s23, %s10068_s23 }
   0x8   :  { %p10075_p3 = por %p10074_p2, %p10073_p1 }
   0xa   :  { %p10076_p4 = pnand %p10075_p3, %p10069_p0 }
   0xc   :  { %10079 = shalt.err (!%p10076_p4)
}
   0xd   :  { %s10169_s24 = smov 128   ;;  %s10170_s25 = smov 8  }
   0xe   :  { %31 = dma.hbm_to_vmem [thread:$0]  %s12629_s2, 1024, %s26_s22, [#allocation3], %s10169_s24, %s10169_s24, %s10170_s25  }
   0xf   :  { %s10171_s28 = smov [#allocation5]  }
  0x10   :  { %s37_s29 = sshll.u32 %s10171_s28, 4  ;;  %s38_s29 = int_to_ptr.vmem [resolvable:$true] %s37_s29 }
  0x11   :  { %s10088_s30 = scalar_lea.vmem %s38_s29, 27648  ;;  %p10093_p6 = scmp.lt.s32.totalorder %s38_s29, %s38_s29 }
  0x12   :  { %p10089_p5 = scmp.ne.s32.totalorder %s38_s29, %s10088_s30  ;;  %p10094_p7 = scmp.lt.s32.totalorder %s10088_s30, %s10088_s30 }
  0x14   :  { %p10095_p8 = por %p10094_p7, %p10093_p6 }
  0x16   :  { %p10096_p9 = pnand %p10095_p8, %p10089_p5 }
  0x18   :  { %10099 = shalt.err (!%p10096_p9)
}
  0x19   :  { %s10172_s7 = smov 384   ;;  %s10173_s8 = smov 24  }
  0x1a   :  { %43 = dma.hbm_to_vmem [thread:$0]  %s12630_s3, 27648, %s38_s29, [#allocation6], %s10172_s7, %s10172_s7, %s10173_s8  }
  0x1b   :  { %10160 = dma.done.wait [#allocation3], 1024  }
  0x1c   :  { %10161 = vsyncadd [#allocation3], 4294966272 }
  0x1d   :  { %10162 = dma.done.wait [#allocation6], 27648  }
  0x1e   :  { %10163 = vsyncadd [#allocation6], 4294939648  ;;  %vm85_vm0 = vcmask 1041408   ;;  %vm60_vm1 = vcmask 15360   ;;  %v58_v0 = vld [vmem:[#allocation5] sm:$0x3] }
  0x1f   :  { %v50_v1 = vld [vmem:[%s12627_s0] sm:$0xff]  ;;  %v51_v2 = vld [vmem:[%s12627_s0 + $0x8] sm:$0xff]  ;;  %8690 = vmatprep.subr.msk.mxu0 %vm85_vm0, %v58_v0  ;;  %v52_v3 = vld [vmem:[%s12627_s0 + $0x10] sm:$0xff]  ;;  %v12635_v32 = vmov 0.0   ;;  %vm231_vm2 = vcmask 523264   ;;  %vm10175_vm3 = vmmov 0  }
  0x20   :  { %8692 = vmatprep.mubr.msk.f32.mxu0 %vm60_vm1, %v50_v1  ;;  %8691 = vmatpush3.msk.msra.mxu0 %vm85_vm0, %v58_v0  ;;  %v53_v4 = vld [vmem:[%s12627_s0 + $0x18] sm:$0xff]  ;;  %v217_v5 = vld [vmem:[#allocation5 + $0xe0] sm:$0xff]  ;;  %v215_v7 = vld [vmem:[#allocation5 + $0xc8] sm:$0xff]  ;;  %s10176_s27 = smov 112   ;;  %vm695_vm4 = vcmask 130048   ;;  %s10177_s28 = smov 64  }
  0x21   :  { %8693 = vmatmul.mubr.msk.f32.vlgmr.msra.gmra.mxu0 %vm60_vm1, %v51_v2  ;;  %v216_v6 = vld [vmem:[#allocation5 + $0xd8] sm:$0xff]  ;;  %272 = vmatprep.subr.mxu1 %v217_v5  ;;  %v10244_v8 = vld [vmem:[#allocation5 + $0x4d0] sm:$0xff]  ;;  %v214_v9 = vld [vmem:[#allocation5 + $0xc0] sm:$0xff]  ;;  %s10178_s29 = smov 96   ;;  %vm448_vm5 = vcmask 261120   ;;  %vm377_vm6 = vcmask 64512  }
  0x22   :  { %8695 = vmatprep.mubr.msk.f32.mxu0 %vm60_vm1, %v52_v3  ;;  %v10246_v10 = vld [vmem:[#allocation5 + $0x4c8] sm:$0xff]  ;;  %v54_v11 = vld [vmem:[%s12627_s0 + $0x20] sm:$0xff]  ;;  %273 = vmatpush1.msra.mxu1 %v216_v6  ;;  %v213_v12 = vld [vmem:[#allocation5 + $0xb0] sm:$0xff]  ;;  %s10179_s8 = smov 32   ;;  %s10180_s21 = smov 80   ;;  %vm8038_vm7 = vcmask 7168  }
  0x23   :  { %476 = vmatprep.subr.mxu0 %v10244_v8  ;;  %274 = vmatprep.subr.mxu1 %v215_v7  ;;  %v212_v13 = vld [vmem:[#allocation5 + $0xa8] sm:$0xff]  ;;  %v10253_v14 = vld [vmem:[#allocation5 + $0x4b8] sm:$0xff]  ;;  %v10256_v16 = vld [vmem:[#allocation5 + $0x4b0] sm:$0xff]  ;;  %s10183_s16 = smov [#allocation8]   ;;  %vm8051_vm8 = vcmask 0   ;;  %s10184_s19 = smov [#allocation10]  }
  0x24   :  { %477 = vmatpush1.msra.mxu0 %v10246_v10  ;;  %275 = vmatpush1.msra.mxu1 %v214_v9  ;;  %v211_v15 = vld [vmem:[#allocation5 + $0x98] sm:$0xff]  ;;  %v55_v17 = vld [vmem:[%s12627_s0 + $0x28] sm:$0xff]  ;;  %v210_v18 = vld [vmem:[#allocation5 + $0x90] sm:$0xff]  ;;  %s8086_s17 = sshll.u32 %s10183_s16, 4  ;;  %s8095_s20 = sshll.u32 %s10184_s19, 4  ;;  %s8087_s17 = int_to_ptr.vmem [resolvable:$true] %s8086_s17  ;;  %s12608_s20 = int_to_ptr.vmem [resolvable:$true] %s8095_s20 }
  0x25   :  { %8696 = vmatmul.mubr.msk.f32.gmra.mxu0 %vm60_vm1, %v53_v4  ;;  %276 = vmatprep.subr.mxu1 %v213_v12  ;;  %v56_v19 = vld [vmem:[%s12627_s0 + $0x30] sm:$0xff]  ;;  %v209_v20 = vld [vmem:[#allocation5 + $0x80] sm:$0xff]  ;;  %v57_v21 = vld [vmem:[%s12627_s0 + $0x38] sm:$0xff] }
  0x26   :  { %8698 = vmatprep.mubr.msk.f32.mxu0 %vm60_vm1, %v54_v11  ;;  %277 = vmatpush1.msra.mxu1 %v212_v13  ;;  %v208_v22 = vld [vmem:[#allocation5 + $0x78] sm:$0xff]  ;;  %v207_v23 = vld [vmem:[#allocation5 + $0x68] sm:$0xff]  ;;  %v10273_v24 = vld [vmem:[#allocation5 + $0x4a0] sm:$0xff]  ;;  %v221_v13 = vlaneseq }
  0x27   :  { %478 = vmatprep.subr.mxu0 %v10253_v14  ;;  %278 = vmatprep.subr.mxu1 %v211_v15  ;;  %v206_v25 = vld [vmem:[#allocation5 + $0x60] sm:$0xff]  ;;  %v10276_v26 = vld [vmem:[#allocation5 + $0x498] sm:$0xff]  ;;  %v205_v27 = vld [vmem:[#allocation5 + $0x50] sm:$0xff] }
  0x28   :  { %479 = vmatpush1.msra.mxu0 %v10256_v16  ;;  %279 = vmatpush1.msra.mxu1 %v210_v18  ;;  %v10279_v28 = vld [vmem:[#allocation5 + $0x488] sm:$0xff]  ;;  %v10282_v30 = vld [vmem:[#allocation5 + $0x480] sm:$0xff]  ;;  %v203_v31 = vld [vmem:[#allocation5 + $0x38] sm:$0xff]  ;;  %v10373_v15 = vshrl.u32 %v221_v13, 7 }
  0x29   :  { %8699 = vmatmul.mubr.msk.f32.gmra.mxu0 %vm60_vm1, %v55_v17  ;;  %280 = vmatprep.subr.mxu1 %v209_v20  ;;  %v204_v29 = vld [vmem:[#allocation5 + $0x48] sm:$0xff]  ;;  %v202_v33 = vld [vmem:[#allocation5 + $0x30] sm:$0xff]  ;;  %v59_v35 = vld [vmem:[#allocation5 + $0x18] ss:$0 sm:$0xff] }
  0x2a   :  { %8701 = vmatprep.mubr.msk.f32.mxu0 %vm60_vm1, %v56_v19  ;;  %281 = vmatpush1.msra.mxu1 %v208_v22  ;;  %v10290_v41 = vld [vmem:[#allocation5 + $0x270] sm:$0xff]  ;;  %v10293_v44 = vld [vmem:[#allocation5 + $0x258] sm:$0xff]  ;;  %v10298_v47 = vld [vmem:[#allocation5 + $0x240] sm:$0xff]  ;;  %v223_v17 = vsub.s32 0, %v10373_v15 }
  0x2b   :  { %282 = vmatprep.subr.mxu1 %v207_v23  ;;  %480 = vmatprep.subr.mxu0 %v10273_v24  ;;  %v10303_v50 = vld [vmem:[#allocation5 + $0x228] sm:$0xff]  ;;  %v10308_v52 = vld [vmem:[#allocation5 + $0x210] sm:$0xff]  ;;  %v10313_v55 = vld [vmem:[#allocation5 + $0x1f8] sm:$0xff] }
  0x2c   :  { %283 = vmatpush1.msra.mxu1 %v206_v25  ;;  %481 = vmatpush1.msra.mxu0 %v10276_v26  ;;  %v10318_v57 = vld [vmem:[#allocation5 + $0x1e0] sm:$0xff]  ;;  %v10323_v60 = vld [vmem:[#allocation5 + $0x1c8] sm:$0xff]  ;;  %v10328_v62 = vld [vmem:[#allocation5 + $0x1b0] sm:$0xff] }
  0x2d   :  { %8702 = vmatmul.mubr.msk.f32.gmra.mxu0 %vm60_vm1, %v57_v21  ;;  %284 = vmatprep.subr.mxu1 %v205_v27  ;;  %v10333_v1 = vld [vmem:[#allocation5 + $0x198] sm:$0xff]  ;;  %v10338_v2 = vld [vmem:[#allocation5 + $0x180] sm:$0xff]  ;;  %v10343_v5 = vld [vmem:[#allocation5 + $0x168] sm:$0xff] }
  0x2e   :  { %482 = vmatprep.subr.mxu0 %v10279_v28  ;;  %285 = vmatpush1.msra.mxu1 %v204_v29  ;;  %v10353_v7 = vld [vmem:[#allocation5 + $0x150] sm:$0xff]  ;;  %v10357_v9 = vld [vmem:[#allocation5 + $0x138] sm:$0xff]  ;;  %v10361_v11 = vld [vmem:[#allocation5 + $0x120] sm:$0xff] }
  0x2f   :  { %483 = vmatpush1.msra.mxu0 %v10282_v30  ;;  %516 = vmatprep.mubr.f32.mxu0 %v12635_v32  ;;  %v10365_v12 = vld [vmem:[#allocation5 + $0x108] sm:$0xff]  ;;  %v219_v19 = vld [vmem:[#allocation5 + $0xf0] ss:$8 sm:$0x3] }
  0x30   :  { %286 = vmatprep.subr.mxu1 %v203_v31  ;;  %320 = vmatprep.mubr.f32.mxu1 %v12635_v32  ;;  %v10376_v18 = vld [vmem:[#allocation5 + $0x4e0] ss:$8 sm:$0x7]  ;;  %v224_v21 = vrot.slane %v219_v19, %v223_v17 }
  0x31   :  { %517 = vmatmul.mubr.f32.vlgmr.msra.gmra.mxu0 %v12635_v32  ;;  %287 = vmatpush1.msra.mxu1 %v202_v33  ;;  %v10379_v20 = vrot.slane %v10376_v18, %v223_v17  ;;  %v12634_v33 = vsub.s32 1, %v10373_v15 }
  0x32   :  { %8715 = vmatprep.subr.mxu1 %v12635_v32  ;;  %8704 = vmatprep.subr.mxu0 %v12635_v32 }
  0x33   :  { %8712 = vmatprep.mubr.msk.f32.mxu0 %vm10175_vm3, %v12635_v32 }
  0xe1   :  { %v8694_v34 = vpop.f32.mrf.mxu0 }
  0xe2   :  { %v161_v39 = vadd.f32 %v8694_v34, %v59_v35 }
  0xe3   :  { %v155_v36 = vpop.f32.mrf.mxu0 }
  0xe4   :  { %v156_v37 = vadd.f32 %v155_v36, %v59_v35  ;;  %v195_v46 = vmax.f32 %v161_v39, 0.0  ;;  %v10387_v36 = vrot.slane %v219_v19, %v12634_v33 }
  0xe5   :  { %v8697_v38 = vpop.f32.mrf.mxu0 }
  0xe6   :  { %v194_v40 = vmax.f32 %v156_v37, 0.0  ;;  %v171_v48 = vadd.f32 %v8697_v38, %v59_v35  ;;  %12801 = vst [vmem:[#allocation15_spill] sm:$0xff] %v10387_v36 }
  0xe7   :  { %v165_v42 = vpop.f32.mrf.mxu0 }
  0xe8   :  { %8124 = vmatmul.mubr.msk.f32.vlgmr.msra.gmra.mxu1 %vm231_vm2, %v194_v40  ;;  %v166_v43 = vadd.f32 %v165_v42, %v59_v35  ;;  %v197_v53 = vmax.f32 %v171_v48, 0.0 }
  0xe9   :  { %326 = vmatprep.mubr.f32.mxu1 %v12635_v32  ;;  %v8700_v45 = vpop.f32.mrf.mxu0  ;;  %8716 = vmatpush3.msra.mxu1 %v10290_v41 }
  0xea   :  { %8717 = vmatprep.subr.mxu1 %v12635_v32  ;;  %v196_v49 = vmax.f32 %v166_v43, 0.0  ;;  %v181_v58 = vadd.f32 %v8700_v45, %v59_v35 }
  0xeb   :  { %8718 = vmatpush3.msra.mxu1 %v10293_v44  ;;  %v175_v51 = vpop.f32.mrf.mxu0 }
  0xec   :  { %8125 = vmatmul.mubr.msk.f32.gmra.mxu1 %vm231_vm2, %v195_v46  ;;  %8719 = vmatprep.subr.mxu1 %v12635_v32  ;;  %v176_v54 = vadd.f32 %v175_v51, %v59_v35  ;;  %v199_v63 = vmax.f32 %v181_v58, 0.0 }
  0xed   :  { %332 = vmatprep.mubr.f32.mxu1 %v12635_v32  ;;  %8720 = vmatpush3.msra.mxu1 %v10298_v47  ;;  %v8703_v56 = vpop.f32.mrf.mxu0 }
  0xee   :  { %8721 = vmatprep.subr.mxu1 %v12635_v32  ;;  %v198_v59 = vmax.f32 %v176_v54, 0.0  ;;  %v191_v3 = vadd.f32 %v8703_v56, %v59_v35 }
  0xef   :  { %8722 = vmatpush3.msra.mxu1 %v10303_v50  ;;  %v185_v61 = vpop.f32.mrf.mxu0 }
  0xf0   :  { %8126 = vmatmul.mubr.msk.f32.gmra.mxu1 %vm231_vm2, %v196_v49  ;;  %8723 = vmatprep.subr.mxu1 %v12635_v32  ;;  %v186_v0 = vadd.f32 %v185_v61, %v59_v35  ;;  %v201_v6 = vmax.f32 %v191_v3, 0.0 }
  0xf1   :  { %338 = vmatprep.mubr.f32.mxu1 %v12635_v32  ;;  %8724 = vmatpush3.msra.mxu1 %v10308_v52  ;;  %v518_v22 = vpop.f32.mrf.mxu0 }
  0xf2   :  { %8725 = vmatprep.subr.mxu1 %v12635_v32  ;;  %v200_v4 = vmax.f32 %v186_v0, 0.0  ;;  %v519_v23 = vadd.f32 %v518_v22, %v10379_v20  ;;  %v10423_v22 = vld [vmem:[#allocation5 + $0x4d8] sm:$0xff] }
  0xf3   :  { %8726 = vmatpush3.msra.mxu1 %v10313_v55  ;;  %8705 = vmatpush3.msra.mxu0 %v10423_v22 }
  0xf4   :  { %8127 = vmatmul.mubr.msk.f32.gmra.mxu1 %vm231_vm2, %v197_v53  ;;  %8727 = vmatprep.subr.mxu1 %v12635_v32 }
  0xf5   :  { %344 = vmatprep.mubr.f32.mxu1 %v12635_v32  ;;  %8728 = vmatpush3.msra.mxu1 %v10318_v57 }
  0xf6   :  { %8729 = vmatprep.subr.mxu1 %v12635_v32  ;;  %8706 = vmatprep.subr.mxu0 %v12635_v32 }
  0xf7   :  { %8730 = vmatpush3.msra.mxu1 %v10323_v60 }
  0xf8   :  { %8128 = vmatmul.mubr.msk.f32.gmra.mxu1 %vm231_vm2, %v198_v59  ;;  %8731 = vmatprep.subr.mxu1 %v12635_v32 }
  0xf9   :  { %350 = vmatprep.mubr.f32.mxu1 %v12635_v32  ;;  %8732 = vmatpush3.msra.mxu1 %v10328_v62 }
  0xfa   :  { %8733 = vmatprep.subr.mxu1 %v12635_v32 }
  0xfb   :  { %8734 = vmatpush3.msra.mxu1 %v10333_v1 }
  0xfc   :  { %8129 = vmatmul.mubr.msk.f32.gmra.mxu1 %vm231_vm2, %v199_v63  ;;  %8735 = vmatprep.subr.mxu1 %v12635_v32 }
  0xfd   :  { %356 = vmatprep.mubr.f32.mxu1 %v12635_v32  ;;  %8736 = vmatpush3.msra.mxu1 %v10338_v2 }
  0xfe   :  { %8737 = vmatprep.subr.mxu1 %v12635_v32 }
  0xff   :  { %8738 = vmatpush3.msra.mxu1 %v10343_v5 }
 0x100   :  { %8130 = vmatmul.mubr.msk.f32.gmra.mxu1 %vm231_vm2, %v200_v4  ;;  %8739 = vmatprep.subr.mxu1 %v12635_v32 }
 0x101   :  { %362 = vmatprep.mubr.f32.mxu1 %v12635_v32  ;;  %8740 = vmatpush3.msra.mxu1 %v10353_v7 }
 0x102   :  { %8741 = vmatprep.subr.mxu1 %v12635_v32 }
 0x103   :  { %8742 = vmatpush3.msra.mxu1 %v10357_v9 }
 0x104   :  { %8131 = vmatmul.mubr.msk.f32.gmra.mxu1 %vm231_vm2, %v201_v6  ;;  %8743 = vmatprep.subr.mxu1 %v12635_v32 }
 0x105   :  { %8744 = vmatpush3.msra.mxu1 %v10361_v11  ;;  %8747 = vmatprep.mubr.msk.f32.mxu1 %vm10175_vm3, %v12635_v32 }
 0x106   :  { %8745 = vmatprep.subr.mxu1 %v12635_v32 }
 0x107   :  { %8746 = vmatpush3.msra.mxu1 %v10365_v12 }
 0x108   :  { %8776 = vmatprep.subr.mxu1 %v12635_v32 }
 0x1a8   :  { %v322_v25 = vpop.f32.mrf.mxu1 }
 0x1a9   :  { %v323_v27 = vadd.f32 %v322_v25, %v224_v21  ;;  %v10429_v25 = vld [vmem:[#allocation5 + $0x4a8] sm:$0xff] }
 0x1aa   :  { %v10382_v29 = vpop.f32.mrf.mxu1 }
 0x1ab   :  { %v593_v31 = vadd.f32 %v519_v23, %v323_v27  ;;  %v10425_v23 = vld [vmem:[#allocation5 + $0x4c0] sm:$0xff]  ;;  %v10433_v27 = vld [vmem:[#allocation5 + $0x490] sm:$0xff] }
 0x1ac   :  { %v328_v34 = vpop.f32.mrf.mxu1  ;;  %8707 = vmatpush3.msra.mxu0 %v10425_v23 }
 0x1ad   :  { %v594_v35 = vmax.f32 %v593_v31, 0.0  ;;  %v10389_v37 = vadd.f32 %v328_v34, %v224_v21  ;;  %8708 = vmatprep.subr.mxu0 %v12635_v32  ;;  %v10444_v31 = vld [vmem:[#allocation5 + $0x288] ss:$0 sm:$0xff] }
 0x1ae   :  { %v330_v38 = vpop.f32.mrf.mxu1  ;;  %8709 = vmatpush3.msra.mxu0 %v10429_v25 }
 0x1af   :  { %v10392_v39 = vadd.f32 %v330_v38, %v10387_v36  ;;  %8748 = vmatmul.mubr.f32.vlgmr.msra.gmra.mxu1 %v594_v35  ;;  %8710 = vmatprep.subr.mxu0 %v12635_v32 }
 0x1b0   :  { %v334_v40 = vpop.f32.mrf.mxu1  ;;  %8784 = vmatprep.mubr.msk.f32.mxu1 %vm10175_vm3, %v12635_v32  ;;  %8711 = vmatpush3.msra.mxu0 %v10433_v27 }
 0x1b1   :  { %12802 = vst [vmem:[#allocation16_spill] sm:$0xff] %v10392_v39  ;;  %v10396_v42 = vadd.f32 %v334_v40, %v224_v21  ;;  %8713 = vmatmul.mubr.f32.vlgmr.msra.gmra.mxu0 %v12635_v32  ;;  %8750 = vmatprep.subr.mxu0 %v12635_v32 }
 0x1b2   :  { %v336_v43 = vpop.f32.mrf.mxu1  ;;  %8754 = vmatprep.mubr.msk.f32.mxu0 %vm10175_vm3, %v12635_v32 }
 0x1b3   :  { %12803 = vst [vmem:[#allocation17_spill] sm:$0xff] %v10396_v42  ;;  %v10399_v45 = vadd.f32 %v336_v43, %v10387_v36 }
 0x1b4   :  { %v340_v46 = vpop.f32.mrf.mxu1 }
 0x1b5   :  { %12804 = vst [vmem:[#allocation18_spill] sm:$0xff] %v10399_v45  ;;  %v10401_v48 = vadd.f32 %v340_v46, %v224_v21  ;;  %v10450_v46 = vld [vmem:[#allocation5 + $0x2b8] sm:$0xff] }
 0x1b6   :  { %v342_v49 = vpop.f32.mrf.mxu1  ;;  %8751 = vmatpush3.msra.mxu0 %v10450_v46 }
 0x1b7   :  { %12805 = vst [vmem:[#allocation19_spill] sm:$0xff] %v10401_v48  ;;  %v10404_v51 = vadd.f32 %v342_v49, %v10387_v36  ;;  %8752 = vmatprep.subr.mxu0 %v12635_v32  ;;  %v10454_v49 = vld [vmem:[#allocation5 + $0x2a0] sm:$0xff]  ;;  %v10533_v48 = vld [vmem:[#allocation5 + $0x558] ss:$0 sm:$0xff] }
 0x1b8   :  { %v346_v53 = vpop.f32.mrf.mxu1  ;;  %8753 = vmatpush3.msra.mxu0 %v10454_v49 }
 0x1b9   :  { %12806 = vst [vmem:[#allocation20_spill] sm:$0xff] %v10404_v51  ;;  %v10406_v54 = vadd.f32 %v346_v53, %v224_v21  ;;  %v10457_v53 = vld [vmem:[#allocation5 + $0x540] sm:$0xff]  ;;  %v10529_v51 = vld [vmem:[#allocation5 + $0x2e8] sm:$0xff] }
 0x1ba   :  { %v348_v56 = vpop.f32.mrf.mxu1  ;;  %8777 = vmatpush3.msra.mxu1 %v10457_v53  ;;  %12827 = vst [vmem:[#allocation40_spill] sm:$0xff] %v10529_v51 }
 0x1bb   :  { %12807 = vst [vmem:[#allocation21_spill] sm:$0xff] %v10406_v54  ;;  %v10409_v58 = vadd.f32 %v348_v56, %v10387_v36  ;;  %v10459_v56 = vld [vmem:[#allocation5 + $0x528] sm:$0xff]  ;;  %8778 = vmatprep.subr.mxu1 %v12635_v32  ;;  %v10526_v54 = vld [vmem:[#allocation5 + $0x2f0] sm:$0xff] }
 0x1bc   :  { %v352_v59 = vpop.f32.mrf.mxu1  ;;  %8779 = vmatpush3.msra.mxu1 %v10459_v56  ;;  %12826 = vst [vmem:[#allocation39_spill] sm:$0xff] %v10526_v54 }
 0x1bd   :  { %12808 = vst [vmem:[#allocation22_spill] sm:$0xff] %v10409_v58  ;;  %v10411_v61 = vadd.f32 %v352_v59, %v224_v21  ;;  %v10462_v59 = vld [vmem:[#allocation5 + $0x398] sm:$0xff]  ;;  %8780 = vmatprep.subr.mxu1 %v12635_v32  ;;  %v10523_v58 = vld [vmem:[#allocation5 + $0x300] sm:$0xff] }
 0x1be   :  { %v354_v63 = vpop.f32.mrf.mxu1  ;;  %805 = vmatprep.subr.mxu0 %v10462_v59  ;;  %12825 = vst [vmem:[#allocation38_spill] sm:$0xff] %v10523_v58 }
 0x1bf   :  { %12809 = vst [vmem:[#allocation23_spill] sm:$0xff] %v10411_v61  ;;  %v10414_v0 = vadd.f32 %v354_v63, %v10387_v36  ;;  %v10465_v63 = vld [vmem:[#allocation5 + $0x510] sm:$0xff]  ;;  %v10520_v61 = vld [vmem:[#allocation5 + $0x308] sm:$0xff] }
 0x1c0   :  { %v358_v3 = vpop.f32.mrf.mxu1  ;;  %8781 = vmatpush3.msra.mxu1 %v10465_v63  ;;  %12824 = vst [vmem:[#allocation37_spill] sm:$0xff] %v10520_v61 }
 0x1c1   :  { %12810 = vst [vmem:[#allocation24_spill] sm:$0xff] %v10414_v0  ;;  %v10416_v4 = vadd.f32 %v358_v3, %v224_v21  ;;  %v10470_v3 = vld [vmem:[#allocation5 + $0x4f8] sm:$0xff]  ;;  %8782 = vmatprep.subr.mxu1 %v12635_v32 }
 0x1c2   :  { %v360_v6 = vpop.f32.mrf.mxu1  ;;  %8783 = vmatpush3.msra.mxu1 %v10470_v3  ;;  %v10517_v0 = vld [vmem:[#allocation5 + $0x318] sm:$0xff] }
 0x1c3   :  { %12811 = vst [vmem:[#allocation25_spill] sm:$0xff] %v10416_v4  ;;  %v10419_v13 = vadd.f32 %v360_v6, %v10387_v36  ;;  %8785 = vmatmul.mubr.f32.vlgmr.msra.gmra.mxu1 %v12635_v32  ;;  %8787 = vmatprep.subr.mxu1 %v12635_v32  ;;  %v12816_v4 = vmov 0.0   ;;  %12823 = vst [vmem:[#allocation36_spill] sm:$0xff] %v10517_v0 }
 0x1c4   :  { %v364_v17 = vpop.f32.mrf.mxu1  ;;  %8795 = vmatprep.mubr.msk.f32.mxu1 %vm10175_vm3, %v12635_v32  ;;  %v10493_v32 = vld [vmem:[#allocation5 + $0x368] sm:$0xff] }
 0x1c5   :  { %12812 = vst [vmem:[#allocation26_spill] sm:$0xff] %v10419_v13  ;;  %v10421_v19 = vadd.f32 %v364_v17, %v224_v21  ;;  %v10480_v17 = vpop.f32.mrf.mxu0  ;;  %v10487_v13 = vld [vmem:[#allocation5 + $0x380] sm:$0xff] }
 0x1c6   :  { %v10442_v21 = vpop.f32.mrf.mxu1 }
 0x1c7   :  { %12813 = vst [vmem:[#allocation27_spill] sm:$0xff] %v10421_v19  ;;  %12814 = vst [vmem:[#allocation28_spill] sm:$0xff] %v10442_v21  ;;  %v10485_v19 = vld [vmem:[#allocation5 + $0x390] sm:$0xff] }
 0x26f   :  { %v678_v34 = vpop.f32.mrf.mxu1 }
 0x270   :  { %v10447_v35 = vadd.f32 %v678_v34, %v10444_v31 }
 0x271   :  { %v8749_v38 = vpop.f32.mrf.mxu1  ;;  %v10482_v34 = vpop.f32.mrf.mxu0 }
 0x272   :  { %12815 = vst [vmem:[#allocation29_spill] sm:$0xff] %v10447_v35  ;;  %v683_v40 = vmul.f32 0.5, %v10447_v35 }
 0x273   :  { %v8714_v38 = vpop.f32.mrf.mxu0 }
 0x274   :  { %v684_v43 = vmul.f32 1.442695, %v683_v40  ;;  %v682_v40 = vld [vmem:[#allocation2] sm:$0xff] }
 0x275   :  { %v10497_v38 = vld [vmem:[#allocation5 + $0x360] sm:$0xff] }
 0x276   :  { %9693 = vpow2.f32 %v684_v43  ;;  %12817 = vst [vmem:[#allocation30_spill] sm:$0xff] %v10497_v38 }
 0x283   :  { %v9694_v6 = vpop.eup %9693  ;;  %v1016_v45 = vpop.f32.mrf.mxu1 }
 0x284   :  { %687 = vrot.lane.b32.xlu0 %v9694_v6, %s10176_s27  ;;  %v10490_v6 = vld [vmem:[#allocation5 + $0x378] sm:$0xff]  ;;  %v1017_v42 = vadd.f32 %v1016_v45, %v10533_v48  ;;  %v10553_v45 = vld [vmem:[#allocation5 + $0x408] sm:$0xff] }
 0x285   :  { %v8786_v39 = vpop.f32.mrf.mxu1  ;;  %12832 = vst [vmem:[#allocation45_spill] sm:$0xff] %v10553_v45 }
 0x286   :  { %v10549_v39 = vld [vmem:[#allocation5 + $0x420] sm:$0xff] }
 0x287   :  { %12831 = vst [vmem:[#allocation44_spill] sm:$0xff] %v10549_v39 }
 0x288   :  { %1028 = vrot.lane.b32.xlu0 %v1017_v42, %s10177_s28 }
 0x2f6   :  { %v688_v43 = vpop.permute.xlu0 %687 }
 0x2f7   :  { %v690_v33 = vmul.f32 %v688_v43, %v682_v40  ;;  %v10503_v40 = vld [vmem:[#allocation5 + $0x348] sm:$0xff]  ;;  %v10509_v43 = vld [vmem:[#allocation5 + $0x330] sm:$0xff] }
 0x2f8   :  { %12819 = vst [vmem:[#allocation32_spill] sm:$0xff] %v10503_v40  ;;  %12821 = vst [vmem:[#allocation34_spill] sm:$0xff] %v10509_v43 }
 0x2f9   :  { %v691_v21 = vadd.f32 %v690_v33, %v10447_v35  ;;  %v10500_v33 = vld [vmem:[#allocation5 + $0x350] sm:$0xff]  ;;  %v10512_v35 = vld [vmem:[#allocation5 + $0x320] sm:$0xff] }
 0x2fa   :  { %12818 = vst [vmem:[#allocation31_spill] sm:$0xff] %v10500_v33  ;;  %12822 = vst [vmem:[#allocation35_spill] sm:$0xff] %v10512_v35 }
 0x2fb   :  { %8755 = vmatmul.mubr.msk.f32.vlgmr.msra.gmra.mxu0 %vm695_vm4, %v691_v21  ;;  %v10506_v21 = vld [vmem:[#allocation5 + $0x338] sm:$0xff] }
 0x2fc   :  { %806 = vmatpush1.msra.mxu0 %v10485_v19  ;;  %853 = vmatprep.mubr.f32.mxu0 %v12816_v4  ;;  %12820 = vst [vmem:[#allocation33_spill] sm:$0xff] %v10506_v21 }
 0x2fd   :  { %807 = vmatprep.subr.mxu0 %v10487_v13 }
 0x2fe   :  { %808 = vmatpush1.msra.mxu0 %v10490_v6 }
 0x2ff   :  { %809 = vmatprep.subr.mxu0 %v10493_v32 }
 0x300   :  { %810 = vmatpush1.msra.mxu0 %v10497_v38 }
 0x301   :  { %811 = vmatprep.subr.mxu0 %v10500_v33 }
 0x302   :  { %812 = vmatpush1.msra.mxu0 %v10503_v40 }
 0x303   :  { %813 = vmatprep.subr.mxu0 %v10506_v21 }
 0x304   :  { %814 = vmatpush1.msra.mxu0 %v10509_v43  ;;  %v10540_v43 = vld [vmem:[#allocation5 + $0x450] sm:$0xff] }
 0x305   :  { %815 = vmatprep.subr.mxu0 %v10512_v35  ;;  %12829 = vst [vmem:[#allocation42_spill] sm:$0xff] %v10540_v43 }
 0x306   :  { %816 = vmatpush1.msra.mxu0 %v10517_v0 }
 0x307   :  { %817 = vmatprep.subr.mxu0 %v10520_v61 }
 0x308   :  { %818 = vmatpush1.msra.mxu0 %v10523_v58  ;;  %v10537_v58 = vld [vmem:[#allocation5 + $0x2d0] ss:$0 sm:$0xff] }
 0x309   :  { %819 = vmatprep.subr.mxu0 %v10526_v54  ;;  %12828 = vst [vmem:[#allocation41_spill] sm:$0xff] %v10537_v58 }
 0x30a   :  { %820 = vmatpush1.msra.mxu0 %v10529_v51  ;;  %v10543_v51 = vld [vmem:[#allocation5 + $0x438] sm:$0xff] }
 0x30b   :  { %8757 = vmatprep.subr.mxu0 %v12816_v4  ;;  %12830 = vst [vmem:[#allocation43_spill] sm:$0xff] %v10543_v51 }
 0x3bb   :  { %v765_v61 = vpop.f32.mrf.mxu0 }
 0x3bc   :  { %v766_v54 = vadd.f32 %v765_v61, %v10537_v58  ;;  %v10563_v61 = vld [vmem:[#allocation5 + $0x3d8] sm:$0xff] }
 0x3bd   :  { %v8756_v0 = vpop.f32.mrf.mxu0  ;;  %12834 = vst [vmem:[#allocation47_spill] sm:$0xff] %v10563_v61 }
 0x3be   :  { %v769_v35 = vmax.f32 %v766_v54, 0.0  ;;  %v10557_v54 = vld [vmem:[#allocation5 + $0x3f0] sm:$0xff]  ;;  %v10567_v0 = vld [vmem:[#allocation5 + $0x3c0] sm:$0xff] }
 0x3bf   :  { %12833 = vst [vmem:[#allocation46_spill] sm:$0xff] %v10557_v54  ;;  %12835 = vst [vmem:[#allocation48_spill] sm:$0xff] %v10567_v0 }
 0x3c0   :  { %8133 = vmatmul.mubr.msk.f32.vlgmr.msra.gmra.mxu0 %vm231_vm2, %v769_v35  ;;  %v10571_v35 = vld [vmem:[#allocation5 + $0x3a8] sm:$0xff] }
 0x3c1   :  { %8758 = vmatpush3.msra.mxu0 %v10540_v43  ;;  %8773 = vmatprep.mubr.msk.f32.mxu0 %vm10175_vm3, %v12816_v4  ;;  %12836 = vst [vmem:[#allocation49_spill] sm:$0xff] %v10571_v35 }
 0x3c2   :  { %8759 = vmatprep.subr.mxu0 %v12816_v4 }
 0x3c3   :  { %8760 = vmatpush3.msra.mxu0 %v10543_v51 }
 0x3c4   :  { %8761 = vmatprep.subr.mxu0 %v12816_v4 }
 0x3c5   :  { %8762 = vmatpush3.msra.mxu0 %v10549_v39 }
 0x3c6   :  { %8763 = vmatprep.subr.mxu0 %v12816_v4 }
 0x3c7   :  { %8764 = vmatpush3.msra.mxu0 %v10553_v45 }
 0x3c8   :  { %8765 = vmatprep.subr.mxu0 %v12816_v4 }
 0x3c9   :  { %8766 = vmatpush3.msra.mxu0 %v10557_v54  ;;  %v443_v54 = vsub.s32 2, %v10373_v15 }
 0x3ca   :  { %8767 = vmatprep.subr.mxu0 %v12816_v4 }
 0x3cb   :  { %8768 = vmatpush3.msra.mxu0 %v10563_v61  ;;  %v10577_v45 = vrot.slane %v10376_v18, %v443_v54 }
 0x3cc   :  { %8769 = vmatprep.subr.mxu0 %v12816_v4 }
 0x3cd   :  { %8770 = vmatpush3.msra.mxu0 %v10567_v0  ;;  %12837 = vst [vmem:[#allocation50_spill] sm:$0xff] %v10577_v45  ;;  %v590_v61 = vadd.f32 %v10482_v34, %v10577_v45  ;;  %v325_v0 = vadd.f32 %v10382_v29, %v10387_v36  ;;  %v1029_v34 = vpop.permute.xlu0 %1028 }
 0x3ce   :  { %8771 = vmatprep.subr.mxu0 %v12816_v4 }
 0x3cf   :  { %8772 = vmatpush3.msra.mxu0 %v10571_v35 }
 0x3d0   :  { %8798 = vmatprep.subr.mxu0 %v12816_v4 }
 0x480   :  { %v855_v39 = vpop.f32.mrf.mxu0 }
 0x481   :  { %v860_v51 = vadd.f32 %v855_v39, %v590_v61 }
 0x482   :  { %v857_v43 = vpop.f32.mrf.mxu0 }
 0x483   :  { %v861_v58 = vmax.f32 %v860_v51, 0.0  ;;  %v944_v21 = vadd.f32 %v857_v43, %v325_v0  ;;  %v10587_v51 = vld [vmem:[#allocation5 + $0x5b8] sm:$0xff] }
 0x484   :  { %8788 = vmatpush3.msra.mxu1 %v10587_v51 }
 0x485   :  { %v1020_v40 = vadd.f32 %v1017_v42, %v944_v21  ;;  %8774 = vmatmul.mubr.msk.f32.vlgmr.msra.gmra.mxu0 %vm231_vm2, %v861_v58  ;;  %v10589_v42 = vld [vmem:[#allocation5 + $0x5a0] sm:$0xff]  ;;  %8789 = vmatprep.subr.mxu1 %v12816_v4  ;;  %v10593_v58 = vld [vmem:[#allocation5 + $0x588] sm:$0xff] }
 0x486   :  { %8800 = vmatprep.mubr.msk.f32.mxu0 %vm10175_vm3, %v12816_v4  ;;  %8790 = vmatpush3.msra.mxu1 %v10589_v42 }
 0x487   :  { %v8135_v35 = vmul.f32 -1.442695, %v1020_v40  ;;  %8791 = vmatprep.subr.mxu1 %v12816_v4 }
 0x488   :  { %8792 = vmatpush3.msra.mxu1 %v10593_v58 }
 0x489   :  { %9695 = vpow2.f32 %v8135_v35  ;;  %8793 = vmatprep.subr.mxu1 %v12816_v4 }
 0x496   :  { %v9696_v54 = vpop.eup %9695 }
 0x497   :  { %v1024_v33 = vadd.f32 1.0, %v9696_v54 }
 0x499   :  { %9697 = vrcp.f32 %v1024_v33  ;;  %v10597_v33 = vld [vmem:[#allocation5 + $0x570] sm:$0xff] }
 0x49a   :  { %12838 = vst [vmem:[#allocation51_spill] sm:$0xff] %v10597_v33  ;;  %8794 = vmatpush3.msra.mxu1 %v10597_v33 }
 0x49b   :  { %8803 = vmatprep.subr.mxu1 %v12816_v4 }
 0x4a6   :  { %v9698_v45 = vpop.eup %9697 }
 0x4a7   :  { %v1031_v38 = vmul.f32 %v9698_v45, %v1029_v34 }
 0x4a9   :  { %1033 = vrot.lane.b32.xlu1 %v1031_v38, %s10177_s28  ;;  %v12839_v38 = vsub.s32 1, %v10373_v15  ;;  %v1038_v15 = vsub.f32 1.0, %v9698_v45 }
 0x4ab   :  { %v10604_v40 = vrot.slane %v10376_v18, %v12839_v38  ;;  %v1044_v18 = vmul.f32 0.0, %v9698_v45 }
 0x4ad   :  { %12840 = vst [vmem:[#allocation52_spill] sm:$0xff] %v10604_v40  ;;  %v521_v43 = vadd.f32 %v10480_v17, %v10604_v40  ;;  %v10624_v17 = vld [vmem:[#allocation5 + $0x5d0] ss:$0 sm:$0xff] }
 0x51b   :  { %v1034_v29 = vpop.permute.xlu1 %1033 }
 0x51c   :  { %v1036_v39 = vadd.f32 %v1034_v29, %v944_v21 }
 0x51e   :  { %9699 = vtanh.f32 %v1036_v39 }
 0x52b   :  { %v9700_v21 = vpop.eup %9699 }
 0x52c   :  { %1040 = vrot.lane.b32.xlu1 %v9700_v21, %s10178_s29 }
 0x530   :  { %1134 = vrot.lane.b32.xlu1 %v521_v43, %s10177_s28 }
 0x545   :  { %v10612_v61 = vpop.f32.mrf.mxu0 }
 0x546   :  { %12841 = vst [vmem:[#allocation53_spill] sm:$0xff] %v10612_v61 }
 0x547   :  { %v8775_v0 = vpop.f32.mrf.mxu0 }
 0x59e   :  { %v1041_v35 = vpop.permute.xlu1 %1040 }
 0x59f   :  { %v1043_v54 = vmul.f32 %v1041_v35, %v1038_v15 }
 0x5a1   :  { %v10614_v34 = vadd.f32 %v1044_v18, %v1043_v54 }
 0x5a2   :  { %v1135_v54 = vpop.permute.xlu1 %1134 }
 0x5a3   :  { %12842 = vst [vmem:[#allocation54_spill] sm:$0xff] %v10614_v34  ;;  %1052 = vrot.lane.b32.xlu0 %v10614_v34, %s10178_s29 }
 0x615   :  { %v10618_v29 = vpop.permute.xlu0 %1052 }
 0x616   :  { %8796 = vmatmul.mubr.msk.f32.vlgmr.msra.gmra.mxu1 %vm448_vm5, %v10618_v29 }
 0x617   :  { %8811 = vmatprep.mubr.msk.f32.mxu1 %vm10175_vm3, %v12816_v4 }
 0x6d6   :  { %v1122_v39 = vpop.f32.mrf.mxu1 }
 0x6d7   :  { %v1123_v45 = vadd.f32 %v1122_v39, %v10624_v17 }
 0x6d8   :  { %v8797_v38 = vpop.f32.mrf.mxu1 }
 0x6d9   :  { %v1126_v21 = vadd.f32 %v1123_v45, %v521_v43  ;;  %v369_v43 = vld [vmem:[%s12628_s1] sm:$0xff] }
 0x6db   :  { %v8137_v0 = vmul.f32 -1.442695, %v1126_v21 }
 0x6dd   :  { %9701 = vpow2.f32 %v8137_v0  ;;  %v378_v0 = vsel %vm377_vm6, %v369_v43, 0.0 }
 0x6ea   :  { %v9702_v15 = vpop.eup %9701 }
 0x6eb   :  { %v1130_v35 = vadd.f32 1.0, %v9702_v15 }
 0x6ed   :  { %9703 = vrcp.f32 %v1130_v35  ;;  %v10656_v35 = vld [vmem:[#allocation5 + $0x5e8] sm:$0xff] }
 0x6fa   :  { %v9704_v18 = vpop.eup %9703 }
 0x6fb   :  { %v1137_v61 = vmul.f32 %v9704_v18, %v1135_v54  ;;  %v1144_v33 = vsub.f32 1.0, %v9704_v18  ;;  %v1150_v38 = vmul.f32 0.0, %v9704_v18  ;;  %v10673_v18 = vld [vmem:[#allocation5 + $0x660] sm:$0xff]  ;;  %v10677_v54 = vld [vmem:[#allocation5 + $0x648] sm:$0xff] }
 0x6fd   :  { %1139 = vrot.lane.b32.xlu0 %v1137_v61, %s10177_s28 }
 0x76f   :  { %v1140_v36 = vpop.permute.xlu0 %1139 }
 0x770   :  { %v1142_v40 = vadd.f32 %v1140_v36, %v1123_v45  ;;  %v10634_v36 = vld [vmem:[#allocation5 + $0x690] sm:$0xff]  ;;  %v10652_v45 = vld [vmem:[#allocation5 + $0x600] sm:$0xff] }
 0x771   :  { %8804 = vmatpush3.msra.mxu1 %v10634_v36 }
 0x772   :  { %9705 = vtanh.f32 %v1142_v40  ;;  %v10636_v40 = vld [vmem:[#allocation5 + $0x678] sm:$0xff]  ;;  %8805 = vmatprep.subr.mxu1 %v12816_v4 }
 0x773   :  { %8806 = vmatpush3.msra.mxu1 %v10636_v40 }
 0x774   :  { %8807 = vmatprep.subr.mxu1 %v12816_v4 }
 0x775   :  { %8808 = vmatpush3.msra.mxu1 %v10673_v18 }
 0x776   :  { %8809 = vmatprep.subr.mxu1 %v12816_v4 }
 0x777   :  { %8810 = vmatpush3.msra.mxu1 %v10677_v54 }
 0x778   :  { %1478 = vmatprep.subr.mxu1 %v10244_v8 }
 0x77f   :  { %v9706_v34 = vpop.eup %9705 }
 0x780   :  { %1146 = vrot.lane.b32.xlu1 %v9706_v34, %s10178_s29  ;;  %v10646_v34 = vld [vmem:[#allocation5 + $0x618] sm:$0xff] }
 0x7a4   :  { %379 = vadd.xlane.f32.xlu1 %v378_v0 }
 0x7f2   :  { %v1147_v39 = vpop.permute.xlu1 %1146 }
 0x7f3   :  { %v1149_v21 = vmul.f32 %v1147_v39, %v1144_v33  ;;  %v10642_v33 = vld [vmem:[#allocation5 + $0x630] sm:$0xff] }
 0x7f5   :  { %v1151_v15 = vadd.f32 %v1150_v38, %v1149_v21 }
 0x7f7   :  { %1153 = vrot.lane.b32.xlu0 %v1151_v15, %s10178_s29 }
 0x82d   :  { %v380_v39 = vpop.xlane.xlu1 %379 }
 0x82e   :  { %9707 = vrcp.f32 %v380_v39 }
 0x869   :  { %v1154_v61 = vpop.permute.xlu0 %1153 }
 0x86a   :  { %8799 = vmatpush3.msra.mxu0 %v1154_v61 }
 0x86b   :  { %8801 = vmatmul.mubr.msk.f32.vlgmr.msra.gmra.mxu0 %vm377_vm6, %v369_v43  ;;  %8814 = vmatprep.subr.mxu0 %v12816_v4  ;;  %v9708_v43 = vpop.eup %9707 }
 0x86c   :  { %8815 = vmatpush3.msra.mxu0 %v10642_v33  ;;  %8822 = vmatprep.mubr.msk.f32.mxu0 %vm10175_vm3, %v12816_v4 }
 0x86d   :  { %8816 = vmatprep.subr.mxu0 %v12816_v4 }
 0x86e   :  { %8817 = vmatpush3.msra.mxu0 %v10646_v34 }
 0x86f   :  { %8818 = vmatprep.subr.mxu0 %v12816_v4 }
 0x870   :  { %8819 = vmatpush3.msra.mxu0 %v10652_v45 }
 0x871   :  { %8820 = vmatprep.subr.mxu0 %v12816_v4 }
 0x872   :  { %8821 = vmatpush3.msra.mxu0 %v10656_v35 }
 0x873   :  { %8823 = vmatmul.mubr.msk.f32.vlgmr.msra.gmra.mxu0 %vm448_vm5, %v1154_v61  ;;  %8825 = vmatprep.subr.mxu0 %v12816_v4 }
 0x874   :  { %8826 = vmatpush3.msra.mxu0 %v10423_v22  ;;  %8833 = vmatprep.mubr.msk.f32.mxu0 %vm10175_vm3, %v12816_v4 }
 0x875   :  { %8827 = vmatprep.subr.mxu0 %v12816_v4 }
 0x876   :  { %8828 = vmatpush3.msra.mxu0 %v10425_v23 }
 0x877   :  { %8829 = vmatprep.subr.mxu0 %v12816_v4 }
 0x878   :  { %8830 = vmatpush3.msra.mxu0 %v10429_v25 }
 0x879   :  { %8831 = vmatprep.subr.mxu0 %v12816_v4 }
 0x87a   :  { %8832 = vmatpush3.msra.mxu0 %v10433_v27 }
 0x87b   :  { %8871 = vmatprep.subr.mxu0 %v12816_v4 }
 0x92b   :  { %v1225_v38 = vpop.f32.mrf.mxu0 }
 0x92c   :  { %v1229_v21 = vmul.f32 %v9708_v43, %v1225_v38  ;;  %v12855_v38 = vld [vmem:[#allocation41_spill] sm:$0xff] }
 0x92d   :  { %v8802_v0 = vpop.f32.mrf.mxu0 }
 0x92e   :  { %8812 = vmatmul.mubr.msk.f32.vlgmr.msra.gmra.mxu1 %vm448_vm5, %v1229_v21 }
 0x92f   :  { %1479 = vmatpush1.msra.mxu1 %v10246_v10  ;;  %1518 = vmatprep.mubr.f32.mxu1 %v12816_v4  ;;  %v10691_v10 = vld [vmem:[#allocation5 + $0x6a8] ss:$0 sm:$0xff] }
 0x930   :  { %1480 = vmatprep.subr.mxu1 %v10253_v14 }
 0x931   :  { %1481 = vmatpush1.msra.mxu1 %v10256_v16 }
 0x932   :  { %1482 = vmatprep.subr.mxu1 %v10273_v24 }
 0x933   :  { %v1379_v15 = vpop.f32.mrf.mxu0  ;;  %1483 = vmatpush1.msra.mxu1 %v10276_v26 }
 0x934   :  { %1484 = vmatprep.subr.mxu1 %v10279_v28 }
 0x935   :  { %v8824_v8 = vpop.f32.mrf.mxu0  ;;  %1485 = vmatpush1.msra.mxu1 %v10282_v30 }
 0x936   :  { %8836 = vmatprep.subr.mxu1 %v12816_v4  ;;  %v12856_v8 = vld [vmem:[#allocation42_spill] sm:$0xff] }
 0x9ee   :  { %v1307_v61 = vpop.f32.mrf.mxu1 }
 0x9ef   :  { %v1380_v39 = vadd.f32 %v1379_v15, %v1307_v61  ;;  %v12857_v61 = vld [vmem:[#allocation43_spill] sm:$0xff] }
 0x9f0   :  { %v8813_v43 = vpop.f32.mrf.mxu1 }
 0x9f1   :  { %v10694_v14 = vadd.f32 %v10691_v10, %v1380_v39  ;;  %v12858_v39 = vld [vmem:[#allocation44_spill] sm:$0xff]  ;;  %v12859_v43 = vld [vmem:[#allocation45_spill] sm:$0xff] }
 0x9f3   :  { %8142 = vmatmul.mubr.msk.f32.vlgmr.msra.gmra.mxu1 %vm448_vm5, %v10694_v14  ;;  %8834 = vmatmul.mubr.msk.f32.vlgmr.msra.gmra.mxu0 %vm448_vm5, %v10694_v14 }
 0x9f4   :  { %8837 = vmatpush3.msra.mxu1 %v10290_v41  ;;  %8868 = vmatprep.mubr.msk.f32.mxu1 %vm10175_vm3, %v12816_v4 }
 0x9f5   :  { %8838 = vmatprep.subr.mxu1 %v12816_v4  ;;  %8872 = vmatpush3.msra.mxu0 %v10450_v46 }
 0x9f6   :  { %8839 = vmatpush3.msra.mxu1 %v10293_v44  ;;  %8873 = vmatprep.subr.mxu0 %v12816_v4 }
 0x9f7   :  { %8840 = vmatprep.subr.mxu1 %v12816_v4  ;;  %8874 = vmatpush3.msra.mxu0 %v10454_v49 }
 0x9f8   :  { %8841 = vmatpush3.msra.mxu1 %v10298_v47  ;;  %8875 = vmatprep.mubr.msk.f32.mxu0 %vm10175_vm3, %v12816_v4 }
 0x9f9   :  { %8842 = vmatprep.subr.mxu1 %v12816_v4  ;;  %1771 = vmatprep.subr.mxu0 %v10462_v59 }
 0x9fa   :  { %8843 = vmatpush3.msra.mxu1 %v10303_v50 }
 0x9fb   :  { %8844 = vmatprep.subr.mxu1 %v12816_v4 }
 0x9fc   :  { %8845 = vmatpush3.msra.mxu1 %v10308_v52 }
 0x9fd   :  { %8846 = vmatprep.subr.mxu1 %v12816_v4 }
 0x9fe   :  { %8847 = vmatpush3.msra.mxu1 %v10313_v55 }
 0x9ff   :  { %8848 = vmatprep.subr.mxu1 %v12816_v4 }
 0xa00   :  { %8849 = vmatpush3.msra.mxu1 %v10318_v57 }
 0xa01   :  { %8850 = vmatprep.subr.mxu1 %v12816_v4 }
 0xa02   :  { %8851 = vmatpush3.msra.mxu1 %v10323_v60 }
 0xa03   :  { %8852 = vmatprep.subr.mxu1 %v12816_v4 }
 0xa04   :  { %8853 = vmatpush3.msra.mxu1 %v10328_v62 }
 0xa05   :  { %8854 = vmatprep.subr.mxu1 %v12816_v4 }
 0xa06   :  { %8855 = vmatpush3.msra.mxu1 %v10333_v1 }
 0xa07   :  { %8856 = vmatprep.subr.mxu1 %v12816_v4 }
 0xa08   :  { %8857 = vmatpush3.msra.mxu1 %v10338_v2 }
 0xa09   :  { %8858 = vmatprep.subr.mxu1 %v12816_v4 }
 0xa0a   :  { %8859 = vmatpush3.msra.mxu1 %v10343_v5  ;;  %v1668_v5 = vld [vmem:[#allocation2 + $0x8] sm:$0xff] }
 0xa0b   :  { %8860 = vmatprep.subr.mxu1 %v12816_v4 }
 0xa0c   :  { %8861 = vmatpush3.msra.mxu1 %v10353_v7 }
 0xa0d   :  { %8862 = vmatprep.subr.mxu1 %v12816_v4 }
 0xa0e   :  { %8863 = vmatpush3.msra.mxu1 %v10357_v9 }
 0xa0f   :  { %8864 = vmatprep.subr.mxu1 %v12816_v4 }
 0xa10   :  { %8865 = vmatpush3.msra.mxu1 %v10361_v11 }
 0xa11   :  { %8866 = vmatprep.subr.mxu1 %v12816_v4 }
 0xa12   :  { %8867 = vmatpush3.msra.mxu1 %v10365_v12  ;;  %v12844_v12 = vld [vmem:[#allocation30_spill] sm:$0xff] }
 0xa13   :  { %8897 = vmatprep.subr.mxu1 %v12816_v4 }
 0xab3   :  { %v1520_v16 = vpop.f32.mrf.mxu1  ;;  %v10740_v24 = vpop.f32.mrf.mxu0 }
 0xab4   :  { %v1521_v26 = vadd.f32 %v1520_v16, %v10379_v20  ;;  %v12860_v16 = vld [vmem:[#allocation46_spill] sm:$0xff] }
 0xab5   :  { %v8835_v28 = vpop.f32.mrf.mxu0  ;;  %v10758_v44 = vpop.f32.mrf.mxu1 }
 0xab6   :  { %v1595_v30 = vadd.f32 %v1521_v26, %v10389_v37  ;;  %v12845_v37 = vld [vmem:[#allocation31_spill] sm:$0xff]  ;;  %v12862_v28 = vld [vmem:[#allocation48_spill] sm:$0xff] }
 0xab7   :  { %v12861_v26 = vld [vmem:[#allocation47_spill] sm:$0xff] }
 0xab8   :  { %v1596_v41 = vmax.f32 %v1595_v30, 0.0  ;;  %v12863_v30 = vld [vmem:[#allocation49_spill] sm:$0xff] }
 0xaba   :  { %8869 = vmatmul.mubr.f32.vlgmr.msra.gmra.mxu1 %v1596_v41  ;;  %v12864_v41 = vld [vmem:[#allocation50_spill] sm:$0xff] }
 0xabb   :  { %8898 = vmatpush3.msra.mxu1 %v10457_v53  ;;  %8905 = vmatprep.mubr.msk.f32.mxu1 %vm10175_vm3, %v12816_v4  ;;  %v12847_v53 = vld [vmem:[#allocation33_spill] sm:$0xff] }
 0xabc   :  { %8899 = vmatprep.subr.mxu1 %v12816_v4 }
 0xabd   :  { %8900 = vmatpush3.msra.mxu1 %v10459_v56  ;;  %v12848_v56 = vld [vmem:[#allocation34_spill] sm:$0xff] }
 0xabe   :  { %8901 = vmatprep.subr.mxu1 %v12816_v4 }
 0xabf   :  { %8902 = vmatpush3.msra.mxu1 %v10465_v63  ;;  %v12849_v63 = vld [vmem:[#allocation35_spill] sm:$0xff] }
 0xac0   :  { %8903 = vmatprep.subr.mxu1 %v12816_v4 }
 0xac1   :  { %8904 = vmatpush3.msra.mxu1 %v10470_v3  ;;  %v12851_v3 = vld [vmem:[#allocation37_spill] sm:$0xff] }
 0xac2   :  { %8906 = vmatmul.mubr.msk.f32.vlgmr.msra.gmra.mxu1 %vm448_vm5, %v10618_v29  ;;  %8919 = vmatprep.subr.mxu1 %v12816_v4 }
 0xac3   :  { %8921 = vmatprep.mubr.msk.f32.mxu1 %vm10175_vm3, %v12816_v4 }
 0xb7a   :  { %v1663_v47 = vpop.f32.mrf.mxu1 }
 0xb7b   :  { %v10761_v50 = vadd.f32 %v1663_v47, %v10444_v31  ;;  %v12846_v31 = vld [vmem:[#allocation32_spill] sm:$0xff]  ;;  %v1592_v47 = vadd.f32 %v10740_v24, %v12864_v41  ;;  %v12866_v24 = vld [vmem:[#allocation51_spill] sm:$0xff] }
 0xb7c   :  { %v8870_v52 = vpop.f32.mrf.mxu1 }
 0xb7d   :  { %12843 = vst [vmem:[#allocation55_spill] sm:$0xff] %v10761_v50  ;;  %v1669_v55 = vmul.f32 0.5, %v10761_v50 }
 0xb7f   :  { %v1670_v57 = vmul.f32 1.442695, %v1669_v55 }
 0xb81   :  { %9709 = vpow2.f32 %v1670_v57 }
 0xb82   :  { %v1968_v60 = vpop.f32.mrf.mxu1 }
 0xb83   :  { %v1969_v2 = vadd.f32 %v1968_v60, %v10533_v48 }
 0xb84   :  { %v8907_v62 = vpop.f32.mrf.mxu1 }
 0xb85   :  { %v12865_v62 = vld [vmem:[#allocation16_spill] sm:$0xff] }
 0xb8e   :  { %v9710_v1 = vpop.eup %9709 }
 0xb8f   :  { %1673 = vrot.lane.b32.xlu0 %v9710_v1, %s10176_s27 }
 0xb93   :  { %1980 = vrot.lane.b32.xlu0 %v1969_v2, %s10177_s28 }
 0xc01   :  { %v1674_v7 = vpop.permute.xlu0 %1673 }
 0xc02   :  { %v1676_v9 = vmul.f32 %v1674_v7, %v1668_v5 }
 0xc04   :  { %v1677_v11 = vadd.f32 %v1676_v9, %v10761_v50 }
 0xc06   :  { %8876 = vmatmul.mubr.msk.f32.vlgmr.msra.gmra.mxu0 %vm695_vm4, %v1677_v11 }
 0xc07   :  { %1772 = vmatpush1.msra.mxu0 %v10485_v19  ;;  %1819 = vmatprep.mubr.f32.mxu0 %v12816_v4  ;;  %v12850_v19 = vld [vmem:[#allocation36_spill] sm:$0xff] }
 0xc08   :  { %1773 = vmatprep.subr.mxu0 %v10487_v13  ;;  %v12852_v13 = vld [vmem:[#allocation38_spill] sm:$0xff] }
 0xc09   :  { %1774 = vmatpush1.msra.mxu0 %v10490_v6  ;;  %v12853_v6 = vld [vmem:[#allocation39_spill] sm:$0xff] }
 0xc0a   :  { %1775 = vmatprep.subr.mxu0 %v10493_v32  ;;  %v12854_v32 = vld [vmem:[#allocation40_spill] sm:$0xff] }
 0xc0b   :  { %1776 = vmatpush1.msra.mxu0 %v12844_v12  ;;  %v1981_v12 = vpop.permute.xlu0 %1980 }
 0xc0c   :  { %1777 = vmatprep.subr.mxu0 %v12845_v37 }
 0xc0d   :  { %1778 = vmatpush1.msra.mxu0 %v12846_v31 }
 0xc0e   :  { %1779 = vmatprep.subr.mxu0 %v12847_v53 }
 0xc0f   :  { %1780 = vmatpush1.msra.mxu0 %v12848_v56 }
 0xc10   :  { %1781 = vmatprep.subr.mxu0 %v12849_v63 }
 0xc11   :  { %1782 = vmatpush1.msra.mxu0 %v12850_v19 }
 0xc12   :  { %1783 = vmatprep.subr.mxu0 %v12851_v3 }
 0xc13   :  { %1784 = vmatpush1.msra.mxu0 %v12852_v13 }
 0xc14   :  { %1785 = vmatprep.subr.mxu0 %v12853_v6  ;;  %v12868_v6 = vld [vmem:[#allocation54_spill] sm:$0xff] }
 0xc15   :  { %1786 = vmatpush1.msra.mxu0 %v12854_v32 }
 0xc16   :  { %8878 = vmatprep.subr.mxu0 %v12816_v4 }
 0xcc6   :  { %v1747_v29 = vpop.f32.mrf.mxu0 }
 0xcc7   :  { %v1748_v21 = vadd.f32 %v1747_v29, %v12855_v38 }
 0xcc8   :  { %v8877_v0 = vpop.f32.mrf.mxu0 }
 0xcc9   :  { %v1751_v15 = vmax.f32 %v1748_v21, 0.0  ;;  %v12869_v21 = vld [vmem:[#allocation52_spill] sm:$0xff] }
 0xcca   :  { %v1523_v0 = vadd.f32 %v10758_v44, %v12869_v21 }
 0xccb   :  { %8145 = vmatmul.mubr.msk.f32.vlgmr.msra.gmra.mxu0 %vm231_vm2, %v1751_v15 }
 0xccc   :  { %8879 = vmatpush3.msra.mxu0 %v12856_v8  ;;  %8894 = vmatprep.mubr.msk.f32.mxu0 %vm10175_vm3, %v12816_v4 }
 0xccd   :  { %8880 = vmatprep.subr.mxu0 %v12816_v4 }
 0xcce   :  { %8881 = vmatpush3.msra.mxu0 %v12857_v61 }
 0xccf   :  { %8882 = vmatprep.subr.mxu0 %v12816_v4 }
 0xcd0   :  { %8883 = vmatpush3.msra.mxu0 %v12858_v39 }
 0xcd1   :  { %8884 = vmatprep.subr.mxu0 %v12816_v4 }
 0xcd2   :  { %8885 = vmatpush3.msra.mxu0 %v12859_v43 }
 0xcd3   :  { %8886 = vmatprep.subr.mxu0 %v12816_v4 }
 0xcd4   :  { %8887 = vmatpush3.msra.mxu0 %v12860_v16 }
 0xcd5   :  { %8888 = vmatprep.subr.mxu0 %v12816_v4 }
 0xcd6   :  { %8889 = vmatpush3.msra.mxu0 %v12861_v26 }
 0xcd7   :  { %8890 = vmatprep.subr.mxu0 %v12816_v4 }
 0xcd8   :  { %8891 = vmatpush3.msra.mxu0 %v12862_v28 }
 0xcd9   :  { %8892 = vmatprep.subr.mxu0 %v12816_v4 }
 0xcda   :  { %8893 = vmatpush3.msra.mxu0 %v12863_v30 }
 0xcdb   :  { %8908 = vmatprep.subr.mxu0 %v12816_v4 }
 0xd8b   :  { %v1821_v52 = vpop.f32.mrf.mxu0 }
 0xd8c   :  { %v1826_v55 = vadd.f32 %v1821_v52, %v1592_v47 }
 0xd8d   :  { %v1823_v57 = vpop.f32.mrf.mxu0 }
 0xd8e   :  { %v1827_v60 = vmax.f32 %v1826_v55, 0.0  ;;  %v1901_v1 = vadd.f32 %v1823_v57, %v12865_v62 }
 0xd90   :  { %v1972_v5 = vadd.f32 %v1969_v2, %v1901_v1  ;;  %8895 = vmatmul.mubr.msk.f32.vlgmr.msra.gmra.mxu0 %vm231_vm2, %v1827_v60 }
 0xd91   :  { %8909 = vmatpush3.msra.mxu0 %v10587_v51  ;;  %8916 = vmatprep.mubr.msk.f32.mxu0 %vm10175_vm3, %v12816_v4 }
 0xd92   :  { %v8148_v7 = vmul.f32 -1.442695, %v1972_v5  ;;  %8910 = vmatprep.subr.mxu0 %v12816_v4 }
 0xd93   :  { %8911 = vmatpush3.msra.mxu0 %v10589_v42 }
 0xd94   :  { %9711 = vpow2.f32 %v8148_v7  ;;  %8912 = vmatprep.subr.mxu0 %v12816_v4 }
 0xd95   :  { %8913 = vmatpush3.msra.mxu0 %v10593_v58 }
 0xd96   :  { %8914 = vmatprep.subr.mxu0 %v12816_v4 }
 0xd97   :  { %8915 = vmatpush3.msra.mxu0 %v12866_v24 }
 0xd98   :  { %8935 = vmatprep.subr.mxu0 %v12816_v4 }
 0xda1   :  { %v9712_v2 = vpop.eup %9711 }
 0xda2   :  { %v1976_v9 = vadd.f32 1.0, %v9712_v2  ;;  %v370_v2 = vld [vmem:[%s12628_s1 + $0x8] sm:$0xff] }
 0xda4   :  { %9713 = vrcp.f32 %v1976_v9  ;;  %v381_v9 = vsel %vm377_vm6, %v370_v2, 0.0 }
 0xdb1   :  { %v9714_v11 = vpop.eup %9713 }
 0xdb2   :  { %v1983_v37 = vmul.f32 %v9714_v11, %v1981_v12  ;;  %v1990_v3 = vsub.f32 1.0, %v9714_v11  ;;  %v1996_v32 = vmul.f32 %v9714_v11, %v12868_v6 }
 0xdb4   :  { %1985 = vrot.lane.b32.xlu0 %v1983_v37, %s10177_s28 }
 0xe26   :  { %v1986_v31 = vpop.permute.xlu0 %1985 }
 0xe27   :  { %v1988_v53 = vadd.f32 %v1986_v31, %v1901_v1 }
 0xe29   :  { %9715 = vtanh.f32 %v1988_v53 }
 0xe36   :  { %v9716_v56 = vpop.eup %9715 }
 0xe37   :  { %1992 = vrot.lane.b32.xlu0 %v9716_v56, %s10178_s29 }
 0xe50   :  { %v10822_v63 = vpop.f32.mrf.mxu0 }
 0xe51   :  { %12867 = vst [vmem:[#allocation30_spill] sm:$0xff] %v10822_v63 }
 0xe52   :  { %v8896_v19 = vpop.f32.mrf.mxu0 }
 0xea9   :  { %v1993_v13 = vpop.permute.xlu0 %1992 }
 0xeaa   :  { %v1995_v29 = vmul.f32 %v1993_v13, %v1990_v3 }
 0xeac   :  { %v10825_v38 = vadd.f32 %v1996_v32, %v1995_v29  ;;  %v10882_v29 = vld [vmem:[#allocation5 + $0x4c8] sm:$0xff] }
 0xeae   :  { %1999 = vrot.lane.b32.xlu0 %v10825_v38, %s10178_s29 }
 0xeb2   :  { %2081 = vrot.lane.b32.xlu0 %v1523_v0, %s10177_s28 }
 0xf20   :  { %v10832_v15 = vpop.permute.xlu0 %1999 }
 0xf21   :  { %8917 = vmatmul.mubr.msk.f32.vlgmr.msra.gmra.mxu0 %vm448_vm5, %v10832_v15 }
 0xf22   :  { %8936 = vmatpush3.msra.mxu0 %v10642_v33  ;;  %8943 = vmatprep.mubr.msk.f32.mxu0 %vm10175_vm3, %v12816_v4 }
 0xf23   :  { %8937 = vmatprep.subr.mxu0 %v12816_v4 }
 0xf24   :  { %8938 = vmatpush3.msra.mxu0 %v10646_v34  ;;  %v2082_v60 = vpop.permute.xlu0 %2081 }
 0xf25   :  { %8939 = vmatprep.subr.mxu0 %v12816_v4 }
 0xf26   :  { %8940 = vmatpush3.msra.mxu0 %v10652_v45 }
 0xf27   :  { %8941 = vmatprep.subr.mxu0 %v12816_v4 }
 0xf28   :  { %8942 = vmatpush3.msra.mxu0 %v10656_v35 }
 0xf29   :  { %8946 = vmatprep.subr.mxu0 %v12816_v4 }
 0xfe1   :  { %v2069_v44 = vpop.f32.mrf.mxu0 }
 0xfe2   :  { %v2070_v8 = vadd.f32 %v2069_v44, %v10624_v17  ;;  %v10892_v44 = vld [vmem:[#allocation5 + $0x4a0] sm:$0xff] }
 0xfe3   :  { %v8918_v61 = vpop.f32.mrf.mxu0 }
 0xfe4   :  { %v2073_v39 = vadd.f32 %v2070_v8, %v1523_v0  ;;  %v10889_v0 = vld [vmem:[#allocation5 + $0x4b0] sm:$0xff]  ;;  %v10898_v61 = vld [vmem:[#allocation5 + $0x488] sm:$0xff] }
 0xfe6   :  { %v8150_v47 = vmul.f32 -1.442695, %v2073_v39  ;;  %v10901_v39 = vld [vmem:[#allocation5 + $0x480] sm:$0xff] }
 0xfe8   :  { %9717 = vpow2.f32 %v8150_v47 }
 0xff5   :  { %v9718_v52 = vpop.eup %9717 }
 0xff6   :  { %v2077_v55 = vadd.f32 1.0, %v9718_v52 }
 0xff8   :  { %9719 = vrcp.f32 %v2077_v55 }
0x1005   :  { %v9720_v57 = vpop.eup %9719 }
0x1006   :  { %v2084_v62 = vmul.f32 %v9720_v57, %v2082_v60  ;;  %v2091_v12 = vsub.f32 1.0, %v9720_v57  ;;  %v10912_v60 = vld [vmem:[#allocation5 + $0x270] sm:$0xff] }
0x1008   :  { %2086 = vrot.lane.b32.xlu0 %v2084_v62, %s10177_s28  ;;  %v10919_v62 = vld [vmem:[#allocation5 + $0x258] sm:$0xff] }
0x107a   :  { %v2087_v1 = vpop.permute.xlu0 %2086 }
0x107b   :  { %v2089_v5 = vadd.f32 %v2087_v1, %v2070_v8  ;;  %v10895_v8 = vld [vmem:[#allocation5 + $0x498] sm:$0xff]  ;;  %v10925_v1 = vld [vmem:[#allocation5 + $0x240] sm:$0xff] }
0x107d   :  { %9721 = vtanh.f32 %v2089_v5  ;;  %v10936_v5 = vld [vmem:[#allocation5 + $0x210] sm:$0xff] }
0x108a   :  { %v9722_v7 = vpop.eup %9721 }
0x108b   :  { %2093 = vrot.lane.b32.xlu0 %v9722_v7, %s10178_s29  ;;  %v10944_v7 = vld [vmem:[#allocation5 + $0x1e0] sm:$0xff] }
0x108f   :  { %2097 = vrot.lane.b32.xlu0 %v10694_v14, %s10179_s8 }
0x10ae   :  { %382 = vadd.xlane.f32.xlu0 %v381_v9  ;;  %v10956_v9 = vld [vmem:[#allocation5 + $0x198] sm:$0xff] }
0x10fd   :  { %v2094_v11 = vpop.permute.xlu0 %2093 }
0x10fe   :  { %v2096_v31 = vmul.f32 %v2094_v11, %v2091_v12  ;;  %v10960_v11 = vld [vmem:[#allocation5 + $0x180] sm:$0xff]  ;;  %v10964_v12 = vld [vmem:[#allocation5 + $0x168] sm:$0xff] }
0x1101   :  { %v2098_v37 = vpop.permute.xlu0 %2097 }
0x1102   :  { %v2100_v53 = vmul.f32 %v9720_v57, %v2098_v37  ;;  %v10968_v37 = vld [vmem:[#allocation5 + $0x150] sm:$0xff] }
0x1104   :  { %v2101_v56 = vadd.f32 %v2100_v53, %v2096_v31  ;;  %v10972_v31 = vld [vmem:[#allocation5 + $0x138] sm:$0xff]  ;;  %v10976_v53 = vld [vmem:[#allocation5 + $0x120] sm:$0xff] }
0x1106   :  { %2103 = vrot.lane.b32.xlu1 %v2101_v56, %s10178_s29  ;;  %v10980_v56 = vld [vmem:[#allocation5 + $0x108] sm:$0xff] }
0x1178   :  { %v2104_v19 = vpop.permute.xlu1 %2103 }
0x1179   :  { %8920 = vmatpush3.msra.mxu1 %v2104_v19  ;;  %8944 = vmatmul.mubr.msk.f32.vlgmr.msra.gmra.mxu0 %vm448_vm5, %v2104_v19 }
0x117a   :  { %8922 = vmatmul.mubr.msk.f32.vlgmr.msra.gmra.mxu1 %vm377_vm6, %v370_v2  ;;  %8924 = vmatprep.subr.mxu1 %v12816_v4  ;;  %v10952_v2 = vld [vmem:[#allocation5 + $0x1b0] sm:$0xff] }
0x117b   :  { %8925 = vmatpush3.msra.mxu1 %v10634_v36  ;;  %8932 = vmatprep.mubr.msk.f32.mxu1 %vm10175_vm3, %v12816_v4 }
0x117c   :  { %8926 = vmatprep.subr.mxu1 %v12816_v4  ;;  %8947 = vmatpush3.msra.mxu0 %v10423_v22  ;;  %v10874_v22 = vld [vmem:[#allocation5 + $0x4d0] sm:$0xff] }
0x117d   :  { %8927 = vmatpush3.msra.mxu1 %v10636_v40  ;;  %8948 = vmatprep.subr.mxu0 %v12816_v4 }
0x117e   :  { %8928 = vmatprep.subr.mxu1 %v12816_v4  ;;  %8949 = vmatpush3.msra.mxu0 %v10425_v23  ;;  %v383_v23 = vpop.xlane.xlu0 %382 }
0x117f   :  { %8929 = vmatpush3.msra.mxu1 %v10673_v18  ;;  %8950 = vmatprep.subr.mxu0 %v12816_v4  ;;  %9723 = vrcp.f32 %v383_v23 }
0x1180   :  { %8930 = vmatprep.subr.mxu1 %v12816_v4  ;;  %8951 = vmatpush3.msra.mxu0 %v10429_v25 }
0x1181   :  { %8931 = vmatpush3.msra.mxu1 %v10677_v54  ;;  %8952 = vmatprep.subr.mxu0 %v12816_v4 }
0x1182   :  { %2419 = vmatprep.subr.mxu1 %v10874_v22  ;;  %8953 = vmatpush3.msra.mxu0 %v10433_v27  ;;  %v10886_v27 = vld [vmem:[#allocation5 + $0x4b8] sm:$0xff] }
0x1183   :  { %8954 = vmatprep.mubr.msk.f32.mxu0 %vm10175_vm3, %v12816_v4  ;;  %8992 = vmatprep.subr.mxu0 %v12816_v4 }
0x118c   :  { %v9724_v14 = vpop.eup %9723 }
0x1239   :  { %v2321_v3 = vpop.f32.mrf.mxu0 }
0x123a   :  { %v2175_v25 = vpop.f32.mrf.mxu1 }
0x123b   :  { %v2179_v13 = vmul.f32 %v9724_v14, %v2175_v25  ;;  %v8945_v6 = vpop.f32.mrf.mxu0 }
0x123c   :  { %v8923_v32 = vpop.f32.mrf.mxu1 }
0x123d   :  { %8933 = vmatmul.mubr.msk.f32.vlgmr.msra.gmra.mxu1 %vm448_vm5, %v2179_v13  ;;  %v12870_v13 = vld [vmem:[#allocation17_spill] sm:$0xff] }
0x123e   :  { %2420 = vmatpush1.msra.mxu1 %v10882_v29  ;;  %2459 = vmatprep.mubr.f32.mxu1 %v12816_v4 }
0x123f   :  { %2421 = vmatprep.subr.mxu1 %v10886_v27 }
0x1240   :  { %2422 = vmatpush1.msra.mxu1 %v10889_v0 }
0x1241   :  { %2423 = vmatprep.subr.mxu1 %v10892_v44 }
0x1242   :  { %2424 = vmatpush1.msra.mxu1 %v10895_v8 }
0x1243   :  { %2425 = vmatprep.subr.mxu1 %v10898_v61 }
0x1244   :  { %2426 = vmatpush1.msra.mxu1 %v10901_v39 }
0x1245   :  { %8957 = vmatprep.subr.mxu1 %v12816_v4 }
0x12fd   :  { %v2249_v47 = vpop.f32.mrf.mxu1 }
0x12fe   :  { %v2322_v52 = vadd.f32 %v2321_v3, %v2249_v47 }
0x12ff   :  { %v8934_v55 = vpop.f32.mrf.mxu1 }
0x1300   :  { %v10906_v57 = vadd.f32 %v2322_v52, %v10691_v10  ;;  %v10993_v52 = vld [vmem:[#allocation5 + $0x540] sm:$0xff]  ;;  %v10999_v55 = vld [vmem:[#allocation5 + $0x528] sm:$0xff] }
0x1301   :  { %12871 = vst [vmem:[#allocation31_spill] sm:$0xff] %v10999_v55 }
0x1302   :  { %8155 = vmatmul.mubr.msk.f32.vlgmr.msra.gmra.mxu1 %vm448_vm5, %v10906_v57  ;;  %8955 = vmatmul.mubr.msk.f32.vlgmr.msra.gmra.mxu0 %vm448_vm5, %v10906_v57 }
0x1303   :  { %8958 = vmatpush3.msra.mxu1 %v10912_v60  ;;  %8989 = vmatprep.mubr.msk.f32.mxu1 %vm10175_vm3, %v12816_v4 }
0x1304   :  { %8959 = vmatprep.subr.mxu1 %v12816_v4  ;;  %8993 = vmatpush3.msra.mxu0 %v10450_v46  ;;  %v10932_v46 = vld [vmem:[#allocation5 + $0x228] sm:$0xff] }
0x1305   :  { %8960 = vmatpush3.msra.mxu1 %v10919_v62  ;;  %8994 = vmatprep.subr.mxu0 %v12816_v4 }
0x1306   :  { %8961 = vmatprep.subr.mxu1 %v12816_v4  ;;  %8995 = vmatpush3.msra.mxu0 %v10454_v49  ;;  %v10940_v49 = vld [vmem:[#allocation5 + $0x1f8] sm:$0xff] }
0x1307   :  { %8962 = vmatpush3.msra.mxu1 %v10925_v1  ;;  %8996 = vmatprep.mubr.msk.f32.mxu0 %vm10175_vm3, %v12816_v4 }
0x1308   :  { %8963 = vmatprep.subr.mxu1 %v12816_v4  ;;  %2712 = vmatprep.subr.mxu0 %v10462_v59  ;;  %v10948_v59 = vld [vmem:[#allocation5 + $0x1c8] sm:$0xff] }
0x1309   :  { %8964 = vmatpush3.msra.mxu1 %v10932_v46 }
0x130a   :  { %8965 = vmatprep.subr.mxu1 %v12816_v4 }
0x130b   :  { %8966 = vmatpush3.msra.mxu1 %v10936_v5 }
0x130c   :  { %8967 = vmatprep.subr.mxu1 %v12816_v4 }
0x130d   :  { %8968 = vmatpush3.msra.mxu1 %v10940_v49 }
0x130e   :  { %8969 = vmatprep.subr.mxu1 %v12816_v4 }
0x130f   :  { %8970 = vmatpush3.msra.mxu1 %v10944_v7 }
0x1310   :  { %8971 = vmatprep.subr.mxu1 %v12816_v4 }
0x1311   :  { %8972 = vmatpush3.msra.mxu1 %v10948_v59 }
0x1312   :  { %8973 = vmatprep.subr.mxu1 %v12816_v4 }
0x1313   :  { %8974 = vmatpush3.msra.mxu1 %v10952_v2 }
0x1314   :  { %8975 = vmatprep.subr.mxu1 %v12816_v4 }
0x1315   :  { %8976 = vmatpush3.msra.mxu1 %v10956_v9 }
0x1316   :  { %8977 = vmatprep.subr.mxu1 %v12816_v4 }
0x1317   :  { %8978 = vmatpush3.msra.mxu1 %v10960_v11 }
0x1318   :  { %8979 = vmatprep.subr.mxu1 %v12816_v4 }
0x1319   :  { %8980 = vmatpush3.msra.mxu1 %v10964_v12 }
0x131a   :  { %8981 = vmatprep.subr.mxu1 %v12816_v4 }
0x131b   :  { %8982 = vmatpush3.msra.mxu1 %v10968_v37 }
0x131c   :  { %8983 = vmatprep.subr.mxu1 %v12816_v4 }
0x131d   :  { %8984 = vmatpush3.msra.mxu1 %v10972_v31 }
0x131e   :  { %8985 = vmatprep.subr.mxu1 %v12816_v4 }
0x131f   :  { %8986 = vmatpush3.msra.mxu1 %v10976_v53 }
0x1320   :  { %8987 = vmatprep.subr.mxu1 %v12816_v4 }
0x1321   :  { %8988 = vmatpush3.msra.mxu1 %v10980_v56 }
0x1322   :  { %9018 = vmatprep.subr.mxu1 %v12816_v4 }
0x13c2   :  { %v2461_v19 = vpop.f32.mrf.mxu1  ;;  %v10984_v23 = vpop.f32.mrf.mxu0 }
0x13c3   :  { %v2462_v14 = vadd.f32 %v2461_v19, %v10379_v20  ;;  %v11003_v19 = vld [vmem:[#allocation5 + $0x510] sm:$0xff] }
0x13c4   :  { %v2463_v3 = vpop.f32.mrf.mxu1  ;;  %v8956_v25 = vpop.f32.mrf.mxu0  ;;  %12872 = vst [vmem:[#allocation32_spill] sm:$0xff] %v11003_v19 }
0x13c5   :  { %v2536_v6 = vadd.f32 %v2462_v14, %v12870_v13  ;;  %v10989_v32 = vadd.f32 %v2463_v3, %v12869_v21  ;;  %v11007_v14 = vld [vmem:[#allocation5 + $0x4f8] sm:$0xff]  ;;  %v11015_v25 = vld [vmem:[#allocation5 + $0x288] ss:$0 sm:$0xff] }
0x13c6   :  { %12873 = vst [vmem:[#allocation33_spill] sm:$0xff] %v11007_v14 }
0x13c7   :  { %v2537_v47 = vmax.f32 %v2536_v6, 0.0  ;;  %3022 = vrot.lane.b32.xlu0 %v10989_v32, %s10177_s28 }
0x13c9   :  { %8990 = vmatmul.mubr.f32.vlgmr.msra.gmra.mxu1 %v2537_v47 }
0x13ca   :  { %9019 = vmatpush3.msra.mxu1 %v10993_v52  ;;  %9026 = vmatprep.mubr.msk.f32.mxu1 %vm10175_vm3, %v12816_v4 }
0x13cb   :  { %9020 = vmatprep.subr.mxu1 %v12816_v4 }
0x13cc   :  { %9021 = vmatpush3.msra.mxu1 %v10999_v55 }
0x13cd   :  { %9022 = vmatprep.subr.mxu1 %v12816_v4 }
0x13ce   :  { %9023 = vmatpush3.msra.mxu1 %v11003_v19  ;;  %v2609_v19 = vld [vmem:[#allocation2 + $0x10] sm:$0xff] }
0x13cf   :  { %9024 = vmatprep.subr.mxu1 %v12816_v4 }
0x13d0   :  { %9025 = vmatpush3.msra.mxu1 %v11007_v14 }
0x13d1   :  { %9027 = vmatmul.mubr.msk.f32.vlgmr.msra.gmra.mxu1 %vm448_vm5, %v10832_v15  ;;  %9040 = vmatprep.subr.mxu1 %v12816_v4 }
0x13d2   :  { %9042 = vmatprep.mubr.msk.f32.mxu1 %vm10175_vm3, %v12816_v4 }
0x1489   :  { %v2604_v3 = vpop.f32.mrf.mxu1 }
0x148a   :  { %v11018_v13 = vadd.f32 %v11015_v25, %v2604_v3 }
0x148b   :  { %v8991_v6 = vpop.f32.mrf.mxu1 }
0x148c   :  { %12874 = vst [vmem:[#allocation34_spill] sm:$0xff] %v11018_v13  ;;  %v2610_v47 = vmul.f32 0.5, %v11018_v13 }
0x148e   :  { %v2611_v63 = vmul.f32 1.442695, %v2610_v47  ;;  %v11029_v47 = vld [vmem:[#allocation5 + $0x390] sm:$0xff] }
0x1490   :  { %9725 = vpow2.f32 %v2611_v63  ;;  %v11033_v63 = vld [vmem:[#allocation5 + $0x380] sm:$0xff] }
0x1491   :  { %v2909_v50 = vpop.f32.mrf.mxu1 }
0x1492   :  { %v11023_v15 = vadd.f32 %v2909_v50, %v10533_v48  ;;  %v11036_v48 = vld [vmem:[#allocation5 + $0x378] sm:$0xff]  ;;  %v11039_v50 = vld [vmem:[#allocation5 + $0x368] sm:$0xff] }
0x1493   :  { %v9028_v21 = vpop.f32.mrf.mxu1  ;;  %12875 = vst [vmem:[#allocation35_spill] sm:$0xff] %v11039_v50 }
0x1494   :  { %v11042_v21 = vld [vmem:[#allocation5 + $0x360] sm:$0xff] }
0x1495   :  { %12876 = vst [vmem:[#allocation36_spill] sm:$0xff] %v11042_v21 }
0x149d   :  { %v9726_v14 = vpop.eup %9725 }
0x149e   :  { %2614 = vrot.lane.b32.xlu1 %v9726_v14, %s10176_s27  ;;  %v11051_v14 = vld [vmem:[#allocation5 + $0x338] sm:$0xff] }
0x149f   :  { %12879 = vst [vmem:[#allocation39_spill] sm:$0xff] %v11051_v14 }
0x14a2   :  { %2921 = vrot.lane.b32.xlu1 %v11023_v15, %s10177_s28 }
0x1510   :  { %v2615_v55 = vpop.permute.xlu1 %2614 }
0x1511   :  { %v2617_v3 = vmul.f32 %v2615_v55, %v2609_v19  ;;  %v11045_v55 = vld [vmem:[#allocation5 + $0x350] sm:$0xff]  ;;  %v11048_v19 = vld [vmem:[#allocation5 + $0x348] sm:$0xff] }
0x1512   :  { %12877 = vst [vmem:[#allocation37_spill] sm:$0xff] %v11045_v55  ;;  %12878 = vst [vmem:[#allocation38_spill] sm:$0xff] %v11048_v19 }
0x1513   :  { %v2618_v6 = vadd.f32 %v2617_v3, %v11018_v13  ;;  %v11054_v3 = vld [vmem:[#allocation5 + $0x330] sm:$0xff]  ;;  %v11060_v13 = vld [vmem:[#allocation5 + $0x318] sm:$0xff] }
0x1514   :  { %12880 = vst [vmem:[#allocation40_spill] sm:$0xff] %v11054_v3  ;;  %12882 = vst [vmem:[#allocation42_spill] sm:$0xff] %v11060_v13 }
0x1515   :  { %8997 = vmatmul.mubr.msk.f32.vlgmr.msra.gmra.mxu0 %vm695_vm4, %v2618_v6  ;;  %v11057_v6 = vld [vmem:[#allocation5 + $0x320] sm:$0xff] }
0x1516   :  { %2713 = vmatpush1.msra.mxu0 %v11029_v47  ;;  %2760 = vmatprep.mubr.f32.mxu0 %v12816_v4  ;;  %12881 = vst [vmem:[#allocation41_spill] sm:$0xff] %v11057_v6 }
0x1517   :  { %2714 = vmatprep.subr.mxu0 %v11033_v63 }
0x1518   :  { %2715 = vmatpush1.msra.mxu0 %v11036_v48 }
0x1519   :  { %2716 = vmatprep.subr.mxu0 %v11039_v50 }
0x151a   :  { %2717 = vmatpush1.msra.mxu0 %v11042_v21 }
0x151b   :  { %2718 = vmatprep.subr.mxu0 %v11045_v55  ;;  %v11063_v55 = vld [vmem:[#allocation5 + $0x308] sm:$0xff] }
0x151c   :  { %2719 = vmatpush1.msra.mxu0 %v11048_v19  ;;  %12883 = vst [vmem:[#allocation43_spill] sm:$0xff] %v11063_v55  ;;  %v11066_v19 = vld [vmem:[#allocation5 + $0x300] sm:$0xff] }
0x151d   :  { %2720 = vmatprep.subr.mxu0 %v11051_v14  ;;  %12884 = vst [vmem:[#allocation44_spill] sm:$0xff] %v11066_v19  ;;  %v11069_v14 = vld [vmem:[#allocation5 + $0x2f0] sm:$0xff] }
0x151e   :  { %2721 = vmatpush1.msra.mxu0 %v11054_v3  ;;  %12885 = vst [vmem:[#allocation45_spill] sm:$0xff] %v11069_v14  ;;  %v11072_v3 = vld [vmem:[#allocation5 + $0x2e8] sm:$0xff] }
0x151f   :  { %2722 = vmatprep.subr.mxu0 %v11057_v6  ;;  %12886 = vst [vmem:[#allocation46_spill] sm:$0xff] %v11072_v3 }
0x1520   :  { %2723 = vmatpush1.msra.mxu0 %v11060_v13  ;;  %v11076_v13 = vld [vmem:[#allocation5 + $0x2d0] ss:$0 sm:$0xff] }
0x1521   :  { %2724 = vmatprep.subr.mxu0 %v11063_v55  ;;  %12887 = vst [vmem:[#allocation47_spill] sm:$0xff] %v11076_v13 }
0x1522   :  { %2725 = vmatpush1.msra.mxu0 %v11066_v19  ;;  %v11080_v19 = vld [vmem:[#allocation5 + $0x450] sm:$0xff] }
0x1523   :  { %2726 = vmatprep.subr.mxu0 %v11069_v14  ;;  %12888 = vst [vmem:[#allocation48_spill] sm:$0xff] %v11080_v19 }
0x1524   :  { %2727 = vmatpush1.msra.mxu0 %v11072_v3  ;;  %v11086_v3 = vld [vmem:[#allocation5 + $0x438] sm:$0xff] }
0x1525   :  { %8999 = vmatprep.subr.mxu0 %v12816_v4  ;;  %12889 = vst [vmem:[#allocation49_spill] sm:$0xff] %v11086_v3 }
0x15d5   :  { %v2688_v6 = vpop.f32.mrf.mxu0 }
0x15d6   :  { %v2689_v21 = vadd.f32 %v11076_v13, %v2688_v6  ;;  %v11090_v6 = vld [vmem:[#allocation5 + $0x420] sm:$0xff] }
0x15d7   :  { %v8998_v55 = vpop.f32.mrf.mxu0  ;;  %12890 = vst [vmem:[#allocation16_spill] sm:$0xff] %v11090_v6 }
0x15d8   :  { %v2692_v50 = vmax.f32 %v2689_v21, 0.0 }
0x15da   :  { %8158 = vmatmul.mubr.msk.f32.vlgmr.msra.gmra.mxu0 %vm231_vm2, %v2692_v50 }
0x15db   :  { %9000 = vmatpush3.msra.mxu0 %v11080_v19  ;;  %9015 = vmatprep.mubr.msk.f32.mxu0 %vm10175_vm3, %v12816_v4 }
0x15dc   :  { %9001 = vmatprep.subr.mxu0 %v12816_v4 }
0x15dd   :  { %9002 = vmatpush3.msra.mxu0 %v11086_v3 }
0x15de   :  { %9003 = vmatprep.subr.mxu0 %v12816_v4 }
0x15df   :  { %9004 = vmatpush3.msra.mxu0 %v11090_v6  ;;  %v12891_v6 = vld [vmem:[#allocation18_spill] sm:$0xff] }
0x15e0   :  { %9005 = vmatprep.subr.mxu0 %v12816_v4 }
0x15e1   :  { %9006 = vmatpush3.msra.mxu0 %v12859_v43  ;;  %v2533_v43 = vadd.f32 %v10984_v23, %v12864_v41 }
0x15e2   :  { %9007 = vmatprep.subr.mxu0 %v12816_v4 }
0x15e3   :  { %9008 = vmatpush3.msra.mxu0 %v12860_v16 }
0x15e4   :  { %9009 = vmatprep.subr.mxu0 %v12816_v4 }
0x15e5   :  { %9010 = vmatpush3.msra.mxu0 %v12861_v26 }
0x15e6   :  { %9011 = vmatprep.subr.mxu0 %v12816_v4 }
0x15e7   :  { %9012 = vmatpush3.msra.mxu0 %v12862_v28 }
0x15e8   :  { %9013 = vmatprep.subr.mxu0 %v12816_v4 }
0x15e9   :  { %9014 = vmatpush3.msra.mxu0 %v12863_v30 }
0x15ea   :  { %9029 = vmatprep.subr.mxu0 %v12816_v4 }
0x169a   :  { %v2762_v50 = vpop.f32.mrf.mxu0 }
0x169b   :  { %v2767_v21 = vadd.f32 %v2762_v50, %v2533_v43 }
0x169c   :  { %v2764_v16 = vpop.f32.mrf.mxu0 }
0x169d   :  { %v2768_v55 = vmax.f32 %v2767_v21, 0.0  ;;  %v2842_v3 = vadd.f32 %v2764_v16, %v12891_v6 }
0x169f   :  { %v2913_v26 = vadd.f32 %v11023_v15, %v2842_v3  ;;  %9016 = vmatmul.mubr.msk.f32.vlgmr.msra.gmra.mxu0 %vm231_vm2, %v2768_v55  ;;  %v2922_v15 = vpop.permute.xlu1 %2921 }
0x16a0   :  { %9030 = vmatpush3.msra.mxu0 %v10587_v51  ;;  %9037 = vmatprep.mubr.msk.f32.mxu0 %vm10175_vm3, %v12816_v4 }
0x16a1   :  { %v8161_v28 = vmul.f32 -1.442695, %v2913_v26  ;;  %9031 = vmatprep.subr.mxu0 %v12816_v4 }
0x16a2   :  { %9032 = vmatpush3.msra.mxu0 %v10589_v42 }
0x16a3   :  { %9727 = vpow2.f32 %v8161_v28  ;;  %9033 = vmatprep.subr.mxu0 %v12816_v4 }
0x16a4   :  { %9034 = vmatpush3.msra.mxu0 %v10593_v58 }
0x16a5   :  { %9035 = vmatprep.subr.mxu0 %v12816_v4 }
0x16a6   :  { %9036 = vmatpush3.msra.mxu0 %v12866_v24 }
0x16a7   :  { %9056 = vmatprep.subr.mxu0 %v12816_v4 }
0x16b0   :  { %v9728_v51 = vpop.eup %9727 }
0x16b1   :  { %v2917_v30 = vadd.f32 1.0, %v9728_v51 }
0x16b3   :  { %9729 = vrcp.f32 %v2917_v30 }
0x16c0   :  { %v9730_v23 = vpop.eup %9729 }
0x16c1   :  { %v2924_v6 = vmul.f32 %v9730_v23, %v2922_v15  ;;  %v2931_v24 = vsub.f32 1.0, %v9730_v23  ;;  %v2937_v55 = vmul.f32 %v9730_v23, %v10825_v38 }
0x16c3   :  { %2926 = vrot.lane.b32.xlu1 %v2924_v6, %s10177_s28 }
0x1735   :  { %v2927_v42 = vpop.permute.xlu1 %2926 }
0x1736   :  { %v2929_v43 = vadd.f32 %v2927_v42, %v2842_v3  ;;  %v3023_v42 = vpop.permute.xlu0 %3022 }
0x1738   :  { %9731 = vtanh.f32 %v2929_v43 }
0x1745   :  { %v9732_v50 = vpop.eup %9731 }
0x1746   :  { %2933 = vrot.lane.b32.xlu1 %v9732_v50, %s10178_s29 }
0x175f   :  { %v11121_v58 = vpop.f32.mrf.mxu0 }
0x1760   :  { %12892 = vst [vmem:[#allocation51_spill] sm:$0xff] %v11121_v58 }
0x1761   :  { %v9017_v21 = vpop.f32.mrf.mxu0 }
0x17b8   :  { %v2934_v16 = vpop.permute.xlu1 %2933 }
0x17b9   :  { %v2936_v26 = vmul.f32 %v2934_v16, %v2931_v24 }
0x17bb   :  { %v11124_v28 = vadd.f32 %v2937_v55, %v2936_v26  ;;  %v371_v26 = vld [vmem:[%s12628_s1 + $0x10] sm:$0xff] }
0x17bd   :  { %2940 = vrot.lane.b32.xlu1 %v11124_v28, %s10178_s29 }
0x182f   :  { %v11128_v51 = vpop.permute.xlu1 %2940 }
0x1830   :  { %9038 = vmatmul.mubr.msk.f32.vlgmr.msra.gmra.mxu0 %vm448_vm5, %v11128_v51 }
0x1831   :  { %9057 = vmatpush3.msra.mxu0 %v10642_v33  ;;  %9064 = vmatprep.mubr.msk.f32.mxu0 %vm10175_vm3, %v12816_v4 }
0x1832   :  { %9058 = vmatprep.subr.mxu0 %v12816_v4 }
0x1833   :  { %9059 = vmatpush3.msra.mxu0 %v10646_v34 }
0x1834   :  { %9060 = vmatprep.subr.mxu0 %v12816_v4 }
0x1835   :  { %9061 = vmatpush3.msra.mxu0 %v10652_v45 }
0x1836   :  { %9062 = vmatprep.subr.mxu0 %v12816_v4 }
0x1837   :  { %9063 = vmatpush3.msra.mxu0 %v10656_v35 }
0x1838   :  { %9067 = vmatprep.subr.mxu0 %v12816_v4 }
0x18f0   :  { %v3010_v38 = vpop.f32.mrf.mxu0 }
0x18f1   :  { %v3011_v33 = vadd.f32 %v3010_v38, %v10624_v17  ;;  %v384_v38 = vsel %vm377_vm6, %v371_v26, 0.0 }
0x18f2   :  { %v9039_v3 = vpop.f32.mrf.mxu0 }
0x18f3   :  { %v3014_v30 = vadd.f32 %v3011_v33, %v10989_v32  ;;  %v11166_v3 = vld [vmem:[#allocation5 + $0x4c0] sm:$0xff] }
0x18f5   :  { %v8163_v23 = vmul.f32 -1.442695, %v3014_v30 }
0x18f7   :  { %9733 = vpow2.f32 %v8163_v23 }
0x1904   :  { %v9734_v15 = vpop.eup %9733 }
0x1905   :  { %v3018_v34 = vadd.f32 1.0, %v9734_v15 }
0x1907   :  { %9735 = vrcp.f32 %v3018_v34 }
0x1914   :  { %v9736_v6 = vpop.eup %9735 }
0x1915   :  { %v3025_v45 = vmul.f32 %v9736_v6, %v3023_v42  ;;  %v3032_v32 = vsub.f32 1.0, %v9736_v6 }
0x1917   :  { %3027 = vrot.lane.b32.xlu1 %v3025_v45, %s10177_s28 }
0x1989   :  { %v3028_v43 = vpop.permute.xlu1 %3027 }
0x198a   :  { %v3030_v35 = vadd.f32 %v3028_v43, %v3011_v33 }
0x198c   :  { %9737 = vtanh.f32 %v3030_v35 }
0x1999   :  { %v9738_v50 = vpop.eup %9737 }
0x199a   :  { %3034 = vrot.lane.b32.xlu1 %v9738_v50, %s10178_s29  ;;  %v11205_v50 = vld [vmem:[#allocation5 + $0x2b8] sm:$0xff] }
0x199e   :  { %3038 = vrot.lane.b32.xlu1 %v10906_v57, %s10179_s8  ;;  %v11160_v57 = vld [vmem:[#allocation5 + $0x4d8] sm:$0xff] }
0x1a0c   :  { %v3035_v17 = vpop.permute.xlu1 %3034 }
0x1a0d   :  { %v3037_v24 = vmul.f32 %v3035_v17, %v3032_v32  ;;  %v11218_v17 = vld [vmem:[#allocation5 + $0x398] sm:$0xff] }
0x1a10   :  { %v3039_v21 = vpop.permute.xlu1 %3038 }
0x1a11   :  { %v3041_v16 = vmul.f32 %v9736_v6, %v3039_v21 }
0x1a13   :  { %v3042_v55 = vadd.f32 %v3041_v16, %v3037_v24 }
0x1a15   :  { %3044 = vrot.lane.b32.xlu1 %v3042_v55, %s10178_s29  ;;  %v12893_v55 = vld [vmem:[#allocation19_spill] sm:$0xff] }
0x1a39   :  { %385 = vadd.xlane.f32.xlu1 %v384_v38 }
0x1a87   :  { %v3045_v33 = vpop.permute.xlu1 %3044 }
0x1a88   :  { %9041 = vmatpush3.msra.mxu1 %v3045_v33  ;;  %9065 = vmatmul.mubr.msk.f32.vlgmr.msra.gmra.mxu0 %vm448_vm5, %v3045_v33  ;;  %v12894_v33 = vld [vmem:[#allocation31_spill] sm:$0xff] }
0x1a89   :  { %9043 = vmatmul.mubr.msk.f32.vlgmr.msra.gmra.mxu1 %vm377_vm6, %v371_v26  ;;  %9045 = vmatprep.subr.mxu1 %v12816_v4 }
0x1a8a   :  { %9046 = vmatpush3.msra.mxu1 %v10634_v36  ;;  %9053 = vmatprep.mubr.msk.f32.mxu1 %vm10175_vm3, %v12816_v4  ;;  %v11172_v36 = vld [vmem:[#allocation5 + $0x4a8] sm:$0xff] }
0x1a8b   :  { %9047 = vmatprep.subr.mxu1 %v12816_v4  ;;  %9068 = vmatpush3.msra.mxu0 %v11160_v57 }
0x1a8c   :  { %9048 = vmatpush3.msra.mxu1 %v10636_v40  ;;  %9069 = vmatprep.subr.mxu0 %v12816_v4  ;;  %v11178_v40 = vld [vmem:[#allocation5 + $0x490] sm:$0xff] }
0x1a8d   :  { %9049 = vmatprep.subr.mxu1 %v12816_v4  ;;  %9070 = vmatpush3.msra.mxu0 %v11166_v3 }
0x1a8e   :  { %9050 = vmatpush3.msra.mxu1 %v10673_v18  ;;  %9071 = vmatprep.subr.mxu0 %v12816_v4 }
0x1a8f   :  { %9051 = vmatprep.subr.mxu1 %v12816_v4  ;;  %9072 = vmatpush3.msra.mxu0 %v11172_v36 }
0x1a90   :  { %9052 = vmatpush3.msra.mxu1 %v10677_v54  ;;  %9073 = vmatprep.subr.mxu0 %v12816_v4 }
0x1a91   :  { %3360 = vmatprep.subr.mxu1 %v10874_v22  ;;  %9074 = vmatpush3.msra.mxu0 %v11178_v40 }
0x1a92   :  { %9075 = vmatprep.mubr.msk.f32.mxu0 %vm10175_vm3, %v12816_v4  ;;  %9113 = vmatprep.subr.mxu0 %v12816_v4 }
0x1ac2   :  { %v386_v18 = vpop.xlane.xlu1 %385 }
0x1ac3   :  { %9739 = vrcp.f32 %v386_v18  ;;  %v12895_v18 = vld [vmem:[#allocation32_spill] sm:$0xff] }
0x1ad0   :  { %v9740_v30 = vpop.eup %9739 }
0x1b48   :  { %v3262_v23 = vpop.f32.mrf.mxu0 }
0x1b49   :  { %v3116_v15 = vpop.f32.mrf.mxu1 }
0x1b4a   :  { %v3120_v34 = vmul.f32 %v9740_v30, %v3116_v15  ;;  %v9066_v54 = vpop.f32.mrf.mxu0  ;;  %v12896_v30 = vld [vmem:[#allocation33_spill] sm:$0xff] }
0x1b4b   :  { %v9044_v6 = vpop.f32.mrf.mxu1 }
0x1b4c   :  { %9054 = vmatmul.mubr.msk.f32.vlgmr.msra.gmra.mxu1 %vm448_vm5, %v3120_v34 }
0x1b4d   :  { %3361 = vmatpush1.msra.mxu1 %v10882_v29  ;;  %3400 = vmatprep.mubr.f32.mxu1 %v12816_v4 }
0x1b4e   :  { %3362 = vmatprep.subr.mxu1 %v10886_v27 }
0x1b4f   :  { %3363 = vmatpush1.msra.mxu1 %v10889_v0 }
0x1b50   :  { %3364 = vmatprep.subr.mxu1 %v10892_v44 }
0x1b51   :  { %3365 = vmatpush1.msra.mxu1 %v10895_v8 }
0x1b52   :  { %3366 = vmatprep.subr.mxu1 %v10898_v61 }
0x1b53   :  { %3367 = vmatpush1.msra.mxu1 %v10901_v39 }
0x1b54   :  { %9078 = vmatprep.subr.mxu1 %v12816_v4 }
0x1c0c   :  { %v3190_v42 = vpop.f32.mrf.mxu1 }
0x1c0d   :  { %v3263_v45 = vadd.f32 %v3262_v23, %v3190_v42 }
0x1c0e   :  { %v9055_v43 = vpop.f32.mrf.mxu1 }
0x1c0f   :  { %v11195_v35 = vadd.f32 %v3263_v45, %v10691_v10  ;;  %v11211_v10 = vld [vmem:[#allocation5 + $0x2a0] sm:$0xff] }
0x1c11   :  { %8168 = vmatmul.mubr.msk.f32.vlgmr.msra.gmra.mxu1 %vm448_vm5, %v11195_v35  ;;  %9076 = vmatmul.mubr.msk.f32.vlgmr.msra.gmra.mxu0 %vm448_vm5, %v11195_v35 }
0x1c12   :  { %9079 = vmatpush3.msra.mxu1 %v10912_v60  ;;  %9110 = vmatprep.mubr.msk.f32.mxu1 %vm10175_vm3, %v12816_v4 }
0x1c13   :  { %9080 = vmatprep.subr.mxu1 %v12816_v4  ;;  %9114 = vmatpush3.msra.mxu0 %v11205_v50 }
0x1c14   :  { %9081 = vmatpush3.msra.mxu1 %v10919_v62  ;;  %9115 = vmatprep.subr.mxu0 %v12816_v4 }
0x1c15   :  { %9082 = vmatprep.subr.mxu1 %v12816_v4  ;;  %9116 = vmatpush3.msra.mxu0 %v11211_v10 }
0x1c16   :  { %9083 = vmatpush3.msra.mxu1 %v10925_v1  ;;  %9117 = vmatprep.mubr.msk.f32.mxu0 %vm10175_vm3, %v12816_v4 }
0x1c17   :  { %9084 = vmatprep.subr.mxu1 %v12816_v4  ;;  %3653 = vmatprep.subr.mxu0 %v11218_v17 }
0x1c18   :  { %9085 = vmatpush3.msra.mxu1 %v10932_v46 }
0x1c19   :  { %9086 = vmatprep.subr.mxu1 %v12816_v4 }
0x1c1a   :  { %9087 = vmatpush3.msra.mxu1 %v10936_v5 }
0x1c1b   :  { %9088 = vmatprep.subr.mxu1 %v12816_v4 }
0x1c1c   :  { %9089 = vmatpush3.msra.mxu1 %v10940_v49 }
0x1c1d   :  { %9090 = vmatprep.subr.mxu1 %v12816_v4 }
0x1c1e   :  { %9091 = vmatpush3.msra.mxu1 %v10944_v7 }
0x1c1f   :  { %9092 = vmatprep.subr.mxu1 %v12816_v4 }
0x1c20   :  { %9093 = vmatpush3.msra.mxu1 %v10948_v59 }
0x1c21   :  { %9094 = vmatprep.subr.mxu1 %v12816_v4 }
0x1c22   :  { %9095 = vmatpush3.msra.mxu1 %v10952_v2 }
0x1c23   :  { %9096 = vmatprep.subr.mxu1 %v12816_v4 }
0x1c24   :  { %9097 = vmatpush3.msra.mxu1 %v10956_v9 }
0x1c25   :  { %9098 = vmatprep.subr.mxu1 %v12816_v4 }
0x1c26   :  { %9099 = vmatpush3.msra.mxu1 %v10960_v11 }
0x1c27   :  { %9100 = vmatprep.subr.mxu1 %v12816_v4 }
0x1c28   :  { %9101 = vmatpush3.msra.mxu1 %v10964_v12 }
0x1c29   :  { %9102 = vmatprep.subr.mxu1 %v12816_v4 }
0x1c2a   :  { %9103 = vmatpush3.msra.mxu1 %v10968_v37 }
0x1c2b   :  { %9104 = vmatprep.subr.mxu1 %v12816_v4 }
0x1c2c   :  { %9105 = vmatpush3.msra.mxu1 %v10972_v31 }
0x1c2d   :  { %9106 = vmatprep.subr.mxu1 %v12816_v4 }
0x1c2e   :  { %9107 = vmatpush3.msra.mxu1 %v10976_v53 }
0x1c2f   :  { %9108 = vmatprep.subr.mxu1 %v12816_v4 }
0x1c30   :  { %9109 = vmatpush3.msra.mxu1 %v10980_v56 }
0x1c31   :  { %9139 = vmatprep.subr.mxu1 %v12816_v4 }
0x1cd1   :  { %v3402_v32 = vpop.f32.mrf.mxu1  ;;  %v11247_v21 = vpop.f32.mrf.mxu0 }
0x1cd2   :  { %v3403_v24 = vadd.f32 %v3402_v32, %v10379_v20 }
0x1cd3   :  { %v9077_v16 = vpop.f32.mrf.mxu0  ;;  %v11265_v23 = vpop.f32.mrf.mxu1 }
0x1cd4   :  { %v3477_v26 = vadd.f32 %v3403_v24, %v12893_v55  ;;  %v3550_v16 = vld [vmem:[#allocation2 + $0x18] sm:$0xff] }
0x1cd6   :  { %v3478_v38 = vmax.f32 %v3477_v26, 0.0 }
0x1cd8   :  { %9111 = vmatmul.mubr.f32.vlgmr.msra.gmra.mxu1 %v3478_v38 }
0x1cd9   :  { %9140 = vmatpush3.msra.mxu1 %v10993_v52  ;;  %9147 = vmatprep.mubr.msk.f32.mxu1 %vm10175_vm3, %v12816_v4 }
0x1cda   :  { %9141 = vmatprep.subr.mxu1 %v12816_v4 }
0x1cdb   :  { %9142 = vmatpush3.msra.mxu1 %v12894_v33 }
0x1cdc   :  { %9143 = vmatprep.subr.mxu1 %v12816_v4 }
0x1cdd   :  { %9144 = vmatpush3.msra.mxu1 %v12895_v18 }
0x1cde   :  { %9145 = vmatprep.subr.mxu1 %v12816_v4 }
0x1cdf   :  { %9146 = vmatpush3.msra.mxu1 %v12896_v30 }
0x1ce0   :  { %9148 = vmatmul.mubr.msk.f32.vlgmr.msra.gmra.mxu1 %vm448_vm5, %v11128_v51  ;;  %9161 = vmatprep.subr.mxu1 %v12816_v4  ;;  %v11272_v51 = vld [vmem:[#allocation5 + $0x558] ss:$0 sm:$0xff] }
0x1ce1   :  { %9163 = vmatprep.mubr.msk.f32.mxu1 %vm10175_vm3, %v12816_v4 }
0x1d98   :  { %v3545_v15 = vpop.f32.mrf.mxu1 }
0x1d99   :  { %v11268_v34 = vadd.f32 %v11015_v25, %v3545_v15  ;;  %v12898_v15 = vld [vmem:[#allocation35_spill] sm:$0xff] }
0x1d9a   :  { %v9112_v54 = vpop.f32.mrf.mxu1 }
0x1d9b   :  { %12897 = vst [vmem:[#allocation54_spill] sm:$0xff] %v11268_v34  ;;  %v3551_v6 = vmul.f32 0.5, %v11268_v34  ;;  %v12899_v54 = vld [vmem:[#allocation36_spill] sm:$0xff] }
0x1d9d   :  { %v3552_v42 = vmul.f32 1.442695, %v3551_v6  ;;  %v12900_v6 = vld [vmem:[#allocation37_spill] sm:$0xff] }
0x1d9f   :  { %9741 = vpow2.f32 %v3552_v42  ;;  %v12901_v42 = vld [vmem:[#allocation38_spill] sm:$0xff] }
0x1da0   :  { %v3850_v45 = vpop.f32.mrf.mxu1 }
0x1da1   :  { %v3851_v24 = vadd.f32 %v11272_v51, %v3850_v45  ;;  %v12902_v45 = vld [vmem:[#allocation39_spill] sm:$0xff] }
0x1da2   :  { %v9149_v43 = vpop.f32.mrf.mxu1 }
0x1da3   :  { %v12903_v43 = vld [vmem:[#allocation40_spill] sm:$0xff] }
0x1dac   :  { %v9742_v32 = vpop.eup %9741 }
0x1dad   :  { %3555 = vrot.lane.b32.xlu0 %v9742_v32, %s10176_s27  ;;  %v12904_v32 = vld [vmem:[#allocation41_spill] sm:$0xff] }
0x1db1   :  { %3862 = vrot.lane.b32.xlu0 %v3851_v24, %s10177_s28 }
0x1e1f   :  { %v3556_v55 = vpop.permute.xlu0 %3555 }
0x1e20   :  { %v3558_v26 = vmul.f32 %v3556_v55, %v3550_v16  ;;  %v12905_v16 = vld [vmem:[#allocation42_spill] sm:$0xff]  ;;  %v12906_v55 = vld [vmem:[#allocation43_spill] sm:$0xff] }
0x1e22   :  { %v3559_v38 = vadd.f32 %v3558_v26, %v11268_v34  ;;  %v12907_v26 = vld [vmem:[#allocation44_spill] sm:$0xff] }
0x1e24   :  { %9118 = vmatmul.mubr.msk.f32.vlgmr.msra.gmra.mxu0 %vm695_vm4, %v3559_v38  ;;  %v12908_v38 = vld [vmem:[#allocation46_spill] sm:$0xff] }
0x1e25   :  { %3654 = vmatpush1.msra.mxu0 %v11029_v47  ;;  %3701 = vmatprep.mubr.f32.mxu0 %v12816_v4 }
0x1e26   :  { %3655 = vmatprep.subr.mxu0 %v11033_v63 }
0x1e27   :  { %3656 = vmatpush1.msra.mxu0 %v11036_v48 }
0x1e28   :  { %3657 = vmatprep.subr.mxu0 %v12898_v15 }
0x1e29   :  { %3658 = vmatpush1.msra.mxu0 %v12899_v54 }
0x1e2a   :  { %3659 = vmatprep.subr.mxu0 %v12900_v6 }
0x1e2b   :  { %3660 = vmatpush1.msra.mxu0 %v12901_v42 }
0x1e2c   :  { %3661 = vmatprep.subr.mxu0 %v12902_v45 }
0x1e2d   :  { %3662 = vmatpush1.msra.mxu0 %v12903_v43 }
0x1e2e   :  { %3663 = vmatprep.subr.mxu0 %v12904_v32 }
0x1e2f   :  { %3664 = vmatpush1.msra.mxu0 %v12905_v16 }
0x1e30   :  { %3665 = vmatprep.subr.mxu0 %v12906_v55 }
0x1e31   :  { %3666 = vmatpush1.msra.mxu0 %v12907_v26  ;;  %v12909_v26 = vld [vmem:[#allocation49_spill] sm:$0xff] }
0x1e32   :  { %3667 = vmatprep.subr.mxu0 %v11069_v14 }
0x1e33   :  { %3668 = vmatpush1.msra.mxu0 %v12908_v38  ;;  %v12910_v38 = vld [vmem:[#allocation16_spill] sm:$0xff] }
0x1e34   :  { %9120 = vmatprep.subr.mxu0 %v12816_v4 }
0x1ee4   :  { %v3629_v34 = vpop.f32.mrf.mxu0 }
0x1ee5   :  { %v3630_v58 = vadd.f32 %v11076_v13, %v3629_v34  ;;  %v11305_v34 = vld [vmem:[#allocation5 + $0x408] sm:$0xff]  ;;  %v12916_v13 = vld [vmem:[#allocation20_spill] sm:$0xff] }
0x1ee6   :  { %v9119_v45 = vpop.f32.mrf.mxu0  ;;  %12911 = vst [vmem:[#allocation17_spill] sm:$0xff] %v11305_v34 }
0x1ee7   :  { %v3633_v42 = vmax.f32 %v3630_v58, 0.0  ;;  %v11309_v58 = vld [vmem:[#allocation5 + $0x3f0] sm:$0xff]  ;;  %v11317_v45 = vld [vmem:[#allocation5 + $0x3c0] sm:$0xff] }
0x1ee8   :  { %12912 = vst [vmem:[#allocation18_spill] sm:$0xff] %v11309_v58  ;;  %12914 = vst [vmem:[#allocation31_spill] sm:$0xff] %v11317_v45 }
0x1ee9   :  { %8171 = vmatmul.mubr.msk.f32.vlgmr.msra.gmra.mxu0 %vm231_vm2, %v3633_v42  ;;  %v11313_v42 = vld [vmem:[#allocation5 + $0x3d8] sm:$0xff] }
0x1eea   :  { %9121 = vmatpush3.msra.mxu0 %v11080_v19  ;;  %9136 = vmatprep.mubr.msk.f32.mxu0 %vm10175_vm3, %v12816_v4  ;;  %12913 = vst [vmem:[#allocation19_spill] sm:$0xff] %v11313_v42 }
0x1eeb   :  { %9122 = vmatprep.subr.mxu0 %v12816_v4 }
0x1eec   :  { %9123 = vmatpush3.msra.mxu0 %v12909_v26 }
0x1eed   :  { %9124 = vmatprep.subr.mxu0 %v12816_v4 }
0x1eee   :  { %9125 = vmatpush3.msra.mxu0 %v12910_v38 }
0x1eef   :  { %9126 = vmatprep.subr.mxu0 %v12816_v4 }
0x1ef0   :  { %9127 = vmatpush3.msra.mxu0 %v11305_v34  ;;  %v11321_v34 = vld [vmem:[#allocation5 + $0x3a8] sm:$0xff] }
0x1ef1   :  { %9128 = vmatprep.subr.mxu0 %v12816_v4  ;;  %12915 = vst [vmem:[#allocation32_spill] sm:$0xff] %v11321_v34 }
0x1ef2   :  { %9129 = vmatpush3.msra.mxu0 %v11309_v58  ;;  %v3474_v58 = vadd.f32 %v11247_v21, %v12864_v41  ;;  %v11335_v21 = vld [vmem:[#allocation5 + $0x5a0] sm:$0xff] }
0x1ef3   :  { %9130 = vmatprep.subr.mxu0 %v12816_v4  ;;  %12918 = vst [vmem:[#allocation35_spill] sm:$0xff] %v11335_v21 }
0x1ef4   :  { %9131 = vmatpush3.msra.mxu0 %v11313_v42 }
0x1ef5   :  { %9132 = vmatprep.subr.mxu0 %v12816_v4 }
0x1ef6   :  { %9133 = vmatpush3.msra.mxu0 %v11317_v45  ;;  %v11329_v45 = vld [vmem:[#allocation5 + $0x5b8] sm:$0xff] }
0x1ef7   :  { %9134 = vmatprep.subr.mxu0 %v12816_v4  ;;  %12917 = vst [vmem:[#allocation33_spill] sm:$0xff] %v11329_v45 }
0x1ef8   :  { %9135 = vmatpush3.msra.mxu0 %v11321_v34 }
0x1ef9   :  { %9150 = vmatprep.subr.mxu0 %v12816_v4 }
0x1fa9   :  { %v3703_v38 = vpop.f32.mrf.mxu0 }
0x1faa   :  { %v3708_v26 = vadd.f32 %v3703_v38, %v3474_v58  ;;  %v3863_v38 = vpop.permute.xlu0 %3862 }
0x1fab   :  { %v3705_v42 = vpop.f32.mrf.mxu0 }
0x1fac   :  { %v3709_v19 = vmax.f32 %v3708_v26, 0.0  ;;  %v3783_v14 = vadd.f32 %v3705_v42, %v12916_v13  ;;  %v11339_v13 = vld [vmem:[#allocation5 + $0x588] sm:$0xff] }
0x1fad   :  { %12919 = vst [vmem:[#allocation36_spill] sm:$0xff] %v11339_v13 }
0x1fae   :  { %v3854_v55 = vadd.f32 %v3851_v24, %v3783_v14  ;;  %9137 = vmatmul.mubr.msk.f32.vlgmr.msra.gmra.mxu0 %vm231_vm2, %v3709_v19  ;;  %v11343_v19 = vld [vmem:[#allocation5 + $0x570] sm:$0xff] }
0x1faf   :  { %9151 = vmatpush3.msra.mxu0 %v11329_v45  ;;  %9158 = vmatprep.mubr.msk.f32.mxu0 %vm10175_vm3, %v12816_v4  ;;  %12920 = vst [vmem:[#allocation37_spill] sm:$0xff] %v11343_v19 }
0x1fb0   :  { %v8174_v34 = vmul.f32 -1.442695, %v3854_v55  ;;  %9152 = vmatprep.subr.mxu0 %v12816_v4 }
0x1fb1   :  { %9153 = vmatpush3.msra.mxu0 %v11335_v21 }
0x1fb2   :  { %9743 = vpow2.f32 %v8174_v34  ;;  %9154 = vmatprep.subr.mxu0 %v12816_v4 }
0x1fb3   :  { %9155 = vmatpush3.msra.mxu0 %v11339_v13 }
0x1fb4   :  { %9156 = vmatprep.subr.mxu0 %v12816_v4 }
0x1fb5   :  { %9157 = vmatpush3.msra.mxu0 %v11343_v19 }
0x1fb6   :  { %9177 = vmatprep.subr.mxu0 %v12816_v4 }
0x1fbf   :  { %v9744_v24 = vpop.eup %9743 }
0x1fc0   :  { %v3858_v55 = vadd.f32 1.0, %v9744_v24 }
0x1fc2   :  { %9745 = vrcp.f32 %v3858_v55 }
0x1fcf   :  { %v9746_v26 = vpop.eup %9745 }
0x1fd0   :  { %v3865_v34 = vmul.f32 %v9746_v26, %v3863_v38  ;;  %v3872_v19 = vsub.f32 1.0, %v9746_v26  ;;  %v3878_v16 = vmul.f32 %v9746_v26, %v11124_v28  ;;  %v12923_v38 = vld [vmem:[#allocation52_spill] sm:$0xff] }
0x1fd1   :  { %v11373_v28 = vld [vmem:[#allocation5 + $0x600] sm:$0xff] }
0x1fd2   :  { %3867 = vrot.lane.b32.xlu0 %v3865_v34, %s10177_s28  ;;  %12926 = vst [vmem:[#allocation58_spill] sm:$0xff] %v11373_v28 }
0x2044   :  { %v3868_v58 = vpop.permute.xlu0 %3867 }
0x2045   :  { %v3870_v42 = vadd.f32 %v3868_v58, %v3783_v14  ;;  %v3405_v14 = vadd.f32 %v11265_v23, %v12923_v38  ;;  %v11377_v23 = vld [vmem:[#allocation5 + $0x5e8] sm:$0xff] }
0x2046   :  { %12927 = vst [vmem:[#allocation59_spill] sm:$0xff] %v11377_v23 }
0x2047   :  { %9747 = vtanh.f32 %v3870_v42 }
0x2054   :  { %v9748_v13 = vpop.eup %9747 }
0x2055   :  { %3874 = vrot.lane.b32.xlu0 %v9748_v13, %s10178_s29  ;;  %v11381_v13 = vld [vmem:[#allocation5 + $0x5d0] ss:$0 sm:$0xff] }
0x206e   :  { %v11349_v21 = vpop.f32.mrf.mxu0 }
0x206f   :  { %12921 = vst [vmem:[#allocation40_spill] sm:$0xff] %v11349_v21 }
0x2070   :  { %v9138_v45 = vpop.f32.mrf.mxu0 }
0x2071   :  { %v11363_v45 = vld [vmem:[#allocation5 + $0x630] sm:$0xff] }
0x2072   :  { %12924 = vst [vmem:[#allocation56_spill] sm:$0xff] %v11363_v45 }
0x20c7   :  { %v3875_v41 = vpop.permute.xlu0 %3874 }
0x20c8   :  { %v3877_v24 = vmul.f32 %v3875_v41, %v3872_v19  ;;  %v11369_v41 = vld [vmem:[#allocation5 + $0x618] sm:$0xff] }
0x20c9   :  { %12925 = vst [vmem:[#allocation57_spill] sm:$0xff] %v11369_v41 }
0x20ca   :  { %v11352_v55 = vadd.f32 %v3878_v16, %v3877_v24 }
0x20cc   :  { %12922 = vst [vmem:[#allocation20_spill] sm:$0xff] %v11352_v55  ;;  %3881 = vrot.lane.b32.xlu0 %v11352_v55, %s10178_s29 }
0x20d0   :  { %3963 = vrot.lane.b32.xlu0 %v3405_v14, %s10177_s28 }
0x213e   :  { %v11359_v34 = vpop.permute.xlu0 %3881 }
0x213f   :  { %9159 = vmatmul.mubr.msk.f32.vlgmr.msra.gmra.mxu0 %vm448_vm5, %v11359_v34 }
0x2140   :  { %9178 = vmatpush3.msra.mxu0 %v11363_v45  ;;  %9185 = vmatprep.mubr.msk.f32.mxu0 %vm10175_vm3, %v12816_v4 }
0x2141   :  { %9179 = vmatprep.subr.mxu0 %v12816_v4 }
0x2142   :  { %9180 = vmatpush3.msra.mxu0 %v11369_v41  ;;  %v3964_v41 = vpop.permute.xlu0 %3963 }
0x2143   :  { %9181 = vmatprep.subr.mxu0 %v12816_v4 }
0x2144   :  { %9182 = vmatpush3.msra.mxu0 %v11373_v28 }
0x2145   :  { %9183 = vmatprep.subr.mxu0 %v12816_v4 }
0x2146   :  { %9184 = vmatpush3.msra.mxu0 %v11377_v23 }
0x2147   :  { %9188 = vmatprep.subr.mxu0 %v12816_v4 }
0x21ff   :  { %v3951_v16 = vpop.f32.mrf.mxu0 }
0x2200   :  { %v3952_v19 = vadd.f32 %v11381_v13, %v3951_v16 }
0x2201   :  { %v9160_v26 = vpop.f32.mrf.mxu0 }
0x2202   :  { %v3955_v58 = vadd.f32 %v3952_v19, %v3405_v14  ;;  %v372_v14 = vld [vmem:[%s12628_s1 + $0x18] sm:$0xff] }
0x2204   :  { %v8176_v42 = vmul.f32 -1.442695, %v3955_v58 }
0x2206   :  { %9749 = vpow2.f32 %v8176_v42 }
0x2213   :  { %v9750_v24 = vpop.eup %9749 }
0x2214   :  { %v3959_v21 = vadd.f32 1.0, %v9750_v24 }
0x2216   :  { %9751 = vrcp.f32 %v3959_v21  ;;  %v387_v21 = vsel %vm377_vm6, %v372_v14, 0.0 }
0x2223   :  { %v9752_v28 = vpop.eup %9751 }
0x2224   :  { %v3966_v45 = vmul.f32 %v9752_v28, %v3964_v41  ;;  %v3973_v41 = vsub.f32 1.0, %v9752_v28 }
0x2226   :  { %3968 = vrot.lane.b32.xlu0 %v3966_v45, %s10177_s28 }
0x2298   :  { %v3969_v23 = vpop.permute.xlu0 %3968 }
0x2299   :  { %v3971_v55 = vadd.f32 %v3969_v23, %v3952_v19  ;;  %v11415_v19 = vld [vmem:[#allocation5 + $0x648] sm:$0xff] }
0x229b   :  { %9753 = vtanh.f32 %v3971_v55 }
0x22a8   :  { %v9754_v32 = vpop.eup %9753 }
0x22a9   :  { %3975 = vrot.lane.b32.xlu0 %v9754_v32, %s10178_s29  ;;  %v11403_v32 = vld [vmem:[#allocation5 + $0x678] sm:$0xff] }
0x22ad   :  { %3979 = vrot.lane.b32.xlu0 %v11195_v35, %s10179_s8  ;;  %v11396_v35 = vld [vmem:[#allocation5 + $0x690] sm:$0xff] }
0x22cc   :  { %388 = vadd.xlane.f32.xlu0 %v387_v21 }
0x231b   :  { %v3976_v16 = vpop.permute.xlu0 %3975 }
0x231c   :  { %v3978_v45 = vmul.f32 %v3976_v16, %v3973_v41 }
0x231f   :  { %v3980_v26 = vpop.permute.xlu0 %3979 }
0x2320   :  { %v3982_v58 = vmul.f32 %v9752_v28, %v3980_v26  ;;  %v11409_v28 = vld [vmem:[#allocation5 + $0x660] sm:$0xff] }
0x2322   :  { %v3983_v23 = vadd.f32 %v3982_v58, %v3978_v45 }
0x2324   :  { %3985 = vrot.lane.b32.xlu1 %v3983_v23, %s10178_s29 }
0x2355   :  { %v389_v42 = vpop.xlane.xlu0 %388 }
0x2356   :  { %9755 = vrcp.f32 %v389_v42  ;;  %v12940_v42 = vld [vmem:[#allocation49_spill] sm:$0xff] }
0x2363   :  { %v9756_v24 = vpop.eup %9755 }
0x2396   :  { %v3986_v55 = vpop.permute.xlu1 %3985 }
0x2397   :  { %9162 = vmatpush3.msra.mxu1 %v3986_v55  ;;  %9186 = vmatmul.mubr.msk.f32.vlgmr.msra.gmra.mxu0 %vm448_vm5, %v3986_v55 }
0x2398   :  { %9164 = vmatmul.mubr.msk.f32.vlgmr.msra.gmra.mxu1 %vm377_vm6, %v372_v14  ;;  %9166 = vmatprep.subr.mxu1 %v12816_v4 }
0x2399   :  { %9167 = vmatpush3.msra.mxu1 %v11396_v35  ;;  %9174 = vmatprep.mubr.msk.f32.mxu1 %vm10175_vm3, %v12816_v4 }
0x239a   :  { %9168 = vmatprep.subr.mxu1 %v12816_v4  ;;  %9189 = vmatpush3.msra.mxu0 %v11160_v57 }
0x239b   :  { %9169 = vmatpush3.msra.mxu1 %v11403_v32  ;;  %9190 = vmatprep.subr.mxu0 %v12816_v4 }
0x239c   :  { %9170 = vmatprep.subr.mxu1 %v12816_v4  ;;  %9191 = vmatpush3.msra.mxu0 %v11166_v3 }
0x239d   :  { %9171 = vmatpush3.msra.mxu1 %v11409_v28  ;;  %9192 = vmatprep.subr.mxu0 %v12816_v4 }
0x239e   :  { %9172 = vmatprep.subr.mxu1 %v12816_v4  ;;  %9193 = vmatpush3.msra.mxu0 %v11172_v36 }
0x239f   :  { %9173 = vmatpush3.msra.mxu1 %v11415_v19  ;;  %9194 = vmatprep.subr.mxu0 %v12816_v4 }
0x23a0   :  { %4301 = vmatprep.subr.mxu1 %v10874_v22  ;;  %9195 = vmatpush3.msra.mxu0 %v11178_v40 }
0x23a1   :  { %9196 = vmatprep.mubr.msk.f32.mxu0 %vm10175_vm3, %v12816_v4  ;;  %9234 = vmatprep.subr.mxu0 %v12816_v4 }
0x2457   :  { %v4203_v14 = vpop.f32.mrf.mxu0 }
0x2458   :  { %v4057_v21 = vpop.f32.mrf.mxu1 }
0x2459   :  { %v4061_v16 = vmul.f32 %v9756_v24, %v4057_v21  ;;  %v9187_v41 = vpop.f32.mrf.mxu0  ;;  %v12941_v24 = vld [vmem:[#allocation16_spill] sm:$0xff]  ;;  %v12943_v21 = vld [vmem:[#allocation18_spill] sm:$0xff] }
0x245a   :  { %v9165_v26 = vpop.f32.mrf.mxu1  ;;  %v12945_v41 = vld [vmem:[#allocation31_spill] sm:$0xff] }
0x245b   :  { %9175 = vmatmul.mubr.msk.f32.vlgmr.msra.gmra.mxu1 %vm448_vm5, %v4061_v16  ;;  %v12944_v16 = vld [vmem:[#allocation19_spill] sm:$0xff]  ;;  %v12946_v26 = vld [vmem:[#allocation32_spill] sm:$0xff] }
0x245c   :  { %4302 = vmatpush1.msra.mxu1 %v10882_v29  ;;  %4341 = vmatprep.mubr.f32.mxu1 %v12816_v4  ;;  %v11434_v29 = vld [vmem:[#allocation5 + $0x6a8] ss:$0 sm:$0xff] }
0x245d   :  { %4303 = vmatprep.subr.mxu1 %v10886_v27 }
0x245e   :  { %4304 = vmatpush1.msra.mxu1 %v10889_v0 }
0x245f   :  { %4305 = vmatprep.subr.mxu1 %v10892_v44 }
0x2460   :  { %4306 = vmatpush1.msra.mxu1 %v10895_v8 }
0x2461   :  { %4307 = vmatprep.subr.mxu1 %v10898_v61 }
0x2462   :  { %4308 = vmatpush1.msra.mxu1 %v10901_v39  ;;  %v12928_v39 = vld [vmem:[#allocation21_spill] sm:$0xff] }
0x2463   :  { %9199 = vmatprep.subr.mxu1 %v12816_v4 }
0x251b   :  { %v4131_v22 = vpop.f32.mrf.mxu1 }
0x251c   :  { %v4204_v45 = vadd.f32 %v4203_v14, %v4131_v22  ;;  %v12942_v14 = vld [vmem:[#allocation17_spill] sm:$0xff]  ;;  %v12947_v22 = vld [vmem:[#allocation50_spill] sm:$0xff] }
0x251d   :  { %v9176_v58 = vpop.f32.mrf.mxu1 }
0x251e   :  { %v11437_v23 = vadd.f32 %v11434_v29, %v4204_v45 }
0x2520   :  { %8181 = vmatmul.mubr.msk.f32.vlgmr.msra.gmra.mxu1 %vm448_vm5, %v11437_v23  ;;  %9197 = vmatmul.mubr.msk.f32.vlgmr.msra.gmra.mxu0 %vm448_vm5, %v11437_v23 }
0x2521   :  { %9200 = vmatpush3.msra.mxu1 %v10912_v60  ;;  %9231 = vmatprep.mubr.msk.f32.mxu1 %vm10175_vm3, %v12816_v4 }
0x2522   :  { %9201 = vmatprep.subr.mxu1 %v12816_v4  ;;  %9235 = vmatpush3.msra.mxu0 %v11205_v50 }
0x2523   :  { %9202 = vmatpush3.msra.mxu1 %v10919_v62  ;;  %9236 = vmatprep.subr.mxu0 %v12816_v4 }
0x2524   :  { %9203 = vmatprep.subr.mxu1 %v12816_v4  ;;  %9237 = vmatpush3.msra.mxu0 %v11211_v10 }
0x2525   :  { %9204 = vmatpush3.msra.mxu1 %v10925_v1  ;;  %9238 = vmatprep.mubr.msk.f32.mxu0 %vm10175_vm3, %v12816_v4 }
0x2526   :  { %9205 = vmatprep.subr.mxu1 %v12816_v4  ;;  %4594 = vmatprep.subr.mxu0 %v11218_v17 }
0x2527   :  { %9206 = vmatpush3.msra.mxu1 %v10932_v46 }
0x2528   :  { %9207 = vmatprep.subr.mxu1 %v12816_v4 }
0x2529   :  { %9208 = vmatpush3.msra.mxu1 %v10936_v5 }
0x252a   :  { %9209 = vmatprep.subr.mxu1 %v12816_v4 }
0x252b   :  { %9210 = vmatpush3.msra.mxu1 %v10940_v49 }
0x252c   :  { %9211 = vmatprep.subr.mxu1 %v12816_v4 }
0x252d   :  { %9212 = vmatpush3.msra.mxu1 %v10944_v7 }
0x252e   :  { %9213 = vmatprep.subr.mxu1 %v12816_v4 }
0x252f   :  { %9214 = vmatpush3.msra.mxu1 %v10948_v59 }
0x2530   :  { %9215 = vmatprep.subr.mxu1 %v12816_v4 }
0x2531   :  { %9216 = vmatpush3.msra.mxu1 %v10952_v2 }
0x2532   :  { %9217 = vmatprep.subr.mxu1 %v12816_v4 }
0x2533   :  { %9218 = vmatpush3.msra.mxu1 %v10956_v9 }
0x2534   :  { %9219 = vmatprep.subr.mxu1 %v12816_v4 }
0x2535   :  { %9220 = vmatpush3.msra.mxu1 %v10960_v11 }
0x2536   :  { %9221 = vmatprep.subr.mxu1 %v12816_v4 }
0x2537   :  { %9222 = vmatpush3.msra.mxu1 %v10964_v12 }
0x2538   :  { %9223 = vmatprep.subr.mxu1 %v12816_v4 }
0x2539   :  { %9224 = vmatpush3.msra.mxu1 %v10968_v37  ;;  %v4491_v37 = vld [vmem:[#allocation2 + $0x20] sm:$0xff] }
0x253a   :  { %9225 = vmatprep.subr.mxu1 %v12816_v4 }
0x253b   :  { %9226 = vmatpush3.msra.mxu1 %v10972_v31 }
0x253c   :  { %9227 = vmatprep.subr.mxu1 %v12816_v4 }
0x253d   :  { %9228 = vmatpush3.msra.mxu1 %v10976_v53 }
0x253e   :  { %9229 = vmatprep.subr.mxu1 %v12816_v4 }
0x253f   :  { %9230 = vmatpush3.msra.mxu1 %v10980_v56 }
0x2540   :  { %9260 = vmatprep.subr.mxu1 %v12816_v4 }
0x25e0   :  { %v4343_v27 = vpop.f32.mrf.mxu1  ;;  %v11483_v0 = vpop.f32.mrf.mxu0 }
0x25e1   :  { %v4344_v44 = vadd.f32 %v4343_v27, %v10379_v20  ;;  %v4415_v45 = vadd.f32 %v11483_v0, %v12947_v22  ;;  %v12951_v0 = vld [vmem:[#allocation36_spill] sm:$0xff] }
0x25e2   :  { %v4345_v8 = vpop.f32.mrf.mxu1  ;;  %v9198_v61 = vpop.f32.mrf.mxu0 }
0x25e3   :  { %v4418_v60 = vadd.f32 %v4344_v44, %v12928_v39  ;;  %v11488_v62 = vadd.f32 %v4345_v8, %v12923_v38  ;;  %v12948_v61 = vld [vmem:[#allocation22_spill] sm:$0xff] }
0x25e5   :  { %v4419_v1 = vmax.f32 %v4418_v60, 0.0  ;;  %4904 = vrot.lane.b32.xlu0 %v11488_v62, %s10177_s28 }
0x25e7   :  { %9232 = vmatmul.mubr.f32.vlgmr.msra.gmra.mxu1 %v4419_v1  ;;  %v12949_v1 = vld [vmem:[#allocation33_spill] sm:$0xff] }
0x25e8   :  { %9261 = vmatpush3.msra.mxu1 %v10993_v52  ;;  %9268 = vmatprep.mubr.msk.f32.mxu1 %vm10175_vm3, %v12816_v4  ;;  %v12930_v52 = vld [vmem:[#allocation38_spill] sm:$0xff] }
0x25e9   :  { %9262 = vmatprep.subr.mxu1 %v12816_v4 }
0x25ea   :  { %9263 = vmatpush3.msra.mxu1 %v12894_v33  ;;  %v12932_v33 = vld [vmem:[#allocation41_spill] sm:$0xff] }
0x25eb   :  { %9264 = vmatprep.subr.mxu1 %v12816_v4 }
0x25ec   :  { %9265 = vmatpush3.msra.mxu1 %v12895_v18  ;;  %v12934_v18 = vld [vmem:[#allocation43_spill] sm:$0xff] }
0x25ed   :  { %9266 = vmatprep.subr.mxu1 %v12816_v4 }
0x25ee   :  { %9267 = vmatpush3.msra.mxu1 %v12896_v30  ;;  %v12937_v30 = vld [vmem:[#allocation46_spill] sm:$0xff] }
0x25ef   :  { %9269 = vmatmul.mubr.msk.f32.vlgmr.msra.gmra.mxu1 %vm448_vm5, %v11359_v34  ;;  %9282 = vmatprep.subr.mxu1 %v12816_v4 }
0x25f0   :  { %9284 = vmatprep.mubr.msk.f32.mxu1 %vm10175_vm3, %v12816_v4 }
0x26a7   :  { %v4486_v46 = vpop.f32.mrf.mxu1 }
0x26a8   :  { %v11507_v5 = vadd.f32 %v11015_v25, %v4486_v46  ;;  %v12931_v25 = vld [vmem:[#allocation39_spill] sm:$0xff] }
0x26a9   :  { %v9233_v49 = vpop.f32.mrf.mxu1 }
0x26aa   :  { %12929 = vst [vmem:[#allocation21_spill] sm:$0xff] %v11507_v5  ;;  %v4492_v7 = vmul.f32 0.5, %v11507_v5  ;;  %v12950_v49 = vld [vmem:[#allocation35_spill] sm:$0xff] }
0x26ac   :  { %v4493_v59 = vmul.f32 1.442695, %v4492_v7  ;;  %v12952_v7 = vld [vmem:[#allocation37_spill] sm:$0xff] }
0x26ae   :  { %9757 = vpow2.f32 %v4493_v59 }
0x26af   :  { %v4791_v2 = vpop.f32.mrf.mxu1 }
0x26b0   :  { %v4792_v12 = vadd.f32 %v11272_v51, %v4791_v2 }
0x26b1   :  { %v9270_v9 = vpop.f32.mrf.mxu1 }
0x26bb   :  { %v9758_v11 = vpop.eup %9757 }
0x26bc   :  { %4496 = vrot.lane.b32.xlu1 %v9758_v11, %s10176_s27 }
0x26c0   :  { %4803 = vrot.lane.b32.xlu1 %v4792_v12, %s10177_s28 }
0x272e   :  { %v4497_v31 = vpop.permute.xlu1 %4496 }
0x272f   :  { %v4499_v53 = vmul.f32 %v4497_v31, %v4491_v37 }
0x2731   :  { %v4500_v56 = vadd.f32 %v4499_v53, %v11507_v5 }
0x2732   :  { %v4804_v11 = vpop.permute.xlu1 %4803 }
0x2733   :  { %9239 = vmatmul.mubr.msk.f32.vlgmr.msra.gmra.mxu0 %vm695_vm4, %v4500_v56 }
0x2734   :  { %4595 = vmatpush1.msra.mxu0 %v11029_v47  ;;  %4642 = vmatprep.mubr.f32.mxu0 %v12816_v4  ;;  %v12933_v47 = vld [vmem:[#allocation42_spill] sm:$0xff] }
0x2735   :  { %4596 = vmatprep.subr.mxu0 %v11033_v63  ;;  %v12935_v63 = vld [vmem:[#allocation44_spill] sm:$0xff] }
0x2736   :  { %4597 = vmatpush1.msra.mxu0 %v11036_v48  ;;  %v12936_v48 = vld [vmem:[#allocation45_spill] sm:$0xff] }
0x2737   :  { %4598 = vmatprep.subr.mxu0 %v12898_v15 }
0x2738   :  { %4599 = vmatpush1.msra.mxu0 %v12899_v54  ;;  %v12938_v54 = vld [vmem:[#allocation47_spill] sm:$0xff] }
0x2739   :  { %4600 = vmatprep.subr.mxu0 %v12900_v6 }
0x273a   :  { %4601 = vmatpush1.msra.mxu0 %v12930_v52 }
0x273b   :  { %4602 = vmatprep.subr.mxu0 %v12931_v25 }
0x273c   :  { %4603 = vmatpush1.msra.mxu0 %v12903_v43  ;;  %v12939_v43 = vld [vmem:[#allocation48_spill] sm:$0xff] }
0x273d   :  { %4604 = vmatprep.subr.mxu0 %v12932_v33 }
0x273e   :  { %4605 = vmatpush1.msra.mxu0 %v12933_v47  ;;  %v12954_v47 = vld [vmem:[#allocation20_spill] sm:$0xff] }
0x273f   :  { %4606 = vmatprep.subr.mxu0 %v12934_v18 }
0x2740   :  { %4607 = vmatpush1.msra.mxu0 %v12935_v63 }
0x2741   :  { %4608 = vmatprep.subr.mxu0 %v12936_v48 }
0x2742   :  { %4609 = vmatpush1.msra.mxu0 %v12937_v30 }
0x2743   :  { %9241 = vmatprep.subr.mxu0 %v12816_v4 }
0x27f3   :  { %v4570_v15 = vpop.f32.mrf.mxu0 }
0x27f4   :  { %v4571_v6 = vadd.f32 %v12938_v54, %v4570_v15  ;;  %v12955_v15 = vld [vmem:[#allocation56_spill] sm:$0xff]  ;;  %v12956_v54 = vld [vmem:[#allocation57_spill] sm:$0xff] }
0x27f5   :  { %v9240_v34 = vpop.f32.mrf.mxu0 }
0x27f6   :  { %v4574_v55 = vmax.f32 %v4571_v6, 0.0  ;;  %v12957_v6 = vld [vmem:[#allocation58_spill] sm:$0xff]  ;;  %v12958_v34 = vld [vmem:[#allocation59_spill] sm:$0xff] }
0x27f8   :  { %8184 = vmatmul.mubr.msk.f32.vlgmr.msra.gmra.mxu0 %vm231_vm2, %v4574_v55 }
0x27f9   :  { %9242 = vmatpush3.msra.mxu0 %v12939_v43  ;;  %9257 = vmatprep.mubr.msk.f32.mxu0 %vm10175_vm3, %v12816_v4 }
0x27fa   :  { %9243 = vmatprep.subr.mxu0 %v12816_v4 }
0x27fb   :  { %9244 = vmatpush3.msra.mxu0 %v12940_v42 }
0x27fc   :  { %9245 = vmatprep.subr.mxu0 %v12816_v4 }
0x27fd   :  { %9246 = vmatpush3.msra.mxu0 %v12941_v24 }
0x27fe   :  { %9247 = vmatprep.subr.mxu0 %v12816_v4 }
0x27ff   :  { %9248 = vmatpush3.msra.mxu0 %v12942_v14 }
0x2800   :  { %9249 = vmatprep.subr.mxu0 %v12816_v4 }
0x2801   :  { %9250 = vmatpush3.msra.mxu0 %v12943_v21 }
0x2802   :  { %9251 = vmatprep.subr.mxu0 %v12816_v4 }
0x2803   :  { %9252 = vmatpush3.msra.mxu0 %v12944_v16 }
0x2804   :  { %9253 = vmatprep.subr.mxu0 %v12816_v4 }
0x2805   :  { %9254 = vmatpush3.msra.mxu0 %v12945_v41 }
0x2806   :  { %9255 = vmatprep.subr.mxu0 %v12816_v4 }
0x2807   :  { %9256 = vmatpush3.msra.mxu0 %v12946_v26 }
0x2808   :  { %9271 = vmatprep.subr.mxu0 %v12816_v4 }
0x28b8   :  { %v4644_v58 = vpop.f32.mrf.mxu0 }
0x28b9   :  { %v4649_v27 = vadd.f32 %v4644_v58, %v4415_v45 }
0x28ba   :  { %v4646_v44 = vpop.f32.mrf.mxu0 }
0x28bb   :  { %v4650_v8 = vmax.f32 %v4649_v27, 0.0  ;;  %v4724_v39 = vadd.f32 %v4646_v44, %v12948_v61 }
0x28bd   :  { %v4795_v60 = vadd.f32 %v4792_v12, %v4724_v39  ;;  %9258 = vmatmul.mubr.msk.f32.vlgmr.msra.gmra.mxu0 %vm231_vm2, %v4650_v8  ;;  %v4905_v8 = vpop.permute.xlu0 %4904 }
0x28be   :  { %9272 = vmatpush3.msra.mxu0 %v12949_v1  ;;  %9279 = vmatprep.mubr.msk.f32.mxu0 %vm10175_vm3, %v12816_v4 }
0x28bf   :  { %v8187_v46 = vmul.f32 -1.442695, %v4795_v60  ;;  %9273 = vmatprep.subr.mxu0 %v12816_v4 }
0x28c0   :  { %9274 = vmatpush3.msra.mxu0 %v12950_v49 }
0x28c1   :  { %9759 = vpow2.f32 %v8187_v46  ;;  %9275 = vmatprep.subr.mxu0 %v12816_v4 }
0x28c2   :  { %9276 = vmatpush3.msra.mxu0 %v12951_v0 }
0x28c3   :  { %9277 = vmatprep.subr.mxu0 %v12816_v4 }
0x28c4   :  { %9278 = vmatpush3.msra.mxu0 %v12952_v7 }
0x28c5   :  { %9298 = vmatprep.subr.mxu0 %v12816_v4 }
0x28ce   :  { %v9760_v59 = vpop.eup %9759 }
0x28cf   :  { %v4799_v2 = vadd.f32 1.0, %v9760_v59 }
0x28d1   :  { %9761 = vrcp.f32 %v4799_v2 }
0x28de   :  { %v9762_v9 = vpop.eup %9761 }
0x28df   :  { %v4806_v12 = vmul.f32 %v9762_v9, %v4804_v11  ;;  %v4813_v25 = vsub.f32 1.0, %v9762_v9  ;;  %v4819_v18 = vmul.f32 %v9762_v9, %v12954_v47 }
0x28e1   :  { %4808 = vrot.lane.b32.xlu1 %v4806_v12, %s10177_s28 }
0x2953   :  { %v4809_v37 = vpop.permute.xlu1 %4808 }
0x2954   :  { %v4811_v31 = vadd.f32 %v4809_v37, %v4724_v39  ;;  %v373_v37 = vld [vmem:[%s12628_s1 + $0x20] sm:$0xff] }
0x2956   :  { %9763 = vtanh.f32 %v4811_v31  ;;  %v390_v31 = vsel %vm377_vm6, %v373_v37, 0.0 }
0x2963   :  { %v9764_v53 = vpop.eup %9763 }
0x2964   :  { %4815 = vrot.lane.b32.xlu1 %v9764_v53, %s10178_s29 }
0x297d   :  { %v11568_v56 = vpop.f32.mrf.mxu0 }
0x297e   :  { %12953 = vst [vmem:[#allocation38_spill] sm:$0xff] %v11568_v56 }
0x297f   :  { %v9259_v52 = vpop.f32.mrf.mxu0 }
0x29d6   :  { %v4816_v33 = vpop.permute.xlu1 %4815 }
0x29d7   :  { %v4818_v63 = vmul.f32 %v4816_v33, %v4813_v25 }
0x29d9   :  { %v11571_v48 = vadd.f32 %v4819_v18, %v4818_v63  ;;  %v11626_v18 = vld [vmem:[#allocation5 + $0x4c8] sm:$0xff]  ;;  %v11633_v63 = vld [vmem:[#allocation5 + $0x4b0] sm:$0xff] }
0x29db   :  { %4822 = vrot.lane.b32.xlu1 %v11571_v48, %s10178_s29 }
0x2a4d   :  { %v11575_v30 = vpop.permute.xlu1 %4822 }
0x2a4e   :  { %9280 = vmatmul.mubr.msk.f32.vlgmr.msra.gmra.mxu0 %vm448_vm5, %v11575_v30 }
0x2a4f   :  { %9299 = vmatpush3.msra.mxu0 %v12955_v15  ;;  %9306 = vmatprep.mubr.msk.f32.mxu0 %vm10175_vm3, %v12816_v4 }
0x2a50   :  { %9300 = vmatprep.subr.mxu0 %v12816_v4 }
0x2a51   :  { %9301 = vmatpush3.msra.mxu0 %v12956_v54 }
0x2a52   :  { %9302 = vmatprep.subr.mxu0 %v12816_v4 }
0x2a53   :  { %9303 = vmatpush3.msra.mxu0 %v12957_v6 }
0x2a54   :  { %9304 = vmatprep.subr.mxu0 %v12816_v4 }
0x2a55   :  { %9305 = vmatpush3.msra.mxu0 %v12958_v34 }
0x2a56   :  { %9309 = vmatprep.subr.mxu0 %v12816_v4 }
0x2b0e   :  { %v4892_v55 = vpop.f32.mrf.mxu0 }
0x2b0f   :  { %v4893_v43 = vadd.f32 %v11381_v13, %v4892_v55  ;;  %v11636_v55 = vld [vmem:[#allocation5 + $0x4a0] sm:$0xff] }
0x2b10   :  { %v9281_v42 = vpop.f32.mrf.mxu0 }
0x2b11   :  { %v4896_v24 = vadd.f32 %v4893_v43, %v11488_v62  ;;  %v11642_v42 = vld [vmem:[#allocation5 + $0x488] sm:$0xff] }
0x2b13   :  { %v8189_v45 = vmul.f32 -1.442695, %v4896_v24  ;;  %v11645_v24 = vld [vmem:[#allocation5 + $0x480] sm:$0xff] }
0x2b15   :  { %9765 = vpow2.f32 %v8189_v45 }
0x2b22   :  { %v9766_v58 = vpop.eup %9765 }
0x2b23   :  { %v4900_v27 = vadd.f32 1.0, %v9766_v58 }
0x2b25   :  { %9767 = vrcp.f32 %v4900_v27 }
0x2b32   :  { %v9768_v44 = vpop.eup %9767 }
0x2b33   :  { %v4907_v61 = vmul.f32 %v9768_v44, %v4905_v8  ;;  %v4914_v59 = vsub.f32 1.0, %v9768_v44  ;;  %v11656_v8 = vld [vmem:[#allocation5 + $0x270] sm:$0xff] }
0x2b35   :  { %4909 = vrot.lane.b32.xlu1 %v4907_v61, %s10177_s28  ;;  %v11663_v61 = vld [vmem:[#allocation5 + $0x258] sm:$0xff] }
0x2ba7   :  { %v4910_v39 = vpop.permute.xlu1 %4909 }
0x2ba8   :  { %v4912_v60 = vadd.f32 %v4910_v39, %v4893_v43  ;;  %v11639_v43 = vld [vmem:[#allocation5 + $0x498] sm:$0xff]  ;;  %v11669_v39 = vld [vmem:[#allocation5 + $0x240] sm:$0xff] }
0x2baa   :  { %9769 = vtanh.f32 %v4912_v60  ;;  %v11680_v60 = vld [vmem:[#allocation5 + $0x210] sm:$0xff] }
0x2bb7   :  { %v9770_v46 = vpop.eup %9769 }
0x2bb8   :  { %4916 = vrot.lane.b32.xlu1 %v9770_v46, %s10178_s29  ;;  %v11688_v46 = vld [vmem:[#allocation5 + $0x1e0] sm:$0xff] }
0x2bbc   :  { %4920 = vrot.lane.b32.xlu1 %v11437_v23, %s10179_s8 }
0x2c2a   :  { %v4917_v62 = vpop.permute.xlu1 %4916 }
0x2c2b   :  { %v4919_v9 = vmul.f32 %v4917_v62, %v4914_v59  ;;  %v11696_v62 = vld [vmem:[#allocation5 + $0x1b0] sm:$0xff]  ;;  %v11700_v59 = vld [vmem:[#allocation5 + $0x198] sm:$0xff] }
0x2c2e   :  { %v4921_v2 = vpop.permute.xlu1 %4920 }
0x2c2f   :  { %v4923_v11 = vmul.f32 %v9768_v44, %v4921_v2  ;;  %v11704_v2 = vld [vmem:[#allocation5 + $0x180] sm:$0xff] }
0x2c31   :  { %v4924_v12 = vadd.f32 %v4923_v11, %v4919_v9  ;;  %v11708_v9 = vld [vmem:[#allocation5 + $0x168] sm:$0xff]  ;;  %v11712_v11 = vld [vmem:[#allocation5 + $0x150] sm:$0xff] }
0x2c33   :  { %4926 = vrot.lane.b32.xlu1 %v4924_v12, %s10178_s29  ;;  %v11716_v12 = vld [vmem:[#allocation5 + $0x138] sm:$0xff] }
0x2c57   :  { %391 = vadd.xlane.f32.xlu1 %v390_v31  ;;  %v11724_v31 = vld [vmem:[#allocation5 + $0x108] sm:$0xff] }
0x2ca5   :  { %v4927_v53 = vpop.permute.xlu1 %4926 }
0x2ca6   :  { %9283 = vmatpush3.msra.mxu1 %v4927_v53  ;;  %9307 = vmatmul.mubr.msk.f32.vlgmr.msra.gmra.mxu0 %vm448_vm5, %v4927_v53 }
0x2ca7   :  { %9285 = vmatmul.mubr.msk.f32.vlgmr.msra.gmra.mxu1 %vm377_vm6, %v373_v37  ;;  %9287 = vmatprep.subr.mxu1 %v12816_v4  ;;  %v11720_v37 = vld [vmem:[#allocation5 + $0x120] sm:$0xff] }
0x2ca8   :  { %9288 = vmatpush3.msra.mxu1 %v11396_v35  ;;  %9295 = vmatprep.mubr.msk.f32.mxu1 %vm10175_vm3, %v12816_v4 }
0x2ca9   :  { %9289 = vmatprep.subr.mxu1 %v12816_v4  ;;  %9310 = vmatpush3.msra.mxu0 %v11160_v57  ;;  %v11618_v57 = vld [vmem:[#allocation5 + $0x4d0] sm:$0xff] }
0x2caa   :  { %9290 = vmatpush3.msra.mxu1 %v11403_v32  ;;  %9311 = vmatprep.subr.mxu0 %v12816_v4 }
0x2cab   :  { %9291 = vmatprep.subr.mxu1 %v12816_v4  ;;  %9312 = vmatpush3.msra.mxu0 %v11166_v3 }
0x2cac   :  { %9292 = vmatpush3.msra.mxu1 %v11409_v28  ;;  %9313 = vmatprep.subr.mxu0 %v12816_v4 }
0x2cad   :  { %9293 = vmatprep.subr.mxu1 %v12816_v4  ;;  %9314 = vmatpush3.msra.mxu0 %v11172_v36 }
0x2cae   :  { %9294 = vmatpush3.msra.mxu1 %v11415_v19  ;;  %9315 = vmatprep.subr.mxu0 %v12816_v4 }
0x2caf   :  { %5242 = vmatprep.subr.mxu1 %v11618_v57  ;;  %9316 = vmatpush3.msra.mxu0 %v11178_v40  ;;  %v11630_v40 = vld [vmem:[#allocation5 + $0x4b8] sm:$0xff] }
0x2cb0   :  { %9317 = vmatprep.mubr.msk.f32.mxu0 %vm10175_vm3, %v12816_v4  ;;  %9355 = vmatprep.subr.mxu0 %v12816_v4 }
0x2ce0   :  { %v392_v3 = vpop.xlane.xlu1 %391 }
0x2ce1   :  { %9771 = vrcp.f32 %v392_v3 }
0x2cee   :  { %v9772_v23 = vpop.eup %9771 }
0x2d66   :  { %v5144_v52 = vpop.f32.mrf.mxu0 }
0x2d67   :  { %v4998_v36 = vpop.f32.mrf.mxu1 }
0x2d68   :  { %v5002_v25 = vmul.f32 %v9772_v23, %v4998_v36  ;;  %v9308_v33 = vpop.f32.mrf.mxu0  ;;  %v12959_v36 = vld [vmem:[#allocation23_spill] sm:$0xff] }
0x2d69   :  { %v9286_v47 = vpop.f32.mrf.mxu1 }
0x2d6a   :  { %9296 = vmatmul.mubr.msk.f32.vlgmr.msra.gmra.mxu1 %vm448_vm5, %v5002_v25  ;;  %v11732_v47 = vld [vmem:[#allocation5 + $0x540] sm:$0xff] }
0x2d6b   :  { %5243 = vmatpush1.msra.mxu1 %v11626_v18  ;;  %5282 = vmatprep.mubr.f32.mxu1 %v12816_v4  ;;  %12960 = vst [vmem:[#allocation39_spill] sm:$0xff] %v11732_v47 }
0x2d6c   :  { %5244 = vmatprep.subr.mxu1 %v11630_v40 }
0x2d6d   :  { %5245 = vmatpush1.msra.mxu1 %v11633_v63 }
0x2d6e   :  { %5246 = vmatprep.subr.mxu1 %v11636_v55 }
0x2d6f   :  { %5247 = vmatpush1.msra.mxu1 %v11639_v43 }
0x2d70   :  { %5248 = vmatprep.subr.mxu1 %v11642_v42 }
0x2d71   :  { %5249 = vmatpush1.msra.mxu1 %v11645_v24 }
0x2d72   :  { %9320 = vmatprep.subr.mxu1 %v12816_v4 }
0x2e2a   :  { %v5072_v45 = vpop.f32.mrf.mxu1 }
0x2e2b   :  { %v5145_v58 = vadd.f32 %v5144_v52, %v5072_v45  ;;  %v11738_v45 = vld [vmem:[#allocation5 + $0x528] sm:$0xff] }
0x2e2c   :  { %v9297_v27 = vpop.f32.mrf.mxu1  ;;  %12961 = vst [vmem:[#allocation41_spill] sm:$0xff] %v11738_v45 }
0x2e2d   :  { %v11650_v44 = vadd.f32 %v11434_v29, %v5145_v58  ;;  %v11742_v58 = vld [vmem:[#allocation5 + $0x510] sm:$0xff]  ;;  %v11746_v27 = vld [vmem:[#allocation5 + $0x4f8] sm:$0xff] }
0x2e2e   :  { %12962 = vst [vmem:[#allocation42_spill] sm:$0xff] %v11742_v58  ;;  %12963 = vst [vmem:[#allocation43_spill] sm:$0xff] %v11746_v27 }
0x2e2f   :  { %8194 = vmatmul.mubr.msk.f32.vlgmr.msra.gmra.mxu1 %vm448_vm5, %v11650_v44  ;;  %9318 = vmatmul.mubr.msk.f32.vlgmr.msra.gmra.mxu0 %vm448_vm5, %v11650_v44 }
0x2e30   :  { %9321 = vmatpush3.msra.mxu1 %v11656_v8  ;;  %9352 = vmatprep.mubr.msk.f32.mxu1 %vm10175_vm3, %v12816_v4 }
0x2e31   :  { %9322 = vmatprep.subr.mxu1 %v12816_v4  ;;  %9356 = vmatpush3.msra.mxu0 %v11205_v50  ;;  %v11676_v50 = vld [vmem:[#allocation5 + $0x228] sm:$0xff] }
0x2e32   :  { %9323 = vmatpush3.msra.mxu1 %v11663_v61  ;;  %9357 = vmatprep.subr.mxu0 %v12816_v4 }
0x2e33   :  { %9324 = vmatprep.subr.mxu1 %v12816_v4  ;;  %9358 = vmatpush3.msra.mxu0 %v11211_v10  ;;  %v11684_v10 = vld [vmem:[#allocation5 + $0x1f8] sm:$0xff] }
0x2e34   :  { %9325 = vmatpush3.msra.mxu1 %v11669_v39  ;;  %9359 = vmatprep.mubr.msk.f32.mxu0 %vm10175_vm3, %v12816_v4 }
0x2e35   :  { %9326 = vmatprep.subr.mxu1 %v12816_v4  ;;  %5535 = vmatprep.subr.mxu0 %v11218_v17  ;;  %v11692_v17 = vld [vmem:[#allocation5 + $0x1c8] sm:$0xff] }
0x2e36   :  { %9327 = vmatpush3.msra.mxu1 %v11676_v50 }
0x2e37   :  { %9328 = vmatprep.subr.mxu1 %v12816_v4 }
0x2e38   :  { %9329 = vmatpush3.msra.mxu1 %v11680_v60 }
0x2e39   :  { %9330 = vmatprep.subr.mxu1 %v12816_v4 }
0x2e3a   :  { %9331 = vmatpush3.msra.mxu1 %v11684_v10 }
0x2e3b   :  { %9332 = vmatprep.subr.mxu1 %v12816_v4 }
0x2e3c   :  { %9333 = vmatpush3.msra.mxu1 %v11688_v46 }
0x2e3d   :  { %9334 = vmatprep.subr.mxu1 %v12816_v4 }
0x2e3e   :  { %9335 = vmatpush3.msra.mxu1 %v11692_v17 }
0x2e3f   :  { %9336 = vmatprep.subr.mxu1 %v12816_v4 }
0x2e40   :  { %9337 = vmatpush3.msra.mxu1 %v11696_v62 }
0x2e41   :  { %9338 = vmatprep.subr.mxu1 %v12816_v4 }
0x2e42   :  { %9339 = vmatpush3.msra.mxu1 %v11700_v59 }
0x2e43   :  { %9340 = vmatprep.subr.mxu1 %v12816_v4 }
0x2e44   :  { %9341 = vmatpush3.msra.mxu1 %v11704_v2 }
0x2e45   :  { %9342 = vmatprep.subr.mxu1 %v12816_v4 }
0x2e46   :  { %9343 = vmatpush3.msra.mxu1 %v11708_v9 }
0x2e47   :  { %9344 = vmatprep.subr.mxu1 %v12816_v4 }
0x2e48   :  { %9345 = vmatpush3.msra.mxu1 %v11712_v11 }
0x2e49   :  { %9346 = vmatprep.subr.mxu1 %v12816_v4 }
0x2e4a   :  { %9347 = vmatpush3.msra.mxu1 %v11716_v12 }
0x2e4b   :  { %9348 = vmatprep.subr.mxu1 %v12816_v4 }
0x2e4c   :  { %9349 = vmatpush3.msra.mxu1 %v11720_v37 }
0x2e4d   :  { %9350 = vmatprep.subr.mxu1 %v12816_v4 }
0x2e4e   :  { %9351 = vmatpush3.msra.mxu1 %v11724_v31 }
0x2e4f   :  { %9381 = vmatprep.subr.mxu1 %v12816_v4 }
0x2eef   :  { %v5284_v53 = vpop.f32.mrf.mxu1  ;;  %v11728_v3 = vpop.f32.mrf.mxu0 }
0x2ef0   :  { %v5285_v23 = vadd.f32 %v5284_v53, %v10379_v20 }
0x2ef1   :  { %v9319_v52 = vpop.f32.mrf.mxu0  ;;  %v11754_v53 = vpop.f32.mrf.mxu1 }
0x2ef2   :  { %v5359_v25 = vadd.f32 %v5285_v23, %v12959_v36  ;;  %v11756_v52 = vld [vmem:[#allocation5 + $0x288] ss:$0 sm:$0xff] }
0x2ef4   :  { %v5360_v33 = vmax.f32 %v5359_v25, 0.0 }
0x2ef6   :  { %9353 = vmatmul.mubr.f32.vlgmr.msra.gmra.mxu1 %v5360_v33 }
0x2ef7   :  { %9382 = vmatpush3.msra.mxu1 %v11732_v47  ;;  %9389 = vmatprep.mubr.msk.f32.mxu1 %vm10175_vm3, %v12816_v4 }
0x2ef8   :  { %9383 = vmatprep.subr.mxu1 %v12816_v4 }
0x2ef9   :  { %9384 = vmatpush3.msra.mxu1 %v11738_v45  ;;  %v5432_v45 = vld [vmem:[#allocation2 + $0x28] sm:$0xff] }
0x2efa   :  { %9385 = vmatprep.subr.mxu1 %v12816_v4 }
0x2efb   :  { %9386 = vmatpush3.msra.mxu1 %v11742_v58 }
0x2efc   :  { %9387 = vmatprep.subr.mxu1 %v12816_v4 }
0x2efd   :  { %9388 = vmatpush3.msra.mxu1 %v11746_v27 }
0x2efe   :  { %9390 = vmatmul.mubr.msk.f32.vlgmr.msra.gmra.mxu1 %vm448_vm5, %v11575_v30  ;;  %9403 = vmatprep.subr.mxu1 %v12816_v4 }
0x2eff   :  { %9405 = vmatprep.mubr.msk.f32.mxu1 %vm10175_vm3, %v12816_v4 }
0x2fb6   :  { %v5427_v23 = vpop.f32.mrf.mxu1 }
0x2fb7   :  { %v11759_v36 = vadd.f32 %v11756_v52, %v5427_v23 }
0x2fb8   :  { %v9354_v25 = vpop.f32.mrf.mxu1 }
0x2fb9   :  { %12964 = vst [vmem:[#allocation44_spill] sm:$0xff] %v11759_v36  ;;  %v5433_v33 = vmul.f32 0.5, %v11759_v36 }
0x2fbb   :  { %v5434_v56 = vmul.f32 1.442695, %v5433_v33  ;;  %v11770_v33 = vld [vmem:[#allocation5 + $0x390] sm:$0xff] }
0x2fbd   :  { %9773 = vpow2.f32 %v5434_v56  ;;  %v11774_v56 = vld [vmem:[#allocation5 + $0x380] sm:$0xff] }
0x2fbe   :  { %v5732_v5 = vpop.f32.mrf.mxu1 }
0x2fbf   :  { %v11764_v58 = vadd.f32 %v11272_v51, %v5732_v5  ;;  %v11777_v51 = vld [vmem:[#allocation5 + $0x378] sm:$0xff]  ;;  %v11780_v5 = vld [vmem:[#allocation5 + $0x368] sm:$0xff] }
0x2fc0   :  { %v9391_v30 = vpop.f32.mrf.mxu1  ;;  %12965 = vst [vmem:[#allocation45_spill] sm:$0xff] %v11780_v5 }
0x2fc1   :  { %v11792_v30 = vld [vmem:[#allocation5 + $0x338] sm:$0xff] }
0x2fc2   :  { %12969 = vst [vmem:[#allocation49_spill] sm:$0xff] %v11792_v30 }
0x2fca   :  { %v9774_v27 = vpop.eup %9773 }
0x2fcb   :  { %5437 = vrot.lane.b32.xlu0 %v9774_v27, %s10176_s27  ;;  %v11789_v27 = vld [vmem:[#allocation5 + $0x348] sm:$0xff] }
0x2fcc   :  { %12968 = vst [vmem:[#allocation48_spill] sm:$0xff] %v11789_v27 }
0x2fcf   :  { %5744 = vrot.lane.b32.xlu0 %v11764_v58, %s10177_s28 }
0x303d   :  { %v5438_v47 = vpop.permute.xlu0 %5437 }
0x303e   :  { %v5440_v23 = vmul.f32 %v5438_v47, %v5432_v45  ;;  %v11783_v47 = vld [vmem:[#allocation5 + $0x360] sm:$0xff]  ;;  %v11786_v45 = vld [vmem:[#allocation5 + $0x350] sm:$0xff] }
0x303f   :  { %12966 = vst [vmem:[#allocation46_spill] sm:$0xff] %v11783_v47  ;;  %12967 = vst [vmem:[#allocation47_spill] sm:$0xff] %v11786_v45 }
0x3040   :  { %v5441_v25 = vadd.f32 %v5440_v23, %v11759_v36  ;;  %v11795_v23 = vld [vmem:[#allocation5 + $0x330] sm:$0xff]  ;;  %v11801_v36 = vld [vmem:[#allocation5 + $0x318] sm:$0xff] }
0x3041   :  { %12970 = vst [vmem:[#allocation16_spill] sm:$0xff] %v11795_v23  ;;  %12972 = vst [vmem:[#allocation18_spill] sm:$0xff] %v11801_v36 }
0x3042   :  { %9360 = vmatmul.mubr.msk.f32.vlgmr.msra.gmra.mxu0 %vm695_vm4, %v5441_v25  ;;  %v11798_v25 = vld [vmem:[#allocation5 + $0x320] sm:$0xff] }
0x3043   :  { %5536 = vmatpush1.msra.mxu0 %v11770_v33  ;;  %5583 = vmatprep.mubr.f32.mxu0 %v12816_v4  ;;  %12971 = vst [vmem:[#allocation17_spill] sm:$0xff] %v11798_v25 }
0x3044   :  { %5537 = vmatprep.subr.mxu0 %v11774_v56 }
0x3045   :  { %5538 = vmatpush1.msra.mxu0 %v11777_v51 }
0x3046   :  { %5539 = vmatprep.subr.mxu0 %v11780_v5 }
0x3047   :  { %5540 = vmatpush1.msra.mxu0 %v11783_v47 }
0x3048   :  { %5541 = vmatprep.subr.mxu0 %v11786_v45  ;;  %v11804_v45 = vld [vmem:[#allocation5 + $0x308] sm:$0xff] }
0x3049   :  { %5542 = vmatpush1.msra.mxu0 %v11789_v27  ;;  %12973 = vst [vmem:[#allocation19_spill] sm:$0xff] %v11804_v45  ;;  %v11807_v27 = vld [vmem:[#allocation5 + $0x300] sm:$0xff] }
0x304a   :  { %5543 = vmatprep.subr.mxu0 %v11792_v30  ;;  %12974 = vst [vmem:[#allocation31_spill] sm:$0xff] %v11807_v27  ;;  %v11810_v30 = vld [vmem:[#allocation5 + $0x2f0] sm:$0xff] }
0x304b   :  { %5544 = vmatpush1.msra.mxu0 %v11795_v23  ;;  %12975 = vst [vmem:[#allocation32_spill] sm:$0xff] %v11810_v30  ;;  %v11813_v23 = vld [vmem:[#allocation5 + $0x2e8] sm:$0xff] }
0x304c   :  { %5545 = vmatprep.subr.mxu0 %v11798_v25  ;;  %12976 = vst [vmem:[#allocation22_spill] sm:$0xff] %v11813_v23 }
0x304d   :  { %5546 = vmatpush1.msra.mxu0 %v11801_v36  ;;  %v11817_v36 = vld [vmem:[#allocation5 + $0x2d0] ss:$0 sm:$0xff] }
0x304e   :  { %5547 = vmatprep.subr.mxu0 %v11804_v45  ;;  %12977 = vst [vmem:[#allocation33_spill] sm:$0xff] %v11817_v36 }
0x304f   :  { %5548 = vmatpush1.msra.mxu0 %v11807_v27  ;;  %v11821_v27 = vld [vmem:[#allocation5 + $0x450] sm:$0xff] }
0x3050   :  { %5549 = vmatprep.subr.mxu0 %v11810_v30  ;;  %12978 = vst [vmem:[#allocation35_spill] sm:$0xff] %v11821_v27 }
0x3051   :  { %5550 = vmatpush1.msra.mxu0 %v11813_v23  ;;  %v11827_v23 = vld [vmem:[#allocation5 + $0x438] sm:$0xff] }
0x3052   :  { %9362 = vmatprep.subr.mxu0 %v12816_v4  ;;  %12979 = vst [vmem:[#allocation36_spill] sm:$0xff] %v11827_v23 }
0x3102   :  { %v5511_v25 = vpop.f32.mrf.mxu0 }
0x3103   :  { %v5512_v47 = vadd.f32 %v11817_v36, %v5511_v25  ;;  %v11831_v25 = vld [vmem:[#allocation5 + $0x420] sm:$0xff] }
0x3104   :  { %v9361_v45 = vpop.f32.mrf.mxu0  ;;  %12980 = vst [vmem:[#allocation37_spill] sm:$0xff] %v11831_v25 }
0x3105   :  { %v5515_v5 = vmax.f32 %v5512_v47, 0.0 }
0x3107   :  { %8197 = vmatmul.mubr.msk.f32.vlgmr.msra.gmra.mxu0 %vm231_vm2, %v5515_v5 }
0x3108   :  { %9363 = vmatpush3.msra.mxu0 %v11821_v27  ;;  %9378 = vmatprep.mubr.msk.f32.mxu0 %vm10175_vm3, %v12816_v4 }
0x3109   :  { %9364 = vmatprep.subr.mxu0 %v12816_v4 }
0x310a   :  { %9365 = vmatpush3.msra.mxu0 %v11827_v23 }
0x310b   :  { %9366 = vmatprep.subr.mxu0 %v12816_v4 }
0x310c   :  { %9367 = vmatpush3.msra.mxu0 %v11831_v25  ;;  %v12981_v25 = vld [vmem:[#allocation24_spill] sm:$0xff] }
0x310d   :  { %9368 = vmatprep.subr.mxu0 %v12816_v4 }
0x310e   :  { %9369 = vmatpush3.msra.mxu0 %v12942_v14  ;;  %v5356_v14 = vadd.f32 %v11728_v3, %v12947_v22 }
0x310f   :  { %9370 = vmatprep.subr.mxu0 %v12816_v4 }
0x3110   :  { %9371 = vmatpush3.msra.mxu0 %v12943_v21 }
0x3111   :  { %9372 = vmatprep.subr.mxu0 %v12816_v4 }
0x3112   :  { %9373 = vmatpush3.msra.mxu0 %v12944_v16 }
0x3113   :  { %9374 = vmatprep.subr.mxu0 %v12816_v4 }
0x3114   :  { %9375 = vmatpush3.msra.mxu0 %v12945_v41 }
0x3115   :  { %9376 = vmatprep.subr.mxu0 %v12816_v4 }
0x3116   :  { %9377 = vmatpush3.msra.mxu0 %v12946_v26 }
0x3117   :  { %9392 = vmatprep.subr.mxu0 %v12816_v4 }
0x31c7   :  { %v5585_v5 = vpop.f32.mrf.mxu0 }
0x31c8   :  { %v5590_v47 = vadd.f32 %v5585_v5, %v5356_v14 }
0x31c9   :  { %v5587_v21 = vpop.f32.mrf.mxu0 }
0x31ca   :  { %v5591_v45 = vmax.f32 %v5590_v47, 0.0  ;;  %v5665_v23 = vadd.f32 %v5587_v21, %v12981_v25 }
0x31cc   :  { %v5736_v16 = vadd.f32 %v11764_v58, %v5665_v23  ;;  %9379 = vmatmul.mubr.msk.f32.vlgmr.msra.gmra.mxu0 %vm231_vm2, %v5591_v45  ;;  %v5745_v58 = vpop.permute.xlu0 %5744 }
0x31cd   :  { %9393 = vmatpush3.msra.mxu0 %v12949_v1  ;;  %9400 = vmatprep.mubr.msk.f32.mxu0 %vm10175_vm3, %v12816_v4 }
0x31ce   :  { %v8200_v41 = vmul.f32 -1.442695, %v5736_v16  ;;  %9394 = vmatprep.subr.mxu0 %v12816_v4 }
0x31cf   :  { %9395 = vmatpush3.msra.mxu0 %v12950_v49 }
0x31d0   :  { %9775 = vpow2.f32 %v8200_v41  ;;  %9396 = vmatprep.subr.mxu0 %v12816_v4 }
0x31d1   :  { %9397 = vmatpush3.msra.mxu0 %v12951_v0 }
0x31d2   :  { %9398 = vmatprep.subr.mxu0 %v12816_v4 }
0x31d3   :  { %9399 = vmatpush3.msra.mxu0 %v12952_v7 }
0x31d4   :  { %9419 = vmatprep.subr.mxu0 %v12816_v4 }
0x31dd   :  { %v9776_v26 = vpop.eup %9775 }
0x31de   :  { %v5740_v1 = vadd.f32 1.0, %v9776_v26 }
0x31e0   :  { %9777 = vrcp.f32 %v5740_v1 }
0x31ed   :  { %v9778_v3 = vpop.eup %9777 }
0x31ee   :  { %v5747_v25 = vmul.f32 %v9778_v3, %v5745_v58  ;;  %v5754_v7 = vsub.f32 1.0, %v9778_v3  ;;  %v5760_v45 = vmul.f32 %v9778_v3, %v11571_v48 }
0x31f0   :  { %5749 = vrot.lane.b32.xlu0 %v5747_v25, %s10177_s28 }
0x3262   :  { %v5750_v49 = vpop.permute.xlu0 %5749 }
0x3263   :  { %v5752_v14 = vadd.f32 %v5750_v49, %v5665_v23  ;;  %v5287_v23 = vadd.f32 %v11754_v53, %v12923_v38 }
0x3265   :  { %9779 = vtanh.f32 %v5752_v14 }
0x3272   :  { %v9780_v5 = vpop.eup %9779 }
0x3273   :  { %5756 = vrot.lane.b32.xlu0 %v9780_v5, %s10178_s29 }
0x328c   :  { %v11862_v0 = vpop.f32.mrf.mxu0 }
0x328d   :  { %12982 = vst [vmem:[#allocation20_spill] sm:$0xff] %v11862_v0  ;;  %v12999_v0 = vld [vmem:[#allocation22_spill] sm:$0xff] }
0x328e   :  { %v9380_v47 = vpop.f32.mrf.mxu0 }
0x32e5   :  { %v5757_v21 = vpop.permute.xlu0 %5756 }
0x32e6   :  { %v5759_v16 = vmul.f32 %v5757_v21, %v5754_v7 }
0x32e8   :  { %v11865_v41 = vadd.f32 %v5760_v45, %v5759_v16 }
0x32ea   :  { %5763 = vrot.lane.b32.xlu0 %v11865_v41, %s10178_s29 }
0x32ee   :  { %5845 = vrot.lane.b32.xlu0 %v5287_v23, %s10177_s28 }
0x335c   :  { %v11872_v26 = vpop.permute.xlu0 %5763 }
0x335d   :  { %9401 = vmatmul.mubr.msk.f32.vlgmr.msra.gmra.mxu0 %vm448_vm5, %v11872_v26 }
0x335e   :  { %9420 = vmatpush3.msra.mxu0 %v12955_v15  ;;  %9427 = vmatprep.mubr.msk.f32.mxu0 %vm10175_vm3, %v12816_v4 }
0x335f   :  { %9421 = vmatprep.subr.mxu0 %v12816_v4 }
0x3360   :  { %9422 = vmatpush3.msra.mxu0 %v12956_v54  ;;  %v5846_v49 = vpop.permute.xlu0 %5845 }
0x3361   :  { %9423 = vmatprep.subr.mxu0 %v12816_v4 }
0x3362   :  { %9424 = vmatpush3.msra.mxu0 %v12957_v6 }
0x3363   :  { %9425 = vmatprep.subr.mxu0 %v12816_v4 }
0x3364   :  { %9426 = vmatpush3.msra.mxu0 %v12958_v34 }
0x3365   :  { %9430 = vmatprep.subr.mxu0 %v12816_v4 }
0x341d   :  { %v5833_v48 = vpop.f32.mrf.mxu0 }
0x341e   :  { %v5834_v15 = vadd.f32 %v11381_v13, %v5833_v48  ;;  %v374_v13 = vld [vmem:[%s12628_s1 + $0x28] sm:$0xff] }
0x341f   :  { %v9402_v53 = vpop.f32.mrf.mxu0  ;;  %v393_v47 = vsel %vm377_vm6, %v374_v13, 0.0 }
0x3420   :  { %v5837_v1 = vadd.f32 %v5834_v15, %v5287_v23  ;;  %v11909_v53 = vld [vmem:[#allocation5 + $0x4c0] sm:$0xff] }
0x3422   :  { %v8202_v3 = vmul.f32 -1.442695, %v5837_v1 }
0x3424   :  { %9781 = vpow2.f32 %v8202_v3 }
0x3431   :  { %v9782_v58 = vpop.eup %9781 }
0x3432   :  { %v5841_v25 = vadd.f32 1.0, %v9782_v58 }
0x3434   :  { %9783 = vrcp.f32 %v5841_v25 }
0x3441   :  { %v9784_v54 = vpop.eup %9783 }
0x3442   :  { %v5848_v14 = vmul.f32 %v9784_v54, %v5846_v49  ;;  %v5855_v21 = vsub.f32 1.0, %v9784_v54 }
0x3444   :  { %5850 = vrot.lane.b32.xlu0 %v5848_v14, %s10177_s28 }
0x34b6   :  { %v5851_v6 = vpop.permute.xlu0 %5850 }
0x34b7   :  { %v5853_v5 = vadd.f32 %v5851_v6, %v5834_v15 }
0x34b9   :  { %9785 = vtanh.f32 %v5853_v5 }
0x34c6   :  { %v9786_v34 = vpop.eup %9785 }
0x34c7   :  { %5857 = vrot.lane.b32.xlu0 %v9786_v34, %s10178_s29  ;;  %v11948_v34 = vld [vmem:[#allocation5 + $0x2b8] sm:$0xff] }
0x34cb   :  { %5861 = vrot.lane.b32.xlu0 %v11650_v44, %s10179_s8  ;;  %v11903_v44 = vld [vmem:[#allocation5 + $0x4d8] sm:$0xff] }
0x34ea   :  { %394 = vadd.xlane.f32.xlu0 %v393_v47 }
0x3539   :  { %v5858_v7 = vpop.permute.xlu0 %5857 }
0x353a   :  { %v5860_v16 = vmul.f32 %v5858_v7, %v5855_v21 }
0x353d   :  { %v5862_v45 = vpop.permute.xlu0 %5861 }
0x353e   :  { %v5864_v23 = vmul.f32 %v9784_v54, %v5862_v45 }
0x3540   :  { %v5865_v48 = vadd.f32 %v5864_v23, %v5860_v16  ;;  %v12983_v23 = vld [vmem:[#allocation25_spill] sm:$0xff] }
0x3542   :  { %5867 = vrot.lane.b32.xlu1 %v5865_v48, %s10178_s29 }
0x35b4   :  { %v5868_v15 = vpop.permute.xlu1 %5867 }
0x35b5   :  { %9404 = vmatpush3.msra.mxu1 %v5868_v15  ;;  %9428 = vmatmul.mubr.msk.f32.vlgmr.msra.gmra.mxu0 %vm448_vm5, %v5868_v15 }
0x35b6   :  { %9406 = vmatmul.mubr.msk.f32.vlgmr.msra.gmra.mxu1 %vm377_vm6, %v374_v13  ;;  %9408 = vmatprep.subr.mxu1 %v12816_v4  ;;  %v11961_v13 = vld [vmem:[#allocation5 + $0x398] sm:$0xff] }
0x35b7   :  { %9409 = vmatpush3.msra.mxu1 %v11396_v35  ;;  %9416 = vmatprep.mubr.msk.f32.mxu1 %vm10175_vm3, %v12816_v4  ;;  %v11915_v35 = vld [vmem:[#allocation5 + $0x4a8] sm:$0xff] }
0x35b8   :  { %9410 = vmatprep.subr.mxu1 %v12816_v4  ;;  %9431 = vmatpush3.msra.mxu0 %v11903_v44 }
0x35b9   :  { %9411 = vmatpush3.msra.mxu1 %v11403_v32  ;;  %9432 = vmatprep.subr.mxu0 %v12816_v4  ;;  %v11921_v32 = vld [vmem:[#allocation5 + $0x490] sm:$0xff] }
0x35ba   :  { %9412 = vmatprep.subr.mxu1 %v12816_v4  ;;  %9433 = vmatpush3.msra.mxu0 %v11909_v53 }
0x35bb   :  { %9413 = vmatpush3.msra.mxu1 %v11409_v28  ;;  %9434 = vmatprep.subr.mxu0 %v12816_v4  ;;  %v395_v28 = vpop.xlane.xlu0 %394 }
0x35bc   :  { %9414 = vmatprep.subr.mxu1 %v12816_v4  ;;  %9435 = vmatpush3.msra.mxu0 %v11915_v35  ;;  %9787 = vrcp.f32 %v395_v28 }
0x35bd   :  { %9415 = vmatpush3.msra.mxu1 %v11415_v19  ;;  %9436 = vmatprep.subr.mxu0 %v12816_v4 }
0x35be   :  { %6183 = vmatprep.subr.mxu1 %v11618_v57  ;;  %9437 = vmatpush3.msra.mxu0 %v11921_v32 }
0x35bf   :  { %9438 = vmatprep.mubr.msk.f32.mxu0 %vm10175_vm3, %v12816_v4  ;;  %9476 = vmatprep.subr.mxu0 %v12816_v4 }
0x35c9   :  { %v9788_v1 = vpop.eup %9787 }
0x3675   :  { %v6085_v3 = vpop.f32.mrf.mxu0 }
0x3676   :  { %v5939_v58 = vpop.f32.mrf.mxu1 }
0x3677   :  { %v5943_v25 = vmul.f32 %v9788_v1, %v5939_v58  ;;  %v9429_v19 = vpop.f32.mrf.mxu0  ;;  %v12984_v1 = vld [vmem:[#allocation39_spill] sm:$0xff]  ;;  %v12986_v58 = vld [vmem:[#allocation42_spill] sm:$0xff] }
0x3678   :  { %v9407_v54 = vpop.f32.mrf.mxu1 }
0x3679   :  { %9417 = vmatmul.mubr.msk.f32.vlgmr.msra.gmra.mxu1 %vm448_vm5, %v5943_v25  ;;  %v12987_v25 = vld [vmem:[#allocation43_spill] sm:$0xff] }
0x367a   :  { %6184 = vmatpush1.msra.mxu1 %v11626_v18  ;;  %6223 = vmatprep.mubr.f32.mxu1 %v12816_v4 }
0x367b   :  { %6185 = vmatprep.subr.mxu1 %v11630_v40 }
0x367c   :  { %6186 = vmatpush1.msra.mxu1 %v11633_v63 }
0x367d   :  { %6187 = vmatprep.subr.mxu1 %v11636_v55 }
0x367e   :  { %6188 = vmatpush1.msra.mxu1 %v11639_v43 }
0x367f   :  { %6189 = vmatprep.subr.mxu1 %v11642_v42 }
0x3680   :  { %6190 = vmatpush1.msra.mxu1 %v11645_v24 }
0x3681   :  { %9441 = vmatprep.subr.mxu1 %v12816_v4 }
0x3739   :  { %v6013_v49 = vpop.f32.mrf.mxu1 }
0x373a   :  { %v6086_v14 = vadd.f32 %v6085_v3, %v6013_v49  ;;  %v12985_v3 = vld [vmem:[#allocation41_spill] sm:$0xff] }
0x373b   :  { %v9418_v6 = vpop.f32.mrf.mxu1 }
0x373c   :  { %v11938_v5 = vadd.f32 %v11434_v29, %v6086_v14  ;;  %v11954_v29 = vld [vmem:[#allocation5 + $0x2a0] sm:$0xff] }
0x373e   :  { %8207 = vmatmul.mubr.msk.f32.vlgmr.msra.gmra.mxu1 %vm448_vm5, %v11938_v5  ;;  %9439 = vmatmul.mubr.msk.f32.vlgmr.msra.gmra.mxu0 %vm448_vm5, %v11938_v5 }
0x373f   :  { %9442 = vmatpush3.msra.mxu1 %v11656_v8  ;;  %9473 = vmatprep.mubr.msk.f32.mxu1 %vm10175_vm3, %v12816_v4 }
0x3740   :  { %9443 = vmatprep.subr.mxu1 %v12816_v4  ;;  %9477 = vmatpush3.msra.mxu0 %v11948_v34 }
0x3741   :  { %9444 = vmatpush3.msra.mxu1 %v11663_v61  ;;  %9478 = vmatprep.subr.mxu0 %v12816_v4 }
0x3742   :  { %9445 = vmatprep.subr.mxu1 %v12816_v4  ;;  %9479 = vmatpush3.msra.mxu0 %v11954_v29 }
0x3743   :  { %9446 = vmatpush3.msra.mxu1 %v11669_v39  ;;  %9480 = vmatprep.mubr.msk.f32.mxu0 %vm10175_vm3, %v12816_v4 }
0x3744   :  { %9447 = vmatprep.subr.mxu1 %v12816_v4  ;;  %6476 = vmatprep.subr.mxu0 %v11961_v13 }
0x3745   :  { %9448 = vmatpush3.msra.mxu1 %v11676_v50 }
0x3746   :  { %9449 = vmatprep.subr.mxu1 %v12816_v4 }
0x3747   :  { %9450 = vmatpush3.msra.mxu1 %v11680_v60 }
0x3748   :  { %9451 = vmatprep.subr.mxu1 %v12816_v4 }
0x3749   :  { %9452 = vmatpush3.msra.mxu1 %v11684_v10 }
0x374a   :  { %9453 = vmatprep.subr.mxu1 %v12816_v4 }
0x374b   :  { %9454 = vmatpush3.msra.mxu1 %v11688_v46 }
0x374c   :  { %9455 = vmatprep.subr.mxu1 %v12816_v4 }
0x374d   :  { %9456 = vmatpush3.msra.mxu1 %v11692_v17 }
0x374e   :  { %9457 = vmatprep.subr.mxu1 %v12816_v4 }
0x374f   :  { %9458 = vmatpush3.msra.mxu1 %v11696_v62 }
0x3750   :  { %9459 = vmatprep.subr.mxu1 %v12816_v4 }
0x3751   :  { %9460 = vmatpush3.msra.mxu1 %v11700_v59 }
0x3752   :  { %9461 = vmatprep.subr.mxu1 %v12816_v4 }
0x3753   :  { %9462 = vmatpush3.msra.mxu1 %v11704_v2 }
0x3754   :  { %9463 = vmatprep.subr.mxu1 %v12816_v4 }
0x3755   :  { %9464 = vmatpush3.msra.mxu1 %v11708_v9 }
0x3756   :  { %9465 = vmatprep.subr.mxu1 %v12816_v4 }
0x3757   :  { %9466 = vmatpush3.msra.mxu1 %v11712_v11 }
0x3758   :  { %9467 = vmatprep.subr.mxu1 %v12816_v4 }
0x3759   :  { %9468 = vmatpush3.msra.mxu1 %v11716_v12 }
0x375a   :  { %9469 = vmatprep.subr.mxu1 %v12816_v4 }
0x375b   :  { %9470 = vmatpush3.msra.mxu1 %v11720_v37 }
0x375c   :  { %9471 = vmatprep.subr.mxu1 %v12816_v4 }
0x375d   :  { %9472 = vmatpush3.msra.mxu1 %v11724_v31 }
0x375e   :  { %9502 = vmatprep.subr.mxu1 %v12816_v4 }
0x37fe   :  { %v6225_v47 = vpop.f32.mrf.mxu1  ;;  %v11990_v7 = vpop.f32.mrf.mxu0 }
0x37ff   :  { %v6226_v21 = vadd.f32 %v6225_v47, %v10379_v20 }
0x3800   :  { %v6227_v45 = vpop.f32.mrf.mxu1  ;;  %v9440_v16 = vpop.f32.mrf.mxu0 }
0x3801   :  { %v6300_v48 = vadd.f32 %v6226_v21, %v12983_v23  ;;  %v11995_v15 = vadd.f32 %v6227_v45, %v12923_v38  ;;  %v6373_v23 = vld [vmem:[#allocation2 + $0x30] sm:$0xff] }
0x3803   :  { %v6301_v28 = vmax.f32 %v6300_v48, 0.0  ;;  %6786 = vrot.lane.b32.xlu0 %v11995_v15, %s10177_s28 }
0x3805   :  { %9474 = vmatmul.mubr.f32.vlgmr.msra.gmra.mxu1 %v6301_v28 }
0x3806   :  { %9503 = vmatpush3.msra.mxu1 %v12984_v1  ;;  %9510 = vmatprep.mubr.msk.f32.mxu1 %vm10175_vm3, %v12816_v4 }
0x3807   :  { %9504 = vmatprep.subr.mxu1 %v12816_v4 }
0x3808   :  { %9505 = vmatpush3.msra.mxu1 %v12985_v3 }
0x3809   :  { %9506 = vmatprep.subr.mxu1 %v12816_v4 }
0x380a   :  { %9507 = vmatpush3.msra.mxu1 %v12986_v58 }
0x380b   :  { %9508 = vmatprep.subr.mxu1 %v12816_v4 }
0x380c   :  { %9509 = vmatpush3.msra.mxu1 %v12987_v25 }
0x380d   :  { %9511 = vmatmul.mubr.msk.f32.vlgmr.msra.gmra.mxu1 %vm448_vm5, %v11872_v26  ;;  %9524 = vmatprep.subr.mxu1 %v12816_v4  ;;  %v12018_v26 = vld [vmem:[#allocation5 + $0x558] ss:$0 sm:$0xff] }
0x380e   :  { %9526 = vmatprep.mubr.msk.f32.mxu1 %vm10175_vm3, %v12816_v4 }
0x38c5   :  { %v6368_v19 = vpop.f32.mrf.mxu1 }
0x38c6   :  { %v12014_v54 = vadd.f32 %v11756_v52, %v6368_v19 }
0x38c7   :  { %v9475_v49 = vpop.f32.mrf.mxu1 }
0x38c8   :  { %12988 = vst [vmem:[#allocation56_spill] sm:$0xff] %v12014_v54  ;;  %v6374_v14 = vmul.f32 0.5, %v12014_v54  ;;  %v12989_v49 = vld [vmem:[#allocation45_spill] sm:$0xff] }
0x38ca   :  { %v6375_v6 = vmul.f32 1.442695, %v6374_v14  ;;  %v12990_v14 = vld [vmem:[#allocation46_spill] sm:$0xff] }
0x38cc   :  { %9789 = vpow2.f32 %v6375_v6  ;;  %v12991_v6 = vld [vmem:[#allocation47_spill] sm:$0xff] }
0x38cd   :  { %v6673_v47 = vpop.f32.mrf.mxu1 }
0x38ce   :  { %v6674_v16 = vadd.f32 %v12018_v26, %v6673_v47  ;;  %v12992_v47 = vld [vmem:[#allocation48_spill] sm:$0xff] }
0x38cf   :  { %v9512_v21 = vpop.f32.mrf.mxu1 }
0x38d0   :  { %v12993_v21 = vld [vmem:[#allocation49_spill] sm:$0xff] }
0x38d9   :  { %v9790_v45 = vpop.eup %9789 }
0x38da   :  { %6378 = vrot.lane.b32.xlu1 %v9790_v45, %s10176_s27  ;;  %v12994_v45 = vld [vmem:[#allocation16_spill] sm:$0xff] }
0x38de   :  { %6685 = vrot.lane.b32.xlu1 %v6674_v16, %s10177_s28 }
0x394c   :  { %v6379_v48 = vpop.permute.xlu1 %6378 }
0x394d   :  { %v6381_v28 = vmul.f32 %v6379_v48, %v6373_v23  ;;  %v12995_v23 = vld [vmem:[#allocation17_spill] sm:$0xff]  ;;  %v12996_v48 = vld [vmem:[#allocation18_spill] sm:$0xff] }
0x394f   :  { %v6382_v19 = vadd.f32 %v6381_v28, %v12014_v54  ;;  %v12997_v28 = vld [vmem:[#allocation19_spill] sm:$0xff] }
0x3951   :  { %9481 = vmatmul.mubr.msk.f32.vlgmr.msra.gmra.mxu0 %vm695_vm4, %v6382_v19  ;;  %v12998_v19 = vld [vmem:[#allocation31_spill] sm:$0xff] }
0x3952   :  { %6477 = vmatpush1.msra.mxu0 %v11770_v33  ;;  %6524 = vmatprep.mubr.f32.mxu0 %v12816_v4 }
0x3953   :  { %6478 = vmatprep.subr.mxu0 %v11774_v56 }
0x3954   :  { %6479 = vmatpush1.msra.mxu0 %v11777_v51 }
0x3955   :  { %6480 = vmatprep.subr.mxu0 %v12989_v49 }
0x3956   :  { %6481 = vmatpush1.msra.mxu0 %v12990_v14 }
0x3957   :  { %6482 = vmatprep.subr.mxu0 %v12991_v6 }
0x3958   :  { %6483 = vmatpush1.msra.mxu0 %v12992_v47 }
0x3959   :  { %6484 = vmatprep.subr.mxu0 %v12993_v21 }
0x395a   :  { %6485 = vmatpush1.msra.mxu0 %v12994_v45 }
0x395b   :  { %6486 = vmatprep.subr.mxu0 %v12995_v23 }
0x395c   :  { %6487 = vmatpush1.msra.mxu0 %v12996_v48 }
0x395d   :  { %6488 = vmatprep.subr.mxu0 %v12997_v28 }
0x395e   :  { %6489 = vmatpush1.msra.mxu0 %v12998_v19  ;;  %v13000_v19 = vld [vmem:[#allocation36_spill] sm:$0xff] }
0x395f   :  { %6490 = vmatprep.subr.mxu0 %v11810_v30 }
0x3960   :  { %6491 = vmatpush1.msra.mxu0 %v12999_v0  ;;  %v13001_v0 = vld [vmem:[#allocation37_spill] sm:$0xff] }
0x3961   :  { %9483 = vmatprep.subr.mxu0 %v12816_v4 }
0x3a11   :  { %v6452_v54 = vpop.f32.mrf.mxu0 }
0x3a12   :  { %v6453_v38 = vadd.f32 %v11817_v36, %v6452_v54  ;;  %v12051_v54 = vld [vmem:[#allocation5 + $0x408] sm:$0xff] }
0x3a13   :  { %v9482_v21 = vpop.f32.mrf.mxu0  ;;  %13002 = vst [vmem:[#allocation57_spill] sm:$0xff] %v12051_v54  ;;  %v13007_v36 = vld [vmem:[#allocation26_spill] sm:$0xff] }
0x3a14   :  { %v6456_v47 = vmax.f32 %v6453_v38, 0.0  ;;  %v12055_v38 = vld [vmem:[#allocation5 + $0x3f0] sm:$0xff]  ;;  %v12063_v21 = vld [vmem:[#allocation5 + $0x3c0] sm:$0xff] }
0x3a15   :  { %13003 = vst [vmem:[#allocation58_spill] sm:$0xff] %v12055_v38  ;;  %13005 = vst [vmem:[#allocation23_spill] sm:$0xff] %v12063_v21 }
0x3a16   :  { %8210 = vmatmul.mubr.msk.f32.vlgmr.msra.gmra.mxu0 %vm231_vm2, %v6456_v47  ;;  %v12059_v47 = vld [vmem:[#allocation5 + $0x3d8] sm:$0xff] }
0x3a17   :  { %9484 = vmatpush3.msra.mxu0 %v11821_v27  ;;  %9499 = vmatprep.mubr.msk.f32.mxu0 %vm10175_vm3, %v12816_v4  ;;  %13004 = vst [vmem:[#allocation59_spill] sm:$0xff] %v12059_v47 }
0x3a18   :  { %9485 = vmatprep.subr.mxu0 %v12816_v4 }
0x3a19   :  { %9486 = vmatpush3.msra.mxu0 %v13000_v19 }
0x3a1a   :  { %9487 = vmatprep.subr.mxu0 %v12816_v4 }
0x3a1b   :  { %9488 = vmatpush3.msra.mxu0 %v13001_v0 }
0x3a1c   :  { %9489 = vmatprep.subr.mxu0 %v12816_v4 }
0x3a1d   :  { %9490 = vmatpush3.msra.mxu0 %v12051_v54  ;;  %v12067_v54 = vld [vmem:[#allocation5 + $0x3a8] sm:$0xff] }
0x3a1e   :  { %9491 = vmatprep.subr.mxu0 %v12816_v4  ;;  %13006 = vst [vmem:[#allocation24_spill] sm:$0xff] %v12067_v54 }
0x3a1f   :  { %9492 = vmatpush3.msra.mxu0 %v12055_v38  ;;  %v6297_v38 = vadd.f32 %v11990_v7, %v12947_v22  ;;  %v12081_v7 = vld [vmem:[#allocation5 + $0x5a0] sm:$0xff] }
0x3a20   :  { %9493 = vmatprep.subr.mxu0 %v12816_v4  ;;  %13009 = vst [vmem:[#allocation39_spill] sm:$0xff] %v12081_v7 }
0x3a21   :  { %9494 = vmatpush3.msra.mxu0 %v12059_v47 }
0x3a22   :  { %9495 = vmatprep.subr.mxu0 %v12816_v4 }
0x3a23   :  { %9496 = vmatpush3.msra.mxu0 %v12063_v21  ;;  %v12075_v21 = vld [vmem:[#allocation5 + $0x5b8] sm:$0xff] }
0x3a24   :  { %9497 = vmatprep.subr.mxu0 %v12816_v4  ;;  %13008 = vst [vmem:[#allocation25_spill] sm:$0xff] %v12075_v21 }
0x3a25   :  { %9498 = vmatpush3.msra.mxu0 %v12067_v54 }
0x3a26   :  { %9513 = vmatprep.subr.mxu0 %v12816_v4 }
0x3ad6   :  { %v6526_v0 = vpop.f32.mrf.mxu0 }
0x3ad7   :  { %v6531_v19 = vadd.f32 %v6526_v0, %v6297_v38 }
0x3ad8   :  { %v6528_v47 = vpop.f32.mrf.mxu0 }
0x3ad9   :  { %v6532_v27 = vmax.f32 %v6531_v19, 0.0  ;;  %v6606_v30 = vadd.f32 %v6528_v47, %v13007_v36  ;;  %v12085_v36 = vld [vmem:[#allocation5 + $0x588] sm:$0xff]  ;;  %v6686_v19 = vpop.permute.xlu1 %6685 }
0x3ada   :  { %13010 = vst [vmem:[#allocation41_spill] sm:$0xff] %v12085_v36 }
0x3adb   :  { %v6677_v28 = vadd.f32 %v6674_v16, %v6606_v30  ;;  %9500 = vmatmul.mubr.msk.f32.vlgmr.msra.gmra.mxu0 %vm231_vm2, %v6532_v27  ;;  %v12089_v27 = vld [vmem:[#allocation5 + $0x570] sm:$0xff] }
0x3adc   :  { %9514 = vmatpush3.msra.mxu0 %v12075_v21  ;;  %9521 = vmatprep.mubr.msk.f32.mxu0 %vm10175_vm3, %v12816_v4  ;;  %13011 = vst [vmem:[#allocation42_spill] sm:$0xff] %v12089_v27 }
0x3add   :  { %v8213_v54 = vmul.f32 -1.442695, %v6677_v28  ;;  %9515 = vmatprep.subr.mxu0 %v12816_v4 }
0x3ade   :  { %9516 = vmatpush3.msra.mxu0 %v12081_v7 }
0x3adf   :  { %9791 = vpow2.f32 %v8213_v54  ;;  %9517 = vmatprep.subr.mxu0 %v12816_v4 }
0x3ae0   :  { %9518 = vmatpush3.msra.mxu0 %v12085_v36 }
0x3ae1   :  { %9519 = vmatprep.subr.mxu0 %v12816_v4 }
0x3ae2   :  { %9520 = vmatpush3.msra.mxu0 %v12089_v27 }
0x3ae3   :  { %9540 = vmatprep.subr.mxu0 %v12816_v4 }
0x3aec   :  { %v9792_v0 = vpop.eup %9791 }
0x3aed   :  { %v6681_v16 = vadd.f32 1.0, %v9792_v0 }
0x3aef   :  { %9793 = vrcp.f32 %v6681_v16 }
0x3afc   :  { %v9794_v28 = vpop.eup %9793 }
0x3afd   :  { %v6688_v54 = vmul.f32 %v9794_v28, %v6686_v19  ;;  %v6695_v27 = vsub.f32 1.0, %v9794_v28  ;;  %v6701_v48 = vmul.f32 %v9794_v28, %v11865_v41  ;;  %v12116_v41 = vld [vmem:[#allocation5 + $0x600] sm:$0xff] }
0x3afe   :  { %13016 = vst [vmem:[#allocation16_spill] sm:$0xff] %v12116_v41 }
0x3aff   :  { %6690 = vrot.lane.b32.xlu1 %v6688_v54, %s10177_s28 }
0x3b71   :  { %v6691_v38 = vpop.permute.xlu1 %6690 }
0x3b72   :  { %v6693_v47 = vadd.f32 %v6691_v38, %v6606_v30  ;;  %v12106_v30 = vld [vmem:[#allocation5 + $0x630] sm:$0xff] }
0x3b73   :  { %13014 = vst [vmem:[#allocation46_spill] sm:$0xff] %v12106_v30 }
0x3b74   :  { %9795 = vtanh.f32 %v6693_v47 }
0x3b81   :  { %v9796_v36 = vpop.eup %9795 }
0x3b82   :  { %6697 = vrot.lane.b32.xlu1 %v9796_v36, %s10178_s29  ;;  %v12124_v36 = vld [vmem:[#allocation5 + $0x5d0] ss:$0 sm:$0xff] }
0x3b9b   :  { %v12095_v7 = vpop.f32.mrf.mxu0 }
0x3b9c   :  { %13012 = vst [vmem:[#allocation43_spill] sm:$0xff] %v12095_v7 }
0x3b9d   :  { %v9501_v21 = vpop.f32.mrf.mxu0 }
0x3bf4   :  { %v6698_v22 = vpop.permute.xlu1 %6697 }
0x3bf5   :  { %v6700_v0 = vmul.f32 %v6698_v22, %v6695_v27  ;;  %v12112_v22 = vld [vmem:[#allocation5 + $0x618] sm:$0xff] }
0x3bf6   :  { %13015 = vst [vmem:[#allocation47_spill] sm:$0xff] %v12112_v22 }
0x3bf7   :  { %v12098_v16 = vadd.f32 %v6701_v48, %v6700_v0  ;;  %v12120_v48 = vld [vmem:[#allocation5 + $0x5e8] sm:$0xff] }
0x3bf8   :  { %13017 = vst [vmem:[#allocation17_spill] sm:$0xff] %v12120_v48 }
0x3bf9   :  { %13013 = vst [vmem:[#allocation45_spill] sm:$0xff] %v12098_v16  ;;  %6704 = vrot.lane.b32.xlu1 %v12098_v16, %s10178_s29 }
0x3c6b   :  { %v12102_v19 = vpop.permute.xlu1 %6704 }
0x3c6c   :  { %9522 = vmatmul.mubr.msk.f32.vlgmr.msra.gmra.mxu0 %vm448_vm5, %v12102_v19 }
0x3c6d   :  { %9541 = vmatpush3.msra.mxu0 %v12106_v30  ;;  %9548 = vmatprep.mubr.msk.f32.mxu0 %vm10175_vm3, %v12816_v4 }
0x3c6e   :  { %9542 = vmatprep.subr.mxu0 %v12816_v4 }
0x3c6f   :  { %9543 = vmatpush3.msra.mxu0 %v12112_v22 }
0x3c70   :  { %9544 = vmatprep.subr.mxu0 %v12816_v4 }
0x3c71   :  { %9545 = vmatpush3.msra.mxu0 %v12116_v41  ;;  %v6787_v41 = vpop.permute.xlu0 %6786 }
0x3c72   :  { %9546 = vmatprep.subr.mxu0 %v12816_v4 }
0x3c73   :  { %9547 = vmatpush3.msra.mxu0 %v12120_v48 }
0x3c74   :  { %9551 = vmatprep.subr.mxu0 %v12816_v4 }
0x3d2c   :  { %v6774_v21 = vpop.f32.mrf.mxu0 }
0x3d2d   :  { %v6775_v27 = vadd.f32 %v12124_v36, %v6774_v21 }
0x3d2e   :  { %v9523_v28 = vpop.f32.mrf.mxu0 }
0x3d2f   :  { %v6778_v54 = vadd.f32 %v6775_v27, %v11995_v15 }
0x3d31   :  { %v8215_v38 = vmul.f32 -1.442695, %v6778_v54 }
0x3d33   :  { %9797 = vpow2.f32 %v8215_v38 }
0x3d40   :  { %v9798_v47 = vpop.eup %9797 }
0x3d41   :  { %v6782_v0 = vadd.f32 1.0, %v9798_v47 }
0x3d43   :  { %9799 = vrcp.f32 %v6782_v0 }
0x3d50   :  { %v9800_v7 = vpop.eup %9799 }
0x3d51   :  { %v6789_v22 = vmul.f32 %v9800_v7, %v6787_v41  ;;  %v6796_v21 = vsub.f32 1.0, %v9800_v7 }
0x3d53   :  { %6791 = vrot.lane.b32.xlu1 %v6789_v22, %s10177_s28  ;;  %v375_v22 = vld [vmem:[%s12628_s1 + $0x30] sm:$0xff] }
0x3dc5   :  { %v6792_v48 = vpop.permute.xlu1 %6791 }
0x3dc6   :  { %v6794_v30 = vadd.f32 %v6792_v48, %v6775_v27  ;;  %v12155_v48 = vld [vmem:[#allocation5 + $0x660] sm:$0xff] }
0x3dc8   :  { %9801 = vtanh.f32 %v6794_v30  ;;  %v396_v30 = vsel %vm377_vm6, %v375_v22, 0.0 }
0x3dd5   :  { %v9802_v16 = vpop.eup %9801 }
0x3dd6   :  { %6798 = vrot.lane.b32.xlu1 %v9802_v16, %s10178_s29  ;;  %v13018_v16 = vld [vmem:[#allocation29_spill] sm:$0xff] }
0x3dda   :  { %6802 = vrot.lane.b32.xlu1 %v11938_v5, %s10179_s8  ;;  %v12142_v5 = vld [vmem:[#allocation5 + $0x690] sm:$0xff] }
0x3e48   :  { %v6799_v15 = vpop.permute.xlu1 %6798 }
0x3e49   :  { %v6801_v54 = vmul.f32 %v6799_v15, %v6796_v21 }
0x3e4c   :  { %v6803_v28 = vpop.permute.xlu1 %6802 }
0x3e4d   :  { %v6805_v38 = vmul.f32 %v9800_v7, %v6803_v28  ;;  %v12149_v7 = vld [vmem:[#allocation5 + $0x678] sm:$0xff] }
0x3e4f   :  { %v6806_v47 = vadd.f32 %v6805_v38, %v6801_v54 }
0x3e51   :  { %6808 = vrot.lane.b32.xlu1 %v6806_v47, %s10178_s29  ;;  %v13036_v47 = vld [vmem:[#allocation50_spill] sm:$0xff] }
0x3e75   :  { %397 = vadd.xlane.f32.xlu1 %v396_v30 }
0x3e86   :  { %1386 = vrot.lane.b32.xlu1 %v13018_v16, %s10179_s8 }
0x3ec3   :  { %v6809_v41 = vpop.permute.xlu1 %6808 }
0x3ec4   :  { %9525 = vmatpush3.msra.mxu1 %v6809_v41  ;;  %9549 = vmatmul.mubr.msk.f32.vlgmr.msra.gmra.mxu0 %vm448_vm5, %v6809_v41  ;;  %v13037_v41 = vld [vmem:[#allocation15_spill] sm:$0xff] }
0x3ec5   :  { %9527 = vmatmul.mubr.msk.f32.vlgmr.msra.gmra.mxu1 %vm377_vm6, %v375_v22  ;;  %9529 = vmatprep.subr.mxu1 %v12816_v4 }
0x3ec6   :  { %9530 = vmatpush3.msra.mxu1 %v12142_v5  ;;  %9537 = vmatprep.mubr.msk.f32.mxu1 %vm10175_vm3, %v12816_v4 }
0x3ec7   :  { %9531 = vmatprep.subr.mxu1 %v12816_v4  ;;  %9552 = vmatpush3.msra.mxu0 %v11903_v44  ;;  %v12161_v44 = vld [vmem:[#allocation5 + $0x648] sm:$0xff] }
0x3ec8   :  { %9532 = vmatpush3.msra.mxu1 %v12149_v7  ;;  %9553 = vmatprep.subr.mxu0 %v12816_v4 }
0x3ec9   :  { %9533 = vmatprep.subr.mxu1 %v12816_v4  ;;  %9554 = vmatpush3.msra.mxu0 %v11909_v53 }
0x3eca   :  { %9534 = vmatpush3.msra.mxu1 %v12155_v48  ;;  %9555 = vmatprep.subr.mxu0 %v12816_v4 }
0x3ecb   :  { %9535 = vmatprep.subr.mxu1 %v12816_v4  ;;  %9556 = vmatpush3.msra.mxu0 %v11915_v35 }
0x3ecc   :  { %9536 = vmatpush3.msra.mxu1 %v12161_v44  ;;  %9557 = vmatprep.subr.mxu0 %v12816_v4 }
0x3ecd   :  { %7124 = vmatprep.subr.mxu1 %v11618_v57  ;;  %9558 = vmatpush3.msra.mxu0 %v11921_v32 }
0x3ece   :  { %9559 = vmatprep.mubr.msk.f32.mxu0 %vm10175_vm3, %v12816_v4  ;;  %9597 = vmatprep.subr.mxu0 %v12816_v4 }
0x3efe   :  { %v398_v53 = vpop.xlane.xlu1 %397 }
0x3eff   :  { %9803 = vrcp.f32 %v398_v53  ;;  %v13038_v53 = vld [vmem:[#allocation28_spill] sm:$0xff] }
0x3f0c   :  { %v9804_v27 = vpop.eup %9803 }
0x3f84   :  { %v7026_v0 = vpop.f32.mrf.mxu0 }
0x3f85   :  { %v6880_v35 = vpop.f32.mrf.mxu1 }
0x3f86   :  { %v6884_v15 = vmul.f32 %v9804_v27, %v6880_v35  ;;  %v9550_v21 = vpop.f32.mrf.mxu0  ;;  %v367_v27 = vadd.f32 %v13038_v53, %v13037_v41 }
0x3f87   :  { %v9528_v28 = vpop.f32.mrf.mxu1 }
0x3f88   :  { %9538 = vmatmul.mubr.msk.f32.vlgmr.msra.gmra.mxu1 %vm448_vm5, %v6884_v15 }
0x3f89   :  { %7125 = vmatpush1.msra.mxu1 %v11626_v18  ;;  %7164 = vmatprep.mubr.f32.mxu1 %v12816_v4  ;;  %v10050_v18 = vld [vmem:[#allocation5 + $0x6a8] ss:$0 sm:$0xff] }
0x3f8a   :  { %7126 = vmatprep.subr.mxu1 %v11630_v40 }
0x3f8b   :  { %7127 = vmatpush1.msra.mxu1 %v11633_v63 }
0x3f8c   :  { %7128 = vmatprep.subr.mxu1 %v11636_v55 }
0x3f8d   :  { %7129 = vmatpush1.msra.mxu1 %v11639_v43 }
0x3f8e   :  { %7130 = vmatprep.subr.mxu1 %v11642_v42  ;;  %v13019_v42 = vld [vmem:[#allocation27_spill] sm:$0xff] }
0x3f8f   :  { %7131 = vmatpush1.msra.mxu1 %v11645_v24 }
0x3f90   :  { %9562 = vmatprep.subr.mxu1 %v12816_v4 }
0x4048   :  { %v6954_v57 = vpop.f32.mrf.mxu1 }
0x4049   :  { %v7027_v32 = vadd.f32 %v7026_v0, %v6954_v57  ;;  %v13039_v57 = vld [vmem:[#allocation25_spill] sm:$0xff] }
0x404a   :  { %v9539_v54 = vpop.f32.mrf.mxu1 }
0x404b   :  { %v12180_v38 = vadd.f32 %v10050_v18, %v7027_v32  ;;  %v13040_v54 = vld [vmem:[#allocation39_spill] sm:$0xff]  ;;  %v13041_v18 = vld [vmem:[#allocation41_spill] sm:$0xff] }
0x404d   :  { %8220 = vmatmul.mubr.msk.f32.vlgmr.msra.gmra.mxu1 %vm448_vm5, %v12180_v38  ;;  %9560 = vmatmul.mubr.msk.f32.vlgmr.msra.gmra.mxu0 %vm448_vm5, %v12180_v38 }
0x404e   :  { %9563 = vmatpush3.msra.mxu1 %v11656_v8  ;;  %9594 = vmatprep.mubr.msk.f32.mxu1 %vm10175_vm3, %v12816_v4 }
0x404f   :  { %9564 = vmatprep.subr.mxu1 %v12816_v4  ;;  %9598 = vmatpush3.msra.mxu0 %v11948_v34  ;;  %v13026_v34 = vld [vmem:[#allocation22_spill] sm:$0xff] }
0x4050   :  { %9565 = vmatpush3.msra.mxu1 %v11663_v61  ;;  %9599 = vmatprep.subr.mxu0 %v12816_v4 }
0x4051   :  { %9566 = vmatprep.subr.mxu1 %v12816_v4  ;;  %9600 = vmatpush3.msra.mxu0 %v11954_v29 }
0x4052   :  { %9567 = vmatpush3.msra.mxu1 %v11669_v39  ;;  %9601 = vmatprep.mubr.msk.f32.mxu0 %vm10175_vm3, %v12816_v4 }
0x4053   :  { %9568 = vmatprep.subr.mxu1 %v12816_v4  ;;  %7417 = vmatprep.subr.mxu0 %v11961_v13  ;;  %v13027_v13 = vld [vmem:[#allocation33_spill] sm:$0xff] }
0x4054   :  { %9569 = vmatpush3.msra.mxu1 %v11676_v50 }
0x4055   :  { %9570 = vmatprep.subr.mxu1 %v12816_v4 }
0x4056   :  { %9571 = vmatpush3.msra.mxu1 %v11680_v60 }
0x4057   :  { %9572 = vmatprep.subr.mxu1 %v12816_v4 }
0x4058   :  { %9573 = vmatpush3.msra.mxu1 %v11684_v10 }
0x4059   :  { %9574 = vmatprep.subr.mxu1 %v12816_v4 }
0x405a   :  { %9575 = vmatpush3.msra.mxu1 %v11688_v46 }
0x405b   :  { %9576 = vmatprep.subr.mxu1 %v12816_v4 }
0x405c   :  { %9577 = vmatpush3.msra.mxu1 %v11692_v17 }
0x405d   :  { %9578 = vmatprep.subr.mxu1 %v12816_v4 }
0x405e   :  { %9579 = vmatpush3.msra.mxu1 %v11696_v62 }
0x405f   :  { %9580 = vmatprep.subr.mxu1 %v12816_v4 }
0x4060   :  { %9581 = vmatpush3.msra.mxu1 %v11700_v59 }
0x4061   :  { %9582 = vmatprep.subr.mxu1 %v12816_v4 }
0x4062   :  { %9583 = vmatpush3.msra.mxu1 %v11704_v2  ;;  %v7314_v2 = vld [vmem:[#allocation2 + $0x38] sm:$0xff] }
0x4063   :  { %9584 = vmatprep.subr.mxu1 %v12816_v4 }
0x4064   :  { %9585 = vmatpush3.msra.mxu1 %v11708_v9 }
0x4065   :  { %9586 = vmatprep.subr.mxu1 %v12816_v4 }
0x4066   :  { %9587 = vmatpush3.msra.mxu1 %v11712_v11 }
0x4067   :  { %9588 = vmatprep.subr.mxu1 %v12816_v4 }
0x4068   :  { %9589 = vmatpush3.msra.mxu1 %v11716_v12 }
0x4069   :  { %9590 = vmatprep.subr.mxu1 %v12816_v4 }
0x406a   :  { %9591 = vmatpush3.msra.mxu1 %v11720_v37  ;;  %v13020_v37 = vld [vmem:[#allocation48_spill] sm:$0xff] }
0x406b   :  { %9592 = vmatprep.subr.mxu1 %v12816_v4 }
0x406c   :  { %9593 = vmatpush3.msra.mxu1 %v11724_v31  ;;  %v13021_v31 = vld [vmem:[#allocation49_spill] sm:$0xff] }
0x406d   :  { %9623 = vmatprep.subr.mxu1 %v12816_v4 }
0x410d   :  { %v7166_v40 = vpop.f32.mrf.mxu1  ;;  %v12226_v63 = vpop.f32.mrf.mxu0 }
0x410e   :  { %v7167_v55 = vadd.f32 %v7166_v40, %v10379_v20  ;;  %v7238_v22 = vadd.f32 %v12226_v63, %v13036_v47  ;;  %v13042_v40 = vld [vmem:[#allocation42_spill] sm:$0xff] }
0x410f   :  { %v9561_v43 = vpop.f32.mrf.mxu0  ;;  %v12244_v20 = vpop.f32.mrf.mxu1 }
0x4110   :  { %v7241_v24 = vadd.f32 %v7167_v55, %v13019_v42 }
0x4112   :  { %v7242_v8 = vmax.f32 %v7241_v24, 0.0 }
0x4114   :  { %9595 = vmatmul.mubr.f32.vlgmr.msra.gmra.mxu1 %v7242_v8  ;;  %v12311_v8 = vld [vmem:[%s12628_s1 + $0x38] sm:$0xff]  ;;  %s10181_s1 = smov 126  }
0x4115   :  { %9624 = vmatpush3.msra.mxu1 %v12984_v1  ;;  %9631 = vmatprep.mubr.msk.f32.mxu1 %vm10175_vm3, %v12816_v4 }
0x4116   :  { %9625 = vmatprep.subr.mxu1 %v12816_v4 }
0x4117   :  { %9626 = vmatpush3.msra.mxu1 %v12985_v3 }
0x4118   :  { %9627 = vmatprep.subr.mxu1 %v12816_v4 }
0x4119   :  { %9628 = vmatpush3.msra.mxu1 %v12986_v58 }
0x411a   :  { %9629 = vmatprep.subr.mxu1 %v12816_v4 }
0x411b   :  { %9630 = vmatpush3.msra.mxu1 %v12987_v25  ;;  %v13028_v25 = vld [vmem:[#allocation35_spill] sm:$0xff] }
0x411c   :  { %9632 = vmatmul.mubr.msk.f32.vlgmr.msra.gmra.mxu1 %vm448_vm5, %v12102_v19  ;;  %9645 = vmatprep.subr.mxu1 %v12816_v4  ;;  %v13035_v19 = vld [vmem:[#allocation24_spill] sm:$0xff] }
0x411d   :  { %9647 = vmatprep.mubr.msk.f32.mxu1 %vm10175_vm3, %v12816_v4 }
0x41d4   :  { %v7309_v61 = vpop.f32.mrf.mxu1 }
0x41d5   :  { %v12247_v39 = vadd.f32 %v11756_v52, %v7309_v61  ;;  %v13022_v52 = vld [vmem:[#allocation18_spill] sm:$0xff]  ;;  %v399_v61 = vsel %vm377_vm6, %v12311_v8, 0.0 }
0x41d6   :  { %v9596_v50 = vpop.f32.mrf.mxu1 }
0x41d7   :  { %v7315_v60 = vmul.f32 0.5, %v12247_v39  ;;  %v1387_v50 = vpop.permute.xlu1 %1386 }
0x41d9   :  { %v7316_v10 = vmul.f32 1.442695, %v7315_v60  ;;  %v1389_v60 = vsub.f32 %v13018_v16, %v1387_v50 }
0x41db   :  { %9805 = vpow2.f32 %v7316_v10 }
0x41dc   :  { %v7614_v46 = vpop.f32.mrf.mxu1 }
0x41dd   :  { %v7615_v59 = vadd.f32 %v12018_v26, %v7614_v46  ;;  %v13029_v26 = vld [vmem:[#allocation36_spill] sm:$0xff] }
0x41de   :  { %v9633_v17 = vpop.f32.mrf.mxu1 }
0x41e8   :  { %v9806_v62 = vpop.eup %9805 }
0x41e9   :  { %7319 = vrot.lane.b32.xlu0 %v9806_v62, %s10176_s27 }
0x41ed   :  { %7626 = vrot.lane.b32.xlu0 %v7615_v59, %s10177_s28 }
0x425b   :  { %v7320_v9 = vpop.permute.xlu0 %7319 }
0x425c   :  { %v7322_v11 = vmul.f32 %v7320_v9, %v7314_v2 }
0x425e   :  { %v7323_v12 = vadd.f32 %v7322_v11, %v12247_v39  ;;  %v1411_v11 = vmul.f32 1.442695, %v13018_v16 }
0x425f   :  { %v7627_v42 = vpop.permute.xlu0 %7626 }
0x4260   :  { %9602 = vmatmul.mubr.msk.f32.vlgmr.msra.gmra.mxu0 %vm695_vm4, %v7323_v12 }
0x4261   :  { %7418 = vmatpush1.msra.mxu0 %v11770_v33  ;;  %7465 = vmatprep.mubr.f32.mxu0 %v12816_v4  ;;  %v13023_v33 = vld [vmem:[#allocation19_spill] sm:$0xff] }
0x4262   :  { %7419 = vmatprep.subr.mxu0 %v11774_v56  ;;  %v13024_v56 = vld [vmem:[#allocation31_spill] sm:$0xff] }
0x4263   :  { %7420 = vmatpush1.msra.mxu0 %v11777_v51  ;;  %v13025_v51 = vld [vmem:[#allocation32_spill] sm:$0xff] }
0x4264   :  { %7421 = vmatprep.subr.mxu0 %v12989_v49  ;;  %v13030_v49 = vld [vmem:[#allocation37_spill] sm:$0xff] }
0x4265   :  { %7422 = vmatpush1.msra.mxu0 %v12990_v14  ;;  %v13031_v14 = vld [vmem:[#allocation57_spill] sm:$0xff] }
0x4266   :  { %7423 = vmatprep.subr.mxu0 %v12991_v6  ;;  %v13032_v6 = vld [vmem:[#allocation58_spill] sm:$0xff] }
0x4267   :  { %7424 = vmatpush1.msra.mxu0 %v13020_v37 }
0x4268   :  { %7425 = vmatprep.subr.mxu0 %v13021_v31 }
0x4269   :  { %7426 = vmatpush1.msra.mxu0 %v12994_v45  ;;  %v13033_v45 = vld [vmem:[#allocation59_spill] sm:$0xff] }
0x426a   :  { %7427 = vmatprep.subr.mxu0 %v12995_v23  ;;  %v13034_v23 = vld [vmem:[#allocation23_spill] sm:$0xff] }
0x426b   :  { %7428 = vmatpush1.msra.mxu0 %v13022_v52 }
0x426c   :  { %7429 = vmatprep.subr.mxu0 %v13023_v33 }
0x426d   :  { %7430 = vmatpush1.msra.mxu0 %v13024_v56 }
0x426e   :  { %7431 = vmatprep.subr.mxu0 %v13025_v51 }
0x426f   :  { %7432 = vmatpush1.msra.mxu0 %v13026_v34 }
0x4270   :  { %9604 = vmatprep.subr.mxu0 %v12816_v4 }
0x4320   :  { %v7393_v29 = vpop.f32.mrf.mxu0 }
0x4321   :  { %v7394_v1 = vadd.f32 %v13027_v13, %v7393_v29 }
0x4322   :  { %v9603_v3 = vpop.f32.mrf.mxu0 }
0x4323   :  { %v7397_v58 = vmax.f32 %v7394_v1, 0.0 }
0x4325   :  { %8223 = vmatmul.mubr.msk.f32.vlgmr.msra.gmra.mxu0 %vm231_vm2, %v7397_v58 }
0x4326   :  { %9605 = vmatpush3.msra.mxu0 %v13028_v25  ;;  %9620 = vmatprep.mubr.msk.f32.mxu0 %vm10175_vm3, %v12816_v4  ;;  %v12330_v25 = vld [vmem:[#allocation5 + $0x468] ss:$0 sm:$0xff] }
0x4327   :  { %9606 = vmatprep.subr.mxu0 %v12816_v4 }
0x4328   :  { %9607 = vmatpush3.msra.mxu0 %v13029_v26  ;;  %v13043_v26 = vld [vmem:[#allocation53_spill] sm:$0xff] }
0x4329   :  { %9608 = vmatprep.subr.mxu0 %v12816_v4 }
0x432a   :  { %9609 = vmatpush3.msra.mxu0 %v13030_v49  ;;  %v941_v49 = vadd.f32 %v13043_v26, %v12330_v25 }
0x432b   :  { %9610 = vmatprep.subr.mxu0 %v12816_v4 }
0x432c   :  { %9611 = vmatpush3.msra.mxu0 %v13031_v14 }
0x432d   :  { %9612 = vmatprep.subr.mxu0 %v12816_v4 }
0x432e   :  { %9613 = vmatpush3.msra.mxu0 %v13032_v6  ;;  %v1429_v6 = vmul.f32 1.442695, %v941_v49 }
0x432f   :  { %9614 = vmatprep.subr.mxu0 %v12816_v4 }
0x4330   :  { %9615 = vmatpush3.msra.mxu0 %v13033_v45 }
0x4331   :  { %9616 = vmatprep.subr.mxu0 %v12816_v4 }
0x4332   :  { %9617 = vmatpush3.msra.mxu0 %v13034_v23 }
0x4333   :  { %9618 = vmatprep.subr.mxu0 %v12816_v4 }
0x4334   :  { %9619 = vmatpush3.msra.mxu0 %v13035_v19  ;;  %v13044_v19 = vld [vmem:[#allocation45_spill] sm:$0xff] }
0x4335   :  { %9634 = vmatprep.subr.mxu0 %v12816_v4 }
0x43e5   :  { %v7467_v30 = vpop.f32.mrf.mxu0 }
0x43e6   :  { %v7472_v0 = vadd.f32 %v7467_v30, %v7238_v22 }
0x43e7   :  { %v7469_v35 = vpop.f32.mrf.mxu0 }
0x43e8   :  { %v7473_v15 = vmax.f32 %v7472_v0, 0.0  ;;  %v7547_v21 = vadd.f32 %v7469_v35, %v367_v27  ;;  %v13045_v0 = vld [vmem:[#allocation55_spill] sm:$0xff] }
0x43ea   :  { %v7618_v28 = vadd.f32 %v7615_v59, %v7547_v21  ;;  %9621 = vmatmul.mubr.msk.f32.vlgmr.msra.gmra.mxu0 %vm231_vm2, %v7473_v15 }
0x43eb   :  { %9635 = vmatpush3.msra.mxu0 %v13039_v57  ;;  %9642 = vmatprep.mubr.msk.f32.mxu0 %vm10175_vm3, %v12816_v4 }
0x43ec   :  { %v8226_v32 = vmul.f32 -1.442695, %v7618_v28  ;;  %9636 = vmatprep.subr.mxu0 %v12816_v4 }
0x43ed   :  { %9637 = vmatpush3.msra.mxu0 %v13040_v54 }
0x43ee   :  { %9807 = vpow2.f32 %v8226_v32  ;;  %9638 = vmatprep.subr.mxu0 %v12816_v4  ;;  %v13046_v32 = vld [vmem:[#allocation46_spill] sm:$0xff] }
0x43ef   :  { %9639 = vmatpush3.msra.mxu0 %v13041_v18  ;;  %v13047_v18 = vld [vmem:[#allocation47_spill] sm:$0xff] }
0x43f0   :  { %9640 = vmatprep.subr.mxu0 %v12816_v4 }
0x43f1   :  { %9641 = vmatpush3.msra.mxu0 %v13042_v40  ;;  %v13048_v40 = vld [vmem:[#allocation16_spill] sm:$0xff] }
0x43f2   :  { %9661 = vmatprep.subr.mxu0 %v12816_v4 }
0x43fb   :  { %v9808_v63 = vpop.eup %9807 }
0x43fc   :  { %v7622_v55 = vadd.f32 1.0, %v9808_v63  ;;  %v13049_v63 = vld [vmem:[#allocation17_spill] sm:$0xff] }
0x43fe   :  { %9809 = vrcp.f32 %v7622_v55  ;;  %v10051_v55 = vld [vmem:[%s12627_s0] sm:$0xff] }
0x440b   :  { %v9810_v43 = vpop.eup %9809 }
0x440c   :  { %v7629_v24 = vmul.f32 %v9810_v43, %v7627_v42  ;;  %v7636_v45 = vsub.f32 1.0, %v9810_v43  ;;  %v7642_v47 = vmul.f32 %v9810_v43, %v13044_v19  ;;  %v1427_v43 = vsub.f32 %v10051_v55, %v941_v49 }
0x440e   :  { %7631 = vrot.lane.b32.xlu0 %v7629_v24, %s10177_s28  ;;  %v1428_v42 = vmul.f32 %v1427_v43, %v1427_v43 }
0x442d   :  { %400 = vadd.xlane.f32.xlu0 %v399_v61 }
0x4443   :  { %1391 = vrot.lane.b32.xlu0 %v1389_v60, %s10180_s21 }
0x4480   :  { %v7632_v10 = vpop.permute.xlu0 %7631 }
0x4481   :  { %v7634_v46 = vadd.f32 %v7632_v10, %v7547_v21 }
0x4483   :  { %9811 = vtanh.f32 %v7634_v46 }
0x4484   :  { %9813 = vpow2.f32 %v1411_v11 }
0x4490   :  { %v9812_v17 = vpop.eup %9811 }
0x4491   :  { %7638 = vrot.lane.b32.xlu0 %v9812_v17, %s10178_s29  ;;  %v9814_v37 = vpop.eup %9813 }
0x4495   :  { %1397 = vrot.lane.b32.xlu0 %v13018_v16, %s10178_s29 }
0x44aa   :  { %v12320_v62 = vpop.f32.mrf.mxu0 }
0x44ac   :  { %v9622_v59 = vpop.f32.mrf.mxu0 }
0x44b6   :  { %v12322_v2 = vpop.xlane.xlu0 %400 }
0x44ba   :  { %v1392_v9 = vpop.permute.xlu0 %1391 }
0x44bb   :  { %v1394_v12 = vsel %vm695_vm4, %v1392_v9, 0.0 }
0x44bc   :  { %1395 = vadd.xlane.f32.xlu1 %v1394_v12 }
0x44cd   :  { %1414 = vrot.lane.b32.xlu1 %v9814_v37, %s10180_s21 }
0x4503   :  { %v7639_v31 = vpop.permute.xlu0 %7638 }
0x4504   :  { %v7641_v23 = vmul.f32 %v7639_v31, %v7636_v45 }
0x4506   :  { %v7643_v22 = vadd.f32 %v7642_v47, %v7641_v23  ;;  %v13051_v47 = vld [vmem:[#allocation34_spill] sm:$0xff] }
0x4507   :  { %v1398_v52 = vpop.permute.xlu0 %1397 }
0x4508   :  { %v1400_v33 = vsub.f32 %v13018_v16, %v1398_v52  ;;  %v13050_v52 = vld [vmem:[#allocation30_spill] sm:$0xff] }
0x450a   :  { %v1401_v56 = vmul.f32 1.442695, %v1400_v33  ;;  %v1410_v13 = vmul.f32 %v1400_v33, %v1400_v33  ;;  %v1898_v33 = vadd.f32 %v13050_v52, %v12330_v25 }
0x450c   :  { %9815 = vpow2.f32 %v1401_v56 }
0x4519   :  { %v9816_v51 = vpop.eup %9815 }
0x451a   :  { %1404 = vrot.lane.b32.xlu0 %v9816_v51, %s10176_s27  ;;  %v2370_v51 = vmul.f32 1.442695, %v1898_v33 }
0x4545   :  { %v1396_v34 = vpop.xlane.xlu1 %1395 }
0x4546   :  { %v8141_v35 = vadd.f32 -16.0, %v1396_v34 }
0x4549   :  { %v1415_v29 = vpop.permute.xlu1 %1414 }
0x454a   :  { %9817 = vrcp.f32 %v1415_v29 }
0x454b   :  { %9819 = vpow2.f32 %v1429_v6 }
0x4557   :  { %v9818_v1 = vpop.eup %9817 }
0x4558   :  { %v1418_v3 = vmul.f32 %v9818_v1, %v1410_v13  ;;  %v9820_v30 = vpop.eup %9819 }
0x455a   :  { %v1419_v58 = vsel %vm695_vm4, %v1418_v3, 0.0  ;;  %v2352_v3 = vmul.f32 1.442695, %v13045_v0 }
0x455b   :  { %1420 = vadd.xlane.f32.xlu1 %v1419_v58 }
0x456c   :  { %1441 = vrot.lane.b32.xlu1 %v941_v49, %s10181_s1 }
0x458c   :  { %v1405_v16 = vpop.permute.xlu0 %1404 }
0x458d   :  { %v1407_v14 = vsel %vm695_vm4, %v1405_v16, 0.0  ;;  %v10052_v16 = vld [vmem:[%s12627_s0 + $0x8] sm:$0xff] }
0x458e   :  { %1408 = vadd.xlane.f32.xlu0 %v1407_v14  ;;  %v2368_v14 = vsub.f32 %v10052_v16, %v1898_v33 }
0x4590   :  { %v2369_v6 = vmul.f32 %v2368_v14, %v2368_v14 }
0x45a4   :  { %7645 = vrot.lane.b32.xlu0 %v7643_v22, %s10178_s29 }
0x45a8   :  { %1432 = vrot.lane.b32.xlu0 %v9820_v30, %s10181_s1 }
0x45e4   :  { %v1421_v41 = vpop.xlane.xlu1 %1420 }
0x45e8   :  { %v1442_v53 = vpop.permute.xlu1 %1441 }
0x45e9   :  { %v1444_v27 = vsel %vm60_vm1, %v1442_v53, 0.0 }
0x45ea   :  { %1445 = vadd.xlane.f32.xlu1 %v1444_v27 }
0x45fb   :  { %2338 = vrot.lane.b32.xlu1 %v13045_v0, %s10178_s29 }
0x4617   :  { %v1409_v15 = vpop.xlane.xlu0 %1408 }
0x4618   :  { %v1423_v21 = vadd.f32 %v8141_v35, %v1409_v15 }
0x461a   :  { %v12342_v28 = vadd.f32 %v1423_v21, %v1421_v41 }
0x461b   :  { %v7646_v57 = vpop.permute.xlu0 %7645 }
0x461c   :  { %8067 = vst.msk [vmem:[#allocation10] sm:$0xff] %vm448_vm5, %v7646_v57  ;;  %9643 = vmatmul.mubr.msk.f32.vlgmr.msra.gmra.mxu0 %vm448_vm5, %v7646_v57 }
0x461d   :  { %9662 = vmatpush3.msra.mxu0 %v13046_v32  ;;  %9669 = vmatprep.mubr.msk.f32.mxu0 %vm10175_vm3, %v12816_v4 }
0x461e   :  { %9663 = vmatprep.subr.mxu0 %v12816_v4 }
0x461f   :  { %v1433_v54 = vpop.permute.xlu0 %1432  ;;  %9664 = vmatpush3.msra.mxu0 %v13047_v18 }
0x4620   :  { %9821 = vrcp.f32 %v1433_v54  ;;  %9665 = vmatprep.subr.mxu0 %v12816_v4 }
0x4621   :  { %9666 = vmatpush3.msra.mxu0 %v13048_v40  ;;  %v1425_v40 = vmul.f32 0.5, %v12342_v28 }
0x4622   :  { %9667 = vmatprep.subr.mxu0 %v12816_v4 }
0x4623   :  { %9668 = vmatpush3.msra.mxu0 %v13049_v63 }
0x462d   :  { %v9822_v24 = vpop.eup %9821 }
0x462e   :  { %v1436_v61 = vmul.f32 %v9822_v24, %v1428_v42  ;;  %v13052_v24 = vld [vmem:[#allocation52_spill] sm:$0xff] }
0x4630   :  { %v1437_v50 = vsel %vm60_vm1, %v1436_v61, 0.0  ;;  %v7169_v61 = vadd.f32 %v12244_v20, %v13052_v24 }
0x4631   :  { %1438 = vadd.xlane.f32.xlu0 %v1437_v50 }
0x4647   :  { %2327 = vrot.lane.b32.xlu0 %v13045_v0, %s10179_s8 }
0x4673   :  { %v12361_v60 = vpop.xlane.xlu1 %1445 }
0x4677   :  { %v2339_v10 = vpop.permute.xlu1 %2338 }
0x4678   :  { %v2341_v46 = vsub.f32 %v13045_v0, %v2339_v10  ;;  %v3293_v10 = vmul.f32 1.442695, %v13051_v47 }
0x467a   :  { %v2342_v17 = vmul.f32 1.442695, %v2341_v46  ;;  %v2351_v27 = vmul.f32 %v2341_v46, %v2341_v46 }
0x467c   :  { %9823 = vpow2.f32 %v2342_v17 }
0x467d   :  { %9825 = vpow2.f32 %v2370_v51 }
0x467e   :  { %9827 = vpow2.f32 %v2352_v3 }
0x4689   :  { %v9824_v59 = vpop.eup %9823 }
0x468a   :  { %2345 = vrot.lane.b32.xlu1 %v9824_v59, %s10176_s27  ;;  %v9826_v29 = vpop.eup %9825 }
0x468b   :  { %v9828_v58 = vpop.eup %9827 }
0x46ba   :  { %v12365_v9 = vpop.xlane.xlu0 %1438 }
0x46be   :  { %v2328_v11 = vpop.permute.xlu0 %2327 }
0x46bf   :  { %v2330_v12 = vsub.f32 %v13045_v0, %v2328_v11 }
0x46c1   :  { %2332 = vrot.lane.b32.xlu0 %v2330_v12, %s10180_s21 }
0x46dc   :  { %v12369_v37 = vpop.f32.mrf.mxu0 }
0x46dd   :  { %v7716_v3 = vadd.f32 %v12124_v36, %v12369_v37  ;;  %v13054_v37 = vld [vmem:[#allocation54_spill] sm:$0xff] }
0x46de   :  { %v9644_v31 = vpop.f32.mrf.mxu0 }
0x46fc   :  { %v2346_v56 = vpop.permute.xlu1 %2345 }
0x46fd   :  { %v2348_v34 = vsel %vm695_vm4, %v2346_v56, 0.0 }
0x46fe   :  { %2349 = vadd.xlane.f32.xlu1 %v2348_v34 }
0x470f   :  { %2373 = vrot.lane.b32.xlu1 %v9826_v29, %s10181_s1 }
0x4733   :  { %v2333_v13 = vpop.permute.xlu0 %2332 }
0x4734   :  { %v2335_v1 = vsel %vm695_vm4, %v2333_v13, 0.0 }
0x4735   :  { %2336 = vadd.xlane.f32.xlu0 %v2335_v1 }
0x474b   :  { %2355 = vrot.lane.b32.xlu0 %v9828_v58, %s10180_s21  ;;  %v7719_v58 = vadd.f32 %v7716_v3, %v7169_v61 }
0x4787   :  { %v2350_v26 = vpop.xlane.xlu1 %2349 }
0x478b   :  { %v2374_v49 = vpop.permute.xlu1 %2373 }
0x478c   :  { %9829 = vrcp.f32 %v2374_v49 }
0x4799   :  { %v9830_v45 = vpop.eup %9829 }
0x479a   :  { %v2377_v23 = vmul.f32 %v9830_v45, %v2369_v6  ;;  %v13053_v45 = vld [vmem:[#allocation51_spill] sm:$0xff] }
0x479c   :  { %v2378_v19 = vsel %vm60_vm1, %v2377_v23, 0.0  ;;  %v2839_v23 = vadd.f32 %v13053_v45, %v12330_v25 }
0x479d   :  { %2379 = vadd.xlane.f32.xlu1 %v2378_v19 }
0x479e   :  { %v3311_v19 = vmul.f32 1.442695, %v2839_v23 }
0x47ae   :  { %3268 = vrot.lane.b32.xlu1 %v13051_v47, %s10179_s8 }
0x47be   :  { %v2337_v22 = vpop.xlane.xlu0 %2336 }
0x47bf   :  { %v8154_v30 = vadd.f32 -16.0, %v2337_v22 }
0x47c1   :  { %v2364_v41 = vadd.f32 %v8154_v30, %v2350_v26  ;;  %v8228_v26 = vmul.f32 -1.442695, %v7719_v58 }
0x47c2   :  { %v2356_v53 = vpop.permute.xlu0 %2355 }
0x47c3   :  { %9831 = vrcp.f32 %v2356_v53 }
0x47c4   :  { %9833 = vpow2.f32 %v3293_v10 }
0x47d0   :  { %v9832_v0 = vpop.eup %9831 }
0x47d1   :  { %v2359_v35 = vmul.f32 %v9832_v0, %v2351_v27  ;;  %v9834_v28 = vpop.eup %9833 }
0x47d3   :  { %v2360_v15 = vsel %vm695_vm4, %v2359_v35, 0.0 }
0x47d4   :  { %2361 = vadd.xlane.f32.xlu0 %v2360_v15 }
0x47ea   :  { %2382 = vrot.lane.b32.xlu0 %v1898_v33, %s10181_s1 }
0x4826   :  { %v2380_v21 = vpop.xlane.xlu1 %2379 }
0x4827   :  { %v2388_v17 = vadd.f32 3.675754, %v2380_v21 }
0x482a   :  { %v3269_v57 = vpop.permute.xlu1 %3268 }
0x482b   :  { %v3271_v32 = vsub.f32 %v13051_v47, %v3269_v57 }
0x482d   :  { %3273 = vrot.lane.b32.xlu1 %v3271_v32, %s10180_s21  ;;  %v10053_v32 = vld [vmem:[%s12627_s0 + $0x10] sm:$0xff] }
0x485d   :  { %v2362_v54 = vpop.xlane.xlu0 %2361 }
0x485e   :  { %v2365_v18 = vadd.f32 %v2364_v41, %v2362_v54  ;;  %v3309_v54 = vsub.f32 %v10053_v32, %v2839_v23 }
0x4860   :  { %v2366_v63 = vmul.f32 0.5, %v2365_v18  ;;  %v3310_v18 = vmul.f32 %v3309_v54, %v3309_v54 }
0x4861   :  { %v2383_v55 = vpop.permute.xlu0 %2382 }
0x4862   :  { %v2367_v43 = vadd.f32 %v2366_v63, %v1425_v40  ;;  %v2385_v42 = vsel %vm60_vm1, %v2383_v55, 0.0 }
0x4863   :  { %2386 = vadd.xlane.f32.xlu0 %v2385_v42 }
0x4879   :  { %7727 = vrot.lane.b32.xlu0 %v7169_v61, %s10177_s28 }
0x487d   :  { %3279 = vrot.lane.b32.xlu0 %v13051_v47, %s10178_s29 }
0x489f   :  { %v3274_v50 = vpop.permute.xlu1 %3273 }
0x48a0   :  { %v3276_v46 = vsel %vm695_vm4, %v3274_v50, 0.0 }
0x48a1   :  { %3277 = vadd.xlane.f32.xlu1 %v3276_v46  ;;  %v1447_v46 = vadd.f32 3.675754, %v12365_v9  ;;  %v4234_v9 = vmul.f32 1.442695, %v13054_v37 }
0x48b2   :  { %3296 = vrot.lane.b32.xlu1 %v9834_v28, %s10180_s21 }
0x48ec   :  { %v2387_v59 = vpop.xlane.xlu0 %2386 }
0x48ed   :  { %v12398_v11 = vadd.f32 %v2388_v17, %v2387_v59  ;;  %v1448_v17 = vadd.f32 %v1447_v46, %v12361_v60 }
0x48ef   :  { %v2390_v59 = vmul.f32 0.5, %v12398_v11 }
0x48f0   :  { %v7728_v20 = vpop.permute.xlu0 %7727 }
0x48f4   :  { %v3280_v12 = vpop.permute.xlu0 %3279 }
0x48f5   :  { %v3282_v31 = vsub.f32 %v13051_v47, %v3280_v12 }
0x48f7   :  { %v3283_v52 = vmul.f32 1.442695, %v3282_v31  ;;  %v3292_v34 = vmul.f32 %v3282_v31, %v3282_v31  ;;  %v1449_v31 = vmul.f32 0.5, %v1448_v17 }
0x48f9   :  { %9835 = vpow2.f32 %v3283_v52 }
0x4906   :  { %v9836_v33 = vpop.eup %9835 }
0x4907   :  { %3286 = vrot.lane.b32.xlu0 %v9836_v33, %s10176_s27  ;;  %v2391_v33 = vadd.f32 %v2390_v59, %v1449_v31 }
0x492a   :  { %v3278_v56 = vpop.xlane.xlu1 %3277 }
0x492b   :  { %v8167_v30 = vadd.f32 -16.0, %v3278_v56 }
0x492e   :  { %v3297_v51 = vpop.permute.xlu1 %3296 }
0x492f   :  { %9837 = vrcp.f32 %v3297_v51 }
0x4930   :  { %9839 = vpow2.f32 %v8228_v26 }
0x493c   :  { %v9838_v29 = vpop.eup %9837 }
0x493d   :  { %v3300_v13 = vmul.f32 %v9838_v29, %v3292_v34  ;;  %v9840_v16 = vpop.eup %9839 }
0x493e   :  { %v7723_v6 = vadd.f32 1.0, %v9840_v16 }
0x493f   :  { %v3301_v1 = vsel %vm695_vm4, %v3300_v13, 0.0 }
0x4940   :  { %3302 = vadd.xlane.f32.xlu1 %v3301_v1  ;;  %9841 = vrcp.f32 %v7723_v6 }
0x4941   :  { %9843 = vpow2.f32 %v3311_v19  ;;  %v13055_v19 = vld [vmem:[#allocation40_spill] sm:$0xff] }
0x494d   :  { %v9842_v47 = vpop.eup %9841 }
0x494e   :  { %v7730_v22 = vmul.f32 %v9842_v47, %v7728_v20  ;;  %v9844_v36 = vpop.eup %9843  ;;  %v7737_v13 = vsub.f32 1.0, %v9842_v47 }
0x4979   :  { %v3287_v49 = vpop.permute.xlu0 %3286 }
0x497a   :  { %v3289_v14 = vsel %vm695_vm4, %v3287_v49, 0.0 }
0x497b   :  { %3290 = vadd.xlane.f32.xlu0 %v3289_v14 }
0x4991   :  { %7732 = vrot.lane.b32.xlu0 %v7730_v22, %s10177_s28 }
0x4995   :  { %3314 = vrot.lane.b32.xlu0 %v9844_v36, %s10181_s1 }
0x4999   :  { %3323 = vrot.lane.b32.xlu0 %v2839_v23, %s10181_s1 }
0x499d   :  { %4209 = vrot.lane.b32.xlu0 %v13054_v37, %s10179_s8 }
0x49c9   :  { %v3303_v27 = vpop.xlane.xlu1 %3302 }
0x4a04   :  { %v3291_v41 = vpop.xlane.xlu0 %3290 }
0x4a05   :  { %v3305_v53 = vadd.f32 %v8167_v30, %v3291_v41 }
0x4a07   :  { %v3306_v0 = vadd.f32 %v3305_v53, %v3303_v27 }
0x4a08   :  { %v7733_v35 = vpop.permute.xlu0 %7732 }
0x4a09   :  { %v3307_v15 = vmul.f32 0.5, %v3306_v0  ;;  %v7735_v61 = vadd.f32 %v7733_v35, %v7716_v3  ;;  %v13056_v0 = vld [vmem:[#allocation21_spill] sm:$0xff] }
0x4a0b   :  { %v12413_v21 = vadd.f32 %v3307_v15, %v2367_v43 }
0x4a0c   :  { %v3315_v57 = vpop.permute.xlu0 %3314 }
0x4a0d   :  { %9845 = vrcp.f32 %v3315_v57 }
0x4a0e   :  { %9847 = vtanh.f32 %v7735_v61 }
0x4a0f   :  { %9849 = vpow2.f32 %v4234_v9 }
0x4a10   :  { %v3324_v42 = vpop.permute.xlu0 %3323 }
0x4a11   :  { %v3326_v24 = vsel %vm60_vm1, %v3324_v42, 0.0 }
0x4a14   :  { %v4210_v43 = vpop.permute.xlu0 %4209 }
0x4a15   :  { %v4212_v50 = vsub.f32 %v13054_v37, %v4210_v43 }
0x4a1a   :  { %v9846_v40 = vpop.eup %9845 }
0x4a1b   :  { %v3318_v63 = vmul.f32 %v9846_v40, %v3310_v18  ;;  %v9848_v10 = vpop.eup %9847 }
0x4a1c   :  { %v9850_v16 = vpop.eup %9849 }
0x4a1d   :  { %v3319_v55 = vsel %vm60_vm1, %v3318_v63, 0.0 }
0x4a1e   :  { %3320 = vadd.xlane.f32.xlu1 %v3319_v55 }
0x4a22   :  { %3327 = vadd.xlane.f32.xlu1 %v3326_v24 }
0x4a33   :  { %4214 = vrot.lane.b32.xlu1 %v4212_v50, %s10180_s21  ;;  %v13058_v50 = vld [vmem:[#allocation56_spill] sm:$0xff] }
0x4a37   :  { %7739 = vrot.lane.b32.xlu1 %v9848_v10, %s10178_s29 }
0x4a3b   :  { %7743 = vrot.lane.b32.xlu1 %v12180_v38, %s10179_s8 }
0x4a3f   :  { %4220 = vrot.lane.b32.xlu1 %v13054_v37, %s10178_s29 }
0x4aa7   :  { %v3321_v28 = vpop.xlane.xlu1 %3320 }
0x4aa8   :  { %v3329_v20 = vadd.f32 3.675754, %v3321_v28 }
0x4aab   :  { %v3328_v12 = vpop.xlane.xlu1 %3327 }
0x4aac   :  { %v3330_v52 = vadd.f32 %v3329_v20, %v3328_v12 }
0x4aae   :  { %v3331_v56 = vmul.f32 0.5, %v3330_v52  ;;  %v5175_v52 = vmul.f32 1.442695, %v13056_v0 }
0x4aaf   :  { %v4215_v51 = vpop.permute.xlu1 %4214 }
0x4ab0   :  { %v12430_v34 = vadd.f32 %v3331_v56, %v2391_v33  ;;  %v4217_v38 = vsel %vm695_vm4, %v4215_v51, 0.0 }
0x4ab1   :  { %4218 = vadd.xlane.f32.xlu0 %v4217_v38 }
0x4ab3   :  { %v7740_v29 = vpop.permute.xlu1 %7739 }
0x4ab4   :  { %v7742_v60 = vmul.f32 %v7740_v29, %v7737_v13 }
0x4ab7   :  { %v7744_v1 = vpop.permute.xlu1 %7743 }
0x4ab8   :  { %v7746_v3 = vmul.f32 %v9842_v47, %v7744_v1  ;;  %v3780_v47 = vadd.f32 %v13055_v19, %v12330_v25 }
0x4aba   :  { %v7747_v11 = vadd.f32 %v7746_v3, %v7742_v60  ;;  %v4252_v36 = vmul.f32 1.442695, %v3780_v47 }
0x4abb   :  { %v4221_v58 = vpop.permute.xlu1 %4220 }
0x4abc   :  { %v4223_v26 = vsub.f32 %v13054_v37, %v4221_v58 }
0x4abe   :  { %v4224_v49 = vmul.f32 1.442695, %v4223_v26  ;;  %v4233_v37 = vmul.f32 %v4223_v26, %v4223_v26 }
0x4ac0   :  { %9851 = vpow2.f32 %v4224_v49 }
0x4ac7   :  { %4237 = vrot.lane.b32.xlu0 %v9850_v16, %s10180_s21 }
0x4acd   :  { %v9852_v14 = vpop.eup %9851 }
0x4ace   :  { %4227 = vrot.lane.b32.xlu1 %v9852_v14, %s10176_s27 }
0x4b3a   :  { %v4219_v6 = vpop.xlane.xlu0 %4218 }
0x4b3b   :  { %v8180_v35 = vadd.f32 -16.0, %v4219_v6  ;;  %v13059_v6 = vld [vmem:[#allocation38_spill] sm:$0xff] }
0x4b3e   :  { %v4238_v45 = vpop.permute.xlu0 %4237 }
0x4b3f   :  { %9853 = vrcp.f32 %v4238_v45  ;;  %v12500_v45 = vadd.f32 %v13059_v6, %v12330_v25 }
0x4b40   :  { %v4228_v23 = vpop.permute.xlu1 %4227  ;;  %9855 = vpow2.f32 %v4252_v36  ;;  %v13060_v36 = vld [vmem:[#allocation43_spill] sm:$0xff] }
0x4b41   :  { %v4230_v22 = vsel %vm695_vm4, %v4228_v23, 0.0  ;;  %v5193_v19 = vmul.f32 1.442695, %v12500_v45 }
0x4b42   :  { %4231 = vadd.xlane.f32.xlu1 %v4230_v22 }
0x4b4c   :  { %v9854_v30 = vpop.eup %9853 }
0x4b4d   :  { %v4241_v41 = vmul.f32 %v9854_v30, %v4233_v37  ;;  %v9856_v27 = vpop.eup %9855  ;;  %v12508_v37 = vadd.f32 %v13060_v36, %v12330_v25 }
0x4b4f   :  { %v4242_v53 = vsel %vm695_vm4, %v4241_v41, 0.0  ;;  %v7075_v41 = vmul.f32 1.442695, %v12508_v37 }
0x4b50   :  { %4243 = vadd.xlane.f32.xlu0 %v4242_v53  ;;  %v7057_v53 = vmul.f32 1.442695, %v13058_v50 }
0x4b53   :  { %7749 = vrot.lane.b32.xlu1 %v7747_v11, %s10178_s29 }
0x4b57   :  { %4255 = vrot.lane.b32.xlu1 %v9856_v27, %s10181_s1  ;;  %v7998_v27 = vmul.f32 1.442695, %v12247_v39 }
0x4b5b   :  { %4264 = vrot.lane.b32.xlu1 %v3780_v47, %s10181_s1 }
0x4b5f   :  { %5150 = vrot.lane.b32.xlu1 %v13056_v0, %s10179_s8 }
0x4bcb   :  { %v4232_v15 = vpop.xlane.xlu1 %4231 }
0x4bcc   :  { %v4246_v57 = vadd.f32 %v8180_v35, %v4232_v15  ;;  %v13061_v35 = vld [vmem:[#allocation20_spill] sm:$0xff] }
0x4bcd   :  { %v12515_v15 = vadd.f32 %v13061_v35, %v12330_v25 }
0x4bcf   :  { %v7750_v32 = vpop.permute.xlu1 %7749 }
0x4bd0   :  { %9646 = vmatpush3.msra.mxu1 %v7750_v32  ;;  %9670 = vmatmul.mubr.msk.f32.vlgmr.msra.gmra.mxu0 %vm448_vm5, %v7750_v32 }
0x4bd1   :  { %9648 = vmatmul.mubr.msk.f32.vlgmr.msra.gmra.mxu1 %vm377_vm6, %v12311_v8  ;;  %9650 = vmatprep.subr.mxu1 %v12816_v4 }
0x4bd2   :  { %9651 = vmatpush3.msra.mxu1 %v12142_v5  ;;  %9658 = vmatprep.mubr.msk.f32.mxu1 %vm10175_vm3, %v12816_v4  ;;  %v10054_v5 = vld [vmem:[%s12627_s0 + $0x18] sm:$0xff] }
0x4bd3   :  { %v4256_v54 = vpop.permute.xlu1 %4255  ;;  %9652 = vmatprep.subr.mxu1 %v12816_v4  ;;  %v4250_v40 = vsub.f32 %v10054_v5, %v3780_v47  ;;  %v12521_v5 = vadd.f32 %v12320_v62, %v12330_v25 }
0x4bd4   :  { %9857 = vrcp.f32 %v4256_v54  ;;  %9653 = vmatpush3.msra.mxu1 %v12149_v7 }
0x4bd5   :  { %9654 = vmatprep.subr.mxu1 %v12816_v4  ;;  %v4251_v7 = vmul.f32 %v4250_v40, %v4250_v40  ;;  %9859 = vpow2.f32 %v5175_v52 }
0x4bd6   :  { %9655 = vmatpush3.msra.mxu1 %v12155_v48 }
0x4bd7   :  { %9656 = vmatprep.subr.mxu1 %v12816_v4  ;;  %v4265_v61 = vpop.permute.xlu1 %4264 }
0x4bd8   :  { %9657 = vmatpush3.msra.mxu1 %v12161_v44  ;;  %v4267_v4 = vsel %vm60_vm1, %v4265_v61, 0.0 }
0x4bd9   :  { %v4244_v8 = vpop.xlane.xlu0 %4243 }
0x4bda   :  { %v4247_v18 = vadd.f32 %v4246_v57, %v4244_v8 }
0x4bdb   :  { %v5151_v44 = vpop.permute.xlu1 %5150 }
0x4bdc   :  { %v4248_v63 = vmul.f32 0.5, %v4247_v18  ;;  %v5153_v43 = vsub.f32 %v13056_v0, %v5151_v44  ;;  %v6134_v18 = vmul.f32 1.442695, %v12515_v15 }
0x4bde   :  { %v12463_v55 = vadd.f32 %v4248_v63, %v12413_v21  ;;  %v13057_v21 = vld [vmem:[#allocation44_spill] sm:$0xff] }
0x4bdf   :  { %v6116_v22 = vmul.f32 1.442695, %v13057_v21 }
0x4be1   :  { %v9858_v42 = vpop.eup %9857 }
0x4be2   :  { %v4259_v24 = vmul.f32 %v9858_v42, %v4251_v7  ;;  %v9860_v38 = vpop.eup %9859  ;;  %v8016_v42 = vmul.f32 1.442695, %v12521_v5 }
0x4be4   :  { %v4260_v48 = vsel %vm60_vm1, %v4259_v24, 0.0 }
0x4be5   :  { %4261 = vadd.xlane.f32.xlu0 %v4260_v48 }
0x4be9   :  { %4268 = vadd.xlane.f32.xlu0 %v4267_v4 }
0x4bff   :  { %5155 = vrot.lane.b32.xlu0 %v5153_v43, %s10180_s21 }
0x4c03   :  { %5161 = vrot.lane.b32.xlu0 %v13056_v0, %s10178_s29 }
0x4c07   :  { %6102 = vrot.lane.b32.xlu0 %v13057_v21, %s10178_s29 }
0x4c0b   :  { %7043 = vrot.lane.b32.xlu0 %v13058_v50, %s10178_s29 }
0x4c0f   :  { %7984 = vrot.lane.b32.xlu0 %v12247_v39, %s10178_s29 }
0x4c13   :  { %6091 = vrot.lane.b32.xlu0 %v13057_v21, %s10179_s8 }
0x4c17   :  { %7973 = vrot.lane.b32.xlu0 %v12247_v39, %s10179_s8 }
0x4c6e   :  { %v4262_v10 = vpop.xlane.xlu0 %4261 }
0x4c6f   :  { %v4270_v46 = vadd.f32 3.675754, %v4262_v10 }
0x4c72   :  { %v4269_v28 = vpop.xlane.xlu0 %4268 }
0x4c73   :  { %v4271_v17 = vadd.f32 %v4270_v46, %v4269_v28 }
0x4c75   :  { %v4272_v59 = vmul.f32 0.5, %v4271_v17 }
0x4c76   :  { %v5156_v20 = vpop.permute.xlu0 %5155 }
0x4c77   :  { %v12482_v12 = vadd.f32 %v4272_v59, %v12430_v34  ;;  %v5158_v31 = vsel %vm695_vm4, %v5156_v20, 0.0 }
0x4c78   :  { %5159 = vadd.xlane.f32.xlu1 %v5158_v31 }
0x4c7a   :  { %v5162_v33 = vpop.permute.xlu0 %5161 }
0x4c7b   :  { %v5164_v56 = vsub.f32 %v13056_v0, %v5162_v33  ;;  %v10055_v33 = vld [vmem:[#allocation5 + $0x6a8] ss:$0 sm:$0xff] }
0x4c7d   :  { %v5165_v51 = vmul.f32 1.442695, %v5164_v56  ;;  %v5174_v57 = vmul.f32 %v5164_v56, %v5164_v56 }
0x4c7e   :  { %v6103_v11 = vpop.permute.xlu0 %6102 }
0x4c7f   :  { %9861 = vpow2.f32 %v5165_v51  ;;  %v12532_v62 = vsub.f32 %v13057_v21, %v6103_v11 }
0x4c80   :  { %9863 = vrcp.f32 %v12322_v2 }
0x4c81   :  { %9865 = vpow2.f32 %v5193_v19  ;;  %v6106_v61 = vmul.f32 1.442695, %v12532_v62  ;;  %v6115_v36 = vmul.f32 %v12532_v62, %v12532_v62 }
0x4c82   :  { %v7044_v2 = vpop.permute.xlu0 %7043 }
0x4c83   :  { %v12526_v63 = vsub.f32 %v13058_v50, %v7044_v2 }
0x4c85   :  { %v7047_v24 = vmul.f32 1.442695, %v12526_v63 }
0x4c86   :  { %v7985_v58 = vpop.permute.xlu0 %7984 }
0x4c87   :  { %v12542_v43 = vsub.f32 %v12247_v39, %v7985_v58 }
0x4c89   :  { %7032 = vrot.lane.b32.xlu1 %v13058_v50, %s10179_s8  ;;  %v7988_v28 = vmul.f32 1.442695, %v12542_v43 }
0x4c8a   :  { %v6092_v26 = vpop.permute.xlu0 %6091 }
0x4c8b   :  { %v6094_v17 = vsub.f32 %v13057_v21, %v6092_v26 }
0x4c8c   :  { %v9862_v29 = vpop.eup %9861 }
0x4c8d   :  { %5178 = vrot.lane.b32.xlu1 %v9860_v38, %s10180_s21  ;;  %5168 = vrot.lane.b32.xlu0 %v9862_v29, %s10176_s27  ;;  %v9864_v9 = vpop.eup %9863 }
0x4c8e   :  { %v12495_v49 = vpop.permute.xlu0 %7973  ;;  %v9866_v0 = vpop.eup %9865 }
0x4c8f   :  { %v7976_v21 = vsub.f32 %v12247_v39, %v12495_v49 }
0x4c90   :  { %v12492_v34 = vpop.f32.mrf.mxu0 }
0x4c91   :  { %v7821_v13 = vpop.f32.mrf.mxu1 }
0x4c92   :  { %v7825_v1 = vmul.f32 %v9864_v9, %v7821_v13  ;;  %v9671_v60 = vpop.f32.mrf.mxu0 }
0x4c93   :  { %v9649_v3 = vpop.f32.mrf.mxu1 }
0x4c94   :  { %9659 = vmatmul.mubr.msk.f32.vlgmr.msra.gmra.mxu1 %vm448_vm5, %v7825_v1  ;;  %v10056_v1 = vld [vmem:[%s12627_s0 + $0x20] sm:$0xff] }
0x4c95   :  { %v5191_v60 = vsub.f32 %v10056_v1, %v12500_v45 }
0x4c97   :  { %v5192_v3 = vmul.f32 %v5191_v60, %v5191_v60 }
0x4cff   :  { %v5169_v16 = vpop.permute.xlu0 %5168 }
0x4d00   :  { %v5171_v14 = vsel %vm695_vm4, %v5169_v16, 0.0 }
0x4d01   :  { %v12502_v23 = vpop.xlane.xlu1 %5159  ;;  %5172 = vadd.xlane.f32.xlu0 %v5171_v14 }
0x4d02   :  { %v8193_v51 = vadd.f32 -16.0, %v12502_v23 }
0x4d05   :  { %v7033_v47 = vpop.permute.xlu1 %7032 }
0x4d06   :  { %v7035_v44 = vsub.f32 %v13058_v50, %v7033_v47 }
0x4d09   :  { %v5179_v30 = vpop.permute.xlu1 %5178 }
0x4d0a   :  { %9867 = vrcp.f32 %v5179_v30 }
0x4d0b   :  { %9869 = vpow2.f32 %v6116_v22 }
0x4d0c   :  { %9871 = vpow2.f32 %v7075_v41  ;;  %v10057_v41 = vld [vmem:[%s12627_s0 + $0x28] sm:$0xff] }
0x4d0d   :  { %9873 = vpow2.f32 %v7057_v53  ;;  %v6132_v53 = vsub.f32 %v10057_v41, %v12515_v15 }
0x4d0e   :  { %9875 = vpow2.f32 %v7998_v27 }
0x4d0f   :  { %9877 = vpow2.f32 %v6134_v18 }
0x4d10   :  { %9879 = vpow2.f32 %v8016_v42 }
0x4d11   :  { %9881 = vpow2.f32 %v7047_v24 }
0x4d12   :  { %9883 = vpow2.f32 %v6106_v61 }
0x4d13   :  { %9885 = vpow2.f32 %v7988_v28 }
0x4d17   :  { %v9868_v32 = vpop.eup %9867  ;;  %5196 = vrot.lane.b32.xlu0 %v9866_v0, %s10181_s1 }
0x4d18   :  { %v5182_v54 = vmul.f32 %v9868_v32, %v5174_v57  ;;  %v9870_v8 = vpop.eup %9869  ;;  %v6133_v57 = vmul.f32 %v6132_v53, %v6132_v53 }
0x4d19   :  { %v9872_v7 = vpop.eup %9871 }
0x4d1a   :  { %v5183_v40 = vsel %vm695_vm4, %v5182_v54, 0.0  ;;  %v9874_v48 = vpop.eup %9873 }
0x4d1b   :  { %5184 = vadd.xlane.f32.xlu1 %v5183_v40  ;;  %6119 = vrot.lane.b32.xlu0 %v9870_v8, %s10180_s21  ;;  %v9876_v25 = vpop.eup %9875 }
0x4d1c   :  { %v9878_v4 = vpop.eup %9877 }
0x4d1d   :  { %v9880_v10 = vpop.eup %9879 }
0x4d1e   :  { %v9882_v46 = vpop.eup %9881 }
0x4d1f   :  { %7078 = vrot.lane.b32.xlu0 %v9872_v7, %s10181_s1  ;;  %v9884_v59 = vpop.eup %9883 }
0x4d20   :  { %v9886_v50 = vpop.eup %9885 }
0x4d23   :  { %7060 = vrot.lane.b32.xlu0 %v9874_v48, %s10180_s21 }
0x4d27   :  { %8001 = vrot.lane.b32.xlu0 %v9876_v25, %s10180_s21 }
0x4d2b   :  { %5205 = vrot.lane.b32.xlu0 %v12500_v45, %s10181_s1 }
0x4d2c   :  { %6137 = vrot.lane.b32.xlu1 %v9878_v4, %s10181_s1 }
0x4d2f   :  { %7037 = vrot.lane.b32.xlu0 %v7035_v44, %s10180_s21 }
0x4d30   :  { %8019 = vrot.lane.b32.xlu1 %v9880_v10, %s10181_s1 }
0x4d33   :  { %7050 = vrot.lane.b32.xlu0 %v9882_v46, %s10176_s27 }
0x4d34   :  { %6096 = vrot.lane.b32.xlu1 %v6094_v17, %s10180_s21  ;;  %v7056_v17 = vmul.f32 %v12526_v63, %v12526_v63  ;;  %v7997_v63 = vmul.f32 %v12542_v43, %v12542_v43 }
0x4d37   :  { %7087 = vrot.lane.b32.xlu0 %v12508_v37, %s10181_s1 }
0x4d38   :  { %6109 = vrot.lane.b32.xlu1 %v9884_v59, %s10176_s27 }
0x4d3b   :  { %8028 = vrot.lane.b32.xlu0 %v12521_v5, %s10181_s1 }
0x4d3c   :  { %6146 = vrot.lane.b32.xlu1 %v12515_v15, %s10181_s1  ;;  %v10058_v15 = vld [vmem:[%s12627_s0 + $0x30] sm:$0xff] }
0x4d3d   :  { %v7073_v18 = vsub.f32 %v10058_v15, %v12508_v37  ;;  %v10059_v37 = vld [vmem:[%s12627_s0 + $0x38] sm:$0xff]  ;;  %s10182_s0 = smov [#allocation7]  }
0x4d3e   :  { %v8014_v28 = vsub.f32 %v10059_v37, %v12521_v5  ;;  %s8076_s3 = sshll.u32 %s10182_s0, 4  ;;  %s8077_s3 = int_to_ptr.vmem [resolvable:$true] %s8076_s3 }
0x4d3f   :  { %v7074_v25 = vmul.f32 %v7073_v18, %v7073_v18  ;;  %s10104_s1 = scalar_lea.vmem %s8077_s3, 32  ;;  %p10105_p11 = scmp.lt.s32.totalorder %s8077_s3, %s8077_s3 }
0x4d40   :  { %7978 = vrot.lane.b32.xlu1 %v7976_v21, %s10180_s21  ;;  %s10100_s21 = scalar_lea.vmem %s8077_s3, 16 }
0x4d41   :  { %p10101_p10 = scmp.ne.s32.totalorder %s8077_s3, %s10100_s21  ;;  %p10106_p12 = scmp.lt.s32.totalorder %s10104_s1, %s10100_s21 }
0x4d43   :  { %p10107_p13 = por %p10106_p12, %p10105_p11 }
0x4d44   :  { %7991 = vrot.lane.b32.xlu1 %v9886_v50, %s10176_s27 }
0x4d45   :  { %p10108_p0 = pnand %p10107_p13, %p10101_p10 }
0x4d54   :  { %v7895_v20 = vpop.f32.mrf.mxu1 }
0x4d55   :  { %v7968_v31 = vadd.f32 %v12492_v34, %v7895_v20 }
0x4d56   :  { %v9660_v52 = vpop.f32.mrf.mxu1 }
0x4d57   :  { %v7971_v56 = vadd.f32 %v10055_v33, %v7968_v31  ;;  %v8015_v52 = vmul.f32 %v8014_v28, %v8014_v28 }
0x4d59   :  { %8069 = vst.msk [vmem:[#allocation10 + $0x8] sm:$0xff] %vm448_vm5, %v7971_v56 }
0x4d8a   :  { %v5173_v38 = vpop.xlane.xlu0 %5172 }
0x4d8b   :  { %v5187_v29 = vadd.f32 %v8193_v51, %v5173_v38 }
0x4d8e   :  { %v5197_v9 = vpop.permute.xlu0 %5196 }
0x4d8f   :  { %9887 = vrcp.f32 %v5197_v9 }
0x4d92   :  { %v6120_v39 = vpop.permute.xlu0 %6119 }
0x4d93   :  { %9889 = vrcp.f32 %v6120_v39 }
0x4d96   :  { %v7079_v13 = vpop.permute.xlu0 %7078 }
0x4d9a   :  { %v7061_v34 = vpop.permute.xlu0 %7060 }
0x4d9c   :  { %v9888_v11 = vpop.eup %9887 }
0x4d9d   :  { %v5200_v2 = vmul.f32 %v9888_v11, %v5192_v3 }
0x4d9e   :  { %v8002_v58 = vpop.permute.xlu0 %8001 }
0x4d9f   :  { %v5201_v26 = vsel %vm60_vm1, %v5200_v2, 0.0 }
0x4da0   :  { %5202 = vadd.xlane.f32.xlu1 %v5201_v26  ;;  %v9890_v22 = vpop.eup %9889 }
0x4da1   :  { %v6123_v0 = vmul.f32 %v9890_v22, %v6115_v36 }
0x4da2   :  { %v5206_v49 = vpop.permute.xlu0 %5205 }
0x4da3   :  { %v5208_v16 = vsel %vm60_vm1, %v5206_v49, 0.0  ;;  %v6124_v54 = vsel %vm695_vm4, %v6123_v0, 0.0 }
0x4da4   :  { %v5185_v14 = vpop.xlane.xlu1 %5184  ;;  %5209 = vadd.xlane.f32.xlu0 %v5208_v16 }
0x4da5   :  { %v5188_v6 = vadd.f32 %v5187_v29, %v5185_v14 }
0x4da7   :  { %v5189_v23 = vmul.f32 0.5, %v5188_v6 }
0x4da8   :  { %v6138_v19 = vpop.permute.xlu1 %6137 }
0x4da9   :  { %v12571_v47 = vadd.f32 %v5189_v23, %v12463_v55  ;;  %9891 = vrcp.f32 %v6138_v19  ;;  %v7038_v55 = vpop.permute.xlu0 %7037 }
0x4daa   :  { %9893 = vrcp.f32 %v7079_v13  ;;  %v7040_v42 = vsel %vm695_vm4, %v7038_v55, 0.0 }
0x4dab   :  { %9895 = vrcp.f32 %v7061_v34 }
0x4dac   :  { %v8020_v45 = vpop.permute.xlu1 %8019 }
0x4dad   :  { %9897 = vrcp.f32 %v8020_v45  ;;  %v7051_v62 = vpop.permute.xlu0 %7050 }
0x4dae   :  { %9899 = vrcp.f32 %v8002_v58  ;;  %v7053_v61 = vsel %vm695_vm4, %v7051_v62, 0.0 }
0x4db0   :  { %v6097_v30 = vpop.permute.xlu1 %6096 }
0x4db1   :  { %v6099_v27 = vsel %vm695_vm4, %v6097_v30, 0.0  ;;  %v7088_v31 = vpop.permute.xlu0 %7087 }
0x4db2   :  { %6100 = vadd.xlane.f32.xlu0 %v6099_v27  ;;  %v7090_v33 = vsel %vm60_vm1, %v7088_v31, 0.0 }
0x4db4   :  { %v6110_v35 = vpop.permute.xlu1 %6109 }
0x4db5   :  { %v6112_v32 = vsel %vm695_vm4, %v6110_v35, 0.0  ;;  %v8029_v13 = vpop.permute.xlu0 %8028 }
0x4db6   :  { %v9892_v8 = vpop.eup %9891  ;;  %6113 = vadd.xlane.f32.xlu1 %v6112_v32  ;;  %6125 = vadd.xlane.f32.xlu0 %v6124_v54  ;;  %v8031_v1 = vsel %vm60_vm1, %v8029_v13, 0.0 }
0x4db7   :  { %v6141_v40 = vmul.f32 %v9892_v8, %v6133_v57  ;;  %v9894_v48 = vpop.eup %9893 }
0x4db8   :  { %v6147_v7 = vpop.permute.xlu1 %6146  ;;  %v7082_v44 = vmul.f32 %v9894_v48, %v7074_v25  ;;  %v9896_v10 = vpop.eup %9895 }
0x4db9   :  { %v6142_v24 = vsel %vm60_vm1, %v6141_v40, 0.0  ;;  %v6149_v4 = vsel %vm60_vm1, %v6147_v7, 0.0  ;;  %v7064_v50 = vmul.f32 %v9896_v10, %v7056_v17 }
0x4dba   :  { %6143 = vadd.xlane.f32.xlu1 %v6142_v24  ;;  %7041 = vadd.xlane.f32.xlu0 %v7040_v42  ;;  %v7083_v21 = vsel %vm60_vm1, %v7082_v44, 0.0  ;;  %v9898_v20 = vpop.eup %9897 }
0x4dbb   :  { %v7065_v56 = vsel %vm695_vm4, %v7064_v50, 0.0  ;;  %v8023_v51 = vmul.f32 %v9898_v20, %v8015_v52  ;;  %v9900_v38 = vpop.eup %9899 }
0x4dbc   :  { %v7979_v46 = vpop.permute.xlu1 %7978  ;;  %v8005_v39 = vmul.f32 %v9900_v38, %v7997_v63 }
0x4dbd   :  { %v7981_v59 = vsel %vm695_vm4, %v7979_v46, 0.0  ;;  %v8024_v9 = vsel %vm60_vm1, %v8023_v51, 0.0 }
0x4dbe   :  { %6150 = vadd.xlane.f32.xlu1 %v6149_v4  ;;  %7054 = vadd.xlane.f32.xlu0 %v7053_v61  ;;  %v8006_v60 = vsel %vm695_vm4, %v8005_v39, 0.0 }
0x4dc0   :  { %v7992_v5 = vpop.permute.xlu1 %7991 }
0x4dc1   :  { %v7994_v29 = vsel %vm695_vm4, %v7992_v5, 0.0 }
0x4dc2   :  { %7084 = vadd.xlane.f32.xlu1 %v7083_v21  ;;  %7982 = vadd.xlane.f32.xlu0 %v7981_v59 }
0x4dc6   :  { %7066 = vadd.xlane.f32.xlu1 %v7065_v56  ;;  %7091 = vadd.xlane.f32.xlu0 %v7090_v33 }
0x4dca   :  { %7995 = vadd.xlane.f32.xlu1 %v7994_v29  ;;  %8025 = vadd.xlane.f32.xlu0 %v8024_v9 }
0x4dce   :  { %8007 = vadd.xlane.f32.xlu1 %v8006_v60  ;;  %8032 = vadd.xlane.f32.xlu0 %v8031_v1 }
0x4e29   :  { %v5203_v3 = vpop.xlane.xlu1 %5202 }
0x4e2a   :  { %v5211_v6 = vadd.f32 3.675754, %v5203_v3 }
0x4e2d   :  { %v5210_v34 = vpop.xlane.xlu0 %5209 }
0x4e2e   :  { %v5212_v22 = vadd.f32 %v5211_v6, %v5210_v34 }
0x4e30   :  { %v5213_v57 = vmul.f32 0.5, %v5212_v22 }
0x4e32   :  { %v5214_v42 = vadd.f32 %v5213_v57, %v12482_v12 }
0x4e3b   :  { %v6101_v11 = vpop.xlane.xlu0 %6100 }
0x4e3c   :  { %v8206_v14 = vadd.f32 -16.0, %v6101_v11 }
0x4e3f   :  { %v6114_v2 = vpop.xlane.xlu1 %6113  ;;  %v6126_v58 = vpop.xlane.xlu0 %6125 }
0x4e40   :  { %v6128_v45 = vadd.f32 %v8206_v14, %v6114_v2 }
0x4e42   :  { %v6129_v27 = vadd.f32 %v6128_v45, %v6126_v58 }
0x4e43   :  { %v6144_v43 = vpop.xlane.xlu1 %6143  ;;  %v7042_v26 = vpop.xlane.xlu0 %7041 }
0x4e44   :  { %v6152_v36 = vadd.f32 3.675754, %v6144_v43  ;;  %v8219_v30 = vadd.f32 -16.0, %v7042_v26  ;;  %v6130_v18 = vmul.f32 0.5, %v6129_v27 }
0x4e46   :  { %v6131_v44 = vadd.f32 %v6130_v18, %v12571_v47 }
0x4e47   :  { %v6151_v49 = vpop.xlane.xlu1 %6150  ;;  %v7055_v16 = vpop.xlane.xlu0 %7054 }
0x4e48   :  { %v6153_v0 = vadd.f32 %v6152_v36, %v6151_v49  ;;  %v7069_v55 = vadd.f32 %v8219_v30, %v7055_v16 }
0x4e4a   :  { %v6154_v40 = vmul.f32 0.5, %v6153_v0 }
0x4e4b   :  { %v7085_v23 = vpop.xlane.xlu1 %7084  ;;  %v7983_v19 = vpop.xlane.xlu0 %7982 }
0x4e4c   :  { %v7093_v35 = vadd.f32 3.675754, %v7085_v23  ;;  %v8232_v7 = vadd.f32 -16.0, %v7983_v19  ;;  %v6155_v10 = vadd.f32 %v6154_v40, %v5214_v42 }
0x4e4f   :  { %v7067_v41 = vpop.xlane.xlu1 %7066  ;;  %v7092_v53 = vpop.xlane.xlu0 %7091 }
0x4e50   :  { %v7070_v32 = vadd.f32 %v7069_v55, %v7067_v41  ;;  %v7094_v54 = vadd.f32 %v7093_v35, %v7092_v53 }
0x4e52   :  { %v7071_v24 = vmul.f32 0.5, %v7070_v32  ;;  %v7095_v48 = vmul.f32 0.5, %v7094_v54 }
0x4e53   :  { %v7996_v8 = vpop.xlane.xlu1 %7995  ;;  %v8026_v15 = vpop.xlane.xlu0 %8025 }
0x4e54   :  { %v8010_v62 = vadd.f32 %v8232_v7, %v7996_v8  ;;  %v8034_v25 = vadd.f32 3.675754, %v8026_v15  ;;  %v7072_v28 = vadd.f32 %v7071_v24, %v6131_v44  ;;  %v7096_v17 = vadd.f32 %v7095_v48, %v6155_v10 }
0x4e57   :  { %v8008_v61 = vpop.xlane.xlu1 %8007  ;;  %v8033_v4 = vpop.xlane.xlu0 %8032 }
0x4e58   :  { %v8011_v46 = vadd.f32 %v8010_v62, %v8008_v61  ;;  %v8035_v37 = vadd.f32 %v8034_v25, %v8033_v4 }
0x4e5a   :  { %v8012_v59 = vmul.f32 0.5, %v8011_v46  ;;  %v8036_v21 = vmul.f32 0.5, %v8035_v37 }
0x4e5c   :  { %v8013_v50 = vadd.f32 %v8012_v59, %v7072_v28  ;;  %v8037_v20 = vadd.f32 %v8036_v21, %v7096_v17 }
0x4e5e   :  { %v8039_v31 = vsel %vm8038_vm7, %v8013_v50, 0.0  ;;  %v8053_v12 = vsel %vm8038_vm7, %v8037_v20, 0.0 }
0x4e5f   :  { %8040 = vadd.xlane.f32.xlu1 %v8039_v31  ;;  %8054 = vadd.xlane.f32.xlu0 %v8053_v12 }
0x4ee8   :  { %v8041_v52 = vpop.xlane.xlu1 %8040  ;;  %v8055_v33 = vpop.xlane.xlu0 %8054 }
0x4ee9   :  { %v8042_v56 = vrot.slane %v8041_v52, 4  ;;  %v8056_v51 = vrot.slane %v8055_v33, 4 }
0x4eeb   :  { %v8043_v38 = vadd.f32 %v8042_v56, %v8041_v52  ;;  %v8057_v47 = vadd.f32 %v8056_v51, %v8055_v33 }
0x4eed   :  { %v8044_v5 = vrot.slane %v8043_v38, 2  ;;  %v8058_v63 = vrot.slane %v8057_v47, 2 }
0x4eef   :  { %v8059_v29 = vadd.f32 %v8058_v63, %v8057_v47  ;;  %v8045_v9 = vadd.f32 %v8044_v5, %v8043_v38 }
0x4ef1   :  { %v8046_v39 = vrot.slane %v8045_v9, 1  ;;  %v8060_v13 = vrot.slane %v8059_v29, 1 }
0x4ef3   :  { %v8047_v1 = vadd.f32 %v8046_v39, %v8045_v9  ;;  %v8061_v60 = vadd.f32 %v8060_v13, %v8059_v29 }
0x4ef5   :  { %9672 = vpush %v8047_v1 }
0x4ef6   :  { %9674 = vpush %v8061_v60 }
0x4f26   :  { %s9673_s15 = spop %9672 }
0x4f27   :  { %v8049_v34 = vstv %s9673_s15  ;;  %s9675_s18 = spop %9674 }
0x4f28   :  { %v8050_v3 = vmul.f32 0.125, %v8049_v34  ;;  %v8063_v11 = vstv %s9675_s18 }
0x4f29   :  { %v8064_v2 = vmul.f32 0.125, %v8063_v11 }
0x4f2a   :  { %8052 = vst.msk [vmem:[#allocation7] sm:$0x1] %vm8051_vm8, %v8050_v3 }
0x4f2b   :  { %8065 = vst.msk [vmem:[#allocation8] sm:$0x1] %vm8051_vm8, %v8064_v2 }
0x4f2c   :  { %10111 = shalt.err (!%p10108_p0)
}
0x4f2d   :  { %8079 = dma.vmem_to_hbm [thread:$0]  %s8077_s3, 16, %s12631_s4, [#allocation4]  }
0x4f2e   :  { %s10120_s26 = scalar_lea.vmem %s8087_s17, 16  ;;  %s10124_s30 = scalar_lea.vmem %s8087_s17, 32 }
0x4f2f   :  { %p10121_p1 = scmp.ne.s32.totalorder %s8087_s17, %s10120_s26  ;;  %p10125_p2 = scmp.lt.s32.totalorder %s8087_s17, %s8087_s17 }
0x4f30   :  { %p10126_p3 = scmp.lt.s32.totalorder %s10124_s30, %s10120_s26 }
0x4f32   :  { %p10127_p4 = por %p10126_p3, %p10125_p2 }
0x4f34   :  { %p10128_p5 = pnand %p10127_p4, %p10121_p1 }
0x4f36   :  { %10131 = shalt.err (!%p10128_p5)
}
0x4f37   :  { %8089 = dma.vmem_to_hbm [thread:$0]  %s8087_s17, 16, %s12632_s5, [#allocation9]  }
0x4f38   :  { %s10140_s9 = scalar_lea.vmem %s12608_s20, 256  ;;  %p10145_p7 = scmp.lt.s32.totalorder %s12608_s20, %s12608_s20 }
0x4f39   :  { %p10141_p6 = scmp.ne.s32.totalorder %s12608_s20, %s10140_s9  ;;  %p10146_p8 = scmp.lt.s32.totalorder %s10140_s9, %s10140_s9 }
0x4f3b   :  { %p10147_p9 = por %p10146_p8, %p10145_p7 }
0x4f3d   :  { %p10148_p10 = pnand %p10147_p9, %p10141_p6 }
0x4f3f   :  { %10151 = shalt.err (!%p10148_p10)
}
0x4f40   :  { %8101 = dma.vmem_to_hbm [thread:$0]  %s12608_s20, 256, %s12633_s6, [#allocation9], %s10169_s24, %s10169_s24, %s10170_s25  }
0x4f41   :  { %10164 = dma.done.wait [#allocation4], 16  }
0x4f42   :  { %10165 = vsyncadd [#allocation4], 4294967280 }
0x4f43   :  { %10166 = dma.done.wait [#allocation9], 272  }
0x4f44   :  { %10167 = vsyncadd [#allocation9], 4294967024 }
0x4f45   :  { %8111 = vsyncpa [#allocation3], 1 }
0x4f46   :  { %8112 = vsyncpa [#allocation6], 1 }
0x4f47   :  { %8113 = vsyncpa [#allocation4], 1 }
0x4f48   :  { %8114 = vsyncpa [#allocation9], 1 }

</bundles_post_ra>
